<compile_context>
chip_gen: v7x
topology: tpu7x:2x2x1
jax: 0.10.0
libtpu: 0.0.40
codegen_flags: <defaults>
</compile_context>

<pallas_src>
import numpy as np
import jax
import jax.numpy as jnp
from jax.experimental import pallas as pl
from jax.experimental.pallas import tpu as pltpu

KSIZE = 3
PAD = 1
ROW_STRIP = 8     # sublane-tile row strip for both convolutions
COL_STRIP = 32    # column-strip cap (columns live on the sublane axis here)


def graphcut_kernel(xpad_ref, w1_ref, b1_ref, w2_ref, b2_ref, out_ref, h_ref):
    # xpad_ref: (Nb, Hp, Wp, 1)  zero-padded input images (NHWC, Cin=1)
    # w1_ref:   (9, C1)          conv1 weights, tap-major (Cin=1 squeezed)
    # b1_ref:   (1, C1)
    # w2_ref:   (9, C1)          conv2 weights, tap-major (Cout=1 squeezed)
    # b2_ref:   (1,) in SMEM     conv2 scalar bias
    # out_ref:  (Nb, H, W)
    # h_ref:    (Hp, Wp, C1)     VMEM scratch: zero-bordered hidden activation
    Nb, H, W = out_ref.shape
    Hp, Wp, C1 = h_ref.shape

    # ---- hoisted constants: build every per-tap broadcasted weight exactly
    # once, outside all loops (JAX does not CSE broadcast_in_dim).
    w1t = [w1_ref[t, :].reshape(1, 1, C1) for t in range(KSIZE * KSIZE)]
    w2t = [w2_ref[t, :].reshape(1, 1, C1) for t in range(KSIZE * KSIZE)]
    b1v = b1_ref[...].reshape(1, 1, C1)
    b2s = b2_ref[0]                       # scalar from SMEM

    # Static strip plan (Python-unrolled, remainder strips get smaller static
    # shapes).  8 rows = one sublane tile; <=32 columns keeps each (rs,cs,C1)
    # accumulator at <=32 vregs.
    row_strips = [(r0, min(ROW_STRIP, H - r0)) for r0 in range(0, H, ROW_STRIP)]
    col_strips = [(c0, min(COL_STRIP, W - c0)) for c0 in range(0, W, COL_STRIP)]

    # Zero ONLY the 1-pixel halo border of the hidden scratch (interior is
    # fully overwritten below).  Unconditional every step: with
    # dimension_semantics=("parallel",) a second TensorCore never runs step 0
    # and each core has its own scratch instance.
    zrow = jnp.zeros((1, Wp, C1), jnp.float32)
    zcol = jnp.zeros((Hp, 1, C1), jnp.float32)
    h_ref[0:1, :, :] = zrow
    h_ref[Hp - 1:Hp, :, :] = zrow
    h_ref[:, 0:1, :] = zcol
    h_ref[:, Wp - 1:Wp, :] = zcol

    for n in range(Nb):
        # ---- conv1: 1 -> C1, 3x3 SAME (input pre-padded).  Cin == 1, so each
        # tap is a lane-broadcast multiply-accumulate on the VPU.  Bias folded
        # into the first tap.
        for r0, rs in row_strips:
            for c0, cs in col_strips:
                acc1 = xpad_ref[n, r0:r0 + rs, c0:c0 + cs, :] * w1t[0] + b1v
                for t in range(1, KSIZE * KSIZE):
                    kh, kw = divmod(t, KSIZE)
                    tap = xpad_ref[n, r0 + kh:r0 + kh + rs,
                                   c0 + kw:c0 + kw + cs, :]       # (rs, cs, 1)
                    acc1 = acc1 + tap * w1t[t]
                h_ref[PAD + r0:PAD + r0 + rs, PAD + c0:PAD + c0 + cs, :] = acc1

        # ---- conv2: C1 -> 1, 3x3 SAME (zero halo already in h_ref).
        # Accumulate all 9 taps elementwise in registers, then ONE cross-lane
        # (XLU) reduction over C1 per strip instead of nine.
        for r0, rs in row_strips:
            for c0, cs in col_strips:
                acc2 = h_ref[r0:r0 + rs, c0:c0 + cs, :] * w2t[0]
                for t in range(1, KSIZE * KSIZE):
                    kh, kw = divmod(t, KSIZE)
                    tap = h_ref[r0 + kh:r0 + kh + rs,
                                c0 + kw:c0 + kw + cs, :]          # (rs, cs, C1)
                    acc2 = acc2 + tap * w2t[t]
                out_ref[n, r0:r0 + rs, c0:c0 + cs] = (
                    jnp.sum(acc2, axis=-1) + b2s).astype(out_ref.dtype)


def graphcut_forward(x_nchw, w1, b1, w2, b2):
    """x_nchw: (N, 1, H, W); weights in PyTorch OIHW layout. Returns (N, 1, H, W)."""
    N, cin, H, W = x_nchw.shape
    assert cin == 1
    C1 = w1.shape[0]
    Hp, Wp = H + 2 * PAD, W + 2 * PAD

    # Images per grid step: amortize the ~0.35us fixed per-step cost, keep the
    # (parallel) grid extent >= 2 so both TensorCores get work on multi-core
    # parts, and bound the per-step VMEM footprint.
    Nb = 1
    for cand in (8, 4, 2):
        if N % cand != 0 or N // cand < 2:
            continue
        vmem_bytes = 4 * (2 * cand * (Hp * Wp + H * W) + Hp * Wp * C1)
        if vmem_bytes <= 24 * 1024 * 1024:
            Nb = cand
            break

    # NCHW -> NHWC + one spatial zero-pad in plain JAX (layout glue only).
    x_nhwc = jnp.transpose(x_nchw, (0, 2, 3, 1))
    xpad = jnp.pad(x_nhwc, ((0, 0), (PAD, PAD), (PAD, PAD), (0, 0)))

    # conv1: (O=C1, I=1, kh, kw) -> tap-major (9, C1)
    w1_k = jnp.transpose(w1, (2, 3, 1, 0)).reshape(KSIZE * KSIZE, C1)
    # conv2: (O=1, I=C1, kh, kw) -> tap-major (9, C1)
    w2_k = jnp.transpose(w2, (2, 3, 0, 1)).reshape(KSIZE * KSIZE, C1)
    b1_k = b1.reshape(1, C1)
    b2_k = b2.reshape(1)

    out_nhw = pl.pallas_call(
        graphcut_kernel,
        out_shape=jax.ShapeDtypeStruct((N, H, W), x_nchw.dtype),
        grid=(N // Nb,),
        in_specs=[
            pl.BlockSpec((Nb, Hp, Wp, 1), lambda n: (n, 0, 0, 0)),
            pl.BlockSpec((KSIZE * KSIZE, C1), lambda n: (0, 0)),
            pl.BlockSpec((1, C1), lambda n: (0, 0)),
            pl.BlockSpec((KSIZE * KSIZE, C1), lambda n: (0, 0)),
            pl.BlockSpec(memory_space=pltpu.MemorySpace.SMEM),
        ],
        out_specs=pl.BlockSpec((Nb, H, W), lambda n: (n, 0, 0)),
        scratch_shapes=[pltpu.VMEM((Hp, Wp, C1), jnp.float32)],
        compiler_params=pltpu.CompilerParams(
            dimension_semantics=("parallel",)),
    )(xpad, w1_k, b1_k, w2_k, b2_k)

    return out_nhw[:, None, :, :]  # back to NCHW


def reference_forward(x_nchw, w1, b1, w2, b2):
    dn = ("NCHW", "OIHW", "NCHW")
    h = jax.lax.conv_general_dilated(
        x_nchw, w1, (1, 1), "SAME", dimension_numbers=dn,
        precision=jax.lax.Precision.HIGHEST) + b1.reshape(1, -1, 1, 1)
    o = jax.lax.conv_general_dilated(
        h, w2, (1, 1), "SAME", dimension_numbers=dn,
        precision=jax.lax.Precision.HIGHEST) + b2.reshape(1, -1, 1, 1)
    return o


if __name__ == "__main__":
    key = jax.random.PRNGKey(0)
    kx, k1, k2, k3, k4 = jax.random.split(key, 5)

    N, H, W = 4, 16, 16
    C1 = 64  # fixed by the module (Conv2d(1, 64), Conv2d(64, 1))

    # Input implied by the module: single-channel image, NCHW.
    x = jax.random.normal(kx, (N, 1, H, W), jnp.float32)

    # Deterministic He-like init (conv1 fan_in = 1*3*3, conv2 fan_in = 64*3*3).
    w1 = jax.random.normal(k1, (C1, 1, KSIZE, KSIZE), jnp.float32) * (2.0 / 9.0) ** 0.5
    b1 = jax.random.normal(k2, (C1,), jnp.float32) * 0.05
    w2 = jax.random.normal(k3, (1, C1, KSIZE, KSIZE), jnp.float32) * (2.0 / 576.0) ** 0.5
    b2 = jax.random.normal(k4, (1,), jnp.float32) * 0.05

    out = jax.jit(graphcut_forward)(x, w1, b1, w2, b2)
    out = jax.block_until_ready(out)
    assert out.shape == (N, 1, H, W)

    ref = reference_forward(x, w1, b1, w2, b2)
    np.testing.assert_allclose(np.asarray(out), np.asarray(ref),
                               atol=1e-4, rtol=1e-4)
    print("KERNEL_OK")
</pallas_src>

<mosaic_0001>
module attributes {stable_mosaic.version = 11 : i64} {
  func.func @graphcut_kernel(%arg0: i32, %arg1: memref<2x18x18x1xf32, #tpu.memory_space<vmem>>, %arg2: memref<9x64xf32, #tpu.memory_space<vmem>>, %arg3: memref<1x64xf32, #tpu.memory_space<vmem>>, %arg4: memref<9x64xf32, #tpu.memory_space<vmem>>, %arg5: memref<1xf32, #tpu.memory_space<smem>>, %arg6: memref<2x16x16xf32, #tpu.memory_space<vmem>>, %arg7: memref<18x18x64xf32, #tpu.memory_space<vmem>>) attributes {dimension_semantics = [#tpu.dimension_semantics<parallel>], iteration_bounds = array<i64: 2>, scalar_prefetch = 0 : i64, scratch_operands = 1 : i64, tpu.core_type = #tpu.core_type<tc>, window_params = [{transform_indices = @transform_0, window_bounds = array<i64: 2, 18, 18, 1>}, {pipeline_mode = #tpu.pipeline_mode<synchronous>, transform_indices = @transform_1, window_bounds = array<i64: 9, 64>}, {pipeline_mode = #tpu.pipeline_mode<synchronous>, transform_indices = @transform_2, window_bounds = array<i64: 1, 64>}, {pipeline_mode = #tpu.pipeline_mode<synchronous>, transform_indices = @transform_3, window_bounds = array<i64: 9, 64>}, {transform_indices = @transform_4, window_bounds = array<i64: 1>}, {transform_indices = @transform_5, window_bounds = array<i64: 2, 16, 16>}]} {
    %c0 = arith.constant 0 : index
    %c0_0 = arith.constant 0 : index
    %0 = vector.load %arg2[%c0, %c0_0] : memref<9x64xf32, #tpu.memory_space<vmem>>, vector<1x64xf32>
    %1 = vector.shape_cast %0 : vector<1x64xf32> to vector<64xf32>
    %2 = vector.shape_cast %1 : vector<64xf32> to vector<1x1x64xf32>
    %c1 = arith.constant 1 : index
    %c0_1 = arith.constant 0 : index
    %3 = vector.load %arg2[%c1, %c0_1] : memref<9x64xf32, #tpu.memory_space<vmem>>, vector<1x64xf32>
    %4 = vector.shape_cast %3 : vector<1x64xf32> to vector<64xf32>
    %5 = vector.shape_cast %4 : vector<64xf32> to vector<1x1x64xf32>
    %c2 = arith.constant 2 : index
    %c0_2 = arith.constant 0 : index
    %6 = vector.load %arg2[%c2, %c0_2] : memref<9x64xf32, #tpu.memory_space<vmem>>, vector<1x64xf32>
    %7 = vector.shape_cast %6 : vector<1x64xf32> to vector<64xf32>
    %8 = vector.shape_cast %7 : vector<64xf32> to vector<1x1x64xf32>
    %c3 = arith.constant 3 : index
    %c0_3 = arith.constant 0 : index
    %9 = vector.load %arg2[%c3, %c0_3] : memref<9x64xf32, #tpu.memory_space<vmem>>, vector<1x64xf32>
    %10 = vector.shape_cast %9 : vector<1x64xf32> to vector<64xf32>
    %11 = vector.shape_cast %10 : vector<64xf32> to vector<1x1x64xf32>
    %c4 = arith.constant 4 : index
    %c0_4 = arith.constant 0 : index
    %12 = vector.load %arg2[%c4, %c0_4] : memref<9x64xf32, #tpu.memory_space<vmem>>, vector<1x64xf32>
    %13 = vector.shape_cast %12 : vector<1x64xf32> to vector<64xf32>
    %14 = vector.shape_cast %13 : vector<64xf32> to vector<1x1x64xf32>
    %c5 = arith.constant 5 : index
    %c0_5 = arith.constant 0 : index
    %15 = vector.load %arg2[%c5, %c0_5] : memref<9x64xf32, #tpu.memory_space<vmem>>, vector<1x64xf32>
    %16 = vector.shape_cast %15 : vector<1x64xf32> to vector<64xf32>
    %17 = vector.shape_cast %16 : vector<64xf32> to vector<1x1x64xf32>
    %c6 = arith.constant 6 : index
    %c0_6 = arith.constant 0 : index
    %18 = vector.load %arg2[%c6, %c0_6] : memref<9x64xf32, #tpu.memory_space<vmem>>, vector<1x64xf32>
    %19 = vector.shape_cast %18 : vector<1x64xf32> to vector<64xf32>
    %20 = vector.shape_cast %19 : vector<64xf32> to vector<1x1x64xf32>
    %c7 = arith.constant 7 : index
    %c0_7 = arith.constant 0 : index
    %21 = vector.load %arg2[%c7, %c0_7] : memref<9x64xf32, #tpu.memory_space<vmem>>, vector<1x64xf32>
    %22 = vector.shape_cast %21 : vector<1x64xf32> to vector<64xf32>
    %23 = vector.shape_cast %22 : vector<64xf32> to vector<1x1x64xf32>
    %c8 = arith.constant 8 : index
    %c0_8 = arith.constant 0 : index
    %24 = vector.load %arg2[%c8, %c0_8] : memref<9x64xf32, #tpu.memory_space<vmem>>, vector<1x64xf32>
    %25 = vector.shape_cast %24 : vector<1x64xf32> to vector<64xf32>
    %26 = vector.shape_cast %25 : vector<64xf32> to vector<1x1x64xf32>
    %c0_9 = arith.constant 0 : index
    %c0_10 = arith.constant 0 : index
    %27 = vector.load %arg4[%c0_9, %c0_10] : memref<9x64xf32, #tpu.memory_space<vmem>>, vector<1x64xf32>
    %28 = vector.shape_cast %27 : vector<1x64xf32> to vector<64xf32>
    %29 = vector.shape_cast %28 : vector<64xf32> to vector<1x1x64xf32>
    %c1_11 = arith.constant 1 : index
    %c0_12 = arith.constant 0 : index
    %30 = vector.load %arg4[%c1_11, %c0_12] : memref<9x64xf32, #tpu.memory_space<vmem>>, vector<1x64xf32>
    %31 = vector.shape_cast %30 : vector<1x64xf32> to vector<64xf32>
    %32 = vector.shape_cast %31 : vector<64xf32> to vector<1x1x64xf32>
    %c2_13 = arith.constant 2 : index
    %c0_14 = arith.constant 0 : index
    %33 = vector.load %arg4[%c2_13, %c0_14] : memref<9x64xf32, #tpu.memory_space<vmem>>, vector<1x64xf32>
    %34 = vector.shape_cast %33 : vector<1x64xf32> to vector<64xf32>
    %35 = vector.shape_cast %34 : vector<64xf32> to vector<1x1x64xf32>
    %c3_15 = arith.constant 3 : index
    %c0_16 = arith.constant 0 : index
    %36 = vector.load %arg4[%c3_15, %c0_16] : memref<9x64xf32, #tpu.memory_space<vmem>>, vector<1x64xf32>
    %37 = vector.shape_cast %36 : vector<1x64xf32> to vector<64xf32>
    %38 = vector.shape_cast %37 : vector<64xf32> to vector<1x1x64xf32>
    %c4_17 = arith.constant 4 : index
    %c0_18 = arith.constant 0 : index
    %39 = vector.load %arg4[%c4_17, %c0_18] : memref<9x64xf32, #tpu.memory_space<vmem>>, vector<1x64xf32>
    %40 = vector.shape_cast %39 : vector<1x64xf32> to vector<64xf32>
    %41 = vector.shape_cast %40 : vector<64xf32> to vector<1x1x64xf32>
    %c5_19 = arith.constant 5 : index
    %c0_20 = arith.constant 0 : index
    %42 = vector.load %arg4[%c5_19, %c0_20] : memref<9x64xf32, #tpu.memory_space<vmem>>, vector<1x64xf32>
    %43 = vector.shape_cast %42 : vector<1x64xf32> to vector<64xf32>
    %44 = vector.shape_cast %43 : vector<64xf32> to vector<1x1x64xf32>
    %c6_21 = arith.constant 6 : index
    %c0_22 = arith.constant 0 : index
    %45 = vector.load %arg4[%c6_21, %c0_22] : memref<9x64xf32, #tpu.memory_space<vmem>>, vector<1x64xf32>
    %46 = vector.shape_cast %45 : vector<1x64xf32> to vector<64xf32>
    %47 = vector.shape_cast %46 : vector<64xf32> to vector<1x1x64xf32>
    %c7_23 = arith.constant 7 : index
    %c0_24 = arith.constant 0 : index
    %48 = vector.load %arg4[%c7_23, %c0_24] : memref<9x64xf32, #tpu.memory_space<vmem>>, vector<1x64xf32>
    %49 = vector.shape_cast %48 : vector<1x64xf32> to vector<64xf32>
    %50 = vector.shape_cast %49 : vector<64xf32> to vector<1x1x64xf32>
    %c8_25 = arith.constant 8 : index
    %c0_26 = arith.constant 0 : index
    %51 = vector.load %arg4[%c8_25, %c0_26] : memref<9x64xf32, #tpu.memory_space<vmem>>, vector<1x64xf32>
    %52 = vector.shape_cast %51 : vector<1x64xf32> to vector<64xf32>
    %53 = vector.shape_cast %52 : vector<64xf32> to vector<1x1x64xf32>
    %c0_27 = arith.constant 0 : index
    %c0_28 = arith.constant 0 : index
    %54 = vector.load %arg3[%c0_27, %c0_28] : memref<1x64xf32, #tpu.memory_space<vmem>>, vector<1x64xf32>
    %55 = vector.shape_cast %54 : vector<1x64xf32> to vector<1x1x64xf32>
    %c0_29 = arith.constant 0 : index
    %56 = memref.load %arg5[%c0_29] : memref<1xf32, #tpu.memory_space<smem>>
    %cst = arith.constant 0.000000e+00 : f32
    %57 = vector.broadcast %cst : f32 to vector<1x18x64xf32>
    %cst_30 = arith.constant 0.000000e+00 : f32
    %58 = vector.broadcast %cst_30 : f32 to vector<18x1x64xf32>
    %c0_31 = arith.constant 0 : index
    %c0_32 = arith.constant 0 : index
    %c0_33 = arith.constant 0 : index
    %59 = vector.load %arg7[%c0_31, %c0_32, %c0_33] : memref<18x18x64xf32, #tpu.memory_space<vmem>>, vector<1x18x64xf32>
    tpu.vector_store %arg7[%c0_31, %c0_32, %c0_33], %57 {strides = array<i32>} : memref<18x18x64xf32, #tpu.memory_space<vmem>>, vector<1x18x64xf32>,
    %c17 = arith.constant 17 : index
    %c0_34 = arith.constant 0 : index
    %c0_35 = arith.constant 0 : index
    %60 = vector.load %arg7[%c17, %c0_34, %c0_35] : memref<18x18x64xf32, #tpu.memory_space<vmem>>, vector<1x18x64xf32>
    tpu.vector_store %arg7[%c17, %c0_34, %c0_35], %57 {strides = array<i32>} : memref<18x18x64xf32, #tpu.memory_space<vmem>>, vector<1x18x64xf32>,
    %c0_36 = arith.constant 0 : index
    %c0_37 = arith.constant 0 : index
    %c0_38 = arith.constant 0 : index
    %61 = vector.load %arg7[%c0_36, %c0_37, %c0_38] : memref<18x18x64xf32, #tpu.memory_space<vmem>>, vector<18x1x64xf32>
    tpu.vector_store %arg7[%c0_36, %c0_37, %c0_38], %58 {strides = array<i32>} : memref<18x18x64xf32, #tpu.memory_space<vmem>>, vector<18x1x64xf32>,
    %c0_39 = arith.constant 0 : index
    %c17_40 = arith.constant 17 : index
    %c0_41 = arith.constant 0 : index
    %62 = vector.load %arg7[%c0_39, %c17_40, %c0_41] : memref<18x18x64xf32, #tpu.memory_space<vmem>>, vector<18x1x64xf32>
    tpu.vector_store %arg7[%c0_39, %c17_40, %c0_41], %58 {strides = array<i32>} : memref<18x18x64xf32, #tpu.memory_space<vmem>>, vector<18x1x64xf32>,
    %c0_42 = arith.constant 0 : index
    %c0_43 = arith.constant 0 : index
    %c0_44 = arith.constant 0 : index
    %c0_45 = arith.constant 0 : index
    %63 = vector.load %arg1[%c0_42, %c0_43, %c0_44, %c0_45] : memref<2x18x18x1xf32, #tpu.memory_space<vmem>>, vector<1x8x16x1xf32>
    %64 = vector.shape_cast %63 : vector<1x8x16x1xf32> to vector<8x16x1xf32>
    %65 = vector.broadcast %64 : vector<8x16x1xf32> to vector<8x16x64xf32>
    %66 = vector.broadcast %2 : vector<1x1x64xf32> to vector<8x16x64xf32>
    %67 = arith.mulf %65, %66 : vector<8x16x64xf32>
    %68 = vector.broadcast %55 : vector<1x1x64xf32> to vector<8x16x64xf32>
    %69 = arith.addf %67, %68 : vector<8x16x64xf32>
    %c0_46 = arith.constant 0 : index
    %c0_47 = arith.constant 0 : index
    %c1_48 = arith.constant 1 : index
    %c0_49 = arith.constant 0 : index
    %70 = vector.load %arg1[%c0_46, %c0_47, %c1_48, %c0_49] : memref<2x18x18x1xf32, #tpu.memory_space<vmem>>, vector<1x8x16x1xf32>
    %71 = vector.shape_cast %70 : vector<1x8x16x1xf32> to vector<8x16x1xf32>
    %72 = vector.broadcast %71 : vector<8x16x1xf32> to vector<8x16x64xf32>
    %73 = vector.broadcast %5 : vector<1x1x64xf32> to vector<8x16x64xf32>
    %74 = arith.mulf %72, %73 : vector<8x16x64xf32>
    %75 = arith.addf %69, %74 : vector<8x16x64xf32>
    %c0_50 = arith.constant 0 : index
    %c0_51 = arith.constant 0 : index
    %c2_52 = arith.constant 2 : index
    %c0_53 = arith.constant 0 : index
    %76 = vector.load %arg1[%c0_50, %c0_51, %c2_52, %c0_53] : memref<2x18x18x1xf32, #tpu.memory_space<vmem>>, vector<1x8x16x1xf32>
    %77 = vector.shape_cast %76 : vector<1x8x16x1xf32> to vector<8x16x1xf32>
    %78 = vector.broadcast %77 : vector<8x16x1xf32> to vector<8x16x64xf32>
    %79 = vector.broadcast %8 : vector<1x1x64xf32> to vector<8x16x64xf32>
    %80 = arith.mulf %78, %79 : vector<8x16x64xf32>
    %81 = arith.addf %75, %80 : vector<8x16x64xf32>
    %c0_54 = arith.constant 0 : index
    %c1_55 = arith.constant 1 : index
    %c0_56 = arith.constant 0 : index
    %c0_57 = arith.constant 0 : index
    %82 = vector.load %arg1[%c0_54, %c1_55, %c0_56, %c0_57] : memref<2x18x18x1xf32, #tpu.memory_space<vmem>>, vector<1x8x16x1xf32>
    %83 = vector.shape_cast %82 : vector<1x8x16x1xf32> to vector<8x16x1xf32>
    %84 = vector.broadcast %83 : vector<8x16x1xf32> to vector<8x16x64xf32>
    %85 = vector.broadcast %11 : vector<1x1x64xf32> to vector<8x16x64xf32>
    %86 = arith.mulf %84, %85 : vector<8x16x64xf32>
    %87 = arith.addf %81, %86 : vector<8x16x64xf32>
    %c0_58 = arith.constant 0 : index
    %c1_59 = arith.constant 1 : index
    %c1_60 = arith.constant 1 : index
    %c0_61 = arith.constant 0 : index
    %88 = vector.load %arg1[%c0_58, %c1_59, %c1_60, %c0_61] : memref<2x18x18x1xf32, #tpu.memory_space<vmem>>, vector<1x8x16x1xf32>
    %89 = vector.shape_cast %88 : vector<1x8x16x1xf32> to vector<8x16x1xf32>
    %90 = vector.broadcast %89 : vector<8x16x1xf32> to vector<8x16x64xf32>
    %91 = vector.broadcast %14 : vector<1x1x64xf32> to vector<8x16x64xf32>
    %92 = arith.mulf %90, %91 : vector<8x16x64xf32>
    %93 = arith.addf %87, %92 : vector<8x16x64xf32>
    %c0_62 = arith.constant 0 : index
    %c1_63 = arith.constant 1 : index
    %c2_64 = arith.constant 2 : index
    %c0_65 = arith.constant 0 : index
    %94 = vector.load %arg1[%c0_62, %c1_63, %c2_64, %c0_65] : memref<2x18x18x1xf32, #tpu.memory_space<vmem>>, vector<1x8x16x1xf32>
    %95 = vector.shape_cast %94 : vector<1x8x16x1xf32> to vector<8x16x1xf32>
    %96 = vector.broadcast %95 : vector<8x16x1xf32> to vector<8x16x64xf32>
    %97 = vector.broadcast %17 : vector<1x1x64xf32> to vector<8x16x64xf32>
    %98 = arith.mulf %96, %97 : vector<8x16x64xf32>
    %99 = arith.addf %93, %98 : vector<8x16x64xf32>
    %c0_66 = arith.constant 0 : index
    %c2_67 = arith.constant 2 : index
    %c0_68 = arith.constant 0 : index
    %c0_69 = arith.constant 0 : index
    %100 = vector.load %arg1[%c0_66, %c2_67, %c0_68, %c0_69] : memref<2x18x18x1xf32, #tpu.memory_space<vmem>>, vector<1x8x16x1xf32>
    %101 = vector.shape_cast %100 : vector<1x8x16x1xf32> to vector<8x16x1xf32>
    %102 = vector.broadcast %101 : vector<8x16x1xf32> to vector<8x16x64xf32>
    %103 = vector.broadcast %20 : vector<1x1x64xf32> to vector<8x16x64xf32>
    %104 = arith.mulf %102, %103 : vector<8x16x64xf32>
    %105 = arith.addf %99, %104 : vector<8x16x64xf32>
    %c0_70 = arith.constant 0 : index
    %c2_71 = arith.constant 2 : index
    %c1_72 = arith.constant 1 : index
    %c0_73 = arith.constant 0 : index
    %106 = vector.load %arg1[%c0_70, %c2_71, %c1_72, %c0_73] : memref<2x18x18x1xf32, #tpu.memory_space<vmem>>, vector<1x8x16x1xf32>
    %107 = vector.shape_cast %106 : vector<1x8x16x1xf32> to vector<8x16x1xf32>
    %108 = vector.broadcast %107 : vector<8x16x1xf32> to vector<8x16x64xf32>
    %109 = vector.broadcast %23 : vector<1x1x64xf32> to vector<8x16x64xf32>
    %110 = arith.mulf %108, %109 : vector<8x16x64xf32>
    %111 = arith.addf %105, %110 : vector<8x16x64xf32>
    %c0_74 = arith.constant 0 : index
    %c2_75 = arith.constant 2 : index
    %c2_76 = arith.constant 2 : index
    %c0_77 = arith.constant 0 : index
    %112 = vector.load %arg1[%c0_74, %c2_75, %c2_76, %c0_77] : memref<2x18x18x1xf32, #tpu.memory_space<vmem>>, vector<1x8x16x1xf32>
    %113 = vector.shape_cast %112 : vector<1x8x16x1xf32> to vector<8x16x1xf32>
    %114 = vector.broadcast %113 : vector<8x16x1xf32> to vector<8x16x64xf32>
    %115 = vector.broadcast %26 : vector<1x1x64xf32> to vector<8x16x64xf32>
    %116 = arith.mulf %114, %115 : vector<8x16x64xf32>
    %117 = arith.addf %111, %116 : vector<8x16x64xf32>
    %c1_78 = arith.constant 1 : index
    %c1_79 = arith.constant 1 : index
    %c0_80 = arith.constant 0 : index
    %118 = vector.load %arg7[%c1_78, %c1_79, %c0_80] : memref<18x18x64xf32, #tpu.memory_space<vmem>>, vector<8x16x64xf32>
    tpu.vector_store %arg7[%c1_78, %c1_79, %c0_80], %117 {strides = array<i32>} : memref<18x18x64xf32, #tpu.memory_space<vmem>>, vector<8x16x64xf32>,
    %c0_81 = arith.constant 0 : index
    %c8_82 = arith.constant 8 : index
    %c0_83 = arith.constant 0 : index
    %c0_84 = arith.constant 0 : index
    %119 = vector.load %arg1[%c0_81, %c8_82, %c0_83, %c0_84] : memref<2x18x18x1xf32, #tpu.memory_space<vmem>>, vector<1x8x16x1xf32>
    %120 = vector.shape_cast %119 : vector<1x8x16x1xf32> to vector<8x16x1xf32>
    %121 = vector.broadcast %120 : vector<8x16x1xf32> to vector<8x16x64xf32>
    %122 = vector.broadcast %2 : vector<1x1x64xf32> to vector<8x16x64xf32>
    %123 = arith.mulf %121, %122 : vector<8x16x64xf32>
    %124 = vector.broadcast %55 : vector<1x1x64xf32> to vector<8x16x64xf32>
    %125 = arith.addf %123, %124 : vector<8x16x64xf32>
    %c0_85 = arith.constant 0 : index
    %c8_86 = arith.constant 8 : index
    %c1_87 = arith.constant 1 : index
    %c0_88 = arith.constant 0 : index
    %126 = vector.load %arg1[%c0_85, %c8_86, %c1_87, %c0_88] : memref<2x18x18x1xf32, #tpu.memory_space<vmem>>, vector<1x8x16x1xf32>
    %127 = vector.shape_cast %126 : vector<1x8x16x1xf32> to vector<8x16x1xf32>
    %128 = vector.broadcast %127 : vector<8x16x1xf32> to vector<8x16x64xf32>
    %129 = vector.broadcast %5 : vector<1x1x64xf32> to vector<8x16x64xf32>
    %130 = arith.mulf %128, %129 : vector<8x16x64xf32>
    %131 = arith.addf %125, %130 : vector<8x16x64xf32>
    %c0_89 = arith.constant 0 : index
    %c8_90 = arith.constant 8 : index
    %c2_91 = arith.constant 2 : index
    %c0_92 = arith.constant 0 : index
    %132 = vector.load %arg1[%c0_89, %c8_90, %c2_91, %c0_92] : memref<2x18x18x1xf32, #tpu.memory_space<vmem>>, vector<1x8x16x1xf32>
    %133 = vector.shape_cast %132 : vector<1x8x16x1xf32> to vector<8x16x1xf32>
    %134 = vector.broadcast %133 : vector<8x16x1xf32> to vector<8x16x64xf32>
    %135 = vector.broadcast %8 : vector<1x1x64xf32> to vector<8x16x64xf32>
    %136 = arith.mulf %134, %135 : vector<8x16x64xf32>
    %137 = arith.addf %131, %136 : vector<8x16x64xf32>
    %c0_93 = arith.constant 0 : index
    %c9 = arith.constant 9 : index
    %c0_94 = arith.constant 0 : index
    %c0_95 = arith.constant 0 : index
    %138 = vector.load %arg1[%c0_93, %c9, %c0_94, %c0_95] : memref<2x18x18x1xf32, #tpu.memory_space<vmem>>, vector<1x8x16x1xf32>
    %139 = vector.shape_cast %138 : vector<1x8x16x1xf32> to vector<8x16x1xf32>
    %140 = vector.broadcast %139 : vector<8x16x1xf32> to vector<8x16x64xf32>
    %141 = vector.broadcast %11 : vector<1x1x64xf32> to vector<8x16x64xf32>
    %142 = arith.mulf %140, %141 : vector<8x16x64xf32>
    %143 = arith.addf %137, %142 : vector<8x16x64xf32>
    %c0_96 = arith.constant 0 : index
    %c9_97 = arith.constant 9 : index
    %c1_98 = arith.constant 1 : index
    %c0_99 = arith.constant 0 : index
    %144 = vector.load %arg1[%c0_96, %c9_97, %c1_98, %c0_99] : memref<2x18x18x1xf32, #tpu.memory_space<vmem>>, vector<1x8x16x1xf32>
    %145 = vector.shape_cast %144 : vector<1x8x16x1xf32> to vector<8x16x1xf32>
    %146 = vector.broadcast %145 : vector<8x16x1xf32> to vector<8x16x64xf32>
    %147 = vector.broadcast %14 : vector<1x1x64xf32> to vector<8x16x64xf32>
    %148 = arith.mulf %146, %147 : vector<8x16x64xf32>
    %149 = arith.addf %143, %148 : vector<8x16x64xf32>
    %c0_100 = arith.constant 0 : index
    %c9_101 = arith.constant 9 : index
    %c2_102 = arith.constant 2 : index
    %c0_103 = arith.constant 0 : index
    %150 = vector.load %arg1[%c0_100, %c9_101, %c2_102, %c0_103] : memref<2x18x18x1xf32, #tpu.memory_space<vmem>>, vector<1x8x16x1xf32>
    %151 = vector.shape_cast %150 : vector<1x8x16x1xf32> to vector<8x16x1xf32>
    %152 = vector.broadcast %151 : vector<8x16x1xf32> to vector<8x16x64xf32>
    %153 = vector.broadcast %17 : vector<1x1x64xf32> to vector<8x16x64xf32>
    %154 = arith.mulf %152, %153 : vector<8x16x64xf32>
    %155 = arith.addf %149, %154 : vector<8x16x64xf32>
    %c0_104 = arith.constant 0 : index
    %c10 = arith.constant 10 : index
    %c0_105 = arith.constant 0 : index
    %c0_106 = arith.constant 0 : index
    %156 = vector.load %arg1[%c0_104, %c10, %c0_105, %c0_106] : memref<2x18x18x1xf32, #tpu.memory_space<vmem>>, vector<1x8x16x1xf32>
    %157 = vector.shape_cast %156 : vector<1x8x16x1xf32> to vector<8x16x1xf32>
    %158 = vector.broadcast %157 : vector<8x16x1xf32> to vector<8x16x64xf32>
    %159 = vector.broadcast %20 : vector<1x1x64xf32> to vector<8x16x64xf32>
    %160 = arith.mulf %158, %159 : vector<8x16x64xf32>
    %161 = arith.addf %155, %160 : vector<8x16x64xf32>
    %c0_107 = arith.constant 0 : index
    %c10_108 = arith.constant 10 : index
    %c1_109 = arith.constant 1 : index
    %c0_110 = arith.constant 0 : index
    %162 = vector.load %arg1[%c0_107, %c10_108, %c1_109, %c0_110] : memref<2x18x18x1xf32, #tpu.memory_space<vmem>>, vector<1x8x16x1xf32>
    %163 = vector.shape_cast %162 : vector<1x8x16x1xf32> to vector<8x16x1xf32>
    %164 = vector.broadcast %163 : vector<8x16x1xf32> to vector<8x16x64xf32>
    %165 = vector.broadcast %23 : vector<1x1x64xf32> to vector<8x16x64xf32>
    %166 = arith.mulf %164, %165 : vector<8x16x64xf32>
    %167 = arith.addf %161, %166 : vector<8x16x64xf32>
    %c0_111 = arith.constant 0 : index
    %c10_112 = arith.constant 10 : index
    %c2_113 = arith.constant 2 : index
    %c0_114 = arith.constant 0 : index
    %168 = vector.load %arg1[%c0_111, %c10_112, %c2_113, %c0_114] : memref<2x18x18x1xf32, #tpu.memory_space<vmem>>, vector<1x8x16x1xf32>
    %169 = vector.shape_cast %168 : vector<1x8x16x1xf32> to vector<8x16x1xf32>
    %170 = vector.broadcast %169 : vector<8x16x1xf32> to vector<8x16x64xf32>
    %171 = vector.broadcast %26 : vector<1x1x64xf32> to vector<8x16x64xf32>
    %172 = arith.mulf %170, %171 : vector<8x16x64xf32>
    %173 = arith.addf %167, %172 : vector<8x16x64xf32>
    %c9_115 = arith.constant 9 : index
    %c1_116 = arith.constant 1 : index
    %c0_117 = arith.constant 0 : index
    %174 = vector.load %arg7[%c9_115, %c1_116, %c0_117] : memref<18x18x64xf32, #tpu.memory_space<vmem>>, vector<8x16x64xf32>
    tpu.vector_store %arg7[%c9_115, %c1_116, %c0_117], %173 {strides = array<i32>} : memref<18x18x64xf32, #tpu.memory_space<vmem>>, vector<8x16x64xf32>,
    %c0_118 = arith.constant 0 : index
    %c0_119 = arith.constant 0 : index
    %c0_120 = arith.constant 0 : index
    %175 = vector.load %arg7[%c0_118, %c0_119, %c0_120] : memref<18x18x64xf32, #tpu.memory_space<vmem>>, vector<8x16x64xf32>
    %176 = vector.broadcast %29 : vector<1x1x64xf32> to vector<8x16x64xf32>
    %177 = arith.mulf %175, %176 : vector<8x16x64xf32>
    %c0_121 = arith.constant 0 : index
    %c1_122 = arith.constant 1 : index
    %c0_123 = arith.constant 0 : index
    %178 = vector.load %arg7[%c0_121, %c1_122, %c0_123] : memref<18x18x64xf32, #tpu.memory_space<vmem>>, vector<8x16x64xf32>
    %179 = vector.broadcast %32 : vector<1x1x64xf32> to vector<8x16x64xf32>
    %180 = arith.mulf %178, %179 : vector<8x16x64xf32>
    %181 = arith.addf %177, %180 : vector<8x16x64xf32>
    %c0_124 = arith.constant 0 : index
    %c2_125 = arith.constant 2 : index
    %c0_126 = arith.constant 0 : index
    %182 = vector.load %arg7[%c0_124, %c2_125, %c0_126] : memref<18x18x64xf32, #tpu.memory_space<vmem>>, vector<8x16x64xf32>
    %183 = vector.broadcast %35 : vector<1x1x64xf32> to vector<8x16x64xf32>
    %184 = arith.mulf %182, %183 : vector<8x16x64xf32>
    %185 = arith.addf %181, %184 : vector<8x16x64xf32>
    %c1_127 = arith.constant 1 : index
    %c0_128 = arith.constant 0 : index
    %c0_129 = arith.constant 0 : index
    %186 = vector.load %arg7[%c1_127, %c0_128, %c0_129] : memref<18x18x64xf32, #tpu.memory_space<vmem>>, vector<8x16x64xf32>
    %187 = vector.broadcast %38 : vector<1x1x64xf32> to vector<8x16x64xf32>
    %188 = arith.mulf %186, %187 : vector<8x16x64xf32>
    %189 = arith.addf %185, %188 : vector<8x16x64xf32>
    %c1_130 = arith.constant 1 : index
    %c1_131 = arith.constant 1 : index
    %c0_132 = arith.constant 0 : index
    %190 = vector.load %arg7[%c1_130, %c1_131, %c0_132] : memref<18x18x64xf32, #tpu.memory_space<vmem>>, vector<8x16x64xf32>
    %191 = vector.broadcast %41 : vector<1x1x64xf32> to vector<8x16x64xf32>
    %192 = arith.mulf %190, %191 : vector<8x16x64xf32>
    %193 = arith.addf %189, %192 : vector<8x16x64xf32>
    %c1_133 = arith.constant 1 : index
    %c2_134 = arith.constant 2 : index
    %c0_135 = arith.constant 0 : index
    %194 = vector.load %arg7[%c1_133, %c2_134, %c0_135] : memref<18x18x64xf32, #tpu.memory_space<vmem>>, vector<8x16x64xf32>
    %195 = vector.broadcast %44 : vector<1x1x64xf32> to vector<8x16x64xf32>
    %196 = arith.mulf %194, %195 : vector<8x16x64xf32>
    %197 = arith.addf %193, %196 : vector<8x16x64xf32>
    %c2_136 = arith.constant 2 : index
    %c0_137 = arith.constant 0 : index
    %c0_138 = arith.constant 0 : index
    %198 = vector.load %arg7[%c2_136, %c0_137, %c0_138] : memref<18x18x64xf32, #tpu.memory_space<vmem>>, vector<8x16x64xf32>
    %199 = vector.broadcast %47 : vector<1x1x64xf32> to vector<8x16x64xf32>
    %200 = arith.mulf %198, %199 : vector<8x16x64xf32>
    %201 = arith.addf %197, %200 : vector<8x16x64xf32>
    %c2_139 = arith.constant 2 : index
    %c1_140 = arith.constant 1 : index
    %c0_141 = arith.constant 0 : index
    %202 = vector.load %arg7[%c2_139, %c1_140, %c0_141] : memref<18x18x64xf32, #tpu.memory_space<vmem>>, vector<8x16x64xf32>
    %203 = vector.broadcast %50 : vector<1x1x64xf32> to vector<8x16x64xf32>
    %204 = arith.mulf %202, %203 : vector<8x16x64xf32>
    %205 = arith.addf %201, %204 : vector<8x16x64xf32>
    %c2_142 = arith.constant 2 : index
    %c2_143 = arith.constant 2 : index
    %c0_144 = arith.constant 0 : index
    %206 = vector.load %arg7[%c2_142, %c2_143, %c0_144] : memref<18x18x64xf32, #tpu.memory_space<vmem>>, vector<8x16x64xf32>
    %207 = vector.broadcast %53 : vector<1x1x64xf32> to vector<8x16x64xf32>
    %208 = arith.mulf %206, %207 : vector<8x16x64xf32>
    %209 = arith.addf %205, %208 : vector<8x16x64xf32>
    %cst_145 = arith.constant dense<0.000000e+00> : vector<8x16xf32>
    %210 = vector.multi_reduction <add>, %209, %cst_145 [2] : vector<8x16x64xf32> to vector<8x16xf32>
    %211 = vector.broadcast %56 : f32 to vector<8x16xf32>
    %212 = arith.addf %210, %211 : vector<8x16xf32>
    %c0_146 = arith.constant 0 : index
    %c0_147 = arith.constant 0 : index
    %c0_148 = arith.constant 0 : index
    %213 = vector.load %arg6[%c0_146, %c0_147, %c0_148] : memref<2x16x16xf32, #tpu.memory_space<vmem>>, vector<1x8x16xf32>
    %214 = vector.shape_cast %213 : vector<1x8x16xf32> to vector<8x16xf32>
    %215 = vector.shape_cast %212 : vector<8x16xf32> to vector<1x8x16xf32>
    tpu.vector_store %arg6[%c0_146, %c0_147, %c0_148], %215 {strides = array<i32>} : memref<2x16x16xf32, #tpu.memory_space<vmem>>, vector<1x8x16xf32>,
    %c8_149 = arith.constant 8 : index
    %c0_150 = arith.constant 0 : index
    %c0_151 = arith.constant 0 : index
    %216 = vector.load %arg7[%c8_149, %c0_150, %c0_151] : memref<18x18x64xf32, #tpu.memory_space<vmem>>, vector<8x16x64xf32>
    %217 = vector.broadcast %29 : vector<1x1x64xf32> to vector<8x16x64xf32>
    %218 = arith.mulf %216, %217 : vector<8x16x64xf32>
    %c8_152 = arith.constant 8 : index
    %c1_153 = arith.constant 1 : index
    %c0_154 = arith.constant 0 : index
    %219 = vector.load %arg7[%c8_152, %c1_153, %c0_154] : memref<18x18x64xf32, #tpu.memory_space<vmem>>, vector<8x16x64xf32>
    %220 = vector.broadcast %32 : vector<1x1x64xf32> to vector<8x16x64xf32>
    %221 = arith.mulf %219, %220 : vector<8x16x64xf32>
    %222 = arith.addf %218, %221 : vector<8x16x64xf32>
    %c8_155 = arith.constant 8 : index
    %c2_156 = arith.constant 2 : index
    %c0_157 = arith.constant 0 : index
    %223 = vector.load %arg7[%c8_155, %c2_156, %c0_157] : memref<18x18x64xf32, #tpu.memory_space<vmem>>, vector<8x16x64xf32>
    %224 = vector.broadcast %35 : vector<1x1x64xf32> to vector<8x16x64xf32>
    %225 = arith.mulf %223, %224 : vector<8x16x64xf32>
    %226 = arith.addf %222, %225 : vector<8x16x64xf32>
    %c9_158 = arith.constant 9 : index
    %c0_159 = arith.constant 0 : index
    %c0_160 = arith.constant 0 : index
    %227 = vector.load %arg7[%c9_158, %c0_159, %c0_160] : memref<18x18x64xf32, #tpu.memory_space<vmem>>, vector<8x16x64xf32>
    %228 = vector.broadcast %38 : vector<1x1x64xf32> to vector<8x16x64xf32>
    %229 = arith.mulf %227, %228 : vector<8x16x64xf32>
    %230 = arith.addf %226, %229 : vector<8x16x64xf32>
    %c9_161 = arith.constant 9 : index
    %c1_162 = arith.constant 1 : index
    %c0_163 = arith.constant 0 : index
    %231 = vector.load %arg7[%c9_161, %c1_162, %c0_163] : memref<18x18x64xf32, #tpu.memory_space<vmem>>, vector<8x16x64xf32>
    %232 = vector.broadcast %41 : vector<1x1x64xf32> to vector<8x16x64xf32>
    %233 = arith.mulf %231, %232 : vector<8x16x64xf32>
    %234 = arith.addf %230, %233 : vector<8x16x64xf32>
    %c9_164 = arith.constant 9 : index
    %c2_165 = arith.constant 2 : index
    %c0_166 = arith.constant 0 : index
    %235 = vector.load %arg7[%c9_164, %c2_165, %c0_166] : memref<18x18x64xf32, #tpu.memory_space<vmem>>, vector<8x16x64xf32>
    %236 = vector.broadcast %44 : vector<1x1x64xf32> to vector<8x16x64xf32>
    %237 = arith.mulf %235, %236 : vector<8x16x64xf32>
    %238 = arith.addf %234, %237 : vector<8x16x64xf32>
    %c10_167 = arith.constant 10 : index
    %c0_168 = arith.constant 0 : index
    %c0_169 = arith.constant 0 : index
    %239 = vector.load %arg7[%c10_167, %c0_168, %c0_169] : memref<18x18x64xf32, #tpu.memory_space<vmem>>, vector<8x16x64xf32>
    %240 = vector.broadcast %47 : vector<1x1x64xf32> to vector<8x16x64xf32>
    %241 = arith.mulf %239, %240 : vector<8x16x64xf32>
    %242 = arith.addf %238, %241 : vector<8x16x64xf32>
    %c10_170 = arith.constant 10 : index
    %c1_171 = arith.constant 1 : index
    %c0_172 = arith.constant 0 : index
    %243 = vector.load %arg7[%c10_170, %c1_171, %c0_172] : memref<18x18x64xf32, #tpu.memory_space<vmem>>, vector<8x16x64xf32>
    %244 = vector.broadcast %50 : vector<1x1x64xf32> to vector<8x16x64xf32>
    %245 = arith.mulf %243, %244 : vector<8x16x64xf32>
    %246 = arith.addf %242, %245 : vector<8x16x64xf32>
    %c10_173 = arith.constant 10 : index
    %c2_174 = arith.constant 2 : index
    %c0_175 = arith.constant 0 : index
    %247 = vector.load %arg7[%c10_173, %c2_174, %c0_175] : memref<18x18x64xf32, #tpu.memory_space<vmem>>, vector<8x16x64xf32>
    %248 = vector.broadcast %53 : vector<1x1x64xf32> to vector<8x16x64xf32>
    %249 = arith.mulf %247, %248 : vector<8x16x64xf32>
    %250 = arith.addf %246, %249 : vector<8x16x64xf32>
    %cst_176 = arith.constant dense<0.000000e+00> : vector<8x16xf32>
    %251 = vector.multi_reduction <add>, %250, %cst_176 [2] : vector<8x16x64xf32> to vector<8x16xf32>
    %252 = vector.broadcast %56 : f32 to vector<8x16xf32>
    %253 = arith.addf %251, %252 : vector<8x16xf32>
    %c0_177 = arith.constant 0 : index
    %c8_178 = arith.constant 8 : index
    %c0_179 = arith.constant 0 : index
    %254 = vector.load %arg6[%c0_177, %c8_178, %c0_179] : memref<2x16x16xf32, #tpu.memory_space<vmem>>, vector<1x8x16xf32>
    %255 = vector.shape_cast %254 : vector<1x8x16xf32> to vector<8x16xf32>
    %256 = vector.shape_cast %253 : vector<8x16xf32> to vector<1x8x16xf32>
    tpu.vector_store %arg6[%c0_177, %c8_178, %c0_179], %256 {strides = array<i32>} : memref<2x16x16xf32, #tpu.memory_space<vmem>>, vector<1x8x16xf32>,
    %c1_180 = arith.constant 1 : index
    %c0_181 = arith.constant 0 : index
    %c0_182 = arith.constant 0 : index
    %c0_183 = arith.constant 0 : index
    %257 = vector.load %arg1[%c1_180, %c0_181, %c0_182, %c0_183] : memref<2x18x18x1xf32, #tpu.memory_space<vmem>>, vector<1x8x16x1xf32>
    %258 = vector.shape_cast %257 : vector<1x8x16x1xf32> to vector<8x16x1xf32>
    %259 = vector.broadcast %258 : vector<8x16x1xf32> to vector<8x16x64xf32>
    %260 = vector.broadcast %2 : vector<1x1x64xf32> to vector<8x16x64xf32>
    %261 = arith.mulf %259, %260 : vector<8x16x64xf32>
    %262 = vector.broadcast %55 : vector<1x1x64xf32> to vector<8x16x64xf32>
    %263 = arith.addf %261, %262 : vector<8x16x64xf32>
    %c1_184 = arith.constant 1 : index
    %c0_185 = arith.constant 0 : index
    %c1_186 = arith.constant 1 : index
    %c0_187 = arith.constant 0 : index
    %264 = vector.load %arg1[%c1_184, %c0_185, %c1_186, %c0_187] : memref<2x18x18x1xf32, #tpu.memory_space<vmem>>, vector<1x8x16x1xf32>
    %265 = vector.shape_cast %264 : vector<1x8x16x1xf32> to vector<8x16x1xf32>
    %266 = vector.broadcast %265 : vector<8x16x1xf32> to vector<8x16x64xf32>
    %267 = vector.broadcast %5 : vector<1x1x64xf32> to vector<8x16x64xf32>
    %268 = arith.mulf %266, %267 : vector<8x16x64xf32>
    %269 = arith.addf %263, %268 : vector<8x16x64xf32>
    %c1_188 = arith.constant 1 : index
    %c0_189 = arith.constant 0 : index
    %c2_190 = arith.constant 2 : index
    %c0_191 = arith.constant 0 : index
    %270 = vector.load %arg1[%c1_188, %c0_189, %c2_190, %c0_191] : memref<2x18x18x1xf32, #tpu.memory_space<vmem>>, vector<1x8x16x1xf32>
    %271 = vector.shape_cast %270 : vector<1x8x16x1xf32> to vector<8x16x1xf32>
    %272 = vector.broadcast %271 : vector<8x16x1xf32> to vector<8x16x64xf32>
    %273 = vector.broadcast %8 : vector<1x1x64xf32> to vector<8x16x64xf32>
    %274 = arith.mulf %272, %273 : vector<8x16x64xf32>
    %275 = arith.addf %269, %274 : vector<8x16x64xf32>
    %c1_192 = arith.constant 1 : index
    %c1_193 = arith.constant 1 : index
    %c0_194 = arith.constant 0 : index
    %c0_195 = arith.constant 0 : index
    %276 = vector.load %arg1[%c1_192, %c1_193, %c0_194, %c0_195] : memref<2x18x18x1xf32, #tpu.memory_space<vmem>>, vector<1x8x16x1xf32>
    %277 = vector.shape_cast %276 : vector<1x8x16x1xf32> to vector<8x16x1xf32>
    %278 = vector.broadcast %277 : vector<8x16x1xf32> to vector<8x16x64xf32>
    %279 = vector.broadcast %11 : vector<1x1x64xf32> to vector<8x16x64xf32>
    %280 = arith.mulf %278, %279 : vector<8x16x64xf32>
    %281 = arith.addf %275, %280 : vector<8x16x64xf32>
    %c1_196 = arith.constant 1 : index
    %c1_197 = arith.constant 1 : index
    %c1_198 = arith.constant 1 : index
    %c0_199 = arith.constant 0 : index
    %282 = vector.load %arg1[%c1_196, %c1_197, %c1_198, %c0_199] : memref<2x18x18x1xf32, #tpu.memory_space<vmem>>, vector<1x8x16x1xf32>
    %283 = vector.shape_cast %282 : vector<1x8x16x1xf32> to vector<8x16x1xf32>
    %284 = vector.broadcast %283 : vector<8x16x1xf32> to vector<8x16x64xf32>
    %285 = vector.broadcast %14 : vector<1x1x64xf32> to vector<8x16x64xf32>
    %286 = arith.mulf %284, %285 : vector<8x16x64xf32>
    %287 = arith.addf %281, %286 : vector<8x16x64xf32>
    %c1_200 = arith.constant 1 : index
    %c1_201 = arith.constant 1 : index
    %c2_202 = arith.constant 2 : index
    %c0_203 = arith.constant 0 : index
    %288 = vector.load %arg1[%c1_200, %c1_201, %c2_202, %c0_203] : memref<2x18x18x1xf32, #tpu.memory_space<vmem>>, vector<1x8x16x1xf32>
    %289 = vector.shape_cast %288 : vector<1x8x16x1xf32> to vector<8x16x1xf32>
    %290 = vector.broadcast %289 : vector<8x16x1xf32> to vector<8x16x64xf32>
    %291 = vector.broadcast %17 : vector<1x1x64xf32> to vector<8x16x64xf32>
    %292 = arith.mulf %290, %291 : vector<8x16x64xf32>
    %293 = arith.addf %287, %292 : vector<8x16x64xf32>
    %c1_204 = arith.constant 1 : index
    %c2_205 = arith.constant 2 : index
    %c0_206 = arith.constant 0 : index
    %c0_207 = arith.constant 0 : index
    %294 = vector.load %arg1[%c1_204, %c2_205, %c0_206, %c0_207] : memref<2x18x18x1xf32, #tpu.memory_space<vmem>>, vector<1x8x16x1xf32>
    %295 = vector.shape_cast %294 : vector<1x8x16x1xf32> to vector<8x16x1xf32>
    %296 = vector.broadcast %295 : vector<8x16x1xf32> to vector<8x16x64xf32>
    %297 = vector.broadcast %20 : vector<1x1x64xf32> to vector<8x16x64xf32>
    %298 = arith.mulf %296, %297 : vector<8x16x64xf32>
    %299 = arith.addf %293, %298 : vector<8x16x64xf32>
    %c1_208 = arith.constant 1 : index
    %c2_209 = arith.constant 2 : index
    %c1_210 = arith.constant 1 : index
    %c0_211 = arith.constant 0 : index
    %300 = vector.load %arg1[%c1_208, %c2_209, %c1_210, %c0_211] : memref<2x18x18x1xf32, #tpu.memory_space<vmem>>, vector<1x8x16x1xf32>
    %301 = vector.shape_cast %300 : vector<1x8x16x1xf32> to vector<8x16x1xf32>
    %302 = vector.broadcast %301 : vector<8x16x1xf32> to vector<8x16x64xf32>
    %303 = vector.broadcast %23 : vector<1x1x64xf32> to vector<8x16x64xf32>
    %304 = arith.mulf %302, %303 : vector<8x16x64xf32>
    %305 = arith.addf %299, %304 : vector<8x16x64xf32>
    %c1_212 = arith.constant 1 : index
    %c2_213 = arith.constant 2 : index
    %c2_214 = arith.constant 2 : index
    %c0_215 = arith.constant 0 : index
    %306 = vector.load %arg1[%c1_212, %c2_213, %c2_214, %c0_215] : memref<2x18x18x1xf32, #tpu.memory_space<vmem>>, vector<1x8x16x1xf32>
    %307 = vector.shape_cast %306 : vector<1x8x16x1xf32> to vector<8x16x1xf32>
    %308 = vector.broadcast %307 : vector<8x16x1xf32> to vector<8x16x64xf32>
    %309 = vector.broadcast %26 : vector<1x1x64xf32> to vector<8x16x64xf32>
    %310 = arith.mulf %308, %309 : vector<8x16x64xf32>
    %311 = arith.addf %305, %310 : vector<8x16x64xf32>
    %c1_216 = arith.constant 1 : index
    %c1_217 = arith.constant 1 : index
    %c0_218 = arith.constant 0 : index
    %312 = vector.load %arg7[%c1_216, %c1_217, %c0_218] : memref<18x18x64xf32, #tpu.memory_space<vmem>>, vector<8x16x64xf32>
    tpu.vector_store %arg7[%c1_216, %c1_217, %c0_218], %311 {strides = array<i32>} : memref<18x18x64xf32, #tpu.memory_space<vmem>>, vector<8x16x64xf32>,
    %c1_219 = arith.constant 1 : index
    %c8_220 = arith.constant 8 : index
    %c0_221 = arith.constant 0 : index
    %c0_222 = arith.constant 0 : index
    %313 = vector.load %arg1[%c1_219, %c8_220, %c0_221, %c0_222] : memref<2x18x18x1xf32, #tpu.memory_space<vmem>>, vector<1x8x16x1xf32>
    %314 = vector.shape_cast %313 : vector<1x8x16x1xf32> to vector<8x16x1xf32>
    %315 = vector.broadcast %314 : vector<8x16x1xf32> to vector<8x16x64xf32>
    %316 = vector.broadcast %2 : vector<1x1x64xf32> to vector<8x16x64xf32>
    %317 = arith.mulf %315, %316 : vector<8x16x64xf32>
    %318 = vector.broadcast %55 : vector<1x1x64xf32> to vector<8x16x64xf32>
    %319 = arith.addf %317, %318 : vector<8x16x64xf32>
    %c1_223 = arith.constant 1 : index
    %c8_224 = arith.constant 8 : index
    %c1_225 = arith.constant 1 : index
    %c0_226 = arith.constant 0 : index
    %320 = vector.load %arg1[%c1_223, %c8_224, %c1_225, %c0_226] : memref<2x18x18x1xf32, #tpu.memory_space<vmem>>, vector<1x8x16x1xf32>
    %321 = vector.shape_cast %320 : vector<1x8x16x1xf32> to vector<8x16x1xf32>
    %322 = vector.broadcast %321 : vector<8x16x1xf32> to vector<8x16x64xf32>
    %323 = vector.broadcast %5 : vector<1x1x64xf32> to vector<8x16x64xf32>
    %324 = arith.mulf %322, %323 : vector<8x16x64xf32>
    %325 = arith.addf %319, %324 : vector<8x16x64xf32>
    %c1_227 = arith.constant 1 : index
    %c8_228 = arith.constant 8 : index
    %c2_229 = arith.constant 2 : index
    %c0_230 = arith.constant 0 : index
    %326 = vector.load %arg1[%c1_227, %c8_228, %c2_229, %c0_230] : memref<2x18x18x1xf32, #tpu.memory_space<vmem>>, vector<1x8x16x1xf32>
    %327 = vector.shape_cast %326 : vector<1x8x16x1xf32> to vector<8x16x1xf32>
    %328 = vector.broadcast %327 : vector<8x16x1xf32> to vector<8x16x64xf32>
    %329 = vector.broadcast %8 : vector<1x1x64xf32> to vector<8x16x64xf32>
    %330 = arith.mulf %328, %329 : vector<8x16x64xf32>
    %331 = arith.addf %325, %330 : vector<8x16x64xf32>
    %c1_231 = arith.constant 1 : index
    %c9_232 = arith.constant 9 : index
    %c0_233 = arith.constant 0 : index
    %c0_234 = arith.constant 0 : index
    %332 = vector.load %arg1[%c1_231, %c9_232, %c0_233, %c0_234] : memref<2x18x18x1xf32, #tpu.memory_space<vmem>>, vector<1x8x16x1xf32>
    %333 = vector.shape_cast %332 : vector<1x8x16x1xf32> to vector<8x16x1xf32>
    %334 = vector.broadcast %333 : vector<8x16x1xf32> to vector<8x16x64xf32>
    %335 = vector.broadcast %11 : vector<1x1x64xf32> to vector<8x16x64xf32>
    %336 = arith.mulf %334, %335 : vector<8x16x64xf32>
    %337 = arith.addf %331, %336 : vector<8x16x64xf32>
    %c1_235 = arith.constant 1 : index
    %c9_236 = arith.constant 9 : index
    %c1_237 = arith.constant 1 : index
    %c0_238 = arith.constant 0 : index
    %338 = vector.load %arg1[%c1_235, %c9_236, %c1_237, %c0_238] : memref<2x18x18x1xf32, #tpu.memory_space<vmem>>, vector<1x8x16x1xf32>
    %339 = vector.shape_cast %338 : vector<1x8x16x1xf32> to vector<8x16x1xf32>
    %340 = vector.broadcast %339 : vector<8x16x1xf32> to vector<8x16x64xf32>
    %341 = vector.broadcast %14 : vector<1x1x64xf32> to vector<8x16x64xf32>
    %342 = arith.mulf %340, %341 : vector<8x16x64xf32>
    %343 = arith.addf %337, %342 : vector<8x16x64xf32>
    %c1_239 = arith.constant 1 : index
    %c9_240 = arith.constant 9 : index
    %c2_241 = arith.constant 2 : index
    %c0_242 = arith.constant 0 : index
    %344 = vector.load %arg1[%c1_239, %c9_240, %c2_241, %c0_242] : memref<2x18x18x1xf32, #tpu.memory_space<vmem>>, vector<1x8x16x1xf32>
    %345 = vector.shape_cast %344 : vector<1x8x16x1xf32> to vector<8x16x1xf32>
    %346 = vector.broadcast %345 : vector<8x16x1xf32> to vector<8x16x64xf32>
    %347 = vector.broadcast %17 : vector<1x1x64xf32> to vector<8x16x64xf32>
    %348 = arith.mulf %346, %347 : vector<8x16x64xf32>
    %349 = arith.addf %343, %348 : vector<8x16x64xf32>
    %c1_243 = arith.constant 1 : index
    %c10_244 = arith.constant 10 : index
    %c0_245 = arith.constant 0 : index
    %c0_246 = arith.constant 0 : index
    %350 = vector.load %arg1[%c1_243, %c10_244, %c0_245, %c0_246] : memref<2x18x18x1xf32, #tpu.memory_space<vmem>>, vector<1x8x16x1xf32>
    %351 = vector.shape_cast %350 : vector<1x8x16x1xf32> to vector<8x16x1xf32>
    %352 = vector.broadcast %351 : vector<8x16x1xf32> to vector<8x16x64xf32>
    %353 = vector.broadcast %20 : vector<1x1x64xf32> to vector<8x16x64xf32>
    %354 = arith.mulf %352, %353 : vector<8x16x64xf32>
    %355 = arith.addf %349, %354 : vector<8x16x64xf32>
    %c1_247 = arith.constant 1 : index
    %c10_248 = arith.constant 10 : index
    %c1_249 = arith.constant 1 : index
    %c0_250 = arith.constant 0 : index
    %356 = vector.load %arg1[%c1_247, %c10_248, %c1_249, %c0_250] : memref<2x18x18x1xf32, #tpu.memory_space<vmem>>, vector<1x8x16x1xf32>
    %357 = vector.shape_cast %356 : vector<1x8x16x1xf32> to vector<8x16x1xf32>
    %358 = vector.broadcast %357 : vector<8x16x1xf32> to vector<8x16x64xf32>
    %359 = vector.broadcast %23 : vector<1x1x64xf32> to vector<8x16x64xf32>
    %360 = arith.mulf %358, %359 : vector<8x16x64xf32>
    %361 = arith.addf %355, %360 : vector<8x16x64xf32>
    %c1_251 = arith.constant 1 : index
    %c10_252 = arith.constant 10 : index
    %c2_253 = arith.constant 2 : index
    %c0_254 = arith.constant 0 : index
    %362 = vector.load %arg1[%c1_251, %c10_252, %c2_253, %c0_254] : memref<2x18x18x1xf32, #tpu.memory_space<vmem>>, vector<1x8x16x1xf32>
    %363 = vector.shape_cast %362 : vector<1x8x16x1xf32> to vector<8x16x1xf32>
    %364 = vector.broadcast %363 : vector<8x16x1xf32> to vector<8x16x64xf32>
    %365 = vector.broadcast %26 : vector<1x1x64xf32> to vector<8x16x64xf32>
    %366 = arith.mulf %364, %365 : vector<8x16x64xf32>
    %367 = arith.addf %361, %366 : vector<8x16x64xf32>
    %c9_255 = arith.constant 9 : index
    %c1_256 = arith.constant 1 : index
    %c0_257 = arith.constant 0 : index
    %368 = vector.load %arg7[%c9_255, %c1_256, %c0_257] : memref<18x18x64xf32, #tpu.memory_space<vmem>>, vector<8x16x64xf32>
    tpu.vector_store %arg7[%c9_255, %c1_256, %c0_257], %367 {strides = array<i32>} : memref<18x18x64xf32, #tpu.memory_space<vmem>>, vector<8x16x64xf32>,
    %c0_258 = arith.constant 0 : index
    %c0_259 = arith.constant 0 : index
    %c0_260 = arith.constant 0 : index
    %369 = vector.load %arg7[%c0_258, %c0_259, %c0_260] : memref<18x18x64xf32, #tpu.memory_space<vmem>>, vector<8x16x64xf32>
    %370 = vector.broadcast %29 : vector<1x1x64xf32> to vector<8x16x64xf32>
    %371 = arith.mulf %369, %370 : vector<8x16x64xf32>
    %c0_261 = arith.constant 0 : index
    %c1_262 = arith.constant 1 : index
    %c0_263 = arith.constant 0 : index
    %372 = vector.load %arg7[%c0_261, %c1_262, %c0_263] : memref<18x18x64xf32, #tpu.memory_space<vmem>>, vector<8x16x64xf32>
    %373 = vector.broadcast %32 : vector<1x1x64xf32> to vector<8x16x64xf32>
    %374 = arith.mulf %372, %373 : vector<8x16x64xf32>
    %375 = arith.addf %371, %374 : vector<8x16x64xf32>
    %c0_264 = arith.constant 0 : index
    %c2_265 = arith.constant 2 : index
    %c0_266 = arith.constant 0 : index
    %376 = vector.load %arg7[%c0_264, %c2_265, %c0_266] : memref<18x18x64xf32, #tpu.memory_space<vmem>>, vector<8x16x64xf32>
    %377 = vector.broadcast %35 : vector<1x1x64xf32> to vector<8x16x64xf32>
    %378 = arith.mulf %376, %377 : vector<8x16x64xf32>
    %379 = arith.addf %375, %378 : vector<8x16x64xf32>
    %c1_267 = arith.constant 1 : index
    %c0_268 = arith.constant 0 : index
    %c0_269 = arith.constant 0 : index
    %380 = vector.load %arg7[%c1_267, %c0_268, %c0_269] : memref<18x18x64xf32, #tpu.memory_space<vmem>>, vector<8x16x64xf32>
    %381 = vector.broadcast %38 : vector<1x1x64xf32> to vector<8x16x64xf32>
    %382 = arith.mulf %380, %381 : vector<8x16x64xf32>
    %383 = arith.addf %379, %382 : vector<8x16x64xf32>
    %c1_270 = arith.constant 1 : index
    %c1_271 = arith.constant 1 : index
    %c0_272 = arith.constant 0 : index
    %384 = vector.load %arg7[%c1_270, %c1_271, %c0_272] : memref<18x18x64xf32, #tpu.memory_space<vmem>>, vector<8x16x64xf32>
    %385 = vector.broadcast %41 : vector<1x1x64xf32> to vector<8x16x64xf32>
    %386 = arith.mulf %384, %385 : vector<8x16x64xf32>
    %387 = arith.addf %383, %386 : vector<8x16x64xf32>
    %c1_273 = arith.constant 1 : index
    %c2_274 = arith.constant 2 : index
    %c0_275 = arith.constant 0 : index
    %388 = vector.load %arg7[%c1_273, %c2_274, %c0_275] : memref<18x18x64xf32, #tpu.memory_space<vmem>>, vector<8x16x64xf32>
    %389 = vector.broadcast %44 : vector<1x1x64xf32> to vector<8x16x64xf32>
    %390 = arith.mulf %388, %389 : vector<8x16x64xf32>
    %391 = arith.addf %387, %390 : vector<8x16x64xf32>
    %c2_276 = arith.constant 2 : index
    %c0_277 = arith.constant 0 : index
    %c0_278 = arith.constant 0 : index
    %392 = vector.load %arg7[%c2_276, %c0_277, %c0_278] : memref<18x18x64xf32, #tpu.memory_space<vmem>>, vector<8x16x64xf32>
    %393 = vector.broadcast %47 : vector<1x1x64xf32> to vector<8x16x64xf32>
    %394 = arith.mulf %392, %393 : vector<8x16x64xf32>
    %395 = arith.addf %391, %394 : vector<8x16x64xf32>
    %c2_279 = arith.constant 2 : index
    %c1_280 = arith.constant 1 : index
    %c0_281 = arith.constant 0 : index
    %396 = vector.load %arg7[%c2_279, %c1_280, %c0_281] : memref<18x18x64xf32, #tpu.memory_space<vmem>>, vector<8x16x64xf32>
    %397 = vector.broadcast %50 : vector<1x1x64xf32> to vector<8x16x64xf32>
    %398 = arith.mulf %396, %397 : vector<8x16x64xf32>
    %399 = arith.addf %395, %398 : vector<8x16x64xf32>
    %c2_282 = arith.constant 2 : index
    %c2_283 = arith.constant 2 : index
    %c0_284 = arith.constant 0 : index
    %400 = vector.load %arg7[%c2_282, %c2_283, %c0_284] : memref<18x18x64xf32, #tpu.memory_space<vmem>>, vector<8x16x64xf32>
    %401 = vector.broadcast %53 : vector<1x1x64xf32> to vector<8x16x64xf32>
    %402 = arith.mulf %400, %401 : vector<8x16x64xf32>
    %403 = arith.addf %399, %402 : vector<8x16x64xf32>
    %cst_285 = arith.constant dense<0.000000e+00> : vector<8x16xf32>
    %404 = vector.multi_reduction <add>, %403, %cst_285 [2] : vector<8x16x64xf32> to vector<8x16xf32>
    %405 = vector.broadcast %56 : f32 to vector<8x16xf32>
    %406 = arith.addf %404, %405 : vector<8x16xf32>
    %c1_286 = arith.constant 1 : index
    %c0_287 = arith.constant 0 : index
    %c0_288 = arith.constant 0 : index
    %407 = vector.load %arg6[%c1_286, %c0_287, %c0_288] : memref<2x16x16xf32, #tpu.memory_space<vmem>>, vector<1x8x16xf32>
    %408 = vector.shape_cast %407 : vector<1x8x16xf32> to vector<8x16xf32>
    %409 = vector.shape_cast %406 : vector<8x16xf32> to vector<1x8x16xf32>
    tpu.vector_store %arg6[%c1_286, %c0_287, %c0_288], %409 {strides = array<i32>} : memref<2x16x16xf32, #tpu.memory_space<vmem>>, vector<1x8x16xf32>,
    %c8_289 = arith.constant 8 : index
    %c0_290 = arith.constant 0 : index
    %c0_291 = arith.constant 0 : index
    %410 = vector.load %arg7[%c8_289, %c0_290, %c0_291] : memref<18x18x64xf32, #tpu.memory_space<vmem>>, vector<8x16x64xf32>
    %411 = vector.broadcast %29 : vector<1x1x64xf32> to vector<8x16x64xf32>
    %412 = arith.mulf %410, %411 : vector<8x16x64xf32>
    %c8_292 = arith.constant 8 : index
    %c1_293 = arith.constant 1 : index
    %c0_294 = arith.constant 0 : index
    %413 = vector.load %arg7[%c8_292, %c1_293, %c0_294] : memref<18x18x64xf32, #tpu.memory_space<vmem>>, vector<8x16x64xf32>
    %414 = vector.broadcast %32 : vector<1x1x64xf32> to vector<8x16x64xf32>
    %415 = arith.mulf %413, %414 : vector<8x16x64xf32>
    %416 = arith.addf %412, %415 : vector<8x16x64xf32>
    %c8_295 = arith.constant 8 : index
    %c2_296 = arith.constant 2 : index
    %c0_297 = arith.constant 0 : index
    %417 = vector.load %arg7[%c8_295, %c2_296, %c0_297] : memref<18x18x64xf32, #tpu.memory_space<vmem>>, vector<8x16x64xf32>
    %418 = vector.broadcast %35 : vector<1x1x64xf32> to vector<8x16x64xf32>
    %419 = arith.mulf %417, %418 : vector<8x16x64xf32>
    %420 = arith.addf %416, %419 : vector<8x16x64xf32>
    %c9_298 = arith.constant 9 : index
    %c0_299 = arith.constant 0 : index
    %c0_300 = arith.constant 0 : index
    %421 = vector.load %arg7[%c9_298, %c0_299, %c0_300] : memref<18x18x64xf32, #tpu.memory_space<vmem>>, vector<8x16x64xf32>
    %422 = vector.broadcast %38 : vector<1x1x64xf32> to vector<8x16x64xf32>
    %423 = arith.mulf %421, %422 : vector<8x16x64xf32>
    %424 = arith.addf %420, %423 : vector<8x16x64xf32>
    %c9_301 = arith.constant 9 : index
    %c1_302 = arith.constant 1 : index
    %c0_303 = arith.constant 0 : index
    %425 = vector.load %arg7[%c9_301, %c1_302, %c0_303] : memref<18x18x64xf32, #tpu.memory_space<vmem>>, vector<8x16x64xf32>
    %426 = vector.broadcast %41 : vector<1x1x64xf32> to vector<8x16x64xf32>
    %427 = arith.mulf %425, %426 : vector<8x16x64xf32>
    %428 = arith.addf %424, %427 : vector<8x16x64xf32>
    %c9_304 = arith.constant 9 : index
    %c2_305 = arith.constant 2 : index
    %c0_306 = arith.constant 0 : index
    %429 = vector.load %arg7[%c9_304, %c2_305, %c0_306] : memref<18x18x64xf32, #tpu.memory_space<vmem>>, vector<8x16x64xf32>
    %430 = vector.broadcast %44 : vector<1x1x64xf32> to vector<8x16x64xf32>
    %431 = arith.mulf %429, %430 : vector<8x16x64xf32>
    %432 = arith.addf %428, %431 : vector<8x16x64xf32>
    %c10_307 = arith.constant 10 : index
    %c0_308 = arith.constant 0 : index
    %c0_309 = arith.constant 0 : index
    %433 = vector.load %arg7[%c10_307, %c0_308, %c0_309] : memref<18x18x64xf32, #tpu.memory_space<vmem>>, vector<8x16x64xf32>
    %434 = vector.broadcast %47 : vector<1x1x64xf32> to vector<8x16x64xf32>
    %435 = arith.mulf %433, %434 : vector<8x16x64xf32>
    %436 = arith.addf %432, %435 : vector<8x16x64xf32>
    %c10_310 = arith.constant 10 : index
    %c1_311 = arith.constant 1 : index
    %c0_312 = arith.constant 0 : index
    %437 = vector.load %arg7[%c10_310, %c1_311, %c0_312] : memref<18x18x64xf32, #tpu.memory_space<vmem>>, vector<8x16x64xf32>
    %438 = vector.broadcast %50 : vector<1x1x64xf32> to vector<8x16x64xf32>
    %439 = arith.mulf %437, %438 : vector<8x16x64xf32>
    %440 = arith.addf %436, %439 : vector<8x16x64xf32>
    %c10_313 = arith.constant 10 : index
    %c2_314 = arith.constant 2 : index
    %c0_315 = arith.constant 0 : index
    %441 = vector.load %arg7[%c10_313, %c2_314, %c0_315] : memref<18x18x64xf32, #tpu.memory_space<vmem>>, vector<8x16x64xf32>
    %442 = vector.broadcast %53 : vector<1x1x64xf32> to vector<8x16x64xf32>
    %443 = arith.mulf %441, %442 : vector<8x16x64xf32>
    %444 = arith.addf %440, %443 : vector<8x16x64xf32>
    %cst_316 = arith.constant dense<0.000000e+00> : vector<8x16xf32>
    %445 = vector.multi_reduction <add>, %444, %cst_316 [2] : vector<8x16x64xf32> to vector<8x16xf32>
    %446 = vector.broadcast %56 : f32 to vector<8x16xf32>
    %447 = arith.addf %445, %446 : vector<8x16xf32>
    %c1_317 = arith.constant 1 : index
    %c8_318 = arith.constant 8 : index
    %c0_319 = arith.constant 0 : index
    %448 = vector.load %arg6[%c1_317, %c8_318, %c0_319] : memref<2x16x16xf32, #tpu.memory_space<vmem>>, vector<1x8x16xf32>
    %449 = vector.shape_cast %448 : vector<1x8x16xf32> to vector<8x16xf32>
    %450 = vector.shape_cast %447 : vector<8x16xf32> to vector<1x8x16xf32>
    tpu.vector_store %arg6[%c1_317, %c8_318, %c0_319], %450 {strides = array<i32>} : memref<2x16x16xf32, #tpu.memory_space<vmem>>, vector<1x8x16xf32>,
    return
  }
  func.func @transform_0(%arg0: i32) -> (i32, i32, i32, i32) {
    %c0_i32 = arith.constant 0 : i32
    %c0_i32_0 = arith.constant 0 : i32
    %c0_i32_1 = arith.constant 0 : i32
    %c0_i32_2 = arith.constant 0 : i32
    return %arg0, %c0_i32, %c0_i32_0, %c0_i32_1 : i32, i32, i32, i32
  }
  func.func @transform_1(%arg0: i32) -> (i32, i32) {
    %c0_i32 = arith.constant 0 : i32
    %c0_i32_0 = arith.constant 0 : i32
    %c0_i32_1 = arith.constant 0 : i32
    return %c0_i32, %c0_i32_0 : i32, i32
  }
  func.func @transform_2(%arg0: i32) -> (i32, i32) {
    %c0_i32 = arith.constant 0 : i32
    %c0_i32_0 = arith.constant 0 : i32
    %c0_i32_1 = arith.constant 0 : i32
    return %c0_i32, %c0_i32_0 : i32, i32
  }
  func.func @transform_3(%arg0: i32) -> (i32, i32) {
    %c0_i32 = arith.constant 0 : i32
    %c0_i32_0 = arith.constant 0 : i32
    %c0_i32_1 = arith.constant 0 : i32
    return %c0_i32, %c0_i32_0 : i32, i32
  }
  func.func @transform_4(%arg0: i32) -> i32 {
    %c0_i32 = arith.constant 0 : i32
    %c0_i32_0 = arith.constant 0 : i32
    return %c0_i32 : i32
  }
  func.func @transform_5(%arg0: i32) -> (i32, i32, i32) {
    %c0_i32 = arith.constant 0 : i32
    %c0_i32_0 = arith.constant 0 : i32
    %c0_i32_1 = arith.constant 0 : i32
    return %arg0, %c0_i32, %c0_i32_0 : i32, i32, i32
  }
}

</mosaic_0001>

<bundles_post_ra>
// kernel: graphcut_forward.1
= control target key start
LH: loop header
LB: loop body
LE: loop exit
PB: predicated region body
PF: predicated region fallthrough
CT: control target
= control target key end

     0   :  { %s13886_s0 = inlined_call_operand.vmem [shape: f32[4,18,18,1], index: 0, kind: input, shape index: {}]   ;;  %s13887_s1 = inlined_call_operand.vmem [shape: f32[9,64], index: 1, kind: input, shape index: {}]   ;;  %s13888_s2 = inlined_call_operand.vmem [shape: f32[1,64], index: 2, kind: input, shape index: {}]   ;;  %s13889_s3 = inlined_call_operand.vmem [shape: f32[9,64], index: 3, kind: input, shape index: {}]   ;;  %s13890_s4 = inlined_call_operand.<no memory space> [shape: f32[1], index: 4, kind: input, shape index: {}]   ;;  %s13891_s5 = inlined_call_operand.hbm [shape: f32[4,16,16], index: 5, kind: output, shape index: {}]  }
   0x1   :  { %10 = sst [smem:[#allocation3]] %s13890_s4 }
   0x2   :  { %11 = vsyncpa [#allocation5], 0 }
   0x3   :  { %13 = vsyncpa [#allocation5 + $0x1], 0  ;;  %s8287_s20 = smov 0   ;;  %s8289_s21 = smov 0  }
   0x4   :  { %s8291_s22 = smov 0   ;;  %s8293_s23 = smov 0  }
   0x5 LB: > { %s8308_s4 = sadd.s32 4294967295, %s8247_s23   ;;  %s7461_s24 = sadd.s32 4294967294, %s8247_s23   ;;  %s8247_s23 = sphi %s8293_s23, %s14856_s23   ;;  %s8243_s22 = sphi %s8291_s22, %s14855_s22   ;;  %s8239_s21 = sphi %s8289_s21, %s14854_s21   ;;  %s8235_s20 = sphi %s8287_s20, %s14853_s20  }
   0x6   : > { %s8312_s25 = sadd.s32 1, %s8247_s23   ;;  %s136_s26 = sadd.s32 1, %s8243_s22 }
   0x7   : > { %s133_s27 = ssub.s32 %s8247_s23, %s8312_s25  ;;  %p146_p0 = scmp.ne.s32.totalorder %s8243_s22, %s8239_s21 }
   0x8   : > { %p134_p1 = scmp.eq.s32.totalorder %s133_s27, 0  ;;  %p147_p2 = scmp.eq.s32.totalorder %s8308_s4, 1 }
   0x9   : > { %p152_p3 = scmp.ne.s32.totalorder %s8239_s21, %s8235_s20  ;;  %p153_p4 = scmp.eq.s32.totalorder %s7461_s24, 1 }
   0xa   : > { %s8323_s28 = scalar_select %p134_p1, %s8243_s22, %s136_s26  }
   0xb   : > { %p8325_p5 = por %p147_p2, %p146_p0  ;;  %p8329_p6 = por %p153_p4, %p152_p3 }
   0xc   : > { %p7464_p7 = scmp.ge.s32.totalorder %s8247_s23, 1  ;;  %p193_p8 = scmp.lt.s32.totalorder %s8247_s23, 3 }
   0xe   : > { %p194_p9 = pnand %p7464_p7, %p193_p8 }
  0x10   : > { %197 = sbr.rel (%p194_p9) target bundleno = 1746 (0x6d2), region = 40 }
  0x17   : > { %s7466_s6 = sshll.u32 %s8308_s4, 1  ;;  %v8249_v0 = vmov 0   ;;  %vm250_vm0 = vcmask 523264   ;;  %vm259_vm1 = vcmask 516096   ;;  %vm253_vm2 = vcmask 517120   ;;  %s8024_s11 = sshll.u32 %s8308_s4, 9 }
  0x18   : > { %8070 = vset.pattern.permute.xlu1 %v8249_v0  ;;  %8069 = vset.pattern.permute.xlu0 %v8249_v0  ;;  %p223_p10 = scmp.lt.s32.totalorder %s7466_s6, 3  ;;  %vm3226_vm3 = vcmask 130112   ;;  %vm3291_vm4 = vcmask 1041409   ;;  %vm3293_vm5 = vcmask 1042434   ;;  %vm3295_vm6 = vcmask 1043459   ;;  %s13834_s15 = scalar_lea.hbm %s13891_s5, %s8024_s11 }
  0x19   : > { %vm3297_vm7 = vcmask 1044484   ;;  %vm3299_vm8 = vcmask 1045509   ;;  %vm3301_vm9 = vcmask 1046534   ;;  %vm3303_vm10 = vcmask 1047559   ;;  %s8251_s17 = smov [#allocation4]  }
  0x1a   : > { %s14858_s6 = smov (!%p223_p10, %s7466_s6), 3  ;;  %vm3306_vm11 = vcmask 130048   ;;  %s8189_s18 = sshll.u32 %s8251_s17, 4  ;;  %s8190_s18 = int_to_ptr.vmem [resolvable:$false] %s8189_s18 }
  0x1b   : > { %s8025_s7 = smul.u32 432, %s14858_s6  ;;  %s249_s6 = sld [smem:[#allocation3]] }
  0x1c   : > { %s8191_s19 = scalar_lea.vmem %s8190_s18, 1024 }
  0x1d   : > { %s8339_s10 = scalar_lea.vmem %s13886_s0, %s8025_s7  ;;  %s219_s7 = sand.u32 1, %s8239_s21  }
  0x1e   : > { %v8342_v1 = vld [vmem:[%s8339_s10 + $0x18] sm:$0xff]  ;;  %v296_v2 = vld [vmem:[%s8339_s10] sm:$0xff]  ;;  %v297_v4 = vld [vmem:[%s8339_s10 + $0x8] sm:$0xff]  ;;  %s7465_s8 = sshll.u32 %s219_s7, 5  ;;  %s13845_s4 = scalar_lea.sflag [#allocation5], %s219_s7 }
  0x1f   : > { %324 = vperm.xlu1 %8070, %v8342_v1   ;;  %314 = vperm.xlu0 %8069, %v296_v2   ;;  %v8347_v3 = vld [vmem:[%s8339_s10 + $0x20] sm:$0xff]  ;;  %v8352_v5 = vld [vmem:[%s8339_s10 + $0x38] sm:$0xff]  ;;  %v8355_v6 = vld [vmem:[%s8339_s10 + $0x30] sm:$0xff]  ;;  %s11091_s9 = scalar_lea.vmem [#allocation4], %s7465_s8 }
  0x20   : > { %v8360_v7 = vld [vmem:[%s8339_s10 + $0x50] sm:$0xff]  ;;  %v8363_v8 = vld [vmem:[%s8339_s10 + $0x48] sm:$0xff]  ;;  %v8371_v10 = vld [vmem:[%s8339_s10 + $0x60] sm:$0xff]  ;;  %s7399_s12 = sshll.u32 %s11091_s9, 4  ;;  %s13836_s12 = int_to_ptr.vmem [resolvable:$true] %s7399_s12 }
  0x21   : > { %v8368_v9 = vld [vmem:[%s8339_s10 + $0x68] sm:$0xff]  ;;  %v8376_v11 = vld [vmem:[%s8339_s10 + $0x80] sm:$0xff]  ;;  %v8379_v12 = vld [vmem:[%s8339_s10 + $0x78] sm:$0xff]  ;;  %s8185_s16 = scalar_lea.vmem %s13836_s12, 512  ;;  %p8192_p0 = scmp.lt.s32.totalorder %s13836_s12, %s8190_s18 }
  0x22   : > { %v8384_v13 = vld [vmem:[%s8339_s10 + $0x98] sm:$0xff]  ;;  %v8387_v14 = vld [vmem:[%s8339_s10 + $0x90] sm:$0xff]  ;;  %v8395_v16 = vld [vmem:[%s8339_s10 + $0xa8] sm:$0xff]  ;;  %p8186_p11 = scmp.ne.s32.totalorder %s13836_s12, %s8185_s16  ;;  %p8193_p1 = scmp.lt.s32.totalorder %s8191_s19, %s8185_s16 }
  0x23   : > { %329 = vperm.xlu1 %8070, %v8347_v3   ;;  %319 = vperm.xlu0 %8069, %v297_v4   ;;  %v8392_v15 = vld [vmem:[%s8339_s10 + $0xb0] sm:$0xff]  ;;  %v434_v18 = vld [vmem:[%s8339_s10 + $0x1] sm:$0xff]  ;;  %v8405_v20 = vld [vmem:[%s8339_s10 + $0x19] sm:$0xff] }
  0x24   : > { %v435_v17 = vld [vmem:[%s8339_s10 + $0x9] sm:$0xff]  ;;  %v8402_v19 = vld [vmem:[%s8339_s10 + $0x21] sm:$0xff]  ;;  %v8410_v21 = vld [vmem:[%s8339_s10 + $0x39] sm:$0xff]  ;;  %p8187_p12 = pnand %p8186_p11, %p8325_p5  ;;  %p8194_p2 = por %p8193_p1, %p8192_p0 }
  0x25   : > { %v8413_v22 = vld [vmem:[%s8339_s10 + $0x31] sm:$0xff]  ;;  %v8421_v24 = vld [vmem:[%s8339_s10 + $0x49] sm:$0xff]  ;;  %v8429_v26 = vld [vmem:[%s8339_s10 + $0x61] sm:$0xff] }
  0x26   : > { %v8418_v23 = vld [vmem:[%s8339_s10 + $0x51] sm:$0xff]  ;;  %v8426_v25 = vld [vmem:[%s8339_s10 + $0x69] sm:$0xff]  ;;  %v8434_v27 = vld [vmem:[%s8339_s10 + $0x81] sm:$0xff]  ;;  %p8188_p13 = pneg %p8187_p12 }
  0x27   : > { %339 = vperm.xlu1 %8070, %v8352_v5   ;;  %334 = vperm.xlu0 %8069, %v8355_v6   ;;  %v8437_v28 = vld [vmem:[%s8339_s10 + $0x79] sm:$0xff]  ;;  %v8445_v30 = vld [vmem:[%s8339_s10 + $0x91] sm:$0xff]  ;;  %v8453_v32 = vld [vmem:[%s8339_s10 + $0xa9] sm:$0xff] }
  0x28   : > { %v8442_v29 = vld [vmem:[%s8339_s10 + $0x99] sm:$0xff]  ;;  %v8450_v31 = vld [vmem:[%s8339_s10 + $0xb1] sm:$0xff]  ;;  %v566_v34 = vld [vmem:[%s8339_s10 + $0x2] sm:$0xff]  ;;  %p8195_p3 = pnand %p8194_p2, %p8188_p13 }
  0x29   : > { %v567_v33 = vld [vmem:[%s8339_s10 + $0xa] sm:$0xff]  ;;  %v8460_v35 = vld [vmem:[%s8339_s10 + $0x22] sm:$0xff]  ;;  %v8463_v36 = vld [vmem:[%s8339_s10 + $0x1a] sm:$0xff] }
  0x2a   : > { %v8468_v37 = vld [vmem:[%s8339_s10 + $0x3a] sm:$0xff]  ;;  %v8471_v38 = vld [vmem:[%s8339_s10 + $0x32] sm:$0xff]  ;;  %v8479_v40 = vld [vmem:[%s8339_s10 + $0x4a] sm:$0xff] }
  0x2b   : > { %349 = vperm.xlu1 %8070, %v8360_v7   ;;  %344 = vperm.xlu0 %8069, %v8363_v8   ;;  %v8476_v39 = vld [vmem:[%s8339_s10 + $0x52] sm:$0xff]  ;;  %v8484_v41 = vld [vmem:[%s8339_s10 + $0x6a] sm:$0xff]  ;;  %v8487_v42 = vld [vmem:[%s8339_s10 + $0x62] sm:$0xff] }
  0x2c   : > { %v8492_v43 = vld [vmem:[%s8339_s10 + $0x82] sm:$0xff]  ;;  %v8495_v44 = vld [vmem:[%s8339_s10 + $0x7a] sm:$0xff]  ;;  %v8503_v46 = vld [vmem:[%s8339_s10 + $0x92] sm:$0xff] }
  0x2d   : > { %v8500_v45 = vld [vmem:[%s8339_s10 + $0x9a] sm:$0xff]  ;;  %v8508_v47 = vld [vmem:[%s8339_s10 + $0xb2] sm:$0xff]  ;;  %v8511_v48 = vld [vmem:[%s8339_s10 + $0xaa] sm:$0xff] }
  0x2e   : > { %v8530_v49 = vld [vmem:[%s8339_s10 + $0xc8] sm:$0xff]  ;;  %v8533_v50 = vld [vmem:[%s8339_s10 + $0xc0] sm:$0xff] }
  0x2f   : > { %359 = vperm.xlu1 %8070, %v8368_v9   ;;  %354 = vperm.xlu0 %8069, %v8371_v10   ;;  %v8583_v2 = vld [vmem:[%s8339_s10 + $0xc1] sm:$0xff] }
  0x33   : > { %369 = vperm.xlu1 %8070, %v8376_v11   ;;  %364 = vperm.xlu0 %8069, %v8379_v12  }
  0x37   : > { %379 = vperm.xlu1 %8070, %v8384_v13   ;;  %374 = vperm.xlu0 %8069, %v8387_v14  }
  0x3b   : > { %389 = vperm.xlu1 %8070, %v8392_v15   ;;  %384 = vperm.xlu0 %8069, %v8395_v16  }
  0x3f   : > { %457 = vperm.xlu1 %8070, %v435_v17   ;;  %452 = vperm.xlu0 %8069, %v434_v18  }
  0x43   : > { %467 = vperm.xlu1 %8070, %v8402_v19   ;;  %462 = vperm.xlu0 %8069, %v8405_v20  }
  0x47   : > { %477 = vperm.xlu1 %8070, %v8410_v21   ;;  %472 = vperm.xlu0 %8069, %v8413_v22  }
  0x4b   : > { %487 = vperm.xlu1 %8070, %v8418_v23   ;;  %482 = vperm.xlu0 %8069, %v8421_v24  }
  0x4f   : > { %497 = vperm.xlu1 %8070, %v8426_v25   ;;  %492 = vperm.xlu0 %8069, %v8429_v26  }
  0x53   : > { %507 = vperm.xlu1 %8070, %v8434_v27   ;;  %502 = vperm.xlu0 %8069, %v8437_v28  }
  0x57   : > { %517 = vperm.xlu1 %8070, %v8442_v29   ;;  %512 = vperm.xlu0 %8069, %v8445_v30  }
  0x5b   : > { %527 = vperm.xlu1 %8070, %v8450_v31   ;;  %522 = vperm.xlu0 %8069, %v8453_v32  }
  0x5f   : > { %589 = vperm.xlu1 %8070, %v567_v33   ;;  %584 = vperm.xlu0 %8069, %v566_v34  }
  0x63   : > { %599 = vperm.xlu1 %8070, %v8460_v35   ;;  %594 = vperm.xlu0 %8069, %v8463_v36  }
  0x67   : > { %609 = vperm.xlu1 %8070, %v8468_v37   ;;  %604 = vperm.xlu0 %8069, %v8471_v38  }
  0x6b   : > { %619 = vperm.xlu1 %8070, %v8476_v39   ;;  %614 = vperm.xlu0 %8069, %v8479_v40  }
  0x6f   : > { %629 = vperm.xlu1 %8070, %v8484_v41   ;;  %624 = vperm.xlu0 %8069, %v8487_v42  }
  0x73   : > { %639 = vperm.xlu1 %8070, %v8492_v43   ;;  %634 = vperm.xlu0 %8069, %v8495_v44  }
  0x77   : > { %649 = vperm.xlu1 %8070, %v8500_v45   ;;  %644 = vperm.xlu0 %8069, %v8503_v46  }
  0x7b   : > { %659 = vperm.xlu1 %8070, %v8508_v47   ;;  %654 = vperm.xlu0 %8069, %v8511_v48  }
  0x7f   : > { %722 = vperm.xlu1 %8070, %v8347_v3   ;;  %717 = vperm.xlu0 %8069, %v8342_v1   ;;  %v8580_v1 = vld [vmem:[%s8339_s10 + $0xc9] sm:$0xff] }
  0x83   : > { %732 = vperm.xlu1 %8070, %v8352_v5   ;;  %727 = vperm.xlu0 %8069, %v8355_v6  }
  0x87   : > { %742 = vperm.xlu1 %8070, %v8360_v7   ;;  %737 = vperm.xlu0 %8069, %v8363_v8  }
  0x8b   : > { %752 = vperm.xlu1 %8070, %v8368_v9   ;;  %747 = vperm.xlu0 %8069, %v8371_v10  }
  0x8f   : > { %762 = vperm.xlu1 %8070, %v8376_v11   ;;  %757 = vperm.xlu0 %8069, %v8379_v12  }
  0x93   : > { %772 = vperm.xlu1 %8070, %v8384_v13   ;;  %767 = vperm.xlu0 %8069, %v8387_v14  }
  0x97   : > { %782 = vperm.xlu1 %8070, %v8392_v15   ;;  %777 = vperm.xlu0 %8069, %v8395_v16  }
  0x9b   : > { %792 = vperm.xlu1 %8070, %v8530_v49   ;;  %787 = vperm.xlu0 %8069, %v8533_v50  }
  0x9e   : > { %v8537_v51 = vpop.permute.xlu1 %324  ;;  %v8539_v52 = vpop.permute.xlu0 %314 }
  0x9f   : > { %854 = vperm.xlu1 %8070, %v8402_v19   ;;  %849 = vperm.xlu0 %8069, %v8405_v20  }
  0xa2   : > { %v8543_v53 = vpop.permute.xlu1 %329  ;;  %v8545_v54 = vpop.permute.xlu0 %319 }
  0xa3   : > { %864 = vperm.xlu1 %8070, %v8410_v21   ;;  %859 = vperm.xlu0 %8069, %v8413_v22  }
  0xa6   : > { %v8549_v55 = vpop.permute.xlu1 %339  ;;  %v8551_v56 = vpop.permute.xlu0 %334 }
  0xa7   : > { %874 = vperm.xlu1 %8070, %v8418_v23   ;;  %869 = vperm.xlu0 %8069, %v8421_v24  }
  0xaa   : > { %v8555_v57 = vpop.permute.xlu1 %349  ;;  %v8557_v58 = vpop.permute.xlu0 %344 }
  0xab   : > { %884 = vperm.xlu1 %8070, %v8426_v25   ;;  %879 = vperm.xlu0 %8069, %v8429_v26  }
  0xae   : > { %v8561_v59 = vpop.permute.xlu1 %359  ;;  %v8563_v60 = vpop.permute.xlu0 %354 }
  0xaf   : > { %894 = vperm.xlu1 %8070, %v8434_v27   ;;  %889 = vperm.xlu0 %8069, %v8437_v28  }
  0xb2   : > { %v8567_v61 = vpop.permute.xlu1 %369  ;;  %v8569_v62 = vpop.permute.xlu0 %364 }
  0xb3   : > { %904 = vperm.xlu1 %8070, %v8442_v29   ;;  %899 = vperm.xlu0 %8069, %v8445_v30  }
  0xb6   : > { %v8573_v63 = vpop.permute.xlu1 %379  ;;  %v8575_v0 = vpop.permute.xlu0 %374 }
  0xb7   : > { %914 = vperm.xlu1 %8070, %v8450_v31   ;;  %909 = vperm.xlu0 %8069, %v8453_v32  }
  0xba   : > { %v8585_v3 = vpop.permute.xlu1 %389  ;;  %v8587_v4 = vpop.permute.xlu0 %384 }
  0xbb   : > { %924 = vperm.xlu1 %8070, %v8580_v1   ;;  %919 = vperm.xlu0 %8069, %v8583_v2  }
  0xbe   : > { %v8591_v17 = vpop.permute.xlu1 %457  ;;  %v8593_v18 = vpop.permute.xlu0 %452 }
  0xbf   : > { %13989 = vst [vmem:[#allocation7_spill] sm:$0xff] %v8591_v17  ;;  %13990 = vst [vmem:[#allocation8_spill] sm:$0xff] %v8593_v18  ;;  %986 = vperm.xlu1 %8070, %v8460_v35   ;;  %981 = vperm.xlu0 %8069, %v8463_v36  }
  0xc2   : > { %v8597_v19 = vpop.permute.xlu1 %467  ;;  %v8599_v20 = vpop.permute.xlu0 %462 }
  0xc3   : > { %13991 = vst [vmem:[#allocation9_spill] sm:$0xff] %v8597_v19  ;;  %13992 = vst [vmem:[#allocation10_spill] sm:$0xff] %v8599_v20  ;;  %996 = vperm.xlu1 %8070, %v8468_v37   ;;  %991 = vperm.xlu0 %8069, %v8471_v38  }
  0xc6   : > { %v8603_v33 = vpop.permute.xlu1 %477  ;;  %v8605_v34 = vpop.permute.xlu0 %472 }
  0xc7   : > { %13993 = vst [vmem:[#allocation11_spill] sm:$0xff] %v8603_v33  ;;  %13994 = vst [vmem:[#allocation12_spill] sm:$0xff] %v8605_v34  ;;  %1006 = vperm.xlu1 %8070, %v8476_v39   ;;  %1001 = vperm.xlu0 %8069, %v8479_v40  }
  0xca   : > { %v8609_v18 = vpop.permute.xlu1 %487  ;;  %v8611_v35 = vpop.permute.xlu0 %482 }
  0xcb   : > { %13995 = vst [vmem:[#allocation13_spill] sm:$0xff] %v8609_v18  ;;  %13996 = vst [vmem:[#allocation14_spill] sm:$0xff] %v8611_v35  ;;  %1016 = vperm.xlu1 %8070, %v8484_v41   ;;  %1011 = vperm.xlu0 %8069, %v8487_v42  }
  0xce   : > { %v8615_v36 = vpop.permute.xlu1 %497  ;;  %v8617_v20 = vpop.permute.xlu0 %492 }
  0xcf   : > { %13997 = vst [vmem:[#allocation15_spill] sm:$0xff] %v8615_v36  ;;  %13998 = vst [vmem:[#allocation16_spill] sm:$0xff] %v8617_v20  ;;  %1026 = vperm.xlu1 %8070, %v8492_v43   ;;  %1021 = vperm.xlu0 %8069, %v8495_v44   ;;  %v8634_v20 = vld [vmem:[%s8339_s10 + $0xca] sm:$0xff]  ;;  %v8637_v36 = vld [vmem:[%s8339_s10 + $0xc2] sm:$0xff] }
  0xd2   : > { %v8621_v34 = vpop.permute.xlu1 %507  ;;  %v8623_v33 = vpop.permute.xlu0 %502 }
  0xd3   : > { %13999 = vst [vmem:[#allocation17_spill] sm:$0xff] %v8621_v34  ;;  %14000 = vst [vmem:[#allocation18_spill] sm:$0xff] %v8623_v33  ;;  %1036 = vperm.xlu1 %8070, %v8500_v45   ;;  %1031 = vperm.xlu0 %8069, %v8503_v46  }
  0xd6   : > { %v8627_v35 = vpop.permute.xlu1 %517  ;;  %v8629_v18 = vpop.permute.xlu0 %512 }
  0xd7   : > { %14001 = vst [vmem:[#allocation19_spill] sm:$0xff] %v8627_v35  ;;  %14002 = vst [vmem:[#allocation20_spill] sm:$0xff] %v8629_v18  ;;  %1046 = vperm.xlu1 %8070, %v8508_v47   ;;  %1041 = vperm.xlu0 %8069, %v8511_v48  }
  0xda   : > { %v8639_v19 = vpop.permute.xlu1 %527  ;;  %v8641_v34 = vpop.permute.xlu0 %522 }
  0xdb   : > { %14003 = vst [vmem:[#allocation21_spill] sm:$0xff] %v8639_v19  ;;  %14004 = vst [vmem:[#allocation22_spill] sm:$0xff] %v8641_v34  ;;  %1056 = vperm.xlu1 %8070, %v8634_v20   ;;  %1051 = vperm.xlu0 %8069, %v8637_v36  }
  0xde   : > { %v8645_v33 = vpop.permute.xlu1 %589  ;;  %v8647_v35 = vpop.permute.xlu0 %584 }
  0xdf   : > { %14005 = vst [vmem:[#allocation23_spill] sm:$0xff] %v8647_v35  ;;  %1119 = vperm.xlu1 %8070, %v8352_v5   ;;  %1114 = vperm.xlu0 %8069, %v8355_v6  }
  0xe2   : > { %v8651_v18 = vpop.permute.xlu1 %599  ;;  %v8653_v17 = vpop.permute.xlu0 %594 }
  0xe3   : > { %1129 = vperm.xlu1 %8070, %v8360_v7   ;;  %1124 = vperm.xlu0 %8069, %v8363_v8  }
  0xe6   : > { %v8657_v34 = vpop.permute.xlu1 %609  ;;  %v8659_v19 = vpop.permute.xlu0 %604 }
  0xe7   : > { %1139 = vperm.xlu1 %8070, %v8368_v9   ;;  %1134 = vperm.xlu0 %8069, %v8371_v10  }
  0xea   : > { %v8663_v35 = vpop.permute.xlu1 %619  ;;  %v8665_v5 = vpop.permute.xlu0 %614 }
  0xeb   : > { %1149 = vperm.xlu1 %8070, %v8376_v11   ;;  %1144 = vperm.xlu0 %8069, %v8379_v12   ;;  %v8688_v12 = vld [vmem:[%s8339_s10 + $0xe0] sm:$0xff] }
  0xec   : > { %14009 = vst [vmem:[#allocation27_spill] sm:$0xff] %v8688_v12 }
  0xee   : > { %v8669_v6 = vpop.permute.xlu1 %629  ;;  %v8671_v7 = vpop.permute.xlu0 %624 }
  0xef   : > { %1159 = vperm.xlu1 %8070, %v8384_v13   ;;  %1154 = vperm.xlu0 %8069, %v8387_v14   ;;  %v8691_v13 = vld [vmem:[%s8339_s10 + $0xd8] sm:$0xff] }
  0xf0   : > { %14010 = vst [vmem:[#allocation28_spill] sm:$0xff] %v8691_v13 }
  0xf2   : > { %v8675_v8 = vpop.permute.xlu1 %639  ;;  %v8677_v9 = vpop.permute.xlu0 %634 }
  0xf3   : > { %14006 = vst [vmem:[#allocation24_spill] sm:$0xff] %v8675_v8  ;;  %1169 = vperm.xlu1 %8070, %v8392_v15   ;;  %1164 = vperm.xlu0 %8069, %v8395_v16  }
  0xf6   : > { %v8681_v10 = vpop.permute.xlu1 %649  ;;  %v8683_v11 = vpop.permute.xlu0 %644 }
  0xf7   : > { %14007 = vst [vmem:[#allocation25_spill] sm:$0xff] %v8681_v10  ;;  %14008 = vst [vmem:[#allocation26_spill] sm:$0xff] %v8683_v11  ;;  %1179 = vperm.xlu1 %8070, %v8530_v49   ;;  %1174 = vperm.xlu0 %8069, %v8533_v50  }
  0xfa   : > { %v8693_v14 = vpop.permute.xlu1 %659  ;;  %v8695_v8 = vpop.permute.xlu0 %654 }
  0xfb   : > { %14011 = vst [vmem:[#allocation29_spill] sm:$0xff] %v8693_v14  ;;  %14012 = vst [vmem:[#allocation30_spill] sm:$0xff] %v8695_v8  ;;  %1189 = vperm.xlu1 %8070, %v8688_v12   ;;  %1184 = vperm.xlu0 %8069, %v8691_v13  }
  0xfe   : > { %v8699_v15 = vpop.permute.xlu1 %722  ;;  %v8701_v16 = vpop.permute.xlu0 %717 }
  0xff   : > { %14013 = vst [vmem:[#allocation31_spill] sm:$0xff] %v8701_v16  ;;  %1251 = vperm.xlu1 %8070, %v8410_v21   ;;  %1246 = vperm.xlu0 %8069, %v8413_v22  }
 0x102   : > { %v8705_v11 = vpop.permute.xlu1 %732  ;;  %v8707_v10 = vpop.permute.xlu0 %727 }
 0x103   : > { %1261 = vperm.xlu1 %8070, %v8418_v23   ;;  %1256 = vperm.xlu0 %8069, %v8421_v24  }
 0x106   : > { %v8711_v8 = vpop.permute.xlu1 %742  ;;  %v8713_v14 = vpop.permute.xlu0 %737 }
 0x107   : > { %1271 = vperm.xlu1 %8070, %v8426_v25   ;;  %1266 = vperm.xlu0 %8069, %v8429_v26  }
 0x10a   : > { %v8717_v16 = vpop.permute.xlu1 %752  ;;  %v8719_v21 = vpop.permute.xlu0 %747 }
 0x10b   : > { %14014 = vst [vmem:[#allocation32_spill] sm:$0xff] %v8717_v16  ;;  %14015 = vst [vmem:[#allocation33_spill] sm:$0xff] %v8719_v21  ;;  %1281 = vperm.xlu1 %8070, %v8434_v27   ;;  %1276 = vperm.xlu0 %8069, %v8437_v28   ;;  %v8742_v28 = vld [vmem:[%s8339_s10 + $0xe1] sm:$0xff] }
 0x10e   : > { %v8723_v22 = vpop.permute.xlu1 %762  ;;  %v8725_v23 = vpop.permute.xlu0 %757 }
 0x10f   : > { %14016 = vst [vmem:[#allocation34_spill] sm:$0xff] %v8723_v22  ;;  %14017 = vst [vmem:[#allocation35_spill] sm:$0xff] %v8725_v23  ;;  %1291 = vperm.xlu1 %8070, %v8442_v29   ;;  %1286 = vperm.xlu0 %8069, %v8445_v30   ;;  %v8745_v29 = vld [vmem:[%s8339_s10 + $0xd9] sm:$0xff] }
 0x112   : > { %v8729_v24 = vpop.permute.xlu1 %772  ;;  %v8731_v25 = vpop.permute.xlu0 %767 }
 0x113   : > { %14018 = vst [vmem:[#allocation36_spill] sm:$0xff] %v8729_v24  ;;  %14019 = vst [vmem:[#allocation37_spill] sm:$0xff] %v8731_v25  ;;  %1301 = vperm.xlu1 %8070, %v8450_v31   ;;  %1296 = vperm.xlu0 %8069, %v8453_v32   ;;  %v14103_v25 = vld [vmem:[#allocation18_spill] sm:$0xff] }
 0x116   : > { %v8735_v26 = vpop.permute.xlu1 %782  ;;  %v8737_v27 = vpop.permute.xlu0 %777 }
 0x117   : > { %14020 = vst [vmem:[#allocation38_spill] sm:$0xff] %v8735_v26  ;;  %14021 = vst [vmem:[#allocation39_spill] sm:$0xff] %v8737_v27  ;;  %1311 = vperm.xlu1 %8070, %v8580_v1   ;;  %1306 = vperm.xlu0 %8069, %v8583_v2   ;;  %v8250_v27 = vmov 0.0  }
 0x118   : > { %251 = vst.msk [vmem:[#allocation2] sm:$0xff] %vm250_vm0, %v8250_v27  ;;  %252 = vst.msk [vmem:[#allocation2 + $0x8] sm:$0xff] %vm250_vm0, %v8250_v27 }
 0x119   : > { %256 = vst.msk [vmem:[#allocation2 + $0x198] sm:$0xff] %vm250_vm0, %v8250_v27  ;;  %257 = vst.msk [vmem:[#allocation2 + $0x1a0] sm:$0xff] %vm250_vm0, %v8250_v27 }
 0x11a   : > { %v8747_v30 = vpop.permute.xlu1 %792  ;;  %v8749_v24 = vpop.permute.xlu0 %787  ;;  %260 = vst.msk [vmem:[#allocation2] sm:$0x1] %vm259_vm1, %v8250_v27  ;;  %261 = vst.msk [vmem:[#allocation2 + $0x18] sm:$0x1] %vm259_vm1, %v8250_v27 }
 0x11b   : > { %14022 = vst [vmem:[#allocation40_spill] sm:$0xff] %v8747_v30  ;;  %14023 = vst [vmem:[#allocation41_spill] sm:$0xff] %v8749_v24  ;;  %1321 = vperm.xlu1 %8070, %v8742_v28   ;;  %1316 = vperm.xlu0 %8069, %v8745_v29   ;;  %v14100_v24 = vld [vmem:[#allocation15_spill] sm:$0xff] }
 0x11c   : > { %262 = vst.msk [vmem:[#allocation2 + $0x30] sm:$0x1] %vm259_vm1, %v8250_v27  ;;  %263 = vst.msk [vmem:[#allocation2 + $0x48] sm:$0x1] %vm259_vm1, %v8250_v27  ;;  %v9038_v30 = vld [vmem:[%s8339_s10 + $0x171] sm:$0xff] }
 0x11d   : > { %264 = vst.msk [vmem:[#allocation2 + $0x60] sm:$0x1] %vm259_vm1, %v8250_v27  ;;  %265 = vst.msk [vmem:[#allocation2 + $0x78] sm:$0x1] %vm259_vm1, %v8250_v27 }
 0x11e   : > { %v8753_v31 = vpop.permute.xlu1 %854  ;;  %v8755_v32 = vpop.permute.xlu0 %849  ;;  %266 = vst.msk [vmem:[#allocation2 + $0x90] sm:$0x1] %vm259_vm1, %v8250_v27  ;;  %267 = vst.msk [vmem:[#allocation2 + $0xa8] sm:$0x1] %vm259_vm1, %v8250_v27 }
 0x11f   : > { %14024 = vst [vmem:[#allocation42_spill] sm:$0xff] %v8753_v31  ;;  %14025 = vst [vmem:[#allocation43_spill] sm:$0xff] %v8755_v32  ;;  %1383 = vperm.xlu1 %8070, %v8468_v37   ;;  %1378 = vperm.xlu0 %8069, %v8471_v38  }
 0x120   : > { %268 = vst.msk [vmem:[#allocation2 + $0xc0] sm:$0x1] %vm259_vm1, %v8250_v27  ;;  %269 = vst.msk [vmem:[#allocation2 + $0xd8] sm:$0x1] %vm259_vm1, %v8250_v27 }
 0x121   : > { %270 = vst.msk [vmem:[#allocation2 + $0xf0] sm:$0x1] %vm259_vm1, %v8250_v27  ;;  %271 = vst.msk [vmem:[#allocation2 + $0x108] sm:$0x1] %vm259_vm1, %v8250_v27 }
 0x122   : > { %272 = vst.msk [vmem:[#allocation2 + $0x120] sm:$0x1] %vm259_vm1, %v8250_v27  ;;  %273 = vst.msk [vmem:[#allocation2 + $0x138] sm:$0x1] %vm259_vm1, %v8250_v27  ;;  %v8797_v37 = vpop.permute.xlu1 %864  ;;  %v8799_v38 = vpop.permute.xlu0 %859 }
 0x123   : > { %274 = vst.msk [vmem:[#allocation2 + $0x150] sm:$0x1] %vm259_vm1, %v8250_v27  ;;  %275 = vst.msk [vmem:[#allocation2 + $0x168] sm:$0x1] %vm259_vm1, %v8250_v27  ;;  %1393 = vperm.xlu1 %8070, %v8476_v39   ;;  %1388 = vperm.xlu0 %8069, %v8479_v40  }
 0x124   : > { %276 = vst.msk [vmem:[#allocation2 + $0x180] sm:$0x1] %vm259_vm1, %v8250_v27  ;;  %279 = vst.msk [vmem:[#allocation2 + $0x29] sm:$0x1] %vm259_vm1, %v8250_v27 }
 0x125   : > { %280 = vst.msk [vmem:[#allocation2 + $0x41] sm:$0x1] %vm259_vm1, %v8250_v27  ;;  %281 = vst.msk [vmem:[#allocation2 + $0x59] sm:$0x1] %vm259_vm1, %v8250_v27 }
 0x126   : > { %282 = vst.msk [vmem:[#allocation2 + $0x71] sm:$0x1] %vm259_vm1, %v8250_v27  ;;  %283 = vst.msk [vmem:[#allocation2 + $0x89] sm:$0x1] %vm259_vm1, %v8250_v27  ;;  %v8805_v32 = vpop.permute.xlu1 %874  ;;  %v8807_v31 = vpop.permute.xlu0 %869 }
 0x127   : > { %284 = vst.msk [vmem:[#allocation2 + $0xa1] sm:$0x1] %vm259_vm1, %v8250_v27  ;;  %285 = vst.msk [vmem:[#allocation2 + $0xb9] sm:$0x1] %vm259_vm1, %v8250_v27  ;;  %1403 = vperm.xlu1 %8070, %v8484_v41   ;;  %1398 = vperm.xlu0 %8069, %v8487_v42  }
 0x128   : > { %286 = vst.msk [vmem:[#allocation2 + $0xd1] sm:$0x1] %vm259_vm1, %v8250_v27  ;;  %287 = vst.msk [vmem:[#allocation2 + $0xe9] sm:$0x1] %vm259_vm1, %v8250_v27 }
 0x129   : > { %288 = vst.msk [vmem:[#allocation2 + $0x101] sm:$0x1] %vm259_vm1, %v8250_v27  ;;  %289 = vst.msk [vmem:[#allocation2 + $0x119] sm:$0x1] %vm259_vm1, %v8250_v27 }
 0x12a   : > { %290 = vst.msk [vmem:[#allocation2 + $0x131] sm:$0x1] %vm259_vm1, %v8250_v27  ;;  %291 = vst.msk [vmem:[#allocation2 + $0x149] sm:$0x1] %vm259_vm1, %v8250_v27 }
 0x12b   : > { %292 = vst.msk [vmem:[#allocation2 + $0x161] sm:$0x1] %vm259_vm1, %v8250_v27  ;;  %293 = vst.msk [vmem:[#allocation2 + $0x179] sm:$0x1] %vm259_vm1, %v8250_v27  ;;  %1413 = vperm.xlu1 %8070, %v8492_v43   ;;  %1408 = vperm.xlu0 %8069, %v8495_v44   ;;  %v8836_v44 = vld [vmem:[%s8339_s10 + $0xe2] sm:$0xff] }
 0x12c   : > { %294 = vst.msk [vmem:[#allocation2 + $0x191] sm:$0x1] %vm259_vm1, %v8250_v27  ;;  %277 = vst.msk [vmem:[#allocation2 + $0x198] sm:$0x1] %vm259_vm1, %v8250_v27 }
 0x12d   : > { %14026 = vst [vmem:[#allocation44_spill] sm:$0xff] %v8797_v37  ;;  %14027 = vst [vmem:[#allocation45_spill] sm:$0xff] %v8799_v38  ;;  %v8811_v37 = vpop.permute.xlu1 %884  ;;  %v8813_v38 = vpop.permute.xlu0 %879 }
 0x12e   : > { %254 = vst.msk [vmem:[#allocation2 + $0x10] sm:$0x3] %vm253_vm2, %v8250_v27  ;;  %258 = vst.msk [vmem:[#allocation2 + $0x1a8] sm:$0x3] %vm253_vm2, %v8250_v27 }
 0x12f   : > { %278 = vst.msk [vmem:[#allocation2 + $0x11] sm:$0x1] %vm259_vm1, %v8250_v27  ;;  %295 = vst.msk [vmem:[#allocation2 + $0x1a9] sm:$0x1] %vm259_vm1, %v8250_v27  ;;  %1423 = vperm.xlu1 %8070, %v8500_v45   ;;  %1418 = vperm.xlu0 %8069, %v8503_v46   ;;  %v8839_v45 = vld [vmem:[%s8339_s10 + $0xda] sm:$0xff] }
 0x130   : > { %14028 = vst [vmem:[#allocation46_spill] sm:$0xff] %v8805_v32  ;;  %14029 = vst [vmem:[#allocation47_spill] sm:$0xff] %v8807_v31  ;;  %v14096_v31 = vld [vmem:[#allocation11_spill] sm:$0xff] }
 0x131   : > { %14030 = vst [vmem:[#allocation48_spill] sm:$0xff] %v8811_v37  ;;  %14031 = vst [vmem:[#allocation49_spill] sm:$0xff] %v8813_v38  ;;  %v8817_v39 = vpop.permute.xlu1 %894  ;;  %v8819_v40 = vpop.permute.xlu0 %889 }
 0x132   : > { %14032 = vst [vmem:[#allocation50_spill] sm:$0xff] %v8817_v39  ;;  %14033 = vst [vmem:[#allocation51_spill] sm:$0xff] %v8819_v40 }
 0x133   : > { %1433 = vperm.xlu1 %8070, %v8508_v47   ;;  %1428 = vperm.xlu0 %8069, %v8511_v48  }
 0x135   : > { %v8823_v41 = vpop.permute.xlu1 %904  ;;  %v8825_v42 = vpop.permute.xlu0 %899 }
 0x136   : > { %14034 = vst [vmem:[#allocation52_spill] sm:$0xff] %v8823_v41  ;;  %14035 = vst [vmem:[#allocation53_spill] sm:$0xff] %v8825_v42 }
 0x137   : > { %1443 = vperm.xlu1 %8070, %v8634_v20   ;;  %1438 = vperm.xlu0 %8069, %v8637_v36  }
 0x139   : > { %v8829_v27 = vpop.permute.xlu1 %914  ;;  %v8831_v43 = vpop.permute.xlu0 %909 }
 0x13a   : > { %14036 = vst [vmem:[#allocation54_spill] sm:$0xff] %v8829_v27  ;;  %14037 = vst [vmem:[#allocation55_spill] sm:$0xff] %v8831_v43  ;;  %v8863_v27 = vld [vmem:[%s8339_s10 + $0xf0] sm:$0xff] }
 0x13b   : > { %1453 = vperm.xlu1 %8070, %v8836_v44   ;;  %1448 = vperm.xlu0 %8069, %v8839_v45   ;;  %14045 = vst [vmem:[#allocation63_spill] sm:$0xff] %v8863_v27 }
 0x13d   : > { %v8841_v46 = vpop.permute.xlu1 %924  ;;  %v8843_v42 = vpop.permute.xlu0 %919 }
 0x13e   : > { %14038 = vst [vmem:[#allocation56_spill] sm:$0xff] %v8841_v46  ;;  %14039 = vst [vmem:[#allocation57_spill] sm:$0xff] %v8843_v42  ;;  %v8860_v42 = vld [vmem:[%s8339_s10 + $0xf8] sm:$0xff] }
 0x13f   : > { %1533 = vperm.xlu1 %8070, %v8530_v49   ;;  %1528 = vperm.xlu0 %8069, %v8533_v50   ;;  %14044 = vst [vmem:[#allocation62_spill] sm:$0xff] %v8860_v42  ;;  %v8872_v50 = vld [vmem:[%s8339_s10 + $0x110] sm:$0xff] }
 0x140   : > { %14048 = vst [vmem:[#allocation66_spill] sm:$0xff] %v8872_v50 }
 0x141   : > { %v8847_v47 = vpop.permute.xlu1 %986  ;;  %v8849_v48 = vpop.permute.xlu0 %981 }
 0x142   : > { %14040 = vst [vmem:[#allocation58_spill] sm:$0xff] %v8847_v47  ;;  %14041 = vst [vmem:[#allocation59_spill] sm:$0xff] %v8849_v48  ;;  %v8996_v48 = vld [vmem:[%s8339_s10 + $0x141] sm:$0xff] }
 0x143   : > { %1543 = vperm.xlu1 %8070, %v8688_v12   ;;  %1538 = vperm.xlu0 %8069, %v8691_v13   ;;  %14084 = vst [vmem:[#allocation102_spill] sm:$0xff] %v8996_v48 }
 0x145   : > { %v8853_v43 = vpop.permute.xlu1 %996  ;;  %v8855_v46 = vpop.permute.xlu0 %991 }
 0x146   : > { %14042 = vst [vmem:[#allocation60_spill] sm:$0xff] %v8853_v43  ;;  %14043 = vst [vmem:[#allocation61_spill] sm:$0xff] %v8855_v46  ;;  %v8875_v46 = vld [vmem:[%s8339_s10 + $0x108] sm:$0xff] }
 0x147   : > { %1553 = vperm.xlu1 %8070, %v8860_v42   ;;  %1548 = vperm.xlu0 %8069, %v8863_v27   ;;  %14049 = vst [vmem:[#allocation67_spill] sm:$0xff] %v8875_v46 }
 0x149   : > { %v8865_v47 = vpop.permute.xlu1 %1006  ;;  %v8867_v49 = vpop.permute.xlu0 %1001 }
 0x14a   : > { %14046 = vst [vmem:[#allocation64_spill] sm:$0xff] %v8865_v47  ;;  %14047 = vst [vmem:[#allocation65_spill] sm:$0xff] %v8867_v49  ;;  %v8884_v49 = vld [vmem:[%s8339_s10 + $0x128] sm:$0xff]  ;;  %v8887_v47 = vld [vmem:[%s8339_s10 + $0x120] sm:$0xff] }
 0x14b   : > { %1563 = vperm.xlu1 %8070, %v8872_v50   ;;  %1558 = vperm.xlu0 %8069, %v8875_v46   ;;  %14052 = vst [vmem:[#allocation70_spill] sm:$0xff] %v8884_v49  ;;  %14053 = vst [vmem:[#allocation71_spill] sm:$0xff] %v8887_v47 }
 0x14d   : > { %v8877_v12 = vpop.permute.xlu1 %1016  ;;  %v8879_v13 = vpop.permute.xlu0 %1011 }
 0x14e   : > { %14050 = vst [vmem:[#allocation68_spill] sm:$0xff] %v8877_v12  ;;  %14051 = vst [vmem:[#allocation69_spill] sm:$0xff] %v8879_v13  ;;  %v8896_v13 = vld [vmem:[%s8339_s10 + $0x140] sm:$0xff]  ;;  %v8899_v12 = vld [vmem:[%s8339_s10 + $0x138] sm:$0xff] }
 0x14f   : > { %1573 = vperm.xlu1 %8070, %v8884_v49   ;;  %1568 = vperm.xlu0 %8069, %v8887_v47   ;;  %14056 = vst [vmem:[#allocation74_spill] sm:$0xff] %v8896_v13  ;;  %14057 = vst [vmem:[#allocation75_spill] sm:$0xff] %v8899_v12  ;;  %v8920_v47 = vld [vmem:[%s8339_s10 + $0x170] sm:$0xff] }
 0x150   : > { %14064 = vst [vmem:[#allocation82_spill] sm:$0xff] %v8920_v47 }
 0x151   : > { %v8889_v42 = vpop.permute.xlu1 %1026  ;;  %v8891_v27 = vpop.permute.xlu0 %1021 }
 0x152   : > { %14054 = vst [vmem:[#allocation72_spill] sm:$0xff] %v8889_v42  ;;  %14055 = vst [vmem:[#allocation73_spill] sm:$0xff] %v8891_v27  ;;  %v8908_v42 = vld [vmem:[%s8339_s10 + $0x158] sm:$0xff]  ;;  %v8911_v27 = vld [vmem:[%s8339_s10 + $0x150] sm:$0xff] }
 0x153   : > { %1583 = vperm.xlu1 %8070, %v8896_v13   ;;  %1578 = vperm.xlu0 %8069, %v8899_v12   ;;  %14060 = vst [vmem:[#allocation78_spill] sm:$0xff] %v8908_v42  ;;  %14061 = vst [vmem:[#allocation79_spill] sm:$0xff] %v8911_v27 }
 0x155   : > { %v8901_v50 = vpop.permute.xlu1 %1036  ;;  %v8903_v46 = vpop.permute.xlu0 %1031 }
 0x156   : > { %14058 = vst [vmem:[#allocation76_spill] sm:$0xff] %v8901_v50  ;;  %14059 = vst [vmem:[#allocation77_spill] sm:$0xff] %v8903_v46  ;;  %v8923_v46 = vld [vmem:[%s8339_s10 + $0x168] sm:$0xff] }
 0x157   : > { %1593 = vperm.xlu1 %8070, %v8908_v42   ;;  %1588 = vperm.xlu0 %8069, %v8911_v27   ;;  %14065 = vst [vmem:[#allocation83_spill] sm:$0xff] %v8923_v46 }
 0x159   : > { %v8913_v43 = vpop.permute.xlu1 %1046  ;;  %v8915_v49 = vpop.permute.xlu0 %1041 }
 0x15a   : > { %14062 = vst [vmem:[#allocation80_spill] sm:$0xff] %v8913_v43  ;;  %14063 = vst [vmem:[#allocation81_spill] sm:$0xff] %v8915_v49 }
 0x15b   : > { %1603 = vperm.xlu1 %8070, %v8920_v47   ;;  %1598 = vperm.xlu0 %8069, %v8923_v46   ;;  %v8944_v47 = vld [vmem:[%s8339_s10 + $0xf9] sm:$0xff]  ;;  %v8947_v46 = vld [vmem:[%s8339_s10 + $0xf1] sm:$0xff] }
 0x15c   : > { %14072 = vst [vmem:[#allocation90_spill] sm:$0xff] %v8944_v47  ;;  %14073 = vst [vmem:[#allocation91_spill] sm:$0xff] %v8947_v46 }
 0x15d   : > { %v8925_v13 = vpop.permute.xlu1 %1056  ;;  %v8927_v12 = vpop.permute.xlu0 %1051 }
 0x15e   : > { %14066 = vst [vmem:[#allocation84_spill] sm:$0xff] %v8925_v13  ;;  %14067 = vst [vmem:[#allocation85_spill] sm:$0xff] %v8927_v12 }
 0x15f   : > { %1661 = vperm.xlu1 %8070, %v8580_v1   ;;  %1656 = vperm.xlu0 %8069, %v8583_v2   ;;  %v8956_v1 = vld [vmem:[%s8339_s10 + $0x111] sm:$0xff]  ;;  %v8959_v2 = vld [vmem:[%s8339_s10 + $0x109] sm:$0xff] }
 0x160   : > { %14076 = vst [vmem:[#allocation94_spill] sm:$0xff] %v8956_v1  ;;  %14077 = vst [vmem:[#allocation95_spill] sm:$0xff] %v8959_v2 }
 0x161   : > { %v8931_v49 = vpop.permute.xlu1 %1119  ;;  %v8933_v42 = vpop.permute.xlu0 %1114 }
 0x162   : > { %14068 = vst [vmem:[#allocation86_spill] sm:$0xff] %v8931_v49  ;;  %14069 = vst [vmem:[#allocation87_spill] sm:$0xff] %v8933_v42 }
 0x163   : > { %1671 = vperm.xlu1 %8070, %v8742_v28   ;;  %1666 = vperm.xlu0 %8069, %v8745_v29   ;;  %v7468_v28 = vld [vmem:[%s13887_s1] ss:$0 sm:$0xff] }
 0x164   : > { %v403_v42 = vmul.f32 %v7468_v28, %v8555_v57  ;;  %v406_v57 = vmul.f32 %v7468_v28, %v8569_v62  ;;  %v410_v62 = vmul.f32 %v7468_v28, %v8587_v4 }
 0x165   : > { %v8937_v27 = vpop.permute.xlu1 %1129  ;;  %v8939_v43 = vpop.permute.xlu0 %1124 }
 0x166   : > { %14070 = vst [vmem:[#allocation88_spill] sm:$0xff] %v8937_v27  ;;  %14071 = vst [vmem:[#allocation89_spill] sm:$0xff] %v8939_v43  ;;  %v7469_v43 = vld [vmem:[%s13888_s2] ss:$0 sm:$0xff]  ;;  %v400_v27 = vmul.f32 %v7468_v28, %v8551_v56  ;;  %v407_v56 = vmul.f32 %v7468_v28, %v8567_v61 }
 0x167   : > { %1681 = vperm.xlu1 %8070, %v8944_v47   ;;  %1676 = vperm.xlu0 %8069, %v8947_v46   ;;  %v396_v46 = vmul.f32 %v7468_v28, %v8539_v52  ;;  %v8973_v47 = vld [vmem:[%s8339_s10 + $0x129] sm:$0xff]  ;;  %v428_v38 = vadd.f32 %v7469_v43, %v406_v57 }
 0x168   : > { %14080 = vst [vmem:[#allocation98_spill] sm:$0xff] %v8973_v47  ;;  %v422_v61 = vadd.f32 %v7469_v43, %v400_v27 }
 0x169   : > { %v8949_v12 = vpop.permute.xlu1 %1139  ;;  %v8951_v13 = vpop.permute.xlu0 %1134  ;;  %v418_v49 = vadd.f32 %v7469_v43, %v396_v46  ;;  %v7470_v46 = vld [vmem:[%s13887_s1 + $0x1] ss:$0 sm:$0xff] }
 0x16a   : > { %14074 = vst [vmem:[#allocation92_spill] sm:$0xff] %v8949_v12  ;;  %14075 = vst [vmem:[#allocation93_spill] sm:$0xff] %v8951_v13  ;;  %v398_v12 = vmul.f32 %v7468_v28, %v8537_v51  ;;  %v8976_v13 = vld [vmem:[%s8339_s10 + $0x121] sm:$0xff]  ;;  %v397_v51 = vmul.f32 %v7468_v28, %v8545_v54  ;;  %v405_v54 = vmul.f32 %v7468_v28, %v8561_v59 }
 0x16b   : > { %1691 = vperm.xlu1 %8070, %v8956_v1   ;;  %1686 = vperm.xlu0 %8069, %v8959_v2   ;;  %14081 = vst [vmem:[#allocation99_spill] sm:$0xff] %v8976_v13  ;;  %v401_v1 = vmul.f32 %v7468_v28, %v8549_v55  ;;  %v404_v55 = vmul.f32 %v7468_v28, %v8563_v60 }
 0x16c   : > { %v420_v52 = vadd.f32 %v7469_v43, %v398_v12  ;;  %v409_v59 = vmul.f32 %v7468_v28, %v8573_v63  ;;  %v408_v60 = vmul.f32 %v7468_v28, %v8575_v0  ;;  %v427_v41 = vadd.f32 %v7469_v43, %v405_v54  ;;  %v14088_v63 = vld [vmem:[#allocation7_spill] sm:$0xff]  ;;  %v9018_v0 = vld [vmem:[%s8339_s10 + $0x159] sm:$0xff] }
 0x16d   : > { %v8964_v29 = vpop.permute.xlu1 %1149  ;;  %v8966_v50 = vpop.permute.xlu0 %1144  ;;  %v426_v40 = vadd.f32 %v7469_v43, %v404_v55  ;;  %v535_v39 = vmul.f32 %v7470_v46, %v14088_v63  ;;  %14089 = vst [vmem:[#allocation7_spill] sm:$0xff] %v9018_v0  ;;  %v539_v32 = vmul.f32 %v7470_v46, %v14096_v31  ;;  %v14101_v31 = vld [vmem:[#allocation16_spill] sm:$0xff] }
 0x16e   : > { %14078 = vst [vmem:[#allocation96_spill] sm:$0xff] %v8964_v29  ;;  %14079 = vst [vmem:[#allocation97_spill] sm:$0xff] %v8966_v50  ;;  %v399_v50 = vmul.f32 %v7468_v28, %v8543_v53  ;;  %v402_v53 = vmul.f32 %v7468_v28, %v8557_v58  ;;  %v423_v58 = vadd.f32 %v7469_v43, %v401_v1 }
 0x16f   : > { %1701 = vperm.xlu1 %8070, %v8973_v47   ;;  %1696 = vperm.xlu0 %8069, %v8976_v13   ;;  %v411_v13 = vmul.f32 %v7468_v28, %v8585_v3  ;;  %v9021_v3 = vld [vmem:[%s8339_s10 + $0x151] sm:$0xff]  ;;  %v431_v4 = vadd.f32 %v7469_v43, %v409_v59  ;;  %v430_v28 = vadd.f32 %v7469_v43, %v408_v60  ;;  %v14098_v59 = vld [vmem:[#allocation13_spill] sm:$0xff]  ;;  %v14099_v60 = vld [vmem:[#allocation14_spill] sm:$0xff] }
 0x170   : > { %v421_v12 = vadd.f32 %v7469_v43, %v399_v50  ;;  %v424_v1 = vadd.f32 %v7469_v43, %v402_v53  ;;  %14090 = vst [vmem:[#allocation106_spill] sm:$0xff] %v9021_v3  ;;  %v14093_v53 = vld [vmem:[#allocation10_spill] sm:$0xff] }
 0x171   : > { %v8984_v29 = vpop.permute.xlu1 %1159  ;;  %v8986_v2 = vpop.permute.xlu0 %1154  ;;  %v536_v54 = vmul.f32 %v7470_v46, %v14093_v53  ;;  %v543_v53 = vmul.f32 %v7470_v46, %v14100_v24  ;;  %v7471_v24 = vld [vmem:[%s13887_s1 + $0x2] ss:$0 sm:$0xff] }
 0x172   : > { %14082 = vst [vmem:[#allocation100_spill] sm:$0xff] %v8984_v29  ;;  %14083 = vst [vmem:[#allocation101_spill] sm:$0xff] %v8986_v2  ;;  %v8999_v29 = vld [vmem:[%s8339_s10 + $0x139] sm:$0xff]  ;;  %v419_v2 = vadd.f32 %v7469_v43, %v397_v51  ;;  %v425_v51 = vadd.f32 %v7469_v43, %v403_v42  ;;  %v667_v21 = vmul.f32 %v7471_v24, %v8645_v33 }
 0x173   : > { %14085 = vst [vmem:[#allocation103_spill] sm:$0xff] %v8999_v29  ;;  %1711 = vperm.xlu1 %8070, %v8996_v48   ;;  %1706 = vperm.xlu0 %8069, %v8999_v29   ;;  %v14092_v42 = vld [vmem:[#allocation9_spill] sm:$0xff]  ;;  %v433_v29 = vadd.f32 %v7469_v43, %v411_v13  ;;  %v432_v48 = vadd.f32 %v7469_v43, %v410_v62 }
 0x174   : > { %v537_v37 = vmul.f32 %v7470_v46, %v14092_v42  ;;  %v541_v42 = vmul.f32 %v7470_v46, %v14098_v59  ;;  %v540_v13 = vmul.f32 %v7470_v46, %v14099_v60  ;;  %v14105_v59 = vld [vmem:[#allocation20_spill] sm:$0xff] }
 0x175   : > { %v9009_v47 = vpop.permute.xlu1 %1169  ;;  %v9011_v50 = vpop.permute.xlu0 %1164  ;;  %v546_v23 = vmul.f32 %v7470_v46, %v14105_v59 }
 0x176   : > { %14086 = vst [vmem:[#allocation104_spill] sm:$0xff] %v9009_v47  ;;  %14087 = vst [vmem:[#allocation105_spill] sm:$0xff] %v9011_v50  ;;  %v429_v47 = vadd.f32 %v7469_v43, %v407_v56  ;;  %v14091_v50 = vld [vmem:[#allocation8_spill] sm:$0xff]  ;;  %v553_v62 = vadd.f32 %v537_v37, %v421_v12  ;;  %v555_v37 = vadd.f32 %v539_v32, %v423_v58  ;;  %v14108_v12 = vld [vmem:[#allocation21_spill] sm:$0xff] }
 0x177   : > { %v534_v27 = vmul.f32 %v7470_v46, %v14091_v50  ;;  %v14097_v56 = vld [vmem:[#allocation12_spill] sm:$0xff]  ;;  %1721 = vperm.xlu1 %8070, %v9018_v0   ;;  %1716 = vperm.xlu0 %8069, %v9021_v3   ;;  %v551_v50 = vadd.f32 %v535_v39, %v419_v2  ;;  %v552_v0 = vadd.f32 %v536_v54, %v420_v52  ;;  %v14104_v39 = vld [vmem:[#allocation19_spill] sm:$0xff] }
 0x178   : > { %v538_v57 = vmul.f32 %v7470_v46, %v14097_v56  ;;  %v14102_v56 = vld [vmem:[#allocation17_spill] sm:$0xff]  ;;  %v544_v3 = vmul.f32 %v7470_v46, %v14103_v25  ;;  %v547_v2 = vmul.f32 %v7470_v46, %v14104_v39  ;;  %v557_v25 = vadd.f32 %v541_v42, %v425_v51  ;;  %v9093_v42 = vld [vmem:[%s8339_s10 + $0xf2] sm:$0xff] }
 0x179   : > { %v9026_v55 = vpop.permute.xlu1 %1179  ;;  %v9028_v63 = vpop.permute.xlu0 %1174  ;;  %v550_v43 = vadd.f32 %v534_v27, %v418_v49  ;;  %v545_v26 = vmul.f32 %v7470_v46, %v14102_v56  ;;  %v549_v27 = vmul.f32 %v7470_v46, %v14108_v12  ;;  %v556_v52 = vadd.f32 %v540_v13, %v424_v1  ;;  %v14111_v1 = vld [vmem:[#allocation24_spill] sm:$0xff] }
 0x17a   : > { %14094 = vst [vmem:[#allocation8_spill] sm:$0xff] %v9026_v55  ;;  %14095 = vst [vmem:[#allocation9_spill] sm:$0xff] %v9028_v63  ;;  %v9041_v55 = vld [vmem:[%s8339_s10 + $0x169] sm:$0xff]  ;;  %v542_v63 = vmul.f32 %v7470_v46, %v14101_v31  ;;  %v554_v49 = vadd.f32 %v538_v57, %v422_v61  ;;  %v559_v54 = vadd.f32 %v543_v53, %v427_v41 }
 0x17b   : > { %1731 = vperm.xlu1 %8070, %v9038_v30   ;;  %1726 = vperm.xlu0 %8069, %v9041_v55   ;;  %v14109_v31 = vld [vmem:[#allocation22_spill] sm:$0xff]  ;;  %v561_v59 = vadd.f32 %v545_v26, %v429_v47  ;;  %v563_v32 = vadd.f32 %v547_v2, %v431_v4  ;;  %v562_v58 = vadd.f32 %v546_v23, %v430_v28  ;;  %v14114_v28 = vld [vmem:[#allocation29_spill] sm:$0xff] }
 0x17c   : > { %v548_v56 = vmul.f32 %v7470_v46, %v14109_v31  ;;  %v558_v39 = vadd.f32 %v542_v63, %v426_v40  ;;  %v669_v61 = vmul.f32 %v7471_v24, %v8651_v18  ;;  %v565_v51 = vadd.f32 %v549_v27, %v433_v29  ;;  %v14117_v31 = vld [vmem:[#allocation32_spill] sm:$0xff] }
 0x17d   : > { %v9051_v60 = vpop.permute.xlu1 %1189  ;;  %v9053_v22 = vpop.permute.xlu0 %1184  ;;  %v668_v41 = vmul.f32 %v7471_v24, %v8653_v17  ;;  %v671_v46 = vmul.f32 %v7471_v24, %v8657_v34  ;;  %v670_v26 = vmul.f32 %v7471_v24, %v8659_v19  ;;  %v673_v23 = vmul.f32 %v7471_v24, %v8663_v35  ;;  %v7488_v19 = vld [vmem:[%s13887_s1 + $0x3] ss:$0 sm:$0xff] }
 0x17e   : > { %14106 = vst [vmem:[#allocation10_spill] sm:$0xff] %v9051_v60  ;;  %14107 = vst [vmem:[#allocation11_spill] sm:$0xff] %v9053_v22  ;;  %v14110_v60 = vld [vmem:[#allocation23_spill] sm:$0xff]  ;;  %v560_v22 = vadd.f32 %v544_v3, %v428_v38  ;;  %v564_v33 = vadd.f32 %v548_v56, %v432_v48  ;;  %v672_v18 = vmul.f32 %v7471_v24, %v8665_v5 }
 0x17f   : > { %v666_v16 = vmul.f32 %v7471_v24, %v14110_v60  ;;  %1789 = vperm.xlu1 %8070, %v8634_v20   ;;  %1784 = vperm.xlu0 %8069, %v8637_v36   ;;  %v683_v38 = vadd.f32 %v667_v21, %v551_v50  ;;  %v675_v47 = vmul.f32 %v7471_v24, %v8669_v6  ;;  %v14112_v36 = vld [vmem:[#allocation25_spill] sm:$0xff]  ;;  %v14116_v60 = vld [vmem:[#allocation31_spill] sm:$0xff] }
 0x180   : > { %v674_v29 = vmul.f32 %v7471_v24, %v8671_v7  ;;  %v685_v17 = vadd.f32 %v669_v61, %v553_v62  ;;  %v677_v34 = vmul.f32 %v7471_v24, %v14111_v1  ;;  %v676_v20 = vmul.f32 %v7471_v24, %v8677_v9  ;;  %v14113_v7 = vld [vmem:[#allocation26_spill] sm:$0xff]  ;;  %v9090_v50 = vld [vmem:[%s8339_s10 + $0xfa] sm:$0xff] }
 0x181   : > { %v9062_v57 = vpop.permute.xlu1 %1251  ;;  %v9064_v12 = vpop.permute.xlu0 %1246  ;;  %v682_v40 = vadd.f32 %v666_v16, %v550_v43  ;;  %v679_v48 = vmul.f32 %v7471_v24, %v14112_v36  ;;  %v684_v6 = vadd.f32 %v668_v41, %v552_v0  ;;  %v687_v16 = vadd.f32 %v671_v46, %v555_v37  ;;  %v14115_v43 = vld [vmem:[#allocation30_spill] sm:$0xff] }
 0x182   : > { %v678_v21 = vmul.f32 %v7471_v24, %v14113_v7  ;;  %v686_v3 = vadd.f32 %v670_v26, %v554_v49  ;;  %v689_v9 = vadd.f32 %v673_v23, %v557_v25  ;;  %v688_v4 = vadd.f32 %v672_v18, %v556_v52  ;;  %v14120_v26 = vld [vmem:[#allocation35_spill] sm:$0xff]  ;;  %v14121_v23 = vld [vmem:[#allocation36_spill] sm:$0xff] }
 0x183   : > { %1799 = vperm.xlu1 %8070, %v8836_v44   ;;  %1794 = vperm.xlu0 %8069, %v8839_v45   ;;  %v681_v63 = vmul.f32 %v7471_v24, %v14114_v28  ;;  %v691_v13 = vadd.f32 %v675_v47, %v559_v54  ;;  %v690_v53 = vadd.f32 %v674_v29, %v558_v39  ;;  %v9110_v39 = vld [vmem:[%s8339_s10 + $0x112] sm:$0xff]  ;;  %v9134_v28 = vld [vmem:[%s8339_s10 + $0x12a] sm:$0xff] }
 0x184   : > { %v680_v0 = vmul.f32 %v7471_v24, %v14115_v43  ;;  %v800_v62 = vmul.f32 %v7488_v19, %v8699_v15  ;;  %v693_v2 = vadd.f32 %v677_v34, %v561_v59  ;;  %v692_v44 = vadd.f32 %v676_v20, %v560_v22  ;;  %v9113_v59 = vld [vmem:[%s8339_s10 + $0x10a] sm:$0xff]  ;;  %v14125_v43 = vld [vmem:[#allocation40_spill] sm:$0xff] }
 0x185   : > { %v9081_v35 = vpop.permute.xlu1 %1261  ;;  %v9083_v5 = vpop.permute.xlu0 %1256  ;;  %v695_v45 = vadd.f32 %v679_v48, %v563_v32  ;;  %v799_v37 = vmul.f32 %v7488_v19, %v14116_v60  ;;  %v694_v25 = vadd.f32 %v678_v21, %v562_v58  ;;  %v802_v52 = vmul.f32 %v7488_v19, %v8705_v11  ;;  %v14118_v11 = vld [vmem:[#allocation33_spill] sm:$0xff]  ;;  %v14124_v7 = vld [vmem:[#allocation39_spill] sm:$0xff] }
 0x186   : > { %v801_v54 = vmul.f32 %v7488_v19, %v8707_v10  ;;  %v697_v15 = vadd.f32 %v681_v63, %v565_v51  ;;  %v804_v24 = vmul.f32 %v7488_v19, %v8711_v8  ;;  %v803_v22 = vmul.f32 %v7488_v19, %v8713_v14  ;;  %v14119_v10 = vld [vmem:[#allocation34_spill] sm:$0xff]  ;;  %v14122_v14 = vld [vmem:[#allocation37_spill] sm:$0xff] }
 0x187   : > { %1809 = vperm.xlu1 %8070, %v9090_v50   ;;  %1804 = vperm.xlu0 %8069, %v9093_v42   ;;  %v806_v56 = vmul.f32 %v7488_v19, %v14117_v31  ;;  %v696_v32 = vadd.f32 %v680_v0, %v564_v33  ;;  %v816_v58 = vadd.f32 %v800_v62, %v683_v38  ;;  %v14123_v38 = vld [vmem:[#allocation38_spill] sm:$0xff]  ;;  %v14126_v62 = vld [vmem:[#allocation41_spill] sm:$0xff]  ;;  %v14128_v31 = vld [vmem:[#allocation43_spill] sm:$0xff] }
 0x188   : > { %v805_v61 = vmul.f32 %v7488_v19, %v14118_v11  ;;  %v808_v41 = vmul.f32 %v7488_v19, %v14119_v10  ;;  %v815_v46 = vadd.f32 %v799_v37, %v682_v40  ;;  %v807_v51 = vmul.f32 %v7488_v19, %v14120_v26  ;;  %v9128_v40 = vld [vmem:[%s13887_s1 + $0x4] ss:$0 sm:$0xff] }
 0x189   : > { %v9098_v49 = vpop.permute.xlu1 %1271  ;;  %v9100_v27 = vpop.permute.xlu0 %1266  ;;  %v810_v8 = vmul.f32 %v7488_v19, %v14121_v23  ;;  %v809_v18 = vmul.f32 %v7488_v19, %v14122_v14  ;;  %v818_v1 = vadd.f32 %v802_v52, %v685_v17  ;;  %v817_v33 = vadd.f32 %v801_v54, %v684_v6  ;;  %v9137_v17 = vld [vmem:[%s8339_s10 + $0x122] sm:$0xff]  ;;  %v14135_v23 = vld [vmem:[#allocation48_spill] sm:$0xff] }
 0x18a   : > { %v812_v34 = vmul.f32 %v7488_v19, %v14123_v38  ;;  %v820_v20 = vadd.f32 %v804_v24, %v687_v16  ;;  %v819_v36 = vadd.f32 %v803_v22, %v686_v3  ;;  %v822_v48 = vadd.f32 %v806_v56, %v689_v9  ;;  %v14127_v16 = vld [vmem:[#allocation42_spill] sm:$0xff] }
 0x18b   : > { %1819 = vperm.xlu1 %8070, %v9110_v39   ;;  %1814 = vperm.xlu0 %8069, %v9113_v59   ;;  %v811_v21 = vmul.f32 %v7488_v19, %v14124_v7  ;;  %v821_v6 = vadd.f32 %v805_v61, %v688_v4  ;;  %v824_v63 = vadd.f32 %v808_v41, %v691_v13  ;;  %v14129_v13 = vld [vmem:[#allocation44_spill] sm:$0xff]  ;;  %v14132_v61 = vld [vmem:[#allocation47_spill] sm:$0xff]  ;;  %v9160_v10 = vld [vmem:[%s8339_s10 + $0x142] sm:$0xff] }
 0x18c   : > { %v814_v0 = vmul.f32 %v7488_v19, %v14125_v43  ;;  %v813_v60 = vmul.f32 %v7488_v19, %v14126_v62  ;;  %v823_v37 = vadd.f32 %v807_v51, %v690_v53  ;;  %v826_v52 = vadd.f32 %v810_v8, %v693_v2  ;;  %v14130_v53 = vld [vmem:[#allocation45_spill] sm:$0xff]  ;;  %14133 = vst [vmem:[#allocation12_spill] sm:$0xff] %v9160_v10  ;;  %v14137_v38 = vld [vmem:[#allocation50_spill] sm:$0xff]  ;;  %v14138_v7 = vld [vmem:[#allocation51_spill] sm:$0xff] }
 0x18d   : > { %v9120_v47 = vpop.permute.xlu1 %1281  ;;  %v9122_v29 = vpop.permute.xlu0 %1276  ;;  %v825_v54 = vadd.f32 %v809_v18, %v692_v44  ;;  %v932_v3 = vmul.f32 %v9128_v40, %v14127_v16  ;;  %v828_v22 = vadd.f32 %v812_v34, %v695_v45  ;;  %v931_v4 = vmul.f32 %v9128_v40, %v14128_v31  ;;  %v14131_v44 = vld [vmem:[#allocation46_spill] sm:$0xff]  ;;  %v9163_v41 = vld [vmem:[%s8339_s10 + $0x13a] sm:$0xff] }
 0x18e   : > { %v934_v56 = vmul.f32 %v9128_v40, %v14129_v13  ;;  %v827_v19 = vadd.f32 %v811_v21, %v694_v25  ;;  %v933_v2 = vmul.f32 %v9128_v40, %v14130_v53  ;;  %v936_v11 = vmul.f32 %v9128_v40, %v14131_v44  ;;  %14134 = vst [vmem:[#allocation13_spill] sm:$0xff] %v9163_v41  ;;  %v14136_v25 = vld [vmem:[#allocation49_spill] sm:$0xff]  ;;  %v14139_v43 = vld [vmem:[#allocation52_spill] sm:$0xff]  ;;  %v14141_v44 = vld [vmem:[#allocation54_spill] sm:$0xff] }
 0x18f   : > { %1829 = vperm.xlu1 %8070, %v9134_v28   ;;  %1824 = vperm.xlu0 %8069, %v9137_v17   ;;  %v935_v45 = vmul.f32 %v9128_v40, %v14132_v61  ;;  %v830_v26 = vadd.f32 %v814_v0, %v697_v15  ;;  %v9165_v51 = vadd.f32 %v813_v60, %v696_v32  ;;  %v9180_v32 = vld [vmem:[%s13887_s1 + $0x5] ss:$0 sm:$0xff] }
 0x190   : > { %v938_v8 = vmul.f32 %v9128_v40, %v14135_v23  ;;  %v937_v14 = vmul.f32 %v9128_v40, %v14136_v25  ;;  %v948_v18 = vadd.f32 %v932_v3, %v816_v58  ;;  %v940_v34 = vmul.f32 %v9128_v40, %v14137_v38  ;;  %v14140_v16 = vld [vmem:[#allocation53_spill] sm:$0xff]  ;;  %v9196_v25 = vld [vmem:[%s8339_s10 + $0x152] sm:$0xff] }
 0x191   : > { %v9143_v9 = vpop.permute.xlu1 %1291  ;;  %v9145_v24 = vpop.permute.xlu0 %1286  ;;  %v939_v21 = vmul.f32 %v9128_v40, %v14138_v7  ;;  %v942_v15 = vmul.f32 %v9128_v40, %v14139_v43  ;;  %v947_v58 = vadd.f32 %v931_v4, %v815_v46  ;;  %v950_v60 = vadd.f32 %v934_v56, %v818_v1  ;;  %v9193_v23 = vld [vmem:[%s8339_s10 + $0x15a] sm:$0xff]  ;;  %14143 = vst [vmem:[#allocation15_spill] sm:$0xff] %v9196_v25  ;;  %v14144_v1 = vld [vmem:[#allocation55_spill] sm:$0xff]  ;;  %v14145_v56 = vld [vmem:[#allocation58_spill] sm:$0xff] }
 0x192   : > { %v941_v3 = vmul.f32 %v9128_v40, %v14140_v16  ;;  %v949_v31 = vadd.f32 %v933_v2, %v817_v33  ;;  %v952_v13 = vadd.f32 %v936_v11, %v820_v20  ;;  %v951_v53 = vadd.f32 %v935_v45, %v819_v36  ;;  %14142 = vst [vmem:[#allocation14_spill] sm:$0xff] %v9193_v23  ;;  %v9205_v33 = vld [vmem:[%s13887_s1 + $0x6] ss:$0 sm:$0xff] }
 0x193   : > { %1839 = vperm.xlu1 %8070, %v9160_v10   ;;  %1834 = vperm.xlu0 %8069, %v9163_v41   ;;  %v944_v61 = vmul.f32 %v9128_v40, %v14141_v44  ;;  %v954_v38 = vadd.f32 %v938_v8, %v822_v48  ;;  %v953_v46 = vadd.f32 %v937_v14, %v821_v6  ;;  %v14146_v48 = vld [vmem:[#allocation59_spill] sm:$0xff]  ;;  %v14147_v14 = vld [vmem:[#allocation56_spill] sm:$0xff] }
 0x194   : > { %v943_v4 = vmul.f32 %v9128_v40, %v14144_v1  ;;  %v1064_v7 = vmul.f32 %v9180_v32, %v14145_v56  ;;  %v9207_v20 = vadd.f32 %v940_v34, %v824_v63  ;;  %v9209_v36 = vadd.f32 %v939_v21, %v823_v37  ;;  %v14148_v63 = vld [vmem:[#allocation60_spill] sm:$0xff]  ;;  %v9228_v37 = vld [vmem:[%s13887_s1 + $0x7] ss:$0 sm:$0xff]  ;;  %v9244_v56 = vld [vmem:[%s8339_s10 + $0x16a] sm:$0xff] }
 0x195   : > { %v9182_v0 = vpop.permute.xlu1 %1301  ;;  %v9184_v62 = vpop.permute.xlu0 %1296  ;;  %v9211_v2 = vadd.f32 %v942_v15, %v826_v52  ;;  %v1063_v6 = vmul.f32 %v9180_v32, %v14146_v48  ;;  %v9219_v8 = vadd.f32 %v941_v3, %v825_v54  ;;  %v946_v43 = vmul.f32 %v9128_v40, %v14147_v14  ;;  %v14149_v21 = vld [vmem:[#allocation61_spill] sm:$0xff]  ;;  %v14150_v15 = vld [vmem:[#allocation86_spill] sm:$0xff]  ;;  %v14151_v3 = vld [vmem:[#allocation87_spill] sm:$0xff]  ;;  %14152 = vst [vmem:[#allocation16_spill] sm:$0xff] %v9244_v56 }
 0x196   : > { %v1066_v34 = vmul.f32 %v9180_v32, %v14148_v63  ;;  %v9232_v52 = vadd.f32 %v944_v61, %v828_v22  ;;  %v1065_v54 = vmul.f32 %v9180_v32, %v14149_v21  ;;  %v1197_v16 = vmul.f32 %v9205_v33, %v14150_v15  ;;  %v9241_v1 = vld [vmem:[%s8339_s10 + $0x172] sm:$0xff]  ;;  %v14154_v61 = vld [vmem:[#allocation65_spill] sm:$0xff] }
 0x197   : > { %1849 = vperm.xlu1 %8070, %v9193_v23   ;;  %1844 = vperm.xlu0 %8069, %v9196_v25   ;;  %v1196_v44 = vmul.f32 %v9205_v33, %v14151_v3  ;;  %v9246_v48 = vadd.f32 %v943_v4, %v827_v19  ;;  %v1080_v14 = vadd.f32 %v1064_v7, %v948_v18  ;;  %v14153_v63 = vld [vmem:[#allocation64_spill] sm:$0xff]  ;;  %v14156_v4 = vld [vmem:[#allocation57_spill] sm:$0xff] }
 0x198   : > { %v1068_v22 = vmul.f32 %v9180_v32, %v14153_v63  ;;  %v1067_v25 = vmul.f32 %v9180_v32, %v14154_v61  ;;  %v1079_v21 = vadd.f32 %v1063_v6, %v947_v58  ;;  %v14155_v23 = vld [vmem:[#allocation68_spill] sm:$0xff]  ;;  %v1329_v3 = vmul.f32 %v9228_v37, %v9062_v57 }
 0x199   : > { %v9215_v11 = vpop.permute.xlu1 %1311  ;;  %v9217_v45 = vpop.permute.xlu0 %1306  ;;  %v1070_v15 = vmul.f32 %v9180_v32, %v14155_v23  ;;  %v1328_v41 = vmul.f32 %v9228_v37, %v9064_v12  ;;  %v9262_v18 = vadd.f32 %v946_v43, %v830_v26  ;;  %v9266_v7 = vmul.f32 %v9128_v40, %v14156_v4  ;;  %v14157_v63 = vld [vmem:[#allocation88_spill] sm:$0xff]  ;;  %v9275_v26 = vld [vmem:[%s13887_s1 + $0x8] ss:$0 sm:$0xff]  ;;  %v14158_v40 = vld [vmem:[#allocation69_spill] sm:$0xff] }
 0x19a   : > { %v1082_v58 = vadd.f32 %v1066_v34, %v950_v60  ;;  %v1081_v23 = vadd.f32 %v1065_v54, %v949_v31  ;;  %v1213_v57 = vadd.f32 %v1197_v16, %v1080_v14  ;;  %v1212_v6 = vadd.f32 %v1196_v44, %v1079_v21  ;;  %v14159_v34 = vld [vmem:[#allocation89_spill] sm:$0xff] }
 0x19b   : > { %1859 = vperm.xlu1 %8070, %v9241_v1   ;;  %1854 = vperm.xlu0 %8069, %v9244_v56   ;;  %v1199_v12 = vmul.f32 %v9205_v33, %v14157_v63  ;;  %v1084_v43 = vadd.f32 %v1068_v22, %v952_v13  ;;  %v1083_v61 = vadd.f32 %v1067_v25, %v951_v53  ;;  %v14160_v25 = vld [vmem:[#allocation27_spill] sm:$0xff]  ;;  %v14161_v22 = vld [vmem:[#allocation28_spill] sm:$0xff] }
 0x19c   : > { %v1069_v60 = vmul.f32 %v9180_v32, %v14158_v40  ;;  %v1198_v4 = vmul.f32 %v9205_v33, %v14159_v34  ;;  %v1086_v56 = vadd.f32 %v1070_v15, %v954_v38  ;;  %v1345_v31 = vadd.f32 %v1329_v3, %v1213_v57  ;;  %v14162_v63 = vld [vmem:[#allocation72_spill] sm:$0xff]  ;;  %v14164_v3 = vld [vmem:[#allocation93_spill] sm:$0xff] }
 0x19d   : > { %v9258_v10 = vpop.permute.xlu1 %1321  ;;  %v9260_v19 = vpop.permute.xlu0 %1316  ;;  %v1344_v54 = vadd.f32 %v1328_v41, %v1212_v6  ;;  %v1331_v16 = vmul.f32 %v9228_v37, %v9081_v35  ;;  %v1330_v21 = vmul.f32 %v9228_v37, %v9083_v5  ;;  %v1072_v38 = vmul.f32 %v9180_v32, %v14162_v63  ;;  %v14163_v15 = vld [vmem:[#allocation92_spill] sm:$0xff] }
 0x19e   : > { %v1215_v41 = vadd.f32 %v1199_v12, %v1082_v58  ;;  %v1201_v35 = vmul.f32 %v9205_v33, %v14163_v15  ;;  %v1200_v57 = vmul.f32 %v9205_v33, %v14164_v3  ;;  %v1085_v6 = vadd.f32 %v1069_v60, %v953_v46  ;;  %v14166_v60 = vld [vmem:[#allocation62_spill] sm:$0xff] }
 0x19f   : > { %1918 = vperm.xlu1 %8070, %v14160_v25   ;;  %1913 = vperm.xlu0 %8069, %v14161_v22   ;;  %v1214_v5 = vadd.f32 %v1198_v4, %v1081_v23  ;;  %v1333_v22 = vmul.f32 %v9228_v37, %v9098_v49  ;;  %v1332_v58 = vmul.f32 %v9228_v37, %v9100_v27  ;;  %v14167_v4 = vld [vmem:[#allocation63_spill] sm:$0xff]  ;;  %v14168_v27 = vld [vmem:[#allocation96_spill] sm:$0xff] }
 0x1a0   : > { %v1347_v25 = vadd.f32 %v1331_v16, %v1215_v41  ;;  %v1088_v49 = vadd.f32 %v1072_v38, %v9207_v20  ;;  %v1203_v16 = vmul.f32 %v9205_v33, %v14168_v27  ;;  %v1335_v20 = vmul.f32 %v9228_v37, %v9120_v47 }
 0x1a1   : > { %v1384_v44 = vpop.permute.xlu1 %1383  ;;  %v1379_v14 = vpop.permute.xlu0 %1378  ;;  %v1346_v15 = vadd.f32 %v1330_v21, %v1214_v5  ;;  %v14169_v21 = vld [vmem:[#allocation76_spill] sm:$0xff]  ;;  %v1334_v38 = vmul.f32 %v9228_v37, %v9122_v29  ;;  %v14175_v29 = vld [vmem:[#allocation101_spill] sm:$0xff]  ;;  %v1337_v27 = vmul.f32 %v9228_v37, %v9143_v9 }
 0x1a2   : > { %v1461_v13 = vmul.f32 %v9275_v26, %v1384_v44  ;;  %v1460_v53 = vmul.f32 %v9275_v26, %v1379_v14  ;;  %v14165_v44 = vld [vmem:[#allocation73_spill] sm:$0xff] }
 0x1a3   : > { %v1071_v14 = vmul.f32 %v9180_v32, %v14165_v44  ;;  %1928 = vperm.xlu1 %8070, %v14166_v60   ;;  %1923 = vperm.xlu0 %8069, %v14167_v4   ;;  %v14176_v4 = vld [vmem:[#allocation80_spill] sm:$0xff] }
 0x1a4   : > { %v1477_v40 = vadd.f32 %v1461_v13, %v1345_v31  ;;  %v1476_v34 = vadd.f32 %v1460_v53, %v1344_v54  ;;  %v1217_v31 = vadd.f32 %v1201_v35, %v1084_v43  ;;  %v1216_v54 = vadd.f32 %v1200_v57, %v1083_v61  ;;  %v14170_v53 = vld [vmem:[#allocation97_spill] sm:$0xff] }
 0x1a5   : > { %v1394_v12 = vpop.permute.xlu1 %1393  ;;  %v1389_v63 = vpop.permute.xlu0 %1388  ;;  %v1074_v13 = vmul.f32 %v9180_v32, %v14169_v21  ;;  %v1202_v41 = vmul.f32 %v9205_v33, %v14170_v53 }
 0x1a6   : > { %1494 = vst.msk [vmem:[#allocation2 + $0x21] sm:$0xff] %vm250_vm0, %v1477_v40  ;;  %1493 = vst.msk [vmem:[#allocation2 + $0x19] sm:$0xff] %vm250_vm0, %v1476_v34  ;;  %v1463_v46 = vmul.f32 %v9275_v26, %v1394_v12  ;;  %v1462_v23 = vmul.f32 %v9275_v26, %v1389_v63  ;;  %v1087_v40 = vadd.f32 %v1071_v14, %v9209_v36  ;;  %v14172_v36 = vld [vmem:[#allocation67_spill] sm:$0xff]  ;;  %v14173_v14 = vld [vmem:[#allocation77_spill] sm:$0xff] }
 0x1a7   : > { %v1349_v34 = vadd.f32 %v1333_v22, %v1217_v31  ;;  %v1348_v44 = vadd.f32 %v1332_v58, %v1216_v54  ;;  %1933 = vperm.xlu0 %8069, %v14172_v36   ;;  %v1073_v47 = vmul.f32 %v9180_v32, %v14173_v14  ;;  %v1219_v22 = vadd.f32 %v1203_v16, %v1086_v56  ;;  %v14174_v58 = vld [vmem:[#allocation100_spill] sm:$0xff] }
 0x1a8   : > { %v1479_v3 = vadd.f32 %v1463_v46, %v1347_v25  ;;  %v1478_v5 = vadd.f32 %v1462_v23, %v1346_v15  ;;  %v14171_v25 = vld [vmem:[#allocation66_spill] sm:$0xff]  ;;  %v1205_v12 = vmul.f32 %v9205_v33, %v14174_v58  ;;  %v1204_v63 = vmul.f32 %v9205_v33, %v14175_v29  ;;  %v14184_v29 = vld [vmem:[#allocation8_spill] sm:$0xff] }
 0x1a9   : > { %v1404_v43 = vpop.permute.xlu1 %1403  ;;  %v1399_v61 = vpop.permute.xlu0 %1398  ;;  %1938 = vperm.xlu1 %8070, %v14171_v25   ;;  %v1090_v15 = vadd.f32 %v1074_v13, %v9211_v2  ;;  %v1218_v46 = vadd.f32 %v1202_v41, %v1085_v6  ;;  %v1076_v31 = vmul.f32 %v9180_v32, %v14176_v4  ;;  %v1351_v54 = vadd.f32 %v1335_v20, %v1219_v22  ;;  %v14177_v13 = vld [vmem:[#allocation70_spill] sm:$0xff]  ;;  %v14178_v41 = vld [vmem:[#allocation71_spill] sm:$0xff] }
 0x1aa   : > { %1496 = vst.msk [vmem:[#allocation2 + $0x39] sm:$0xff] %vm250_vm0, %v1479_v3  ;;  %1495 = vst.msk [vmem:[#allocation2 + $0x31] sm:$0xff] %vm250_vm0, %v1478_v5  ;;  %v1465_v35 = vmul.f32 %v9275_v26, %v1404_v43  ;;  %v1464_v57 = vmul.f32 %v9275_v26, %v1399_v61  ;;  %v1336_v56 = vmul.f32 %v9228_v37, %v9145_v24  ;;  %v14179_v3 = vld [vmem:[#allocation81_spill] sm:$0xff]  ;;  %v14182_v58 = vld [vmem:[#allocation74_spill] sm:$0xff] }
 0x1ab   : > { %v1350_v53 = vadd.f32 %v1334_v38, %v1218_v46  ;;  %1943 = vperm.xlu0 %8069, %v14178_v41   ;;  %v1075_v9 = vmul.f32 %v9180_v32, %v14179_v3  ;;  %v1221_v5 = vadd.f32 %v1205_v12, %v1088_v49  ;;  %v1220_v24 = vadd.f32 %v1204_v63, %v1087_v40  ;;  %v14181_v43 = vld [vmem:[#allocation105_spill] sm:$0xff]  ;;  %v14188_v41 = vld [vmem:[#allocation78_spill] sm:$0xff] }
 0x1ac   : > { %v1481_v23 = vadd.f32 %v1465_v35, %v1349_v34  ;;  %v1480_v60 = vadd.f32 %v1464_v57, %v1348_v44  ;;  %v14180_v34 = vld [vmem:[#allocation104_spill] sm:$0xff]  ;;  %v1089_v20 = vadd.f32 %v1073_v47, %v9219_v8  ;;  %v1206_v61 = vmul.f32 %v9205_v33, %v14181_v43  ;;  %v14185_v46 = vld [vmem:[#allocation9_spill] sm:$0xff] }
 0x1ad   : > { %v1414_v16 = vpop.permute.xlu1 %1413  ;;  %v1409_v21 = vpop.permute.xlu0 %1408  ;;  %1948 = vperm.xlu1 %8070, %v14177_v13   ;;  %v1207_v44 = vmul.f32 %v9205_v33, %v14180_v34  ;;  %v1092_v57 = vadd.f32 %v1076_v31, %v9232_v52  ;;  %v1353_v25 = vadd.f32 %v1337_v27, %v1221_v5  ;;  %v1352_v36 = vadd.f32 %v1336_v56, %v1220_v24  ;;  %v14183_v52 = vld [vmem:[#allocation75_spill] sm:$0xff]  ;;  %v14187_v27 = vld [vmem:[#allocation85_spill] sm:$0xff] }
 0x1ae   : > { %1498 = vst.msk [vmem:[#allocation2 + $0x51] sm:$0xff] %vm250_vm0, %v1481_v23  ;;  %1497 = vst.msk [vmem:[#allocation2 + $0x49] sm:$0xff] %vm250_vm0, %v1480_v60  ;;  %v1467_v2 = vmul.f32 %v9275_v26, %v1414_v16  ;;  %v1466_v6 = vmul.f32 %v9275_v26, %v1409_v21  ;;  %v1339_v14 = vmul.f32 %v9228_v37, %v9182_v0  ;;  %v14186_v23 = vld [vmem:[#allocation84_spill] sm:$0xff]  ;;  %v14191_v34 = vld [vmem:[#allocation11_spill] sm:$0xff] }
 0x1af   : > { %v1338_v40 = vmul.f32 %v9228_v37, %v9184_v62  ;;  %1953 = vperm.xlu0 %8069, %v14183_v52   ;;  %v1091_v12 = vadd.f32 %v1075_v9, %v9246_v48  ;;  %v1223_v0 = vadd.f32 %v1207_v44, %v1090_v15  ;;  %v1209_v63 = vmul.f32 %v9205_v33, %v14184_v29  ;;  %v14190_v9 = vld [vmem:[#allocation10_spill] sm:$0xff] }
 0x1b0   : > { %v1483_v38 = vadd.f32 %v1467_v2, %v1351_v54  ;;  %v1482_v35 = vadd.f32 %v1466_v6, %v1350_v53  ;;  %v1208_v62 = vmul.f32 %v9205_v33, %v14185_v46  ;;  %v1078_v60 = vmul.f32 %v9180_v32, %v14186_v23  ;;  %v8071_v23 = vld [vmem:[%s8339_s10 + $0xe1] sm:$0xff] }
 0x1b1   : > { %v1424_v22 = vpop.permute.xlu1 %1423  ;;  %v1419_v49 = vpop.permute.xlu0 %1418  ;;  %1958 = vperm.xlu1 %8070, %v14182_v58   ;;  %v1222_v4 = vadd.f32 %v1206_v61, %v1089_v20  ;;  %v1077_v56 = vmul.f32 %v9180_v32, %v14187_v27  ;;  %v1355_v16 = vadd.f32 %v1339_v14, %v1223_v0  ;;  %v1341_v48 = vmul.f32 %v9228_v37, %v9215_v11  ;;  %v14189_v32 = vld [vmem:[#allocation79_spill] sm:$0xff] }
 0x1b2   : > { %1500 = vst.msk [vmem:[#allocation2 + $0x69] sm:$0xff] %vm250_vm0, %v1483_v38  ;;  %1499 = vst.msk [vmem:[#allocation2 + $0x61] sm:$0xff] %vm250_vm0, %v1482_v35  ;;  %v1469_v8 = vmul.f32 %v9275_v26, %v1424_v22  ;;  %v1468_v47 = vmul.f32 %v9275_v26, %v1419_v49  ;;  %v1340_v15 = vmul.f32 %v9228_v37, %v9217_v45  ;;  %v14193_v14 = vld [vmem:[#allocation83_spill] sm:$0xff]  ;;  %v9399_v49 = vld [vmem:[%s8339_s10 + $0x188] sm:$0xff] }
 0x1b3   : > { %v1354_v2 = vadd.f32 %v1338_v40, %v1222_v4  ;;  %1963 = vperm.xlu0 %8069, %v14189_v32   ;;  %v961_v11 = vadd.f32 %v9266_v7, %v9165_v51  ;;  %v1225_v3 = vadd.f32 %v1209_v63, %v1092_v57  ;;  %v1224_v45 = vadd.f32 %v1208_v62, %v1091_v12  ;;  %v14201_v32 = vld [vmem:[#allocation103_spill] sm:$0xff] }
 0x1b4   : > { %v1485_v31 = vadd.f32 %v1469_v8, %v1353_v25  ;;  %v1484_v54 = vadd.f32 %v1468_v47, %v1352_v36  ;;  %v1211_v5 = vmul.f32 %v9205_v33, %v14190_v9  ;;  %v1094_v24 = vadd.f32 %v1078_v60, %v9262_v18  ;;  %v14192_v36 = vld [vmem:[#allocation82_spill] sm:$0xff]  ;;  %v8072_v60 = vld [vmem:[%s8339_s10 + $0xd9] sm:$0xff] }
 0x1b5   : > { %v1434_v21 = vpop.permute.xlu1 %1433  ;;  %v1429_v53 = vpop.permute.xlu0 %1428  ;;  %1968 = vperm.xlu1 %8070, %v14188_v41   ;;  %v1210_v44 = vmul.f32 %v9205_v33, %v14191_v34  ;;  %v1093_v61 = vadd.f32 %v1077_v56, %v961_v11  ;;  %v1357_v38 = vadd.f32 %v1341_v48, %v1225_v3  ;;  %v1356_v35 = vadd.f32 %v1340_v15, %v1224_v45  ;;  %v14197_v48 = vld [vmem:[#allocation95_spill] sm:$0xff]  ;;  %v14200_v41 = vld [vmem:[#allocation102_spill] sm:$0xff] }
 0x1b6   : > { %1502 = vst.msk [vmem:[#allocation2 + $0x81] sm:$0xff] %vm250_vm0, %v1485_v31  ;;  %1501 = vst.msk [vmem:[#allocation2 + $0x79] sm:$0xff] %vm250_vm0, %v1484_v54  ;;  %v1471_v6 = vmul.f32 %v9275_v26, %v1434_v21  ;;  %v1470_v13 = vmul.f32 %v9275_v26, %v1429_v53  ;;  %v1343_v51 = vmul.f32 %v9228_v37, %v9258_v10  ;;  %v9402_v10 = vld [vmem:[%s8339_s10 + $0x180] sm:$0xff]  ;;  %v14194_v31 = vld [vmem:[#allocation90_spill] sm:$0xff] }
 0x1b7   : > { %v1342_v25 = vmul.f32 %v9228_v37, %v9260_v19  ;;  %1973 = vperm.xlu0 %8069, %v14193_v14   ;;  %v1227_v22 = vadd.f32 %v1211_v5, %v1094_v24  ;;  %v1226_v40 = vadd.f32 %v1210_v44, %v1093_v61  ;;  %v14195_v54 = vld [vmem:[#allocation91_spill] sm:$0xff]  ;;  %v14198_v53 = vld [vmem:[#allocation98_spill] sm:$0xff] }
 0x1b8   : > { %v1487_v20 = vadd.f32 %v1471_v6, %v1355_v16  ;;  %v1486_v43 = vadd.f32 %v1470_v13, %v1354_v2  ;;  %v14196_v16 = vld [vmem:[#allocation94_spill] sm:$0xff]  ;;  %v14199_v2 = vld [vmem:[#allocation99_spill] sm:$0xff] }
 0x1b9   : > { %v1444_v7 = vpop.permute.xlu1 %1443  ;;  %v1439_v57 = vpop.permute.xlu0 %1438  ;;  %1978 = vperm.xlu1 %8070, %v14192_v36   ;;  %v1359_v19 = vadd.f32 %v1343_v51, %v1227_v22  ;;  %v1358_v52 = vadd.f32 %v1342_v25, %v1226_v40  ;;  %v14202_v45 = vld [vmem:[#allocation7_spill] sm:$0xff]  ;;  %v14203_v9 = vld [vmem:[#allocation106_spill] sm:$0xff]  ;;  %v8074_v51 = vld [vmem:[%s8339_s10 + $0xda] sm:$0xff] }
 0x1ba   : > { %1504 = vst.msk [vmem:[#allocation2 + $0x99] sm:$0xff] %vm250_vm0, %v1487_v20  ;;  %1503 = vst.msk [vmem:[#allocation2 + $0x91] sm:$0xff] %vm250_vm0, %v1486_v43  ;;  %v1473_v33 = vmul.f32 %v9275_v26, %v1444_v7  ;;  %v1472_v18 = vmul.f32 %v9275_v26, %v1439_v57  ;;  %v9455_v34 = vld [vmem:[%s8339_s10 + $0x189] sm:$0xff]  ;;  %v9458_v44 = vld [vmem:[%s8339_s10 + $0x181] sm:$0xff] }
 0x1bb   : > { %1983 = vperm.xlu0 %8069, %v9402_v10   ;;  %v14208_v40 = vld [vmem:[#allocation12_spill] sm:$0xff] }
 0x1bc   : > { %v1489_v8 = vadd.f32 %v1473_v33, %v1357_v38  ;;  %v1488_v37 = vadd.f32 %v1472_v18, %v1356_v35  ;;  %v8073_v35 = vld [vmem:[%s8339_s10 + $0xe2] sm:$0xff] }
 0x1bd   : > { %v1454_v47 = vpop.permute.xlu1 %1453  ;;  %v1449_v58 = vpop.permute.xlu0 %1448  ;;  %1988 = vperm.xlu1 %8070, %v9399_v49  }
 0x1be   : > { %1506 = vst.msk [vmem:[#allocation2 + $0xb1] sm:$0xff] %vm250_vm0, %v1489_v8  ;;  %1505 = vst.msk [vmem:[#allocation2 + $0xa9] sm:$0xff] %vm250_vm0, %v1488_v37  ;;  %v1475_v12 = vmul.f32 %v9275_v26, %v1454_v47  ;;  %v1474_v0 = vmul.f32 %v9275_v26, %v1449_v58  ;;  %v14209_v8 = vld [vmem:[#allocation13_spill] sm:$0xff]  ;;  %v14212_v47 = vld [vmem:[#allocation14_spill] sm:$0xff] }
 0x1bf   : > { %2041 = vperm.xlu0 %8069, %v8072_v60   ;;  %v14213_v58 = vld [vmem:[#allocation15_spill] sm:$0xff] }
 0x1c0   : > { %v1491_v29 = vadd.f32 %v1475_v12, %v1359_v19  ;;  %v1490_v63 = vadd.f32 %v1474_v0, %v1358_v52  ;;  %v14216_v0 = vld [vmem:[#allocation16_spill] sm:$0xff] }
 0x1c1   : > { %v9410_v46 = vpop.permute.xlu1 %1533  ;;  %v9412_v62 = vpop.permute.xlu0 %1528  ;;  %2046 = vperm.xlu1 %8070, %v8071_v23  }
 0x1c2   : > { %1508 = vst.msk [vmem:[#allocation2 + $0xc9] sm:$0xff] %vm250_vm0, %v1491_v29  ;;  %1507 = vst.msk [vmem:[#allocation2 + $0xc1] sm:$0xff] %vm250_vm0, %v1490_v63  ;;  %v9509_v29 = vld [vmem:[%s8339_s10 + $0x18a] sm:$0xff]  ;;  %v9512_v63 = vld [vmem:[%s8339_s10 + $0x182] sm:$0xff] }
 0x1c3   : > { %2051 = vperm.xlu0 %8069, %v14195_v54  }
 0x1c5   : > { %v9418_v4 = vpop.permute.xlu1 %1543  ;;  %v9420_v26 = vpop.permute.xlu0 %1538  ;;  %2056 = vperm.xlu1 %8070, %v14194_v31  }
 0x1c7   : > { %2061 = vperm.xlu0 %8069, %v14197_v48   ;;  %v8076_v48 = vld [vmem:[%s8339_s10 + $0xf0] sm:$0xff] }
 0x1c9   : > { %v9424_v27 = vpop.permute.xlu1 %1553  ;;  %v9426_v56 = vpop.permute.xlu0 %1548  ;;  %2066 = vperm.xlu1 %8070, %v14196_v16   ;;  %v8075_v16 = vld [vmem:[%s8339_s10 + $0xf8] sm:$0xff] }
 0x1cb   : > { %2071 = vperm.xlu0 %8069, %v14199_v2  }
 0x1cd   : > { %v9430_v15 = vpop.permute.xlu1 %1563  ;;  %v9432_v21 = vpop.permute.xlu0 %1558  ;;  %2076 = vperm.xlu1 %8070, %v14198_v53  }
 0x1cf   : > { %2081 = vperm.xlu0 %8069, %v14201_v32   ;;  %v8078_v32 = vld [vmem:[%s8339_s10 + $0x108] sm:$0xff] }
 0x1d1   : > { %v9436_v6 = vpop.permute.xlu1 %1573  ;;  %v9438_v13 = vpop.permute.xlu0 %1568  ;;  %2086 = vperm.xlu1 %8070, %v14200_v41   ;;  %v8077_v41 = vld [vmem:[%s8339_s10 + $0x110] sm:$0xff] }
 0x1d3   : > { %2091 = vperm.xlu0 %8069, %v14203_v9  }
 0x1d5   : > { %v9442_v11 = vpop.permute.xlu1 %1583  ;;  %v9444_v3 = vpop.permute.xlu0 %1578  ;;  %2096 = vperm.xlu1 %8070, %v14202_v45  }
 0x1d7   : > { %2101 = vperm.xlu0 %8069, %v9041_v55  }
 0x1d9   : > { %v9448_v5 = vpop.permute.xlu1 %1593  ;;  %v9450_v24 = vpop.permute.xlu0 %1588  ;;  %2106 = vperm.xlu1 %8070, %v9038_v30  }
 0x1db   : > { %2111 = vperm.xlu0 %8069, %v9458_v44  }
 0x1dd   : > { %v9460_v20 = vpop.permute.xlu1 %1603  ;;  %v9462_v43 = vpop.permute.xlu0 %1598  ;;  %2116 = vperm.xlu1 %8070, %v9455_v34  }
 0x1df   : > { %2169 = vperm.xlu0 %8069, %v8074_v51  }
 0x1e1   : > { %v9466_v61 = vpop.permute.xlu1 %1661  ;;  %v9468_v38 = vpop.permute.xlu0 %1656  ;;  %2174 = vperm.xlu1 %8070, %v8073_v35  }
 0x1e3   : > { %2179 = vperm.xlu0 %8069, %v9093_v42  }
 0x1e5   : > { %v9472_v7 = vpop.permute.xlu1 %1671  ;;  %v9474_v57 = vpop.permute.xlu0 %1666  ;;  %2184 = vperm.xlu1 %8070, %v9090_v50  }
 0x1e7   : > { %2189 = vperm.xlu0 %8069, %v9113_v59  }
 0x1e9   : > { %v9478_v25 = vpop.permute.xlu1 %1681  ;;  %v9480_v33 = vpop.permute.xlu0 %1676  ;;  %2194 = vperm.xlu1 %8070, %v9110_v39  }
 0x1eb   : > { %2199 = vperm.xlu0 %8069, %v9137_v17  }
 0x1ed   : > { %v9484_v18 = vpop.permute.xlu1 %1691  ;;  %v9486_v36 = vpop.permute.xlu0 %1686  ;;  %2204 = vperm.xlu1 %8070, %v9134_v28  }
 0x1ee   : > { %14204 = vst [vmem:[#allocation17_spill] sm:$0xff] %v9484_v18  ;;  %14205 = vst [vmem:[#allocation18_spill] sm:$0xff] %v9486_v36 }
 0x1ef   : > { %2209 = vperm.xlu0 %8069, %v14209_v8  }
 0x1f1   : > { %v9490_v14 = vpop.permute.xlu1 %1701  ;;  %v9492_v22 = vpop.permute.xlu0 %1696  ;;  %2214 = vperm.xlu1 %8070, %v14208_v40  }
 0x1f2   : > { %14206 = vst [vmem:[#allocation19_spill] sm:$0xff] %v9490_v14  ;;  %14207 = vst [vmem:[#allocation20_spill] sm:$0xff] %v9492_v22  ;;  %v2874_v22 = vld [vmem:[#allocation2 + $0x21] sm:$0xff] }
 0x1f3   : > { %2219 = vperm.xlu0 %8069, %v14213_v58  }
 0x1f5   : > { %v9496_v37 = vpop.permute.xlu1 %1711  ;;  %v9498_v19 = vpop.permute.xlu0 %1706  ;;  %2224 = vperm.xlu1 %8070, %v14212_v47  }
 0x1f6   : > { %14210 = vst [vmem:[#allocation21_spill] sm:$0xff] %v9496_v37  ;;  %14211 = vst [vmem:[#allocation22_spill] sm:$0xff] %v9498_v19 }
 0x1f7   : > { %2229 = vperm.xlu0 %8069, %v14216_v0  }
 0x1f9   : > { %v9502_v52 = vpop.permute.xlu1 %1721  ;;  %v9504_v12 = vpop.permute.xlu0 %1716  ;;  %2234 = vperm.xlu1 %8070, %v9241_v1  }
 0x1fa   : > { %14214 = vst [vmem:[#allocation23_spill] sm:$0xff] %v9502_v52  ;;  %14215 = vst [vmem:[#allocation24_spill] sm:$0xff] %v9504_v12  ;;  %v2770_v12 = vld [vmem:[#allocation2 + $0xa] sm:$0xff] }
 0x1fb   : > { %2239 = vperm.xlu0 %8069, %v9512_v63  }
 0x1fd   : > { %v9514_v23 = vpop.permute.xlu1 %1731  ;;  %v9516_v60 = vpop.permute.xlu0 %1726  ;;  %2244 = vperm.xlu1 %8070, %v9509_v29  }
 0x1fe   : > { %14217 = vst [vmem:[#allocation25_spill] sm:$0xff] %v9514_v23  ;;  %14218 = vst [vmem:[#allocation26_spill] sm:$0xff] %v9516_v60 }
 0x1ff   : > { %2298 = vperm.xlu0 %8069, %v8076_v48  }
 0x201   : > { %v9520_v31 = vpop.permute.xlu1 %1789  ;;  %v9522_v54 = vpop.permute.xlu0 %1784  ;;  %2303 = vperm.xlu1 %8070, %v8075_v16   ;;  %v8080_v16 = vld [vmem:[%s8339_s10 + $0x120] sm:$0xff] }
 0x202   : > { %14219 = vst [vmem:[#allocation29_spill] sm:$0xff] %v9520_v31  ;;  %14220 = vst [vmem:[#allocation30_spill] sm:$0xff] %v9522_v54  ;;  %v8079_v54 = vld [vmem:[%s8339_s10 + $0x128] sm:$0xff]  ;;  %v8085_v31 = vld [vmem:[%s8339_s10 + $0x170] sm:$0xff] }
 0x203   : > { %2308 = vperm.xlu0 %8069, %v8078_v32  }
 0x205   : > { %v9526_v53 = vpop.permute.xlu1 %1799  ;;  %v9528_v2 = vpop.permute.xlu0 %1794  ;;  %2313 = vperm.xlu1 %8070, %v8077_v41   ;;  %v8082_v41 = vld [vmem:[%s8339_s10 + $0x138] sm:$0xff] }
 0x206   : > { %14221 = vst [vmem:[#allocation31_spill] sm:$0xff] %v9526_v53  ;;  %14222 = vst [vmem:[#allocation32_spill] sm:$0xff] %v9528_v2  ;;  %v8081_v2 = vld [vmem:[%s8339_s10 + $0x140] sm:$0xff] }
 0x207   : > { %2318 = vperm.xlu0 %8069, %v8080_v16  }
 0x209   : > { %v9532_v35 = vpop.permute.xlu1 %1809  ;;  %v9534_v51 = vpop.permute.xlu0 %1804  ;;  %2323 = vperm.xlu1 %8070, %v8079_v54   ;;  %v8084_v54 = vld [vmem:[%s8339_s10 + $0x150] sm:$0xff] }
 0x20a   : > { %14223 = vst [vmem:[#allocation33_spill] sm:$0xff] %v9532_v35  ;;  %14224 = vst [vmem:[#allocation34_spill] sm:$0xff] %v9534_v51  ;;  %v8083_v51 = vld [vmem:[%s8339_s10 + $0x158] sm:$0xff] }
 0x20b   : > { %2328 = vperm.xlu0 %8069, %v8082_v41  }
 0x20d   : > { %v9538_v48 = vpop.permute.xlu1 %1819  ;;  %v9540_v53 = vpop.permute.xlu0 %1814  ;;  %2333 = vperm.xlu1 %8070, %v8081_v2   ;;  %v8086_v2 = vld [vmem:[%s8339_s10 + $0x168] sm:$0xff] }
 0x20e   : > { %14225 = vst [vmem:[#allocation35_spill] sm:$0xff] %v9538_v48  ;;  %14226 = vst [vmem:[#allocation36_spill] sm:$0xff] %v9540_v53  ;;  %v7700_v53 = vld [vmem:[%s8339_s10 + $0x199] sm:$0xff] }
 0x20f   : > { %2338 = vperm.xlu0 %8069, %v8084_v54   ;;  %v7684_v54 = vld [vmem:[%s8339_s10 + $0x198] sm:$0xff] }
 0x211   : > { %v9544_v32 = vpop.permute.xlu1 %1829  ;;  %v9546_v35 = vpop.permute.xlu0 %1824  ;;  %2343 = vperm.xlu1 %8070, %v8083_v51   ;;  %v7685_v51 = vld [vmem:[%s8339_s10 + $0x1a0] sm:$0xff] }
 0x212   : > { %14227 = vst [vmem:[#allocation37_spill] sm:$0xff] %v9544_v32  ;;  %14228 = vst [vmem:[#allocation38_spill] sm:$0xff] %v9546_v35  ;;  %v8094_v35 = vld [vmem:[%s8339_s10 + $0x139] sm:$0xff] }
 0x213   : > { %2348 = vperm.xlu0 %8069, %v8086_v2  }
 0x215   : > { %v9550_v16 = vpop.permute.xlu1 %1839  ;;  %v9552_v48 = vpop.permute.xlu0 %1834  ;;  %2353 = vperm.xlu1 %8070, %v8085_v31  }
 0x216   : > { %14229 = vst [vmem:[#allocation39_spill] sm:$0xff] %v9550_v16  ;;  %14230 = vst [vmem:[#allocation40_spill] sm:$0xff] %v9552_v48 }
 0x217   : > { %2358 = vperm.xlu0 %8069, %v9402_v10  }
 0x219   : > { %v9556_v41 = vpop.permute.xlu1 %1849  ;;  %v9558_v32 = vpop.permute.xlu0 %1844  ;;  %2363 = vperm.xlu1 %8070, %v9399_v49   ;;  %v8088_v49 = vld [vmem:[%s8339_s10 + $0xf1] sm:$0xff] }
 0x21a   : > { %14231 = vst [vmem:[#allocation41_spill] sm:$0xff] %v9556_v41  ;;  %14232 = vst [vmem:[#allocation42_spill] sm:$0xff] %v9558_v32  ;;  %v8087_v32 = vld [vmem:[%s8339_s10 + $0xf9] sm:$0xff] }
 0x21b   : > { %2368 = vperm.xlu0 %8069, %v7684_v54  }
 0x21d   : > { %v9564_v16 = vpop.permute.xlu1 %1859  ;;  %v9566_v48 = vpop.permute.xlu0 %1854  ;;  %2373 = vperm.xlu1 %8070, %v7685_v51   ;;  %v8090_v51 = vld [vmem:[%s8339_s10 + $0x109] sm:$0xff] }
 0x21e   : > { %14233 = vst [vmem:[#allocation43_spill] sm:$0xff] %v9564_v16  ;;  %14234 = vst [vmem:[#allocation44_spill] sm:$0xff] %v9566_v48  ;;  %v8089_v16 = vld [vmem:[%s8339_s10 + $0x111] sm:$0xff]  ;;  %v8091_v48 = vld [vmem:[%s8339_s10 + $0x129] sm:$0xff] }
 0x21f   : > { %2426 = vperm.xlu0 %8069, %v8088_v49  }
 0x221   : > { %v9568_v31 = vpop.permute.xlu1 %1918  ;;  %v9570_v2 = vpop.permute.xlu0 %1913  ;;  %2431 = vperm.xlu1 %8070, %v8087_v32  }
 0x222   : > { %14235 = vst [vmem:[#allocation45_spill] sm:$0xff] %v9568_v31  ;;  %14236 = vst [vmem:[#allocation46_spill] sm:$0xff] %v9570_v2  ;;  %v8092_v2 = vld [vmem:[%s8339_s10 + $0x121] sm:$0xff] }
 0x223   : > { %2436 = vperm.xlu0 %8069, %v8090_v51  }
 0x225   : > { %v9574_v10 = vpop.permute.xlu1 %1928  ;;  %v9576_v41 = vpop.permute.xlu0 %1923  ;;  %2441 = vperm.xlu1 %8070, %v8089_v16  }
 0x226   : > { %14237 = vst [vmem:[#allocation47_spill] sm:$0xff] %v9574_v10  ;;  %14238 = vst [vmem:[#allocation48_spill] sm:$0xff] %v9576_v41  ;;  %v8093_v10 = vld [vmem:[%s8339_s10 + $0x141] sm:$0xff] }
 0x227   : > { %2446 = vperm.xlu0 %8069, %v8092_v2  }
 0x229   : > { %v9580_v54 = vpop.permute.xlu1 %1938  ;;  %v9582_v31 = vpop.permute.xlu0 %1933  ;;  %2451 = vperm.xlu1 %8070, %v8091_v48   ;;  %v9601_v48 = vld [vmem:[%s13889_s3] ss:$0 sm:$0xff] }
 0x22a   : > { %14239 = vst [vmem:[#allocation49_spill] sm:$0xff] %v9580_v54  ;;  %14240 = vst [vmem:[#allocation50_spill] sm:$0xff] %v9582_v31  ;;  %v2769_v54 = vld [vmem:[#allocation2 + $0x2] sm:$0xff] }
 0x22b   : > { %2456 = vperm.xlu0 %8069, %v8094_v35   ;;  %v9610_v35 = vld [vmem:[%s13889_s3 + $0x1] ss:$0 sm:$0xff] }
 0x22d   : > { %v9586_v32 = vpop.permute.xlu1 %1948  ;;  %v9588_v49 = vpop.permute.xlu0 %1943  ;;  %2461 = vperm.xlu1 %8070, %v8093_v10   ;;  %v2681_v10 = vld [vmem:[#allocation2] sm:$0xff] }
 0x22e   : > { %14241 = vst [vmem:[#allocation51_spill] sm:$0xff] %v9586_v32  ;;  %14242 = vst [vmem:[#allocation52_spill] sm:$0xff] %v9588_v49  ;;  %v2718_v49 = vld [vmem:[#allocation2 + $0x9] sm:$0xff] }
 0x22f   : > { %2466 = vperm.xlu0 %8069, %v14203_v9   ;;  %v2873_v9 = vld [vmem:[#allocation2 + $0x19] sm:$0xff] }
 0x231   : > { %v9592_v41 = vpop.permute.xlu1 %1958  ;;  %v9594_v16 = vpop.permute.xlu0 %1953  ;;  %2471 = vperm.xlu1 %8070, %v14202_v45   ;;  %v2821_v45 = vld [vmem:[#allocation2 + $0x18] sm:$0xff] }
 0x232   : > { %14243 = vst [vmem:[#allocation53_spill] sm:$0xff] %v9592_v41  ;;  %14244 = vst [vmem:[#allocation54_spill] sm:$0xff] %v9594_v16  ;;  %v2717_v16 = vld [vmem:[#allocation2 + $0x1] sm:$0xff]  ;;  %v2701_v41 = vmul.f32 %v9601_v48, %v2681_v10 }
 0x233   : > { %2476 = vperm.xlu0 %8069, %v9041_v55   ;;  %v2703_v55 = vmul.f32 %v9601_v48, %v2821_v45  ;;  %v7701_v10 = vld [vmem:[%s8339_s10 + $0x1a1] sm:$0xff] }
 0x235   : > { %v9603_v2 = vpop.permute.xlu1 %1968  ;;  %v9605_v51 = vpop.permute.xlu0 %1963  ;;  %2481 = vperm.xlu1 %8070, %v9038_v30   ;;  %v9623_v30 = vld [vmem:[%s13889_s3 + $0x2] ss:$0 sm:$0xff] }
 0x236   : > { %14245 = vst [vmem:[#allocation55_spill] sm:$0xff] %v9603_v2  ;;  %14246 = vst [vmem:[#allocation58_spill] sm:$0xff] %v9605_v51  ;;  %v2737_v2 = vmul.f32 %v9610_v35, %v2717_v16  ;;  %v2682_v51 = vld [vmem:[#allocation2 + $0x8] sm:$0xff]  ;;  %v2739_v16 = vmul.f32 %v9610_v35, %v2873_v9  ;;  %v2789_v23 = vmul.f32 %v9623_v30, %v2769_v54 }
 0x237   : > { %2486 = vperm.xlu0 %8069, %v9458_v44   ;;  %v2925_v44 = vld [vmem:[#allocation2 + $0x1a] sm:$0xff]  ;;  %v2790_v54 = vmul.f32 %v9623_v30, %v2770_v12 }
 0x238   : > { %v2753_v60 = vadd.f32 %v2737_v2, %v2701_v41  ;;  %v2755_v37 = vadd.f32 %v2739_v16, %v2703_v55  ;;  %v2926_v16 = vld [vmem:[#allocation2 + $0x22] sm:$0xff] }
 0x239   : > { %v9616_v32 = vpop.permute.xlu1 %1978  ;;  %v9618_v31 = vpop.permute.xlu0 %1973  ;;  %2491 = vperm.xlu1 %8070, %v9455_v34   ;;  %v9641_v34 = vld [vmem:[%s13889_s3 + $0x3] ss:$0 sm:$0xff] }
 0x23a   : > { %14247 = vst [vmem:[#allocation59_spill] sm:$0xff] %v9616_v32  ;;  %14248 = vst [vmem:[#allocation56_spill] sm:$0xff] %v9618_v31  ;;  %v2702_v32 = vmul.f32 %v9601_v48, %v2682_v51  ;;  %v2738_v31 = vmul.f32 %v9610_v35, %v2718_v49  ;;  %v2822_v51 = vld [vmem:[#allocation2 + $0x20] sm:$0xff]  ;;  %v9643_v49 = vld [vmem:[#allocation2 + $0x30] sm:$0xff]  ;;  %v2805_v2 = vadd.f32 %v2789_v23, %v2753_v60 }
 0x23b   : > { %2496 = vperm.xlu0 %8069, %v7700_v53   ;;  %v2740_v53 = vmul.f32 %v9610_v35, %v2874_v22  ;;  %v2843_v23 = vmul.f32 %v9641_v34, %v9643_v49  ;;  %v9663_v60 = vld [vmem:[%s13889_s3 + $0x4] ss:$0 sm:$0xff] }
 0x23c   : > { %v2754_v41 = vadd.f32 %v2738_v31, %v2702_v32  ;;  %v9656_v31 = vld [vmem:[#allocation2 + $0x31] sm:$0xff] }
 0x23d   : > { %v9634_v52 = vpop.permute.xlu1 %1988  ;;  %v9636_v19 = vpop.permute.xlu0 %1983  ;;  %2501 = vperm.xlu1 %8070, %v7701_v10   ;;  %v2704_v10 = vmul.f32 %v9601_v48, %v2822_v51 }
 0x23e   : > { %14249 = vst [vmem:[#allocation60_spill] sm:$0xff] %v9634_v52  ;;  %14250 = vst [vmem:[#allocation61_spill] sm:$0xff] %v9636_v19  ;;  %v2841_v52 = vmul.f32 %v9641_v34, %v2821_v45  ;;  %v2791_v19 = vmul.f32 %v9623_v30, %v2925_v44  ;;  %v2806_v32 = vadd.f32 %v2790_v54, %v2754_v41  ;;  %v9680_v54 = vld [vmem:[%s13889_s3 + $0x5] ss:$0 sm:$0xff] }
 0x23f   : > { %2554 = vperm.xlu0 %8069, %v9093_v42   ;;  %v2842_v45 = vmul.f32 %v9641_v34, %v2822_v51  ;;  %v2756_v42 = vadd.f32 %v2740_v53, %v2704_v10  ;;  %v2893_v41 = vmul.f32 %v9663_v60, %v2873_v9  ;;  %v2792_v10 = vmul.f32 %v9623_v30, %v2926_v16 }
 0x240   : > { %v2807_v12 = vadd.f32 %v2791_v19, %v2755_v37  ;;  %v2857_v55 = vadd.f32 %v2841_v52, %v2805_v2  ;;  %v2705_v37 = vmul.f32 %v9601_v48, %v9643_v49  ;;  %v2741_v19 = vmul.f32 %v9610_v35, %v9656_v31  ;;  %v2979_v52 = vld [vmem:[#allocation2 + $0x38] sm:$0xff] }
 0x241   : > { %v9648_v14 = vpop.permute.xlu1 %2046  ;;  %v9650_v36 = vpop.permute.xlu0 %2041  ;;  %2559 = vperm.xlu1 %8070, %v9090_v50   ;;  %v2858_v2 = vadd.f32 %v2842_v45, %v2806_v32  ;;  %v2894_v9 = vmul.f32 %v9663_v60, %v2874_v22  ;;  %v2945_v32 = vmul.f32 %v9680_v54, %v2925_v44 }
 0x242   : > { %14251 = vst [vmem:[#allocation86_spill] sm:$0xff] %v9648_v14  ;;  %14252 = vst [vmem:[#allocation87_spill] sm:$0xff] %v9650_v36  ;;  %v2859_v51 = vadd.f32 %v2843_v23, %v2807_v12  ;;  %v2909_v53 = vadd.f32 %v2893_v41, %v2857_v55  ;;  %v3031_v12 = vld [vmem:[#allocation2 + $0x39] sm:$0xff]  ;;  %v2808_v23 = vadd.f32 %v2792_v10, %v2756_v42  ;;  %v2980_v55 = vld [vmem:[#allocation2 + $0x48] sm:$0xff] }
 0x243   : > { %2564 = vperm.xlu0 %8069, %v9113_v59   ;;  %v2844_v14 = vmul.f32 %v9641_v34, %v2979_v52  ;;  %v2757_v18 = vadd.f32 %v2741_v19, %v2705_v37  ;;  %v9697_v41 = vld [vmem:[%s13889_s3 + $0x6] ss:$0 sm:$0xff]  ;;  %v2706_v37 = vmul.f32 %v9601_v48, %v2979_v52 }
 0x244   : > { %v2961_v42 = vadd.f32 %v2945_v32, %v2909_v53 }
 0x245   : > { %v9666_v36 = vpop.permute.xlu1 %2056  ;;  %v9668_v50 = vpop.permute.xlu0 %2051  ;;  %2569 = vperm.xlu1 %8070, %v9110_v39   ;;  %v2860_v19 = vadd.f32 %v2844_v14, %v2808_v23  ;;  %v2896_v14 = vmul.f32 %v9663_v60, %v3031_v12  ;;  %v3032_v23 = vld [vmem:[#allocation2 + $0x49] sm:$0xff] }
 0x246   : > { %14253 = vst [vmem:[#allocation64_spill] sm:$0xff] %v9666_v36  ;;  %14254 = vst [vmem:[#allocation65_spill] sm:$0xff] %v9668_v50  ;;  %v3082_v50 = vld [vmem:[#allocation2 + $0x32] sm:$0xff]  ;;  %v2895_v36 = vmul.f32 %v9663_v60, %v9656_v31 }
 0x247   : > { %2574 = vperm.xlu0 %8069, %v9137_v17   ;;  %v2793_v22 = vmul.f32 %v9623_v30, %v3082_v50  ;;  %v2947_v10 = vmul.f32 %v9680_v54, %v3082_v50 }
 0x248   : > { %v2911_v45 = vadd.f32 %v2895_v36, %v2859_v51  ;;  %v2946_v36 = vmul.f32 %v9680_v54, %v2926_v16  ;;  %v3000_v16 = vmul.f32 %v9697_v41, %v2980_v55 }
 0x249   : > { %v9685_v39 = vpop.permute.xlu1 %2066  ;;  %v9687_v59 = vpop.permute.xlu0 %2061  ;;  %2579 = vperm.xlu1 %8070, %v9134_v28   ;;  %v2742_v28 = vmul.f32 %v9610_v35, %v3031_v12  ;;  %v2809_v51 = vadd.f32 %v2793_v22, %v2757_v18 }
 0x24a   : > { %14255 = vst [vmem:[#allocation68_spill] sm:$0xff] %v9685_v39  ;;  %14256 = vst [vmem:[#allocation57_spill] sm:$0xff] %v9687_v59  ;;  %v2910_v59 = vadd.f32 %v2894_v9, %v2858_v2  ;;  %v2845_v39 = vmul.f32 %v9641_v34, %v2980_v55  ;;  %v2998_v2 = vmul.f32 %v9697_v41, %v9643_v49  ;;  %v9716_v9 = vld [vmem:[%s13889_s3 + $0x7] ss:$0 sm:$0xff] }
 0x24b   : > { %2584 = vperm.xlu0 %8069, %v14209_v8   ;;  %v2963_v53 = vadd.f32 %v2947_v10, %v2911_v45  ;;  %v2999_v49 = vmul.f32 %v9697_v41, %v2979_v52  ;;  %v2912_v45 = vadd.f32 %v2896_v14, %v2860_v19  ;;  %v9725_v10 = vld [vmem:[#allocation2 + $0x50] sm:$0xff] }
 0x24c   : > { %v2962_v32 = vadd.f32 %v2946_v36, %v2910_v59  ;;  %v3014_v18 = vadd.f32 %v2998_v2, %v2961_v42  ;;  %v9732_v59 = vld [vmem:[%s13889_s3 + $0x8] ss:$0 sm:$0xff]  ;;  %v3050_v42 = vmul.f32 %v9716_v9, %v9656_v31  ;;  %v2846_v2 = vmul.f32 %v9641_v34, %v9725_v10 }
 0x24d   : > { %v9703_v17 = vpop.permute.xlu1 %2076  ;;  %v9705_v44 = vpop.permute.xlu0 %2071  ;;  %2589 = vperm.xlu1 %8070, %v14208_v40   ;;  %v2758_v40 = vadd.f32 %v2742_v28, %v2706_v37  ;;  %v3016_v37 = vadd.f32 %v3000_v16, %v2963_v53  ;;  %v3102_v31 = vmul.f32 %v9732_v59, %v3082_v50  ;;  %v3051_v53 = vmul.f32 %v9716_v9, %v3031_v12 }
 0x24e   : > { %14257 = vst [vmem:[#allocation88_spill] sm:$0xff] %v9703_v17  ;;  %14258 = vst [vmem:[#allocation69_spill] sm:$0xff] %v9705_v44  ;;  %v3083_v44 = vld [vmem:[#allocation2 + $0x3a] sm:$0xff]  ;;  %v2861_v17 = vadd.f32 %v2845_v39, %v2809_v51  ;;  %v3015_v52 = vadd.f32 %v2999_v49, %v2962_v32  ;;  %v2897_v39 = vmul.f32 %v9663_v60, %v3032_v23  ;;  %v3033_v49 = vld [vmem:[#allocation2 + $0x51] sm:$0xff] }
 0x24f   : > { %2594 = vperm.xlu0 %8069, %v14213_v58   ;;  %v2794_v28 = vmul.f32 %v9623_v30, %v3083_v44  ;;  %v2948_v36 = vmul.f32 %v9680_v54, %v3083_v44  ;;  %v3066_v19 = vadd.f32 %v3050_v42, %v3014_v18  ;;  %v3084_v58 = vld [vmem:[#allocation2 + $0x4a] sm:$0xff]  ;;  %v2707_v42 = vmul.f32 %v9601_v48, %v2980_v55 }
 0x250   : > { %v2913_v16 = vadd.f32 %v2897_v39, %v2861_v17  ;;  %v3001_v50 = vmul.f32 %v9697_v41, %v9725_v10  ;;  %v2949_v12 = vmul.f32 %v9680_v54, %v3084_v58  ;;  %v3104_v17 = vmul.f32 %v9732_v59, %v3084_v58 }
 0x251   : > { %v9720_v22 = vpop.permute.xlu1 %2086  ;;  %v9722_v8 = vpop.permute.xlu0 %2081  ;;  %2599 = vperm.xlu1 %8070, %v14212_v47   ;;  %v3052_v47 = vmul.f32 %v9716_v9, %v3032_v23  ;;  %v2810_v51 = vadd.f32 %v2794_v28, %v2758_v40  ;;  %v2964_v32 = vadd.f32 %v2948_v36, %v2912_v45  ;;  %v9750_v40 = vld [vmem:[#allocation2 + $0x52] sm:$0xff]  ;;  %v2743_v28 = vmul.f32 %v9610_v35, %v3032_v23 }
 0x252   : > { %14259 = vst [vmem:[#allocation89_spill] sm:$0xff] %v9720_v22  ;;  %14260 = vst [vmem:[#allocation27_spill] sm:$0xff] %v9722_v8  ;;  %v3118_v45 = vadd.f32 %v3102_v31, %v3066_v19  ;;  %v3105_v39 = vmul.f32 %v9732_v59, %v9750_v40  ;;  %v2965_v19 = vadd.f32 %v2949_v12, %v2913_v16  ;;  %v7716_v16 = vld [vmem:[%s8339_s10 + $0x19a] sm:$0xff] }
 0x253   : > { %2604 = vperm.xlu0 %8069, %v14216_v0   ;;  %v3068_v18 = vadd.f32 %v3052_v47, %v3016_v37  ;;  %v9759_v0 = vld [vmem:[#allocation2 + $0x60] sm:$0xff]  ;;  %v2862_v37 = vadd.f32 %v2846_v2, %v2810_v51  ;;  %v3017_v23 = vadd.f32 %v3001_v50, %v2964_v32  ;;  %v2898_v47 = vmul.f32 %v9663_v60, %v3033_v49 }
 0x254   : > { %v2759_v51 = vadd.f32 %v2743_v28, %v2707_v42  ;;  %v9774_v2 = vld [vmem:[%s13887_s1] ss:$0 sm:$0xff]  ;;  %v7717_v32 = vld [vmem:[%s8339_s10 + $0x1a2] sm:$0xff]  ;;  %v2795_v50 = vmul.f32 %v9623_v30, %v3084_v58 }
 0x255   : > { %v9742_v14 = vpop.permute.xlu1 %2096  ;;  %v9744_v8 = vpop.permute.xlu0 %2091  ;;  %2609 = vperm.xlu1 %8070, %v9241_v1   ;;  %v3103_v1 = vmul.f32 %v9732_v59, %v3083_v44  ;;  %v3120_v44 = vadd.f32 %v3104_v17, %v3068_v18  ;;  %v1607_v31 = vmul.f32 %v9774_v2, %v9410_v46  ;;  %v1609_v18 = vmul.f32 %v9774_v2, %v9418_v4 }
 0x256   : > { %14261 = vst [vmem:[#allocation28_spill] sm:$0xff] %v9742_v14  ;;  %14262 = vst [vmem:[#allocation72_spill] sm:$0xff] %v9744_v8  ;;  %v3067_v14 = vadd.f32 %v3051_v53, %v3015_v52  ;;  %v3053_v52 = vmul.f32 %v9716_v9, %v3033_v49  ;;  %v1606_v53 = vmul.f32 %v9774_v2, %v9412_v62  ;;  %v9798_v4 = vsel %vm250_vm0, %v3118_v45, 0.0 }
 0x257   : > { %2614 = vperm.xlu0 %8069, %v9512_v63   ;;  %v3002_v63 = vmul.f32 %v9697_v41, %v9759_v0  ;;  %v1608_v42 = vmul.f32 %v9774_v2, %v9420_v26  ;;  %v2914_v28 = vadd.f32 %v2898_v47, %v2862_v37  ;;  %v9800_v26 = vld [vmem:[#allocation2 + $0x62] sm:$0xff]  ;;  %v2811_v58 = vadd.f32 %v2795_v50, %v2759_v51  ;;  %v9818_v51 = vld [vmem:[%s13888_s2] ss:$0 sm:$0xff] }
 0x258   : > { %v3069_v62 = vadd.f32 %v3053_v52, %v3017_v23  ;;  %v2708_v37 = vmul.f32 %v9601_v48, %v9725_v10  ;;  %v2744_v23 = vmul.f32 %v9610_v35, %v3033_v49  ;;  %v1611_v52 = vmul.f32 %v9774_v2, %v9424_v27 }
 0x259   : > { %v9761_v36 = vpop.permute.xlu1 %2106  ;;  %v9763_v55 = vpop.permute.xlu0 %2101  ;;  %2619 = vperm.xlu1 %8070, %v9509_v29   ;;  %v3119_v29 = vadd.f32 %v3103_v1, %v3067_v14  ;;  %v3018_v17 = vadd.f32 %v3002_v63, %v2965_v19  ;;  %v2950_v14 = vmul.f32 %v9680_v54, %v9750_v40  ;;  %v2847_v1 = vmul.f32 %v9641_v34, %v9759_v0 }
 0x25a   : > { %14263 = vst [vmem:[#allocation92_spill] sm:$0xff] %v9761_v36  ;;  %14264 = vst [vmem:[#allocation93_spill] sm:$0xff] %v9763_v55  ;;  %v3034_v55 = vld [vmem:[#allocation2 + $0x61] sm:$0xff]  ;;  %v1610_v19 = vmul.f32 %v9774_v2, %v9426_v56  ;;  %v9810_v47 = vsel %vm250_vm0, %v3120_v44, 0.0  ;;  %v9821_v10 = vadd.f32 %v9818_v51, %v1607_v31  ;;  %v9824_v27 = vadd.f32 %v9818_v51, %v1606_v53  ;;  %v9840_v36 = vld [vmem:[#allocation2 + $0x6a] sm:$0xff] }
 0x25b   : > { %2624 = vperm.xlu0 %8069, %v7716_v16   ;;  %v9813_v45 = vsel %vm250_vm0, %v3119_v29, 0.0  ;;  %v3054_v56 = vmul.f32 %v9716_v9, %v3034_v55  ;;  %v2966_v49 = vadd.f32 %v2950_v14, %v2914_v28  ;;  %v9828_v44 = vadd.f32 %v9818_v51, %v1609_v18 }
 0x25c   : > { %v9831_v16 = vadd.f32 %v9818_v51, %v1608_v42  ;;  %v3121_v50 = vadd.f32 %v3105_v39, %v3069_v62  ;;  %v3106_v31 = vmul.f32 %v9732_v59, %v9800_v26  ;;  %v2863_v28 = vadd.f32 %v2847_v1, %v2811_v58 }
 0x25d   : > { %v9789_v12 = vpop.permute.xlu1 %2116  ;;  %v9791_v46 = vpop.permute.xlu0 %2111  ;;  %2629 = vperm.xlu1 %8070, %v7717_v32   ;;  %v2983_v32 = vld [vmem:[#allocation2 + $0x68] sm:$0xff]  ;;  %14267 = vst [vmem:[#allocation63_spill] sm:$0xff] %v9828_v44  ;;  %v3070_v53 = vadd.f32 %v3054_v56, %v3018_v17  ;;  %v2760_v18 = vadd.f32 %v2744_v23, %v2708_v37  ;;  %v9843_v14 = vadd.f32 %v9818_v51, %v1611_v52 }
 0x25e   : > { %14265 = vst [vmem:[#allocation73_spill] sm:$0xff] %v9789_v12  ;;  %14266 = vst [vmem:[#allocation62_spill] sm:$0xff] %v9791_v46  ;;  %v3035_v46 = vld [vmem:[#allocation2 + $0x69] sm:$0xff]  ;;  %v3003_v12 = vmul.f32 %v9697_v41, %v2983_v32  ;;  %v9846_v42 = vadd.f32 %v9818_v51, %v1610_v19  ;;  %v1613_v39 = vmul.f32 %v9774_v2, %v9430_v15 }
 0x25f   : > { %14268 = vst [vmem:[#allocation96_spill] sm:$0xff] %v9831_v16  ;;  %14271 = vst [vmem:[#allocation66_spill] sm:$0xff] %v9843_v14  ;;  %v1612_v62 = vmul.f32 %v9774_v2, %v9432_v21  ;;  %v3055_v17 = vmul.f32 %v9716_v9, %v3035_v46  ;;  %v2899_v56 = vmul.f32 %v9663_v60, %v3034_v55  ;;  %v9865_v21 = vsel %vm250_vm0, %v3121_v50, 0.0  ;;  %v3090_v16 = vld [vmem:[#allocation2 + $0x92] sm:$0xff] }
 0x260   : > { %14272 = vst [vmem:[#allocation67_spill] sm:$0xff] %v9846_v42  ;;  %v2796_v1 = vmul.f32 %v9623_v30, %v9750_v40  ;;  %v1615_v58 = vmul.f32 %v9774_v2, %v9436_v6  ;;  %v1614_v37 = vmul.f32 %v9774_v2, %v9438_v13  ;;  %v3122_v52 = vadd.f32 %v3106_v31, %v3070_v53  ;;  %v9869_v40 = vld [vmem:[#allocation2 + $0x79] sm:$0xff] }
 0x261   : > { %v9833_v29 = vpop.permute.xlu1 %2174  ;;  %v9835_v63 = vpop.permute.xlu0 %2169  ;;  %v2915_v19 = vadd.f32 %v2899_v56, %v2863_v28  ;;  %v2848_v13 = vmul.f32 %v9641_v34, %v2983_v32  ;;  %v2709_v50 = vmul.f32 %v9601_v48, %v9759_v0  ;;  %v2745_v31 = vmul.f32 %v9610_v35, %v3034_v55 }
 0x262   : > { %14269 = vst [vmem:[#allocation76_spill] sm:$0xff] %v9833_v29  ;;  %14270 = vst [vmem:[#allocation97_spill] sm:$0xff] %v9835_v63  ;;  %v3019_v63 = vadd.f32 %v3003_v12, %v2966_v49  ;;  %v3107_v12 = vmul.f32 %v9732_v59, %v9840_v36  ;;  %v2984_v49 = vld [vmem:[#allocation2 + $0x78] sm:$0xff]  ;;  %v2812_v6 = vadd.f32 %v2796_v1, %v2760_v18 }
 0x263   : > { %v9871_v29 = vld [vmem:[#allocation2 + $0x7a] sm:$0xff]  ;;  %v1617_v53 = vmul.f32 %v9774_v2, %v9442_v11  ;;  %v1616_v28 = vmul.f32 %v9774_v2, %v9444_v3  ;;  %v2951_v56 = vmul.f32 %v9680_v54, %v9800_v26  ;;  %v3004_v0 = vmul.f32 %v9697_v41, %v2984_v49 }
 0x264   : > { %v3071_v18 = vadd.f32 %v3055_v17, %v3019_v63  ;;  %v3056_v55 = vmul.f32 %v9716_v9, %v9869_v40  ;;  %v9901_v11 = vmul.f32 %v9732_v59, %v9871_v29  ;;  %v9904_v3 = vadd.f32 %v9818_v51, %v1614_v37 }
 0x265   : > { %v9860_v23 = vpop.permute.xlu1 %2184  ;;  %v9862_v15 = vpop.permute.xlu0 %2179  ;;  %v9907_v63 = vsel %vm250_vm0, %v3122_v52, 0.0  ;;  %v2967_v17 = vadd.f32 %v2951_v56, %v2915_v19  ;;  %v2761_v8 = vadd.f32 %v2745_v31, %v2709_v50  ;;  %v2710_v22 = vmul.f32 %v9601_v48, %v2983_v32  ;;  %v9920_v19 = vld [vmem:[#allocation2 + $0x81] sm:$0xff] }
 0x266   : > { %14273 = vst [vmem:[#allocation77_spill] sm:$0xff] %v9860_v23  ;;  %14274 = vst [vmem:[#allocation100_spill] sm:$0xff] %v9862_v15  ;;  %v9875_v23 = vadd.f32 %v9818_v51, %v1613_v39  ;;  %v9878_v15 = vadd.f32 %v9818_v51, %v1612_v62  ;;  %v9890_v39 = vadd.f32 %v9818_v51, %v1615_v58  ;;  %v9927_v50 = vld [vmem:[#allocation2 + $0x82] sm:$0xff] }
 0x267   : > { %14280 = vst [vmem:[#allocation104_spill] sm:$0xff] %v9904_v3  ;;  %14281 = vst [vmem:[#allocation105_spill] sm:$0xff] %v9907_v63  ;;  %v2864_v58 = vadd.f32 %v2848_v13, %v2812_v6  ;;  %v3123_v37 = vadd.f32 %v3107_v12, %v3071_v18  ;;  %v2952_v52 = vmul.f32 %v9680_v54, %v9840_v36 }
 0x268   : > { %14275 = vst [vmem:[#allocation101_spill] sm:$0xff] %v9875_v23  ;;  %14276 = vst [vmem:[#allocation80_spill] sm:$0xff] %v9878_v15  ;;  %v9913_v15 = vadd.f32 %v9818_v51, %v1617_v53  ;;  %v9916_v23 = vadd.f32 %v9818_v51, %v1616_v28  ;;  %v2711_v31 = vmul.f32 %v9601_v48, %v2984_v49 }
 0x269   : > { %14277 = vst [vmem:[#allocation70_spill] sm:$0xff] %v9890_v39  ;;  %v9892_v62 = vpop.permute.xlu1 %2194  ;;  %v9894_v1 = vpop.permute.xlu0 %2189  ;;  %v2746_v39 = vmul.f32 %v9610_v35, %v3035_v46  ;;  %v2747_v12 = vmul.f32 %v9610_v35, %v9869_v40  ;;  %v1619_v53 = vmul.f32 %v9774_v2, %v9448_v5  ;;  %v1618_v28 = vmul.f32 %v9774_v2, %v9450_v24 }
 0x26a   : > { %14278 = vst [vmem:[#allocation71_spill] sm:$0xff] %v9892_v62  ;;  %14279 = vst [vmem:[#allocation81_spill] sm:$0xff] %v9894_v1  ;;  %v2985_v62 = vld [vmem:[#allocation2 + $0x80] sm:$0xff]  ;;  %v2900_v1 = vmul.f32 %v9663_v60, %v3035_v46  ;;  %v2797_v46 = vmul.f32 %v9623_v30, %v9800_v26  ;;  %v3020_v18 = vadd.f32 %v3004_v0, %v2967_v17  ;;  %v9944_v42 = vsel %vm250_vm0, %v3123_v37, 0.0 }
 0x26b   : > { %14282 = vst [vmem:[#allocation74_spill] sm:$0xff] %v9913_v15  ;;  %14283 = vst [vmem:[#allocation75_spill] sm:$0xff] %v9916_v23  ;;  %v3005_v32 = vmul.f32 %v9697_v41, %v2985_v62  ;;  %v3057_v23 = vmul.f32 %v9716_v9, %v9920_v19  ;;  %v2849_v15 = vmul.f32 %v9641_v34, %v2984_v49  ;;  %v9961_v49 = vld [vmem:[#allocation2 + $0x99] sm:$0xff] }
 0x26c   : > { %v2916_v56 = vadd.f32 %v2900_v1, %v2864_v58  ;;  %v2813_v26 = vadd.f32 %v2797_v46, %v2761_v8  ;;  %v2762_v3 = vadd.f32 %v2746_v39, %v2710_v22  ;;  %14286 = vst [vmem:[#allocation84_spill] sm:$0xff] %v9944_v42  ;;  %v9948_v5 = vmul.f32 %v9732_v59, %v9927_v50  ;;  %v9959_v22 = vld [vmem:[#allocation2 + $0x98] sm:$0xff] }
 0x26d   : > { %v9922_v6 = vpop.permute.xlu1 %2204  ;;  %v9924_v13 = vpop.permute.xlu0 %2199  ;;  %v2712_v24 = vmul.f32 %v9601_v48, %v2985_v62  ;;  %v2748_v1 = vmul.f32 %v9610_v35, %v9920_v19  ;;  %v2798_v8 = vmul.f32 %v9623_v30, %v9840_v36  ;;  %v2763_v39 = vadd.f32 %v2747_v12, %v2711_v31 }
 0x26e   : > { %14284 = vst [vmem:[#allocation8_spill] sm:$0xff] %v9922_v6  ;;  %14285 = vst [vmem:[#allocation9_spill] sm:$0xff] %v9924_v13  ;;  %v2986_v13 = vld [vmem:[#allocation2 + $0x90] sm:$0xff]  ;;  %v9967_v46 = vadd.f32 %v9818_v51, %v1619_v53  ;;  %v2968_v42 = vadd.f32 %v2952_v52, %v2916_v56  ;;  %v2865_v14 = vadd.f32 %v2849_v15, %v2813_v26 }
 0x26f   : > { %v9938_v6 = vld [vmem:[#allocation2 + $0x91] sm:$0xff]  ;;  %v2713_v58 = vmul.f32 %v9601_v48, %v2986_v13  ;;  %v2814_v36 = vadd.f32 %v2798_v8, %v2762_v3  ;;  %v2850_v63 = vmul.f32 %v9641_v34, %v2985_v62  ;;  %v2799_v31 = vmul.f32 %v9623_v30, %v9871_v29 }
 0x270   : > { %v2749_v37 = vmul.f32 %v9610_v35, %v9938_v6  ;;  %v2901_v12 = vmul.f32 %v9663_v60, %v9869_v40  ;;  %v2764_v44 = vadd.f32 %v2748_v1, %v2712_v24  ;;  %v2714_v53 = vmul.f32 %v9601_v48, %v9959_v22  ;;  %v9991_v24 = vld [vmem:[#allocation2 + $0xa8] sm:$0xff] }
 0x271   : > { %v9953_v0 = vpop.permute.xlu1 %2214  ;;  %v9955_v17 = vpop.permute.xlu0 %2209  ;;  %v1621_v15 = vmul.f32 %v9774_v2, %v9460_v20  ;;  %v2815_v3 = vadd.f32 %v2799_v31, %v2763_v39  ;;  %v2851_v52 = vmul.f32 %v9641_v34, %v2986_v13  ;;  %v1620_v40 = vmul.f32 %v9774_v2, %v9462_v43  ;;  %v9997_v39 = vld [vmem:[#allocation2 + $0x9a] sm:$0xff] }
 0x272   : > { %14287 = vst [vmem:[#allocation85_spill] sm:$0xff] %v9953_v0  ;;  %14288 = vst [vmem:[#allocation78_spill] sm:$0xff] %v9955_v17  ;;  %v9970_v0 = vadd.f32 %v9818_v51, %v1618_v28  ;;  %v3072_v17 = vadd.f32 %v3056_v55, %v3020_v18  ;;  %v2750_v28 = vmul.f32 %v9610_v35, %v9961_v49 }
 0x273   : > { %v2765_v18 = vadd.f32 %v2749_v37, %v2713_v58  ;;  %v3021_v26 = vadd.f32 %v3005_v32, %v2968_v42  ;;  %v2800_v1 = vmul.f32 %v9623_v30, %v9927_v50  ;;  %v2917_v20 = vadd.f32 %v2901_v12, %v2865_v14 }
 0x274   : > { %v3124_v56 = vadd.f32 %v9901_v11, %v3072_v17  ;;  %v2953_v8 = vmul.f32 %v9680_v54, %v9871_v29  ;;  %v2801_v58 = vmul.f32 %v9623_v30, %v3090_v16  ;;  %v3006_v37 = vmul.f32 %v9697_v41, %v2986_v13 }
 0x275   : > { %v9983_v55 = vpop.permute.xlu1 %2224  ;;  %v9985_v62 = vpop.permute.xlu0 %2219  ;;  %v2816_v43 = vadd.f32 %v2800_v1, %v2764_v44  ;;  %v2852_v2 = vmul.f32 %v9641_v34, %v9959_v22  ;;  %v2766_v42 = vadd.f32 %v2750_v28, %v2714_v53  ;;  %v2902_v14 = vmul.f32 %v9663_v60, %v9920_v19  ;;  %v10024_v19 = vld [vmem:[%s13887_s1 + $0x1] ss:$0 sm:$0xff] }
 0x276   : > { %14289 = vst [vmem:[#allocation79_spill] sm:$0xff] %v9985_v62  ;;  %v2866_v62 = vadd.f32 %v2850_v63, %v2814_v36  ;;  %v2867_v29 = vadd.f32 %v2851_v52, %v2815_v3  ;;  %v10009_v63 = vld [vmem:[#allocation2 + $0xb0] sm:$0xff]  ;;  %v2817_v17 = vadd.f32 %v2801_v58, %v2765_v18  ;;  %v2853_v36 = vmul.f32 %v9641_v34, %v9991_v24 }
 0x277   : > { %v10014_v44 = vadd.f32 %v9818_v51, %v1621_v15  ;;  %v10017_v13 = vadd.f32 %v9818_v51, %v1620_v40  ;;  %v3073_v31 = vadd.f32 %v3057_v23, %v3021_v26  ;;  %v2802_v12 = vmul.f32 %v9623_v30, %v9997_v39  ;;  %v10032_v23 = vld [vmem:[#allocation2 + $0xa9] sm:$0xff] }
 0x278   : > { %v1735_v53 = vmul.f32 %v10024_v19, %v9466_v61  ;;  %v2969_v28 = vadd.f32 %v2953_v8, %v2917_v20  ;;  %v2918_v3 = vadd.f32 %v2902_v14, %v2866_v62  ;;  %v2903_v15 = vmul.f32 %v9663_v60, %v9938_v6 }
 0x279   : > { %v10003_v11 = vpop.permute.xlu1 %2234  ;;  %v10005_v32 = vpop.permute.xlu0 %2229  ;;  %v1734_v51 = vmul.f32 %v10024_v19, %v9468_v38  ;;  %v2868_v52 = vadd.f32 %v2852_v2, %v2816_v43  ;;  %v2818_v18 = vadd.f32 %v2802_v12, %v2766_v42  ;;  %v2854_v40 = vmul.f32 %v9641_v34, %v10009_v63 }
 0x27a   : > { %3135 = vadd.xlane.f32.xlu0 %v9798_v4  ;;  %v3058_v62 = vmul.f32 %v9716_v9, %v9938_v6  ;;  %v2954_v1 = vmul.f32 %v9680_v54, %v9927_v50  ;;  %v2919_v38 = vadd.f32 %v2903_v15, %v2867_v29  ;;  %v2869_v20 = vadd.f32 %v2853_v36, %v2817_v17  ;;  %v3041_v6 = vld [vmem:[#allocation2 + $0xb1] sm:$0xff] }
 0x27b   : > { %v10046_v8 = vsel %vm250_vm0, %v3124_v56, 0.0  ;;  %v3125_v58 = vadd.f32 %v9948_v5, %v3073_v31  ;;  %v3110_v43 = vmul.f32 %v9732_v59, %v3090_v16  ;;  %v2904_v4 = vmul.f32 %v9663_v60, %v9961_v49  ;;  %v10061_v5 = vld [vmem:[#allocation2 + $0xaa] sm:$0xff] }
 0x27c   : > { %v3022_v2 = vadd.f32 %v3006_v37, %v2969_v28  ;;  %v2970_v42 = vadd.f32 %v2954_v1, %v2918_v3  ;;  %v2955_v14 = vmul.f32 %v9680_v54, %v3090_v16  ;;  %v2905_v50 = vmul.f32 %v9663_v60, %v10032_v23 }
 0x27d   : > { %v10036_v26 = vpop.permute.xlu1 %2244  ;;  %v10039_v61 = vpop.permute.xlu0 %2239  ;;  %v10056_v29 = vadd.f32 %v1735_v53, %v9821_v10  ;;  %v10059_v56 = vadd.f32 %v1734_v51, %v9824_v27  ;;  %v2920_v17 = vadd.f32 %v2904_v4, %v2868_v52  ;;  %v2870_v36 = vadd.f32 %v2854_v40, %v2818_v18  ;;  %v10089_v40 = vld [vmem:[#allocation2 + $0xc0] sm:$0xff] }
 0x27e   : > { %v1737_v37 = vmul.f32 %v10024_v19, %v9472_v7  ;;  %3141 = vadd.xlane.f32.xlu0 %v9810_v47  ;;  %v3007_v10 = vmul.f32 %v9697_v41, %v9959_v22  ;;  %v2971_v12 = vadd.f32 %v2955_v14, %v2919_v38  ;;  %v2921_v53 = vadd.f32 %v2905_v50, %v2869_v20  ;;  %v10081_v22 = vld [vmem:[#allocation2 + $0xb2] sm:$0xff]  ;;  %v14293_v50 = vld [vmem:[#allocation105_spill] sm:$0xff] }
 0x27f   : > { %v1736_v27 = vmul.f32 %v10024_v19, %v9474_v57  ;;  %v3155_v28 = vsel %vm250_vm0, %v3125_v58, 0.0  ;;  %v2956_v7 = vmul.f32 %v9680_v54, %v9997_v39  ;;  %v2906_v3 = vmul.f32 %v9663_v60, %v3041_v6 }
 0x280   : > { %v3074_v47 = vadd.f32 %v3058_v62, %v3022_v2  ;;  %v3023_v15 = vadd.f32 %v3007_v10, %v2970_v42  ;;  %v3008_v51 = vmul.f32 %v9697_v41, %v9991_v24  ;;  %v2957_v52 = vmul.f32 %v9680_v54, %v10061_v5  ;;  %v14291_v2 = vld [vmem:[#allocation63_spill] sm:$0xff]  ;;  %v14292_v42 = vld [vmem:[#allocation96_spill] sm:$0xff]  ;;  %v10115_v10 = vld [vmem:[#allocation2 + $0xc8] sm:$0xff] }
 0x281   : > { %v10065_v31 = vpop.permute.xlu1 %2303  ;;  %v10068_v16 = vpop.permute.xlu0 %2298  ;;  %3138 = vadd.xlane.f32.xlu1 %v9813_v45  ;;  %v3059_v57 = vmul.f32 %v9716_v9, %v9961_v49  ;;  %v3111_v45 = vmul.f32 %v9732_v59, %v9997_v39  ;;  %v2972_v18 = vadd.f32 %v2956_v7, %v2920_v17  ;;  %v2922_v1 = vadd.f32 %v2906_v3, %v2870_v36 }
 0x282   : > { %v1739_v62 = vmul.f32 %v10024_v19, %v9478_v25  ;;  %v1738_v38 = vmul.f32 %v10024_v19, %v9480_v33  ;;  %3144 = vadd.xlane.f32.xlu0 %v9865_v21  ;;  %v3024_v49 = vadd.f32 %v3008_v51, %v2971_v12  ;;  %v2973_v4 = vadd.f32 %v2957_v52, %v2921_v53  ;;  %v14294_v12 = vld [vmem:[#allocation17_spill] sm:$0xff] }
 0x283   : > { %v10101_v39 = vadd.f32 %v1737_v37, %v14291_v2  ;;  %v10104_v14 = vadd.f32 %v1736_v27, %v14292_v42  ;;  %v3009_v25 = vmul.f32 %v9697_v41, %v10009_v63  ;;  %v2958_v33 = vmul.f32 %v9680_v54, %v10081_v22  ;;  %v14295_v27 = vld [vmem:[#allocation18_spill] sm:$0xff]  ;;  %v14298_v42 = vld [vmem:[#allocation84_spill] sm:$0xff] }
 0x284   : > { %v3126_v17 = vadd.f32 %v3110_v43, %v3074_v47  ;;  %v3075_v21 = vadd.f32 %v3059_v57, %v3023_v15  ;;  %v3060_v36 = vmul.f32 %v9716_v9, %v10032_v23  ;;  %v3010_v37 = vmul.f32 %v9697_v41, %v10089_v40  ;;  %v10121_v51 = vld [vmem:[#allocation2 + $0xc1] sm:$0xff]  ;;  %v14297_v15 = vld [vmem:[#allocation67_spill] sm:$0xff] }
 0x285   : > { %v10095_v20 = vpop.permute.xlu1 %2313  ;;  %v10098_v58 = vpop.permute.xlu0 %2308  ;;  %3147 = vadd.xlane.f32.xlu1 %v14293_v50  ;;  %v1741_v53 = vmul.f32 %v10024_v19, %v14294_v12  ;;  %v1740_v7 = vmul.f32 %v10024_v19, %v14295_v27  ;;  %v3025_v3 = vadd.f32 %v3009_v25, %v2972_v18  ;;  %v2974_v52 = vadd.f32 %v2958_v33, %v2922_v1  ;;  %v14296_v43 = vld [vmem:[#allocation66_spill] sm:$0xff] }
 0x286   : > { %14290 = vst [vmem:[#allocation10_spill] sm:$0xff] %v10098_v58  ;;  %v10124_v47 = vadd.f32 %v1739_v62, %v14296_v43  ;;  %v10127_v57 = vadd.f32 %v1738_v38, %v14297_v15  ;;  %3150 = vadd.xlane.f32.xlu0 %v14298_v42  ;;  %v3076_v12 = vadd.f32 %v3060_v36, %v3024_v49  ;;  %v3158_v25 = vsel %vm250_vm0, %v3126_v17, 0.0  ;;  %v10154_v43 = vld [vmem:[#allocation2 + $0xc2] sm:$0xff] }
 0x287   : > { %v3026_v58 = vadd.f32 %v3010_v37, %v2973_v4  ;;  %v3061_v18 = vmul.f32 %v9716_v9, %v3041_v6  ;;  %v3011_v1 = vmul.f32 %v9697_v41, %v10115_v10  ;;  %v2716_v62 = vmul.f32 %v9601_v48, %v10009_v63  ;;  %v14300_v4 = vld [vmem:[#allocation101_spill] sm:$0xff]  ;;  %v14301_v41 = vld [vmem:[#allocation80_spill] sm:$0xff] }
 0x288   : > { %v2752_v38 = vmul.f32 %v9610_v35, %v3041_v6  ;;  %v3127_v33 = vadd.f32 %v3111_v45, %v3075_v21  ;;  %v3112_v27 = vmul.f32 %v9732_v59, %v10061_v5  ;;  %v3062_v49 = vmul.f32 %v9716_v9, %v10121_v51 }
 0x289   : > { %v10129_v2 = vpop.permute.xlu1 %2323  ;;  %v10132_v50 = vpop.permute.xlu0 %2318  ;;  %3153 = vadd.xlane.f32.xlu1 %v10046_v8  ;;  %v10146_v8 = vld [vmem:[#allocation2 + $0xc9] sm:$0xff]  ;;  %v10149_v36 = vadd.f32 %v1741_v53, %v14300_v4  ;;  %v10152_v37 = vadd.f32 %v1740_v7, %v14301_v41  ;;  %v3077_v63 = vadd.f32 %v3061_v18, %v3025_v3  ;;  %v3027_v6 = vadd.f32 %v3011_v1, %v2974_v52  ;;  %v14305_v18 = vld [vmem:[#allocation20_spill] sm:$0xff] }
 0x28a   : > { %14299 = vst [vmem:[#allocation11_spill] sm:$0xff] %v10132_v50  ;;  %3156 = vadd.xlane.f32.xlu0 %v3155_v28  ;;  %v3128_v21 = vadd.f32 %v3112_v27, %v3076_v12  ;;  %v3078_v15 = vadd.f32 %v3062_v49, %v3026_v58  ;;  %v2715_v42 = vmul.f32 %v9601_v48, %v9991_v24  ;;  %v14304_v4 = vld [vmem:[#allocation19_spill] sm:$0xff]  ;;  %v14306_v12 = vld [vmem:[#allocation21_spill] sm:$0xff]  ;;  %v3161_v1 = vsel %vm250_vm0, %v3127_v33, 0.0  ;;  %v14309_v50 = vld [vmem:[#allocation24_spill] sm:$0xff] }
 0x28b   : > { %v2751_v53 = vmul.f32 %v9610_v35, %v10032_v23  ;;  %v1743_v7 = vmul.f32 %v10024_v19, %v14304_v4  ;;  %v3113_v3 = vmul.f32 %v9732_v59, %v10081_v22  ;;  %v3063_v28 = vmul.f32 %v9716_v9, %v10146_v8  ;;  %v10177_v27 = vld [vmem:[#allocation2 + $0xca] sm:$0xff] }
 0x28c   : > { %v2768_v52 = vadd.f32 %v2752_v38, %v2716_v62  ;;  %v1742_v58 = vmul.f32 %v10024_v19, %v14305_v18  ;;  %v1745_v24 = vmul.f32 %v10024_v19, %v14306_v12  ;;  %v3114_v23 = vmul.f32 %v9732_v59, %v10154_v43  ;;  %v14308_v62 = vld [vmem:[#allocation23_spill] sm:$0xff] }
 0x28d   : > { %v10156_v17 = vpop.permute.xlu1 %2333  ;;  %v10158_v45 = vpop.permute.xlu0 %2328  ;;  %3159 = vadd.xlane.f32.xlu1 %v3158_v25  ;;  %v14307_v25 = vld [vmem:[#allocation22_spill] sm:$0xff]  ;;  %v3129_v41 = vadd.f32 %v3113_v3, %v3077_v63  ;;  %v3079_v4 = vadd.f32 %v3063_v28, %v3027_v6  ;;  %v2804_v9 = vmul.f32 %v9623_v30, %v10081_v22  ;;  %v1747_v38 = vmul.f32 %v10024_v19, %v14308_v62 }
 0x28e   : > { %14302 = vst [vmem:[#allocation82_spill] sm:$0xff] %v10156_v17  ;;  %14303 = vst [vmem:[#allocation83_spill] sm:$0xff] %v10158_v45  ;;  %v1744_v49 = vmul.f32 %v10024_v19, %v14307_v25  ;;  %3162 = vadd.xlane.f32.xlu0 %v3161_v1  ;;  %v3164_v12 = vsel %vm250_vm0, %v3128_v21, 0.0  ;;  %v3130_v45 = vadd.f32 %v3114_v23, %v3078_v15  ;;  %v14310_v3 = vld [vmem:[#allocation70_spill] sm:$0xff]  ;;  %v14311_v1 = vld [vmem:[#allocation104_spill] sm:$0xff] }
 0x28f   : > { %v2767_v17 = vadd.f32 %v2751_v53, %v2715_v42  ;;  %v1746_v25 = vmul.f32 %v10024_v19, %v14309_v50  ;;  %v3115_v63 = vmul.f32 %v9732_v59, %v10177_v27  ;;  %v2820_v22 = vadd.f32 %v2804_v9, %v2768_v52  ;;  %v14312_v21 = vld [vmem:[#allocation25_spill] sm:$0xff]  ;;  %v14313_v42 = vld [vmem:[#allocation74_spill] sm:$0xff]  ;;  %v14314_v59 = vld [vmem:[#allocation75_spill] sm:$0xff] }
 0x290   : > { %v2856_v6 = vmul.f32 %v9641_v34, %v10115_v10  ;;  %v10197_v28 = vadd.f32 %v1743_v7, %v14310_v3  ;;  %v10200_v62 = vadd.f32 %v1742_v58, %v14311_v1  ;;  %v1749_v15 = vmul.f32 %v10024_v19, %v14312_v21  ;;  %v14315_v7 = vld [vmem:[#allocation26_spill] sm:$0xff] }
 0x291   : > { %v10185_v18 = vpop.permute.xlu1 %2343  ;;  %v10187_v33 = vpop.permute.xlu0 %2338  ;;  %3165 = vadd.xlane.f32.xlu1 %v3164_v12  ;;  %v2803_v50 = vmul.f32 %v9623_v30, %v10061_v5  ;;  %v10207_v53 = vadd.f32 %v1745_v24, %v14313_v42  ;;  %v10210_v52 = vadd.f32 %v1744_v49, %v14314_v59  ;;  %v3167_v23 = vsel %vm250_vm0, %v3129_v41, 0.0 }
 0x292   : > { %v3131_v9 = vadd.f32 %v3115_v63, %v3079_v4  ;;  %v1748_v12 = vmul.f32 %v10024_v19, %v14315_v7  ;;  %3168 = vadd.xlane.f32.xlu0 %v3167_v23  ;;  %v3170_v1 = vsel %vm250_vm0, %v3130_v45, 0.0  ;;  %v2855_v24 = vmul.f32 %v9641_v34, %v10089_v40  ;;  %v8098_v19 = vld [vmem:[%s13887_s1 + $0x2] ss:$0 sm:$0xff]  ;;  %v14318_v34 = vld [vmem:[#allocation31_spill] sm:$0xff]  ;;  %v14321_v23 = vld [vmem:[#allocation34_spill] sm:$0xff] }
 0x293   : > { %v2819_v5 = vadd.f32 %v2803_v50, %v2767_v17  ;;  %v10223_v49 = vadd.f32 %v1747_v38, %v9967_v46  ;;  %v10226_v41 = vadd.f32 %v1746_v25, %v9970_v0  ;;  %v14316_v4 = vld [vmem:[#allocation29_spill] sm:$0xff]  ;;  %v2872_v21 = vadd.f32 %v2856_v6, %v2820_v22  ;;  %v14317_v17 = vld [vmem:[#allocation30_spill] sm:$0xff]  ;;  %v14319_v0 = vld [vmem:[#allocation32_spill] sm:$0xff] }
 0x294   : > { %v1863_v63 = vmul.f32 %v8098_v19, %v14316_v4  ;;  %v10233_v45 = vadd.f32 %v1749_v15, %v10014_v44  ;;  %v1862_v50 = vmul.f32 %v8098_v19, %v14317_v17  ;;  %v1865_v42 = vmul.f32 %v8098_v19, %v14318_v34  ;;  %v14320_v6 = vld [vmem:[#allocation33_spill] sm:$0xff] }
 0x295   : > { %v10215_v58 = vpop.permute.xlu1 %2353  ;;  %v10217_v3 = vpop.permute.xlu0 %2348  ;;  %3171 = vadd.xlane.f32.xlu1 %v3170_v1  ;;  %v2908_v46 = vmul.f32 %v9663_v60, %v10146_v8  ;;  %v1864_v38 = vmul.f32 %v8098_v19, %v14319_v0  ;;  %v3173_v25 = vsel %vm250_vm0, %v3131_v9, 0.0  ;;  %v3326_v59 = vmul.f32 %v9601_v48, %v10115_v10 }
 0x296   : > { %v3358_v22 = vmul.f32 %v9610_v35, %v10146_v8  ;;  %v1764_v44 = vadd.f32 %v1748_v12, %v10017_v13  ;;  %v1867_v15 = vmul.f32 %v8098_v19, %v14320_v6  ;;  %v1866_v7 = vmul.f32 %v8098_v19, %v14321_v23  ;;  %3174 = vadd.xlane.f32.xlu0 %v3173_v25  ;;  %v14323_v12 = vld [vmem:[#allocation35_spill] sm:$0xff] }
 0x297   : > { %v2871_v17 = vadd.f32 %v2855_v24, %v2819_v5  ;;  %v1879_v9 = vadd.f32 %v1863_v63, %v10056_v29  ;;  %v2924_v34 = vadd.f32 %v2908_v46, %v2872_v21  ;;  %v3325_v10 = vmul.f32 %v9601_v48, %v10089_v40  ;;  %v14324_v24 = vld [vmem:[#allocation36_spill] sm:$0xff] }
 0x298   : > { %v3357_v8 = vmul.f32 %v9610_v35, %v10121_v51  ;;  %v1878_v13 = vadd.f32 %v1862_v50, %v10059_v56  ;;  %v1869_v0 = vmul.f32 %v8098_v19, %v14323_v12  ;;  %v2960_v6 = vmul.f32 %v9680_v54, %v10177_v27 }
 0x299   : > { %v10248_v1 = vpop.permute.xlu1 %2363  ;;  %v10250_v4 = vpop.permute.xlu0 %2358  ;;  %v2907_v25 = vmul.f32 %v9663_v60, %v10121_v51  ;;  %v1881_v5 = vadd.f32 %v1865_v42, %v10101_v39  ;;  %v1880_v29 = vadd.f32 %v1864_v38, %v10104_v14  ;;  %v1868_v63 = vmul.f32 %v8098_v19, %v14324_v24  ;;  %v14329_v38 = vld [vmem:[#allocation38_spill] sm:$0xff]  ;;  %v14338_v24 = vld [vmem:[#allocation45_spill] sm:$0xff] }
 0x29a   : > { %14322 = vst [vmem:[#allocation90_spill] sm:$0xff] %v10250_v4  ;;  %v3374_v48 = vadd.f32 %v3358_v22, %v3326_v59  ;;  %v1883_v40 = vadd.f32 %v1867_v15, %v10124_v47  ;;  %v1882_v35 = vadd.f32 %v1866_v7, %v10127_v57  ;;  %v2959_v46 = vmul.f32 %v9680_v54, %v10154_v43  ;;  %v14328_v57 = vld [vmem:[#allocation37_spill] sm:$0xff]  ;;  %v14330_v22 = vld [vmem:[#allocation39_spill] sm:$0xff]  ;;  %v14331_v54 = vld [vmem:[#allocation40_spill] sm:$0xff] }
 0x29b   : > { %v2923_v50 = vadd.f32 %v2907_v25, %v2871_v17  ;;  %v10274_v60 = vadd.f32 %v2960_v6, %v2924_v34  ;;  %v3406_v39 = vmul.f32 %v9623_v30, %v10177_v27  ;;  %v3373_v14 = vadd.f32 %v3357_v8, %v3325_v10  ;;  %v14332_v17 = vld [vmem:[#allocation41_spill] sm:$0xff]  ;;  %v14334_v27 = vld [vmem:[#allocation42_spill] sm:$0xff]  ;;  %v14335_v8 = vld [vmem:[#allocation43_spill] sm:$0xff] }
 0x29c   : > { %v3405_v51 = vmul.f32 %v9623_v30, %v10154_v43  ;;  %v1885_v47 = vadd.f32 %v1869_v0, %v10149_v36  ;;  %v1871_v42 = vmul.f32 %v8098_v19, %v14328_v57  ;;  %v1870_v59 = vmul.f32 %v8098_v19, %v14329_v38  ;;  %v14336_v43 = vld [vmem:[#allocation44_spill] sm:$0xff]  ;;  %v14340_v57 = vld [vmem:[#allocation47_spill] sm:$0xff] }
 0x29d   : > { %v10268_v56 = vpop.permute.xlu1 %2373  ;;  %v10270_v21 = vpop.permute.xlu0 %2368  ;;  %14327 = vst [vmem:[#allocation95_spill] sm:$0xff] %v10274_v60  ;;  %v1873_v15 = vmul.f32 %v8098_v19, %v14330_v22  ;;  %v1884_v23 = vadd.f32 %v1868_v63, %v10152_v37  ;;  %v1872_v7 = vmul.f32 %v8098_v19, %v14331_v54  ;;  %v1875_v34 = vmul.f32 %v8098_v19, %v14332_v17  ;;  %v8099_v37 = vld [vmem:[%s13887_s1 + $0x3] ss:$0 sm:$0xff] }
 0x29e   : > { %14325 = vst [vmem:[#allocation91_spill] sm:$0xff] %v10268_v56  ;;  %14326 = vst [vmem:[#allocation94_spill] sm:$0xff] %v10270_v21  ;;  %v10287_v12 = vadd.f32 %v3406_v39, %v3374_v48  ;;  %v1874_v10 = vmul.f32 %v8098_v19, %v14334_v27  ;;  %v1877_v30 = vmul.f32 %v8098_v19, %v14335_v8  ;;  %v14339_v48 = vld [vmem:[#allocation46_spill] sm:$0xff]  ;;  %v14353_v21 = vld [vmem:[#allocation56_spill] sm:$0xff] }
 0x29f   : > { %v1876_v36 = vmul.f32 %v8098_v19, %v14336_v43  ;;  %v10296_v25 = vadd.f32 %v2959_v46, %v2923_v50  ;;  %v1992_v63 = vmul.f32 %v8099_v37, %v14338_v24  ;;  %v1991_v39 = vmul.f32 %v8099_v37, %v14339_v48  ;;  %v14342_v50 = vld [vmem:[#allocation48_spill] sm:$0xff]  ;;  %v14343_v43 = vld [vmem:[#allocation49_spill] sm:$0xff] }
 0x2a0   : > { %14333 = vst [vmem:[#allocation98_spill] sm:$0xff] %v10287_v12  ;;  %v1994_v38 = vmul.f32 %v8099_v37, %v14340_v57  ;;  %v10304_v22 = vadd.f32 %v3405_v51, %v3373_v14  ;;  %v1887_v19 = vadd.f32 %v1871_v42, %v10197_v28  ;;  %v1886_v54 = vadd.f32 %v1870_v59, %v10200_v62  ;;  %v14344_v12 = vld [vmem:[#allocation50_spill] sm:$0xff]  ;;  %v14345_v28 = vld [vmem:[#allocation51_spill] sm:$0xff] }
 0x2a1   : > { %v10292_v0 = vpop.permute.xlu1 %2431  ;;  %v10294_v6 = vpop.permute.xlu0 %2426  ;;  %14337 = vst [vmem:[#allocation99_spill] sm:$0xff] %v10296_v25  ;;  %v1889_v17 = vadd.f32 %v1873_v15, %v10207_v53  ;;  %v1993_v46 = vmul.f32 %v8099_v37, %v14342_v50  ;;  %v1888_v27 = vadd.f32 %v1872_v7, %v10210_v52  ;;  %v1891_v8 = vadd.f32 %v1875_v34, %v10223_v49  ;;  %v14347_v7 = vld [vmem:[#allocation52_spill] sm:$0xff]  ;;  %v14348_v50 = vld [vmem:[#allocation53_spill] sm:$0xff] }
 0x2a2   : > { %14341 = vst [vmem:[#allocation102_spill] sm:$0xff] %v10304_v22  ;;  %v1996_v24 = vmul.f32 %v8099_v37, %v14343_v43  ;;  %v1995_v48 = vmul.f32 %v8099_v37, %v14344_v12  ;;  %v1890_v57 = vadd.f32 %v1874_v10, %v10226_v41  ;;  %v1893_v14 = vadd.f32 %v1877_v30, %v10233_v45  ;;  %v14349_v12 = vld [vmem:[#allocation54_spill] sm:$0xff]  ;;  %v14350_v41 = vld [vmem:[#allocation55_spill] sm:$0xff] }
 0x2a3   : > { %v1892_v51 = vadd.f32 %v1876_v36, %v1764_v44  ;;  %v1998_v42 = vmul.f32 %v8099_v37, %v14345_v28  ;;  %v2008_v59 = vadd.f32 %v1992_v63, %v1879_v9  ;;  %v2007_v15 = vadd.f32 %v1991_v39, %v1878_v13  ;;  %v14351_v30 = vld [vmem:[#allocation58_spill] sm:$0xff]  ;;  %v14352_v28 = vld [vmem:[#allocation59_spill] sm:$0xff]  ;;  %v14354_v13 = vld [vmem:[#allocation60_spill] sm:$0xff] }
 0x2a4   : > { %v2010_v52 = vadd.f32 %v1994_v38, %v1881_v5  ;;  %v1997_v49 = vmul.f32 %v8099_v37, %v14347_v7  ;;  %v2009_v34 = vadd.f32 %v1993_v46, %v1880_v29  ;;  %v2000_v43 = vmul.f32 %v8099_v37, %v14348_v50  ;;  %v14355_v63 = vld [vmem:[#allocation61_spill] sm:$0xff] }
 0x2a5   : > { %v10317_v62 = vpop.permute.xlu1 %2441  ;;  %v10319_v53 = vpop.permute.xlu0 %2436  ;;  %v1999_v22 = vmul.f32 %v8099_v37, %v14349_v12  ;;  %v2002_v10 = vmul.f32 %v8099_v37, %v14350_v41  ;;  %v2012_v45 = vadd.f32 %v1996_v24, %v1883_v40  ;;  %v2011_v44 = vadd.f32 %v1995_v48, %v1882_v35  ;;  %v8100_v40 = vld [vmem:[%s13887_s1 + $0x4] ss:$0 sm:$0xff]  ;;  %v14358_v35 = vld [vmem:[#allocation86_spill] sm:$0xff]  ;;  %v14359_v48 = vld [vmem:[#allocation87_spill] sm:$0xff] }
 0x2a6   : > { %14346 = vst [vmem:[#allocation103_spill] sm:$0xff] %v10319_v53  ;;  %v2001_v36 = vmul.f32 %v8099_v37, %v14351_v30  ;;  %v2004_v25 = vmul.f32 %v8099_v37, %v14352_v28  ;;  %v2014_v60 = vadd.f32 %v1998_v42, %v1885_v47  ;;  %v2003_v9 = vmul.f32 %v8099_v37, %v14353_v21  ;;  %v14360_v47 = vld [vmem:[#allocation64_spill] sm:$0xff]  ;;  %v14361_v41 = vld [vmem:[#allocation65_spill] sm:$0xff] }
 0x2a7   : > { %v2006_v5 = vmul.f32 %v8099_v37, %v14354_v13  ;;  %v2005_v39 = vmul.f32 %v8099_v37, %v14355_v63  ;;  %v2013_v46 = vadd.f32 %v1997_v49, %v1884_v23  ;;  %v2120_v24 = vmul.f32 %v8100_v40, %v14358_v35  ;;  %v14362_v13 = vld [vmem:[#allocation68_spill] sm:$0xff]  ;;  %v14363_v23 = vld [vmem:[#allocation57_spill] sm:$0xff] }
 0x2a8   : > { %v2119_v7 = vmul.f32 %v8100_v40, %v14359_v48  ;;  %v2122_v42 = vmul.f32 %v8100_v40, %v14360_v47  ;;  %v2016_v21 = vadd.f32 %v2000_v43, %v1887_v19  ;;  %v2015_v50 = vadd.f32 %v1999_v22, %v1886_v54  ;;  %v14370_v47 = vld [vmem:[#allocation28_spill] sm:$0xff] }
 0x2a9   : > { %v10330_v29 = vpop.permute.xlu1 %2451  ;;  %v10332_v38 = vpop.permute.xlu0 %2446  ;;  %v2018_v12 = vadd.f32 %v2002_v10, %v1889_v17  ;;  %v2121_v37 = vmul.f32 %v8100_v40, %v14361_v41  ;;  %v2017_v30 = vadd.f32 %v2001_v36, %v1888_v27  ;;  %v2020_v28 = vadd.f32 %v2004_v25, %v1891_v8  ;;  %v14367_v17 = vld [vmem:[#allocation69_spill] sm:$0xff]  ;;  %v14369_v10 = vld [vmem:[#allocation27_spill] sm:$0xff] }
 0x2aa   : > { %14356 = vst [vmem:[#allocation7_spill] sm:$0xff] %v10330_v29  ;;  %14357 = vst [vmem:[#allocation106_spill] sm:$0xff] %v10332_v38  ;;  %v2124_v63 = vmul.f32 %v8100_v40, %v14362_v13  ;;  %v2123_v49 = vmul.f32 %v8100_v40, %v14363_v23  ;;  %v2019_v56 = vadd.f32 %v2003_v9, %v1890_v57  ;;  %v14364_v29 = vld [vmem:[#allocation88_spill] sm:$0xff]  ;;  %v14368_v25 = vld [vmem:[#allocation89_spill] sm:$0xff] }
 0x2ab   : > { %v2022_v38 = vadd.f32 %v2006_v5, %v1893_v14  ;;  %v2021_v4 = vadd.f32 %v2005_v39, %v1892_v51  ;;  %v2126_v35 = vmul.f32 %v8100_v40, %v14364_v29  ;;  %v2136_v19 = vadd.f32 %v2120_v24, %v2008_v59  ;;  %v14371_v9 = vld [vmem:[#allocation72_spill] sm:$0xff]  ;;  %v14373_v13 = vld [vmem:[#allocation93_spill] sm:$0xff]  ;;  %v14375_v24 = vld [vmem:[#allocation62_spill] sm:$0xff] }
 0x2ac   : > { %v2135_v22 = vadd.f32 %v2119_v7, %v2007_v15  ;;  %v2138_v54 = vadd.f32 %v2122_v42, %v2010_v52  ;;  %v2125_v43 = vmul.f32 %v8100_v40, %v14367_v17  ;;  %v2137_v27 = vadd.f32 %v2121_v37, %v2009_v34  ;;  %v14372_v39 = vld [vmem:[#allocation92_spill] sm:$0xff]  ;;  %v14374_v15 = vld [vmem:[#allocation73_spill] sm:$0xff] }
 0x2ad   : > { %v10344_v53 = vpop.permute.xlu1 %2461  ;;  %v10346_v48 = vpop.permute.xlu0 %2456  ;;  %v2128_v8 = vmul.f32 %v8100_v40, %v14368_v25  ;;  %v2127_v36 = vmul.f32 %v8100_v40, %v14369_v10  ;;  %v2130_v57 = vmul.f32 %v8100_v40, %v14370_v47  ;;  %v2140_v14 = vadd.f32 %v2124_v63, %v2012_v45  ;;  %v8101_v45 = vld [vmem:[%s13887_s1 + $0x5] ss:$0 sm:$0xff]  ;;  %v14381_v47 = vld [vmem:[#allocation100_spill] sm:$0xff] }
 0x2ae   : > { %14365 = vst [vmem:[#allocation12_spill] sm:$0xff] %v10344_v53  ;;  %14366 = vst [vmem:[#allocation13_spill] sm:$0xff] %v10346_v48  ;;  %v2139_v51 = vadd.f32 %v2123_v49, %v2011_v44  ;;  %v2129_v5 = vmul.f32 %v8100_v40, %v14371_v9  ;;  %v2132_v29 = vmul.f32 %v8100_v40, %v14372_v39  ;;  %v14378_v44 = vld [vmem:[#allocation76_spill] sm:$0xff]  ;;  %v14379_v23 = vld [vmem:[#allocation97_spill] sm:$0xff] }
 0x2af   : > { %v2142_v41 = vadd.f32 %v2126_v35, %v2014_v60  ;;  %v2131_v59 = vmul.f32 %v8100_v40, %v14373_v13  ;;  %v2134_v52 = vmul.f32 %v8100_v40, %v14374_v15  ;;  %v2133_v7 = vmul.f32 %v8100_v40, %v14375_v24  ;;  %v14380_v60 = vld [vmem:[#allocation77_spill] sm:$0xff]  ;;  %v14382_v13 = vld [vmem:[#allocation71_spill] sm:$0xff]  ;;  %v14384_v48 = vld [vmem:[#allocation8_spill] sm:$0xff] }
 0x2b0   : > { %v2141_v37 = vadd.f32 %v2125_v43, %v2013_v46  ;;  %v2248_v63 = vmul.f32 %v8101_v45, %v14378_v44  ;;  %v2247_v49 = vmul.f32 %v8101_v45, %v14379_v23  ;;  %v2250_v35 = vmul.f32 %v8101_v45, %v14380_v60  ;;  %v14383_v46 = vld [vmem:[#allocation81_spill] sm:$0xff] }
 0x2b1   : > { %v10357_v34 = vpop.permute.xlu1 %2471  ;;  %v10359_v42 = vpop.permute.xlu0 %2466  ;;  %v2144_v17 = vadd.f32 %v2128_v8, %v2016_v21  ;;  %v2143_v25 = vadd.f32 %v2127_v36, %v2015_v50  ;;  %v2146_v10 = vadd.f32 %v2130_v57, %v2018_v12  ;;  %v2249_v40 = vmul.f32 %v8101_v45, %v14381_v47  ;;  %v14385_v8 = vld [vmem:[#allocation9_spill] sm:$0xff]  ;;  %v14390_v47 = vld [vmem:[#allocation11_spill] sm:$0xff] }
 0x2b2   : > { %14376 = vst [vmem:[#allocation14_spill] sm:$0xff] %v10357_v34  ;;  %14377 = vst [vmem:[#allocation15_spill] sm:$0xff] %v10359_v42  ;;  %v2145_v9 = vadd.f32 %v2129_v5, %v2017_v30  ;;  %v2148_v39 = vadd.f32 %v2132_v29, %v2020_v28  ;;  %v2252_v15 = vmul.f32 %v8101_v45, %v14382_v13  ;;  %v14386_v28 = vld [vmem:[#allocation85_spill] sm:$0xff]  ;;  %v14387_v5 = vld [vmem:[#allocation78_spill] sm:$0xff] }
 0x2b3   : > { %v2251_v43 = vmul.f32 %v8101_v45, %v14383_v46  ;;  %v2147_v24 = vadd.f32 %v2131_v59, %v2019_v56  ;;  %v2150_v42 = vadd.f32 %v2134_v52, %v2022_v38  ;;  %v2149_v34 = vadd.f32 %v2133_v7, %v2021_v4  ;;  %v14388_v59 = vld [vmem:[#allocation79_spill] sm:$0xff] }
 0x2b4   : > { %v2254_v44 = vmul.f32 %v8101_v45, %v14384_v48  ;;  %v2264_v21 = vadd.f32 %v2248_v63, %v2136_v19  ;;  %v2263_v50 = vadd.f32 %v2247_v49, %v2135_v22  ;;  %v2266_v12 = vadd.f32 %v2250_v35, %v2138_v54 }
 0x2b5   : > { %v10371_v53 = vpop.permute.xlu1 %2481  ;;  %v10373_v23 = vpop.permute.xlu0 %2476  ;;  %v2253_v36 = vmul.f32 %v8101_v45, %v14385_v8  ;;  %v2265_v30 = vadd.f32 %v2249_v40, %v2137_v27  ;;  %v2256_v57 = vmul.f32 %v8101_v45, %v14386_v28  ;;  %v2255_v29 = vmul.f32 %v8101_v45, %v14387_v5  ;;  %v14393_v5 = vld [vmem:[#allocation103_spill] sm:$0xff] }
 0x2b6   : > { %v2258_v56 = vmul.f32 %v8101_v45, %v9983_v55  ;;  %v2268_v38 = vadd.f32 %v2252_v15, %v2140_v14  ;;  %v2267_v4 = vadd.f32 %v2251_v43, %v2139_v51  ;;  %v2257_v48 = vmul.f32 %v8101_v45, %v14388_v59  ;;  %v10391_v55 = vld [vmem:[%s13887_s1 + $0x6] ss:$0 sm:$0xff]  ;;  %v14391_v15 = vld [vmem:[#allocation82_spill] sm:$0xff]  ;;  %v14392_v43 = vld [vmem:[#allocation83_spill] sm:$0xff] }
 0x2b7   : > { %v2260_v52 = vmul.f32 %v8101_v45, %v10003_v11  ;;  %v2270_v7 = vadd.f32 %v2254_v44, %v2142_v41  ;;  %v2259_v19 = vmul.f32 %v8101_v45, %v10005_v32  ;;  %v2262_v22 = vmul.f32 %v8101_v45, %v10036_v26  ;;  %v14389_v41 = vld [vmem:[#allocation10_spill] sm:$0xff] }
 0x2b8   : > { %v2261_v54 = vmul.f32 %v8101_v45, %v10039_v61  ;;  %v2269_v49 = vadd.f32 %v2253_v36, %v2141_v37  ;;  %v2377_v11 = vmul.f32 %v10391_v55, %v10065_v31  ;;  %v2376_v32 = vmul.f32 %v10391_v55, %v10068_v16 }
 0x2b9   : > { %v10384_v27 = vpop.permute.xlu1 %2491  ;;  %v10386_v63 = vpop.permute.xlu0 %2486  ;;  %v2379_v26 = vmul.f32 %v10391_v55, %v10095_v20  ;;  %v2272_v61 = vadd.f32 %v2256_v57, %v2144_v17  ;;  %v2271_v14 = vadd.f32 %v2255_v29, %v2143_v25  ;;  %v2274_v51 = vadd.f32 %v2258_v56, %v2146_v10  ;;  %v10414_v20 = vld [vmem:[%s13887_s1 + $0x7] ss:$0 sm:$0xff] }
 0x2ba   : > { %v2378_v37 = vmul.f32 %v10391_v55, %v14389_v41  ;;  %v2273_v45 = vadd.f32 %v2257_v48, %v2145_v9  ;;  %v2276_v60 = vadd.f32 %v2260_v52, %v2148_v39  ;;  %v2381_v35 = vmul.f32 %v10391_v55, %v10129_v2 }
 0x2bb   : > { %v2380_v31 = vmul.f32 %v10391_v55, %v14390_v47  ;;  %v10405_v40 = vadd.f32 %v2259_v19, %v2147_v24  ;;  %v10407_v16 = vadd.f32 %v2262_v22, %v2150_v42  ;;  %v10409_v13 = vadd.f32 %v2261_v54, %v2149_v34  ;;  %v14396_v47 = vld [vmem:[#allocation106_spill] sm:$0xff] }
 0x2bc   : > { %v2505_v17 = vmul.f32 %v10414_v20, %v10292_v0  ;;  %v2393_v10 = vadd.f32 %v2377_v11, %v2264_v21  ;;  %v2392_v9 = vadd.f32 %v2376_v32, %v2263_v50  ;;  %v2395_v39 = vadd.f32 %v2379_v26, %v2266_v12  ;;  %v14395_v11 = vld [vmem:[#allocation90_spill] sm:$0xff] }
 0x2bd   : > { %v10418_v25 = vpop.permute.xlu1 %2501  ;;  %v10420_v2 = vpop.permute.xlu0 %2496  ;;  %v2504_v42 = vmul.f32 %v10414_v20, %v10294_v6  ;;  %v2394_v34 = vadd.f32 %v2378_v37, %v2265_v30  ;;  %v2383_v46 = vmul.f32 %v10391_v55, %v14391_v15  ;;  %v2382_v24 = vmul.f32 %v10391_v55, %v14392_v43  ;;  %v14402_v43 = vld [vmem:[#allocation15_spill] sm:$0xff] }
 0x2be   : > { %v2385_v0 = vmul.f32 %v10391_v55, %v10185_v18  ;;  %v2397_v44 = vadd.f32 %v2381_v35, %v2268_v38  ;;  %v2396_v8 = vadd.f32 %v2380_v31, %v2267_v4  ;;  %v2384_v21 = vmul.f32 %v10391_v55, %v10187_v33  ;;  %v10445_v33 = vld [vmem:[%s13887_s1 + $0x8] ss:$0 sm:$0xff]  ;;  %v14394_v4 = vld [vmem:[#allocation7_spill] sm:$0xff] }
 0x2bf   : > { %v2387_v50 = vmul.f32 %v10391_v55, %v10215_v58  ;;  %v2386_v6 = vmul.f32 %v10391_v55, %v10217_v3  ;;  %v2389_v12 = vmul.f32 %v10391_v55, %v10248_v1  ;;  %v2521_v36 = vadd.f32 %v2505_v17, %v2393_v10  ;;  %v14399_v17 = vld [vmem:[#allocation12_spill] sm:$0xff] }
 0x2c0   : > { %v2507_v30 = vmul.f32 %v10414_v20, %v10317_v62  ;;  %v2520_v57 = vadd.f32 %v2504_v42, %v2392_v9  ;;  %v2506_v29 = vmul.f32 %v10414_v20, %v14393_v5  ;;  %v2399_v1 = vadd.f32 %v2383_v46, %v2270_v7  ;;  %v14400_v9 = vld [vmem:[#allocation13_spill] sm:$0xff]  ;;  %v14401_v42 = vld [vmem:[#allocation14_spill] sm:$0xff] }
 0x2c1   : > { %v2560_v28 = vpop.permute.xlu1 %2559  ;;  %v2555_v18 = vpop.permute.xlu0 %2554  ;;  %v2398_v56 = vadd.f32 %v2382_v24, %v2269_v49  ;;  %v2401_v38 = vadd.f32 %v2385_v0, %v2272_v61  ;;  %v2509_v62 = vmul.f32 %v10414_v20, %v14394_v4  ;;  %v2400_v59 = vadd.f32 %v2384_v21, %v2271_v14  ;;  %v14397_v14 = vld [vmem:[#allocation91_spill] sm:$0xff] }
 0x2c2   : > { %v2633_v58 = vmul.f32 %v10445_v33, %v2560_v28  ;;  %v2632_v3 = vmul.f32 %v10445_v33, %v2555_v18  ;;  %v2403_v48 = vadd.f32 %v2387_v50, %v2274_v51  ;;  %v2402_v22 = vadd.f32 %v2386_v6, %v2273_v45  ;;  %v14398_v45 = vld [vmem:[#allocation94_spill] sm:$0xff] }
 0x2c3   : > { %v2405_v54 = vadd.f32 %v2389_v12, %v2276_v60  ;;  %v2388_v32 = vmul.f32 %v10391_v55, %v14395_v11  ;;  %v2523_v26 = vadd.f32 %v2507_v30, %v2395_v39  ;;  %v2522_v35 = vadd.f32 %v2506_v29, %v2394_v34 }
 0x2c4   : > { %v2649_v52 = vadd.f32 %v2633_v58, %v2521_v36  ;;  %v2648_v19 = vadd.f32 %v2632_v3, %v2520_v57  ;;  %v2508_v7 = vmul.f32 %v10414_v20, %v14396_v47  ;;  %v2391_v51 = vmul.f32 %v10391_v55, %v14397_v14 }
 0x2c5   : > { %v2570_v41 = vpop.permute.xlu1 %2569  ;;  %v2565_v37 = vpop.permute.xlu0 %2564  ;;  %v2390_v60 = vmul.f32 %v10391_v55, %v14398_v45  ;;  %v2525_v31 = vadd.f32 %v2509_v62, %v2397_v44  ;;  %v2511_v10 = vmul.f32 %v10414_v20, %v14399_v17  ;;  %v2510_v39 = vmul.f32 %v10414_v20, %v14400_v9  ;;  %v14404_v45 = vld [vmem:[#allocation99_spill] sm:$0xff]  ;;  %v10555_v17 = vld [vmem:[%s13889_s3 + $0x4] ss:$0 sm:$0xff] }
 0x2c6   : > { %2666 = vst.msk [vmem:[#allocation2 + $0xe1] sm:$0xff] %vm250_vm0, %v2649_v52  ;;  %2665 = vst.msk [vmem:[#allocation2 + $0xd9] sm:$0xff] %vm250_vm0, %v2648_v19  ;;  %v2635_v49 = vmul.f32 %v10445_v33, %v2570_v41  ;;  %v2634_v61 = vmul.f32 %v10445_v33, %v2565_v37  ;;  %v2513_v34 = vmul.f32 %v10414_v20, %v14401_v42 }
 0x2c7   : > { %v2512_v24 = vmul.f32 %v10414_v20, %v14402_v43  ;;  %v2515_v0 = vmul.f32 %v10414_v20, %v10371_v53  ;;  %v2514_v55 = vmul.f32 %v10414_v20, %v10373_v23  ;;  %v2517_v44 = vmul.f32 %v10414_v20, %v10384_v27 }
 0x2c8   : > { %v2651_v15 = vadd.f32 %v2635_v49, %v2523_v26  ;;  %v2650_v46 = vadd.f32 %v2634_v61, %v2522_v35  ;;  %v2524_v6 = vadd.f32 %v2508_v7, %v2396_v8  ;;  %v2516_v12 = vmul.f32 %v10414_v20, %v10386_v63  ;;  %v14403_v35 = vld [vmem:[#allocation95_spill] sm:$0xff]  ;;  %v10545_v49 = vld [vmem:[%s13889_s3 + $0x3] ss:$0 sm:$0xff] }
 0x2c9   : > { %v2580_v21 = vpop.permute.xlu1 %2579  ;;  %v2575_v50 = vpop.permute.xlu0 %2574  ;;  %v2404_v30 = vadd.f32 %v2388_v32, %v10405_v40  ;;  %v10485_v23 = vadd.f32 %v2391_v51, %v10407_v16  ;;  %v10488_v27 = vadd.f32 %v2390_v60, %v10409_v13  ;;  %v2527_v8 = vadd.f32 %v2511_v10, %v2399_v1  ;;  %v10533_v32 = vld [vmem:[%s13889_s3 + $0x8] ss:$0 sm:$0xff] }
 0x2ca   : > { %2668 = vst.msk [vmem:[#allocation2 + $0xf9] sm:$0xff] %vm250_vm0, %v2651_v15  ;;  %2667 = vst.msk [vmem:[#allocation2 + $0xf1] sm:$0xff] %vm250_vm0, %v2650_v46  ;;  %v2637_v36 = vmul.f32 %v10445_v33, %v2580_v21  ;;  %v2636_v53 = vmul.f32 %v10445_v33, %v2575_v50  ;;  %v2526_v28 = vadd.f32 %v2510_v39, %v2398_v56  ;;  %v14405_v15 = vld [vmem:[#allocation98_spill] sm:$0xff] }
 0x2cb   : > { %v2529_v18 = vadd.f32 %v2513_v34, %v2401_v38  ;;  %v2528_v5 = vadd.f32 %v2512_v24, %v2400_v59  ;;  %v10490_v29 = vadd.f32 %v2515_v0, %v2403_v48  ;;  %v10492_v58 = vadd.f32 %v2514_v55, %v2402_v22  ;;  %v10511_v59 = vld [vmem:[%s13889_s3 + $0x6] ss:$0 sm:$0xff] }
 0x2cc   : > { %v2653_v63 = vadd.f32 %v2637_v36, %v2525_v31  ;;  %v2652_v57 = vadd.f32 %v2636_v53, %v2524_v6  ;;  %v10494_v3 = vadd.f32 %v2517_v44, %v2405_v54  ;;  %v10502_v1 = vadd.f32 %v2516_v12, %v2404_v30  ;;  %v10526_v54 = vld [vmem:[%s13889_s3 + $0x7] ss:$0 sm:$0xff]  ;;  %v10575_v44 = vld [vmem:[%s13889_s3 + $0x5] ss:$0 sm:$0xff] }
 0x2cd   : > { %v2590_v4 = vpop.permute.xlu1 %2589  ;;  %v2585_v40 = vpop.permute.xlu0 %2584  ;;  %v10496_v62 = vld [vmem:[#allocation2 + $0xe0] sm:$0xff]  ;;  %v10515_v52 = vld [vmem:[#allocation2 + $0xd8] sm:$0xff]  ;;  %v10521_v22 = vmul.f32 %v10414_v20, %v10418_v25  ;;  %v2518_v24 = vmul.f32 %v10414_v20, %v10420_v2 }
 0x2ce   : > { %v10498_v16 = vld [vmem:[#allocation2 + $0xe1] sm:$0xff]  ;;  %2670 = vst.msk [vmem:[#allocation2 + $0x111] sm:$0xff] %vm250_vm0, %v2653_v63  ;;  %2669 = vst.msk [vmem:[#allocation2 + $0x109] sm:$0xff] %vm250_vm0, %v2652_v57  ;;  %v2639_v56 = vmul.f32 %v10445_v33, %v2590_v4  ;;  %v2638_v38 = vmul.f32 %v10445_v33, %v2585_v40  ;;  %v3013_v48 = vmul.f32 %v10511_v59, %v10496_v62  ;;  %v10517_v19 = vld [vmem:[#allocation2 + $0xd9] sm:$0xff] }
 0x2cf   : > { %v10500_v13 = vld [vmem:[#allocation2 + $0xe2] sm:$0xff]  ;;  %v3065_v11 = vmul.f32 %v10526_v54, %v10498_v16  ;;  %v3012_v25 = vmul.f32 %v10511_v59, %v10515_v52  ;;  %v10540_v7 = vld [vmem:[#allocation2 + $0xda] sm:$0xff]  ;;  %v3454_v61 = vmul.f32 %v10545_v49, %v10496_v62  ;;  %v3064_v31 = vmul.f32 %v10526_v54, %v10517_v19 }
 0x2d0   : > { %v3117_v26 = vmul.f32 %v10533_v32, %v10500_v13  ;;  %v2655_v41 = vadd.f32 %v2639_v56, %v2527_v8  ;;  %v2654_v37 = vadd.f32 %v2638_v38, %v2526_v28  ;;  %v3029_v47 = vadd.f32 %v3013_v48, %v14403_v35  ;;  %v14406_v63 = vld [vmem:[#allocation102_spill] sm:$0xff] }
 0x2d1   : > { %v2600_v14 = vpop.permute.xlu1 %2599  ;;  %v2595_v51 = vpop.permute.xlu0 %2594  ;;  %v3028_v60 = vadd.f32 %v3012_v25, %v14404_v45  ;;  %v3502_v10 = vmul.f32 %v10555_v17, %v10498_v16  ;;  %v3453_v9 = vmul.f32 %v10545_v49, %v10515_v52  ;;  %v3470_v46 = vadd.f32 %v3454_v61, %v14405_v15  ;;  %v10566_v43 = vld [vmem:[#allocation2 + $0xf8] sm:$0xff]  ;;  %v10593_v38 = vld [vmem:[#allocation2 + $0xf0] sm:$0xff] }
 0x2d2   : > { %2672 = vst.msk [vmem:[#allocation2 + $0x129] sm:$0xff] %vm250_vm0, %v2655_v41  ;;  %2671 = vst.msk [vmem:[#allocation2 + $0x121] sm:$0xff] %vm250_vm0, %v2654_v37  ;;  %v2641_v39 = vmul.f32 %v10445_v33, %v2600_v14  ;;  %v2640_v42 = vmul.f32 %v10445_v33, %v2595_v51  ;;  %v3081_v34 = vadd.f32 %v3065_v11, %v3029_v47  ;;  %v10579_v53 = vld [vmem:[#allocation2 + $0xf9] sm:$0xff]  ;;  %v10600_v41 = vld [vmem:[#allocation2 + $0xf1] sm:$0xff] }
 0x2d3   : > { %v3080_v0 = vadd.f32 %v3064_v31, %v3028_v60  ;;  %v3116_v55 = vmul.f32 %v10533_v32, %v10540_v7  ;;  %v3550_v21 = vmul.f32 %v10575_v44, %v10500_v13  ;;  %v3518_v36 = vadd.f32 %v3502_v10, %v3470_v46  ;;  %v10583_v28 = vld [vmem:[#allocation2 + $0xfa] sm:$0xff] }
 0x2d4   : > { %v2657_v50 = vadd.f32 %v2641_v39, %v2529_v18  ;;  %v2656_v6 = vadd.f32 %v2640_v42, %v2528_v5  ;;  %v3133_v12 = vadd.f32 %v3117_v26, %v3081_v34  ;;  %v3599_v8 = vmul.f32 %v10511_v59, %v10566_v43  ;;  %v10611_v31 = vld [vmem:[%s13889_s3] ss:$0 sm:$0xff]  ;;  %v10628_v34 = vld [vmem:[#allocation2 + $0xf2] sm:$0xff] }
 0x2d5   : > { %v2610_v30 = vpop.permute.xlu1 %2609  ;;  %v2605_v20 = vpop.permute.xlu0 %2604  ;;  %v3132_v2 = vadd.f32 %v3116_v55, %v3080_v0  ;;  %v3469_v57 = vadd.f32 %v3453_v9, %v14406_v63  ;;  %v3501_v4 = vmul.f32 %v10555_v17, %v10517_v19  ;;  %v3566_v56 = vadd.f32 %v3550_v21, %v3518_v36 }
 0x2d6   : > { %2674 = vst.msk [vmem:[#allocation2 + $0x141] sm:$0xff] %vm250_vm0, %v2657_v50  ;;  %2673 = vst.msk [vmem:[#allocation2 + $0x139] sm:$0xff] %vm250_vm0, %v2656_v6  ;;  %v2643_v18 = vmul.f32 %v10445_v33, %v2610_v30  ;;  %v2642_v5 = vmul.f32 %v10445_v33, %v2605_v20  ;;  %v3179_v40 = vsel %vm250_vm0, %v3133_v12, 0.0  ;;  %v3647_v11 = vmul.f32 %v10526_v54, %v10579_v53 }
 0x2d7   : > { %3180 = vadd.xlane.f32.xlu0 %v3179_v40  ;;  %v3176_v48 = vsel %vm250_vm0, %v3132_v2, 0.0  ;;  %v3517_v26 = vadd.f32 %v3501_v4, %v3469_v57  ;;  %v3549_v25 = vmul.f32 %v10575_v44, %v10540_v7  ;;  %v3615_v47 = vadd.f32 %v3599_v8, %v3566_v56  ;;  %v3585_v57 = vld [vmem:[#allocation2 + $0x110] sm:$0xff] }
 0x2d8   : > { %v2659_v37 = vadd.f32 %v2643_v18, %v10490_v29  ;;  %v2658_v35 = vadd.f32 %v2642_v5, %v10492_v58  ;;  %3177 = vadd.xlane.f32.xlu1 %v3176_v48  ;;  %v3695_v61 = vmul.f32 %v10533_v32, %v10583_v28  ;;  %v3598_v60 = vmul.f32 %v10511_v59, %v10593_v38  ;;  %v10618_v58 = vld [vmem:[%s13889_s3 + $0x1] ss:$0 sm:$0xff]  ;;  %v3633_v4 = vld [vmem:[#allocation2 + $0x111] sm:$0xff] }
 0x2d9   : > { %v2620_v14 = vpop.permute.xlu1 %2619  ;;  %v2615_v51 = vpop.permute.xlu0 %2614  ;;  %v3565_v45 = vadd.f32 %v3549_v25, %v3517_v26  ;;  %v3328_v29 = vmul.f32 %v10611_v31, %v10496_v62  ;;  %v3360_v10 = vmul.f32 %v10618_v58, %v10498_v16  ;;  %v3663_v42 = vadd.f32 %v3647_v11, %v3615_v47  ;;  %v10633_v16 = vld [vmem:[%s13889_s3 + $0x2] ss:$0 sm:$0xff]  ;;  %v10655_v18 = vld [vmem:[#allocation2 + $0x112] sm:$0xff] }
 0x2da   : > { %2676 = vst.msk [vmem:[#allocation2 + $0x159] sm:$0xff] %vm250_vm0, %v2659_v37  ;;  %2675 = vst.msk [vmem:[#allocation2 + $0x151] sm:$0xff] %vm250_vm0, %v2658_v35  ;;  %v2645_v9 = vmul.f32 %v10445_v33, %v2620_v14  ;;  %v2644_v39 = vmul.f32 %v10445_v33, %v2615_v51  ;;  %v3646_v62 = vmul.f32 %v10526_v54, %v10600_v41  ;;  %v10666_v37 = vld [vmem:[#allocation2 + $0x108] sm:$0xff] }
 0x2db   : > { %v3614_v15 = vadd.f32 %v3598_v60, %v3565_v45  ;;  %v3376_v46 = vadd.f32 %v3360_v10, %v3328_v29  ;;  %v3408_v0 = vmul.f32 %v10633_v16, %v10500_v13  ;;  %v3456_v55 = vmul.f32 %v10545_v49, %v10566_v43  ;;  %v10668_v35 = vld [vmem:[#allocation2 + $0x109] sm:$0xff] }
 0x2dc   : > { %v2535_v21 = vadd.f32 %v10521_v22, %v10485_v23  ;;  %v2661_v50 = vadd.f32 %v2645_v9, %v10494_v3  ;;  %v2660_v6 = vadd.f32 %v2644_v39, %v10502_v1  ;;  %v3711_v12 = vadd.f32 %v3695_v61, %v3663_v42  ;;  %v10680_v60 = vld [vmem:[#allocation2 + $0x10a] sm:$0xff] }
 0x2dd   : > { %v2534_v36 = vadd.f32 %v2518_v24, %v10488_v27  ;;  %v2630_v30 = vpop.permute.xlu1 %2629  ;;  %v3662_v20 = vadd.f32 %v3646_v62, %v3614_v15  ;;  %v3694_v2 = vmul.f32 %v10533_v32, %v10628_v34  ;;  %v2625_v8 = vpop.permute.xlu0 %2624  ;;  %v3424_v13 = vadd.f32 %v3408_v0, %v3376_v46  ;;  %v10693_v0 = vld [vmem:[#allocation2 + $0x128] sm:$0xff] }
 0x2de   : > { %2678 = vst.msk [vmem:[#allocation2 + $0x171] sm:$0xff] %vm250_vm0, %v2661_v50  ;;  %2677 = vst.msk [vmem:[#allocation2 + $0x169] sm:$0xff] %vm250_vm0, %v2660_v6  ;;  %v2647_v23 = vmul.f32 %v10445_v33, %v2630_v30  ;;  %v3729_v3 = vsel %vm250_vm0, %v3711_v12, 0.0  ;;  %v2646_v1 = vmul.f32 %v10445_v33, %v2625_v8  ;;  %v3327_v27 = vmul.f32 %v10611_v31, %v10515_v52 }
 0x2df   : > { %3730 = vadd.xlane.f32.xlu0 %v3729_v3  ;;  %v3710_v22 = vadd.f32 %v3694_v2, %v3662_v20  ;;  %v3472_v24 = vadd.f32 %v3456_v55, %v3424_v13  ;;  %v3504_v63 = vmul.f32 %v10555_v17, %v10579_v53  ;;  %v3359_v5 = vmul.f32 %v10618_v58, %v10517_v19  ;;  %v10706_v20 = vld [vmem:[#allocation2 + $0x12a] sm:$0xff] }
 0x2e0   : > { %v2663_v40 = vadd.f32 %v2647_v23, %v2535_v21  ;;  %v2662_v56 = vadd.f32 %v2646_v1, %v2534_v36  ;;  %v3552_v33 = vmul.f32 %v10575_v44, %v10583_v28  ;;  %v3407_v52 = vmul.f32 %v10633_v16, %v10540_v7  ;;  %v10698_v21 = vld [vmem:[#allocation2 + $0x129] sm:$0xff] }
 0x2e1   : > { %v3726_v48 = vsel %vm250_vm0, %v3710_v22, 0.0  ;;  %v3520_v11 = vadd.f32 %v3504_v63, %v3472_v24  ;;  %v3375_v26 = vadd.f32 %v3359_v5, %v3327_v27  ;;  %v3455_v25 = vmul.f32 %v10545_v49, %v10593_v38  ;;  %v10718_v24 = vld [vmem:[#allocation2 + $0x120] sm:$0xff] }
 0x2e2   : > { %2680 = vst.msk [vmem:[#allocation2 + $0x189] sm:$0xff] %vm250_vm0, %v2663_v40  ;;  %3727 = vadd.xlane.f32.xlu1 %v3726_v48  ;;  %2679 = vst.msk [vmem:[#allocation2 + $0x181] sm:$0xff] %vm250_vm0, %v2662_v56  ;;  %v3601_v19 = vmul.f32 %v10511_v59, %v3585_v57  ;;  %v3649_v7 = vmul.f32 %v10526_v54, %v3633_v4  ;;  %v3697_v47 = vmul.f32 %v10533_v32, %v10655_v18  ;;  %v10727_v48 = vld [vmem:[#allocation2 + $0x122] sm:$0xff] }
 0x2e3   : > { %v3330_v61 = vmul.f32 %v10611_v31, %v10566_v43  ;;  %v3568_v14 = vadd.f32 %v3552_v33, %v3520_v11  ;;  %v3423_v51 = vadd.f32 %v3407_v52, %v3375_v26  ;;  %v3503_v45 = vmul.f32 %v10555_v17, %v10600_v41  ;;  %v10725_v52 = vld [vmem:[#allocation2 + $0x121] sm:$0xff] }
 0x2e4   : > { %v3362_v29 = vmul.f32 %v10618_v58, %v10579_v53  ;;  %v3551_v10 = vmul.f32 %v10575_v44, %v10628_v34  ;;  %v3600_v9 = vmul.f32 %v10511_v59, %v10666_v37  ;;  %v3648_v39 = vmul.f32 %v10526_v54, %v10668_v35 }
 0x2e5   : > { %v3410_v43 = vmul.f32 %v10633_v16, %v10583_v28  ;;  %v3617_v42 = vadd.f32 %v3601_v19, %v3568_v14  ;;  %v3471_v62 = vadd.f32 %v3455_v25, %v3423_v51  ;;  %v3458_v46 = vmul.f32 %v10545_v49, %v3585_v57 }
 0x2e6   : > { %v3378_v15 = vadd.f32 %v3362_v29, %v3330_v61  ;;  %v3696_v53 = vmul.f32 %v10533_v32, %v10680_v60  ;;  %v3506_v55 = vmul.f32 %v10555_v17, %v3633_v4  ;;  %v3329_v50 = vmul.f32 %v10611_v31, %v10593_v38 }
 0x2e7   : > { %v3361_v28 = vmul.f32 %v10618_v58, %v10600_v41  ;;  %v3665_v6 = vadd.f32 %v3649_v7, %v3617_v42  ;;  %v3519_v12 = vadd.f32 %v3503_v45, %v3471_v62  ;;  %v3554_v30 = vmul.f32 %v10575_v44, %v10655_v18 }
 0x2e8   : > { %v3426_v36 = vadd.f32 %v3410_v43, %v3378_v15  ;;  %v3603_v2 = vmul.f32 %v10511_v59, %v10693_v0  ;;  %v3409_v13 = vmul.f32 %v10633_v16, %v10628_v34  ;;  %v3457_v38 = vmul.f32 %v10545_v49, %v10666_v37  ;;  %v10749_v15 = vld [vmem:[#allocation2 + $0x141] sm:$0xff] }
 0x2e9   : > { %v3377_v8 = vadd.f32 %v3361_v28, %v3329_v50  ;;  %v3713_v23 = vadd.f32 %v3697_v47, %v3665_v6  ;;  %v3567_v41 = vadd.f32 %v3551_v10, %v3519_v12  ;;  %v3651_v1 = vmul.f32 %v10526_v54, %v10698_v21  ;;  %v10741_v10 = vld [vmem:[#allocation2 + $0x140] sm:$0xff] }
 0x2ea   : > { %v3474_v3 = vadd.f32 %v3458_v46, %v3426_v36  ;;  %v3699_v27 = vmul.f32 %v10533_v32, %v10706_v20  ;;  %v3332_v63 = vmul.f32 %v10611_v31, %v3585_v57  ;;  %v3364_v5 = vmul.f32 %v10618_v58, %v3633_v4  ;;  %v10751_v46 = vld [vmem:[#allocation2 + $0x142] sm:$0xff] }
 0x2eb   : > { %v3425_v22 = vadd.f32 %v3409_v13, %v3377_v8  ;;  %v3735_v34 = vsel %vm250_vm0, %v3713_v23, 0.0  ;;  %v3616_v40 = vadd.f32 %v3600_v9, %v3567_v41  ;;  %v3505_v33 = vmul.f32 %v10555_v17, %v10668_v35  ;;  %v10766_v23 = vld [vmem:[#allocation2 + $0x138] sm:$0xff] }
 0x2ec   : > { %v3522_v56 = vadd.f32 %v3506_v55, %v3474_v3  ;;  %3736 = vadd.xlane.f32.xlu0 %v3735_v34  ;;  %v3380_v26 = vadd.f32 %v3364_v5, %v3332_v63  ;;  %v3412_v25 = vmul.f32 %v10633_v16, %v10655_v18  ;;  %v3460_v57 = vmul.f32 %v10545_v49, %v10693_v0  ;;  %v10768_v41 = vld [vmem:[#allocation2 + $0x139] sm:$0xff] }
 0x2ed   : > { %v3473_v11 = vadd.f32 %v3457_v38, %v3425_v22  ;;  %v3664_v4 = vadd.f32 %v3648_v39, %v3616_v40  ;;  %v3553_v7 = vmul.f32 %v10575_v44, %v10680_v60  ;;  %v3602_v47 = vmul.f32 %v10511_v59, %v10718_v24  ;;  %v10777_v5 = vld [vmem:[#allocation2 + $0x13a] sm:$0xff] }
 0x2ee   : > { %v3570_v19 = vadd.f32 %v3554_v30, %v3522_v56  ;;  %v3650_v14 = vmul.f32 %v10526_v54, %v10725_v52  ;;  %v3698_v51 = vmul.f32 %v10533_v32, %v10727_v48  ;;  %v3428_v45 = vadd.f32 %v3412_v25, %v3380_v26 }
 0x2ef   : > { %v3521_v61 = vadd.f32 %v3505_v33, %v3473_v11  ;;  %v3712_v18 = vadd.f32 %v3696_v53, %v3664_v4  ;;  %v3331_v9 = vmul.f32 %v10611_v31, %v10666_v37  ;;  %v3363_v39 = vmul.f32 %v10618_v58, %v10668_v35 }
 0x2f0   : > { %v3619_v29 = vadd.f32 %v3603_v2, %v3570_v19  ;;  %v3476_v42 = vadd.f32 %v3460_v57, %v3428_v45  ;;  %v3508_v62 = vmul.f32 %v10555_v17, %v10698_v21  ;;  %v3411_v53 = vmul.f32 %v10633_v16, %v10680_v60  ;;  %v10789_v57 = vld [vmem:[#allocation2 + $0x158] sm:$0xff] }
 0x2f1   : > { %v3569_v43 = vadd.f32 %v3553_v7, %v3521_v61  ;;  %v3732_v55 = vsel %vm250_vm0, %v3712_v18, 0.0  ;;  %v3379_v28 = vadd.f32 %v3363_v39, %v3331_v9  ;;  %v3459_v37 = vmul.f32 %v10545_v49, %v10718_v24 }
 0x2f2   : > { %v3667_v50 = vadd.f32 %v3651_v1, %v3619_v29  ;;  %3733 = vadd.xlane.f32.xlu1 %v3732_v55  ;;  %v3524_v6 = vadd.f32 %v3508_v62, %v3476_v42  ;;  %v3556_v12 = vmul.f32 %v10575_v44, %v10706_v20  ;;  %v3605_v36 = vmul.f32 %v10511_v59, %v10741_v10 }
 0x2f3   : > { %v3618_v35 = vadd.f32 %v3602_v47, %v3569_v43  ;;  %v3653_v60 = vmul.f32 %v10526_v54, %v10749_v15  ;;  %v3701_v2 = vmul.f32 %v10533_v32, %v10751_v46  ;;  %v3427_v8 = vadd.f32 %v3411_v53, %v3379_v28 }
 0x2f4   : > { %v3715_v30 = vadd.f32 %v3699_v27, %v3667_v50  ;;  %v3572_v38 = vadd.f32 %v3556_v12, %v3524_v6  ;;  %v3334_v3 = vmul.f32 %v10611_v31, %v10693_v0  ;;  %v3366_v1 = vmul.f32 %v10618_v58, %v10698_v21  ;;  %v10817_v6 = vld [vmem:[#allocation2 + $0x150] sm:$0xff] }
 0x2f5   : > { %v3666_v13 = vadd.f32 %v3650_v14, %v3618_v35  ;;  %v3475_v22 = vadd.f32 %v3459_v37, %v3427_v8  ;;  %v3507_v63 = vmul.f32 %v10555_v17, %v10725_v52  ;;  %v3414_v34 = vmul.f32 %v10633_v16, %v10706_v20  ;;  %v10796_v14 = vld [vmem:[#allocation2 + $0x159] sm:$0xff]  ;;  %v10819_v12 = vld [vmem:[#allocation2 + $0x151] sm:$0xff] }
 0x2f6   : > { %v3741_v27 = vsel %vm250_vm0, %v3715_v30, 0.0  ;;  %v3621_v56 = vadd.f32 %v3605_v36, %v3572_v38  ;;  %v3382_v33 = vadd.f32 %v3366_v1, %v3334_v3  ;;  %v3462_v0 = vmul.f32 %v10545_v49, %v10741_v10 }
 0x2f7   : > { %3742 = vadd.xlane.f32.xlu0 %v3741_v27  ;;  %v3714_v40 = vadd.f32 %v3698_v51, %v3666_v13  ;;  %v3523_v11 = vadd.f32 %v3507_v63, %v3475_v22  ;;  %v3555_v21 = vmul.f32 %v10575_v44, %v10727_v48  ;;  %v3604_v26 = vmul.f32 %v10511_v59, %v10766_v23  ;;  %v10798_v51 = vld [vmem:[#allocation2 + $0x15a] sm:$0xff] }
 0x2f8   : > { %v3652_v25 = vmul.f32 %v10526_v54, %v10768_v41  ;;  %v3669_v4 = vadd.f32 %v3653_v60, %v3621_v56  ;;  %v3700_v19 = vmul.f32 %v10533_v32, %v10777_v5  ;;  %v3430_v7 = vadd.f32 %v3414_v34, %v3382_v33  ;;  %v10841_v34 = vld [vmem:[#allocation2 + $0x170] sm:$0xff] }
 0x2f9   : > { %v3738_v20 = vsel %vm250_vm0, %v3714_v40, 0.0  ;;  %v3571_v47 = vadd.f32 %v3555_v21, %v3523_v11  ;;  %v3510_v61 = vmul.f32 %v10555_v17, %v10749_v15  ;;  %v3333_v45 = vmul.f32 %v10611_v31, %v10718_v24  ;;  %v10843_v40 = vld [vmem:[#allocation2 + $0x171] sm:$0xff] }
 0x2fa   : > { %3739 = vadd.xlane.f32.xlu1 %v3738_v20  ;;  %v3365_v18 = vmul.f32 %v10618_v58, %v10725_v52  ;;  %v3717_v29 = vadd.f32 %v3701_v2, %v3669_v4  ;;  %v3478_v9 = vadd.f32 %v3462_v0, %v3430_v7  ;;  %v3558_v39 = vmul.f32 %v10575_v44, %v10751_v46 }
 0x2fb   : > { %v3607_v43 = vmul.f32 %v10511_v59, %v10789_v57  ;;  %v3620_v42 = vadd.f32 %v3604_v26, %v3571_v47  ;;  %v3413_v53 = vmul.f32 %v10633_v16, %v10727_v48  ;;  %v3461_v55 = vmul.f32 %v10545_v49, %v10766_v23  ;;  %v10821_v48 = vld [vmem:[#allocation2 + $0x152] sm:$0xff] }
 0x2fc   : > { %v3381_v62 = vadd.f32 %v3365_v18, %v3333_v45  ;;  %v3747_v24 = vsel %vm250_vm0, %v3717_v29, 0.0  ;;  %v3526_v50 = vadd.f32 %v3510_v61, %v3478_v9  ;;  %v3655_v52 = vmul.f32 %v10526_v54, %v10796_v14  ;;  %v3592_v29 = vld [vmem:[#allocation2 + $0x168] sm:$0xff] }
 0x2fd   : > { %v3703_v28 = vmul.f32 %v10533_v32, %v10798_v51  ;;  %3748 = vadd.xlane.f32.xlu0 %v3747_v24  ;;  %v3668_v37 = vadd.f32 %v3652_v25, %v3620_v42  ;;  %v3336_v36 = vmul.f32 %v10611_v31, %v10741_v10  ;;  %v3368_v30 = vmul.f32 %v10618_v58, %v10749_v15  ;;  %v10852_v25 = vld [vmem:[#allocation2 + $0x172] sm:$0xff] }
 0x2fe   : > { %v3429_v35 = vadd.f32 %v3413_v53, %v3381_v62  ;;  %v3574_v60 = vadd.f32 %v3558_v39, %v3526_v50  ;;  %v3509_v2 = vmul.f32 %v10555_v17, %v10768_v41  ;;  %v3557_v8 = vmul.f32 %v10575_v44, %v10777_v5 }
 0x2ff   : > { %v3416_v13 = vmul.f32 %v10633_v16, %v10751_v46  ;;  %v3716_v38 = vadd.f32 %v3700_v19, %v3668_v37  ;;  %v3384_v1 = vadd.f32 %v3368_v30, %v3336_v36  ;;  %v3464_v27 = vmul.f32 %v10545_v49, %v10789_v57 }
 0x300   : > { %v3477_v3 = vadd.f32 %v3461_v55, %v3429_v35  ;;  %v3623_v10 = vadd.f32 %v3607_v43, %v3574_v60  ;;  %v3606_v15 = vmul.f32 %v10511_v59, %v10817_v6  ;;  %v3654_v22 = vmul.f32 %v10526_v54, %v10819_v12  ;;  %v3640_v55 = vld [vmem:[#allocation2 + $0x169] sm:$0xff] }
 0x301   : > { %v3702_v63 = vmul.f32 %v10533_v32, %v10821_v48  ;;  %v3744_v46 = vsel %vm250_vm0, %v3716_v38, 0.0  ;;  %v3432_v33 = vadd.f32 %v3416_v13, %v3384_v1  ;;  %v3335_v0 = vmul.f32 %v10611_v31, %v10766_v23  ;;  %v3643_v1 = vld [vmem:[#allocation2 + $0x189] sm:$0xff] }
 0x302   : > { %v3525_v56 = vadd.f32 %v3509_v2, %v3477_v3  ;;  %3745 = vadd.xlane.f32.xlu1 %v3744_v46  ;;  %v3671_v11 = vadd.f32 %v3655_v52, %v3623_v10  ;;  %v3512_v21 = vmul.f32 %v10555_v17, %v10796_v14  ;;  %v3560_v26 = vmul.f32 %v10575_v44, %v10798_v51  ;;  %v3595_v3 = vld [vmem:[#allocation2 + $0x188] sm:$0xff] }
 0x303   : > { %v3367_v20 = vmul.f32 %v10618_v58, %v10768_v41  ;;  %v3480_v19 = vadd.f32 %v3464_v27, %v3432_v33  ;;  %v3609_v7 = vmul.f32 %v10511_v59, %v10841_v34  ;;  %v3657_v23 = vmul.f32 %v10526_v54, %v10843_v40 }
 0x304   : > { %v3573_v4 = vadd.f32 %v3557_v8, %v3525_v56  ;;  %v3719_v47 = vadd.f32 %v3703_v28, %v3671_v11  ;;  %v3415_v45 = vmul.f32 %v10633_v16, %v10777_v5  ;;  %v3463_v18 = vmul.f32 %v10545_v49, %v10817_v6  ;;  %v3688_v5 = vld [vmem:[#allocation2 + $0x16a] sm:$0xff] }
 0x305   : > { %v3383_v61 = vadd.f32 %v3367_v20, %v3335_v0  ;;  %v3528_v39 = vadd.f32 %v3512_v21, %v3480_v19  ;;  %v3705_v41 = vmul.f32 %v10533_v32, %v10852_v25  ;;  %v3338_v43 = vmul.f32 %v10611_v31, %v10789_v57 }
 0x306   : > { %v3622_v9 = vadd.f32 %v3606_v15, %v3573_v4  ;;  %v3753_v42 = vsel %vm250_vm0, %v3719_v47, 0.0  ;;  %v3511_v53 = vmul.f32 %v10555_v17, %v10819_v12  ;;  %v3370_v24 = vmul.f32 %v10618_v58, %v10796_v14 }
 0x307   : > { %v3431_v62 = vadd.f32 %v3415_v45, %v3383_v61  ;;  %3754 = vadd.xlane.f32.xlu0 %v3753_v42  ;;  %v3576_v52 = vadd.f32 %v3560_v26, %v3528_v39  ;;  %v3559_v28 = vmul.f32 %v10575_v44, %v10821_v48  ;;  %v3608_v37 = vmul.f32 %v10511_v59, %v3592_v29 }
 0x308   : > { %v3670_v50 = vadd.f32 %v3654_v22, %v3622_v9  ;;  %v3386_v35 = vadd.f32 %v3370_v24, %v3338_v43  ;;  %v3418_v36 = vmul.f32 %v10633_v16, %v10798_v51  ;;  %v3466_v30 = vmul.f32 %v10545_v49, %v10841_v34 }
 0x309   : > { %v3479_v57 = vadd.f32 %v3463_v18, %v3431_v62  ;;  %v3625_v2 = vadd.f32 %v3609_v7, %v3576_v52  ;;  %v3656_v14 = vmul.f32 %v10526_v54, %v3640_v55  ;;  %v3704_v8 = vmul.f32 %v10533_v32, %v3688_v5 }
 0x30a   : > { %v3718_v60 = vadd.f32 %v3702_v63, %v3670_v50  ;;  %v3434_v38 = vadd.f32 %v3418_v36, %v3386_v35  ;;  %v3337_v27 = vmul.f32 %v10611_v31, %v10817_v6  ;;  %v3369_v10 = vmul.f32 %v10618_v58, %v10819_v12  ;;  %v3691_v63 = vld [vmem:[#allocation2 + $0x18a] sm:$0xff] }
 0x30b   : > { %v3527_v13 = vadd.f32 %v3511_v53, %v3479_v57  ;;  %v3673_v15 = vadd.f32 %v3657_v23, %v3625_v2  ;;  %v3514_v22 = vmul.f32 %v10555_v17, %v10843_v40  ;;  %v3417_v46 = vmul.f32 %v10633_v16, %v10821_v48  ;;  %v3597_v2 = vld [vmem:[#allocation2 + $0x1a0] sm:$0xff] }
 0x30c   : > { %v3750_v51 = vsel %vm250_vm0, %v3718_v60, 0.0  ;;  %v3482_v33 = vadd.f32 %v3466_v30, %v3434_v38  ;;  %v3385_v0 = vadd.f32 %v3369_v10, %v3337_v27  ;;  %v3465_v11 = vmul.f32 %v10545_v49, %v3592_v29  ;;  %v3690_v60 = vld [vmem:[#allocation2 + $0x182] sm:$0xff]  ;;  %v3596_v27 = vld [vmem:[#allocation2 + $0x198] sm:$0xff] }
 0x30d   : > { %3751 = vadd.xlane.f32.xlu1 %v3750_v51  ;;  %v3575_v56 = vadd.f32 %v3559_v28, %v3527_v13  ;;  %v3721_v6 = vadd.f32 %v3705_v41, %v3673_v15  ;;  %v3562_v12 = vmul.f32 %v10575_v44, %v10852_v25  ;;  %v3611_v21 = vmul.f32 %v10511_v59, %v3595_v3  ;;  %v3594_v41 = vld [vmem:[#allocation2 + $0x180] sm:$0xff] }
 0x30e   : > { %v3659_v26 = vmul.f32 %v10526_v54, %v3643_v1  ;;  %v3530_v4 = vadd.f32 %v3514_v22, %v3482_v33  ;;  %v3707_v19 = vmul.f32 %v10533_v32, %v3691_v63  ;;  %v3433_v7 = vadd.f32 %v3417_v46, %v3385_v0  ;;  %v3642_v28 = vld [vmem:[#allocation2 + $0x181] sm:$0xff]  ;;  %v3644_v33 = vld [vmem:[#allocation2 + $0x199] sm:$0xff] }
 0x30f   : > { %v3624_v20 = vadd.f32 %v3608_v37, %v3575_v56  ;;  %v3759_v48 = vsel %vm250_vm0, %v3721_v6, 0.0  ;;  %v3513_v23 = vmul.f32 %v10555_v17, %v3640_v55  ;;  %v3340_v47 = vmul.f32 %v10611_v31, %v10841_v34  ;;  %v3645_v13 = vld [vmem:[#allocation2 + $0x1a1] sm:$0xff] }
 0x310   : > { %v3372_v61 = vmul.f32 %v10618_v58, %v10843_v40  ;;  %3760 = vadd.xlane.f32.xlu0 %v3759_v48  ;;  %v3578_v18 = vadd.f32 %v3562_v12, %v3530_v4  ;;  %v3481_v9 = vadd.f32 %v3465_v11, %v3433_v7  ;;  %v3561_v39 = vmul.f32 %v10575_v44, %v3688_v5  ;;  %v3693_v15 = vld [vmem:[#allocation2 + $0x1a2] sm:$0xff] }
 0x311   : > { %v3672_v45 = vadd.f32 %v3656_v14, %v3624_v20  ;;  %v3420_v42 = vmul.f32 %v10633_v16, %v10852_v25  ;;  %v3468_v62 = vmul.f32 %v10545_v49, %v3595_v3  ;;  %v3339_v53 = vmul.f32 %v10611_v31, %v3592_v29 }
 0x312   : > { %v3388_v43 = vadd.f32 %v3372_v61, %v3340_v47  ;;  %v3627_v34 = vadd.f32 %v3611_v21, %v3578_v18  ;;  %v3529_v50 = vadd.f32 %v3513_v23, %v3481_v9  ;;  %v3371_v40 = vmul.f32 %v10618_v58, %v3640_v55  ;;  %v7728_v18 = vld [vmem:[%s8339_s10 + $0x1b8] sm:$0xff] }
 0x313   : > { %v3720_v24 = vadd.f32 %v3704_v8, %v3672_v45  ;;  %v3610_v52 = vmul.f32 %v10511_v59, %v3594_v41  ;;  %v3419_v57 = vmul.f32 %v10633_v16, %v3688_v5  ;;  %v3467_v35 = vmul.f32 %v10545_v49, %v3594_v41  ;;  %v7727_v45 = vld [vmem:[%s8339_s10 + $0x1b0] sm:$0xff] }
 0x314   : > { %v3436_v37 = vadd.f32 %v3420_v42, %v3388_v43  ;;  %v3675_v25 = vadd.f32 %v3659_v26, %v3627_v34  ;;  %v3577_v30 = vadd.f32 %v3561_v39, %v3529_v50  ;;  %v3387_v31 = vadd.f32 %v3371_v40, %v3339_v53  ;;  %v3692_v26 = vld [vmem:[#allocation2 + $0x19a] sm:$0xff]  ;;  %v10941_v41 = vld [vmem:[%s8339_s10 + $0x1d0] sm:$0xff]  ;;  %v3139_v53 = vpop.xlane.xlu1 %3138  ;;  %v10961_v40 = vld [vmem:[%s8339_s10 + $0x228] sm:$0xff] }
 0x315   : > { %v3756_v36 = vsel %vm250_vm0, %v3720_v24, 0.0  ;;  %v3516_v14 = vmul.f32 %v10555_v17, %v3643_v1  ;;  %v3658_v8 = vmul.f32 %v10526_v54, %v3642_v28  ;;  %v3706_v16 = vmul.f32 %v10533_v32, %v3690_v60  ;;  %v10937_v39 = vld [vmem:[%s8339_s10 + $0x1e0] sm:$0xff]  ;;  %v10945_v43 = vld [vmem:[%s8339_s10 + $0x1f8] sm:$0xff]  ;;  %v10953_v24 = vld [vmem:[%s8339_s10 + $0x210] sm:$0xff] }
 0x316   : > { %3757 = vadd.xlane.f32.xlu1 %v3756_v36  ;;  %v3484_v29 = vadd.f32 %v3468_v62, %v3436_v37  ;;  %v3723_v58 = vadd.f32 %v3707_v19, %v3675_v25  ;;  %v3626_v55 = vadd.f32 %v3610_v52, %v3577_v30  ;;  %v3435_v38 = vadd.f32 %v3419_v57, %v3387_v31  ;;  %v10949_v62 = vld [vmem:[%s8339_s10 + $0x1e8] sm:$0xff]  ;;  %v10957_v34 = vld [vmem:[%s8339_s10 + $0x200] sm:$0xff]  ;;  %v10977_v25 = vld [vmem:[%s8339_s10 + $0x258] sm:$0xff] }
 0x317   : > { %v3564_v5 = vmul.f32 %v10575_v44, %v3691_v63  ;;  %v3613_v3 = vmul.f32 %v10511_v59, %v3597_v2  ;;  %v3515_v1 = vmul.f32 %v10555_v17, %v3642_v28  ;;  %v3661_v56 = vmul.f32 %v10526_v54, %v3645_v13  ;;  %v10965_v28 = vld [vmem:[%s8339_s10 + $0x218] sm:$0xff]  ;;  %v10969_v37 = vld [vmem:[%s8339_s10 + $0x240] sm:$0xff]  ;;  %v10981_v30 = vld [vmem:[%s8339_s10 + $0x248] sm:$0xff] }
 0x318   : > { %v3532_v49 = vadd.f32 %v3516_v14, %v3484_v29  ;;  %v3765_v10 = vsel %vm250_vm0, %v3723_v58, 0.0  ;;  %v3674_v51 = vadd.f32 %v3658_v8, %v3626_v55  ;;  %v3483_v22 = vadd.f32 %v3467_v35, %v3435_v38  ;;  %v3148_v52 = vpop.xlane.xlu1 %3147  ;;  %14407 = vst [vmem:[#allocation16_spill] sm:$0xff] %v10965_v28  ;;  %14408 = vst [vmem:[#allocation63_spill] sm:$0xff] %v10969_v37  ;;  %v10973_v35 = vld [vmem:[%s8339_s10 + $0x230] sm:$0xff]  ;;  %v10987_v14 = vld [vmem:[%s8339_s10 + $0x260] sm:$0xff] }
 0x319   : > { %3766 = vadd.xlane.f32.xlu0 %v3765_v10  ;;  %v3563_v6 = vmul.f32 %v10575_v44, %v3690_v60  ;;  %v3612_v63 = vmul.f32 %v10511_v59, %v3596_v27  ;;  %v3709_v21 = vmul.f32 %v10533_v32, %v3693_v15  ;;  %v3660_v4 = vmul.f32 %v10526_v54, %v3644_v33  ;;  %v10929_v54 = vpop.xlane.xlu0 %3135  ;;  %v7743_v2 = vld [vmem:[%s8339_s10 + $0x1b1] sm:$0xff]  ;;  %v10990_v58 = vld [vmem:[%s8339_s10 + $0x1c9] sm:$0xff]  ;;  %v7744_v13 = vld [vmem:[%s8339_s10 + $0x1b9] sm:$0xff] }
 0x31a   : > { %v3580_v46 = vadd.f32 %v3564_v5, %v3532_v49  ;;  %v3722_v0 = vadd.f32 %v3706_v16, %v3674_v51  ;;  %v3531_v11 = vadd.f32 %v3515_v1, %v3483_v22  ;;  %v3708_v44 = vmul.f32 %v10533_v32, %v3692_v26  ;;  %v10934_v32 = vld [vmem:[%s8339_s10 + $0x1c8] sm:$0xff]  ;;  %14409 = vst [vmem:[#allocation96_spill] sm:$0xff] %v10973_v35  ;;  %v11003_v51 = vld [vmem:[%s8339_s10 + $0x1d1] sm:$0xff] }
 0x31b   : > { %v3215_v31 = vlaneseq  ;;  %v10995_v49 = vstv %s249_s6 }
 0x31c   : > { %v3629_v12 = vadd.f32 %v3613_v3, %v3580_v46  ;;  %v3762_v20 = vsel %vm250_vm0, %v3722_v0, 0.0  ;;  %v3579_v17 = vadd.f32 %v3563_v6, %v3531_v11  ;;  %v3154_v36 = vpop.xlane.xlu1 %3153  ;;  %14410 = vst [vmem:[#allocation105_spill] sm:$0xff] %v10995_v49  ;;  %v10998_v3 = vld [vmem:[%s8339_s10 + $0x1e1] sm:$0xff]  ;;  %v3184_v1 = vadd.f32 %v10995_v49, %v3139_v53  ;;  %v11016_v6 = vld [vmem:[%s8339_s10 + $0x1f9] sm:$0xff] }
 0x31d   : > { %3763 = vadd.xlane.f32.xlu1 %v3762_v20  ;;  %v3142_v9 = vpop.xlane.xlu0 %3141  ;;  %v3216_v55 = vand.u32 127, %v3215_v31  ;;  %v3218_v5 = vshrl.u32 %v3215_v31, 7  ;;  %v3187_v0 = vadd.f32 %v10995_v49, %v3148_v52 }
 0x31e   : > { %v3677_v19 = vadd.f32 %v3661_v56, %v3629_v12  ;;  %v3628_v7 = vadd.f32 %v3612_v63, %v3579_v17  ;;  %v3185_v15 = vadd.f32 %v10995_v49, %v3142_v9  ;;  %v3183_v63 = vadd.f32 %v10995_v49, %v10929_v54 }
 0x31f   : > { %v3221_v38 = vadd.s32 4294967288, %v3216_v55  ;;  %v11011_v33 = vsub.s32 %v3216_v55, %v3218_v5 }
 0x320   : > { %v3725_v48 = vadd.f32 %v3709_v21, %v3677_v19  ;;  %v3676_v59 = vadd.f32 %v3660_v4, %v3628_v7  ;;  %v3160_v29 = vpop.xlane.xlu1 %3159  ;;  %v3189_v21 = vadd.f32 %v10995_v49, %v3154_v36  ;;  %v11028_v7 = vld [vmem:[%s8339_s10 + $0x1e9] sm:$0xff]  ;;  %v11050_v36 = vld [vmem:[%s8339_s10 + $0x201] sm:$0xff] }
 0x321   : > { %v3145_v42 = vpop.xlane.xlu0 %3144  ;;  %v11006_v22 = vsub.s32 %v3221_v38, %v3218_v5  ;;  %14412 = vst [vmem:[#allocation18_spill] sm:$0xff] %v11011_v33  ;;  %v3191_v4 = vadd.f32 %v10995_v49, %v3160_v29  ;;  %v11061_v38 = vld [vmem:[%s8339_s10 + $0x229] sm:$0xff] }
 0x322   : > { %v3771_v23 = vsel %vm250_vm0, %v3725_v48, 0.0  ;;  %v3724_v47 = vadd.f32 %v3708_v44, %v3676_v59  ;;  %v3186_v27 = vadd.f32 %v10995_v49, %v3145_v42  ;;  %v3231_v44 = vrot.slane %v3185_v15, %v11011_v33 }
 0x323   : > { %3772 = vadd.xlane.f32.xlu0 %v3771_v23  ;;  %14411 = vst [vmem:[#allocation17_spill] sm:$0xff] %v11006_v22  ;;  %v3225_v48 = vrot.slane %v3184_v1, %v11006_v22  ;;  %v3249_v42 = vrot.slane %v3189_v21, %v11011_v33  ;;  %v3258_v52 = vrot.slane %v3191_v4, %v11011_v33  ;;  %v11081_v21 = vld [vmem:[%s8339_s10 + $0x241] sm:$0xff] }
 0x324   : > { %v3768_v61 = vsel %vm250_vm0, %v3724_v47, 0.0  ;;  %v3166_v16 = vpop.xlane.xlu1 %3165  ;;  %v3235_v12 = vrot.slane %v3186_v27, %v11006_v22  ;;  %v3240_v47 = vrot.slane %v3187_v0, %v11011_v33 }
 0x325   : > { %3769 = vadd.xlane.f32.xlu1 %v3768_v61  ;;  %v3151_v50 = vpop.xlane.xlu0 %3150  ;;  %v3193_v23 = vadd.f32 %v10995_v49, %v3166_v16 }
 0x326   : > { %v3188_v10 = vadd.f32 %v10995_v49, %v3151_v50  ;;  %v3236_v9 = vsel %vm3226_vm3, %v3235_v12, %v3231_v44  ;;  %v11100_v44 = vld [vmem:[%s8339_s10 + $0x249] sm:$0xff] }
 0x327   : > { %v3267_v31 = vrot.slane %v3193_v23, %v11011_v33  ;;  %v11109_v23 = vld [vmem:[%s8339_s10 + $0x1ca] sm:$0xff] }
 0x328   : > { %v3172_v20 = vpop.xlane.xlu1 %3171  ;;  %v3244_v17 = vrot.slane %v3188_v10, %v11006_v22 }
 0x329   : > { %v3157_v57 = vpop.xlane.xlu0 %3156  ;;  %v3195_v54 = vadd.f32 %v10995_v49, %v3172_v20 }
 0x32a   : > { %v3190_v46 = vadd.f32 %v10995_v49, %v3157_v57  ;;  %v3245_v50 = vsel %vm3226_vm3, %v3244_v17, %v3240_v47  ;;  %v11087_v17 = vld [vmem:[%s8339_s10 + $0x231] sm:$0xff]  ;;  %v7760_v47 = vld [vmem:[%s8339_s10 + $0x1ba] sm:$0xff] }
 0x32c   : > { %v3253_v59 = vrot.slane %v3190_v46, %v11006_v22 }
 0x32d   : > { %v3163_v60 = vpop.xlane.xlu0 %3162 }
 0x32e   : > { %v3192_v11 = vadd.f32 %v10995_v49, %v3163_v60 }
 0x330   : > { %v3262_v61 = vrot.slane %v3192_v11, %v11006_v22 }
 0x331   : > { %v3169_v8 = vpop.xlane.xlu0 %3168 }
 0x332   : > { %v3194_v26 = vadd.f32 %v10995_v49, %v3169_v8  ;;  %v3263_v8 = vsel %vm3226_vm3, %v3262_v61, %v3258_v52  ;;  %v11115_v61 = vld [vmem:[%s8339_s10 + $0x1e2] sm:$0xff] }
 0x334   : > { %v3271_v53 = vrot.slane %v3194_v26, %v11006_v22 }
 0x335   : > { %v3175_v56 = vpop.xlane.xlu0 %3174 }
 0x336   : > { %3906 = vperm.xlu1 %8070, %v7727_v45   ;;  %v3196_v19 = vadd.f32 %v10995_v49, %v3175_v56  ;;  %v11039_v45 = vld [vmem:[%s8339_s10 + $0x211] sm:$0xff]  ;;  %v3272_v10 = vsel %vm3226_vm3, %v3271_v53, %v3267_v31  ;;  %v11073_v56 = vld [vmem:[%s8339_s10 + $0x219] sm:$0xff]  ;;  %v11134_v53 = vld [vmem:[%s8339_s10 + $0x202] sm:$0xff] }
 0x337   : > { %v11150_v31 = vld [vmem:[%s8339_s10 + $0x232] sm:$0xff] }
 0x338   : > { %v3280_v57 = vrot.slane %v3196_v19, %v11006_v22  ;;  %v11096_v19 = vld [vmem:[%s8339_s10 + $0x259] sm:$0xff] }
 0x339   : > { %3911 = vperm.xlu0 %8069, %v7728_v18   ;;  %v3220_v18 = vrot.slane %v3183_v63, %v11011_v33 }
 0x33a   : > { %3916 = vperm.xlu1 %8070, %v10934_v32  }
 0x33b   : > { %v3227_v60 = vsel %vm3226_vm3, %v3225_v48, %v3220_v18  ;;  %v7759_v48 = vld [vmem:[%s8339_s10 + $0x1b2] sm:$0xff]  ;;  %v11122_v18 = vld [vmem:[%s8339_s10 + $0x1fa] sm:$0xff] }
 0x33c   : > { %v3292_v55 = vsel %vm3291_vm4, %v3236_v9, %v3227_v60  ;;  %v11126_v9 = vld [vmem:[%s8339_s10 + $0x1ea] sm:$0xff]  ;;  %v11142_v60 = vld [vmem:[%s8339_s10 + $0x21a] sm:$0xff] }
 0x33d   : > { %3926 = vperm.xlu0 %8069, %v10937_v39   ;;  %v3294_v27 = vsel %vm3293_vm5, %v3245_v50, %v3292_v55  ;;  %v11138_v50 = vld [vmem:[%s8339_s10 + $0x22a] sm:$0xff] }
 0x33e   : > { %3921 = vperm.xlu1 %8070, %v10941_v41  }
 0x341   : > { %3936 = vperm.xlu0 %8069, %v10945_v43  }
 0x342   : > { %3931 = vperm.xlu1 %8070, %v10949_v62  }
 0x345   : > { %3946 = vperm.xlu0 %8069, %v10953_v24  }
 0x346   : > { %3941 = vperm.xlu1 %8070, %v10957_v34  }
 0x349   : > { %3956 = vperm.xlu0 %8069, %v10961_v40  }
 0x34a   : > { %3951 = vperm.xlu1 %8070, %v10965_v28  }
 0x34d   : > { %3966 = vperm.xlu0 %8069, %v10969_v37  }
 0x34e   : > { %3961 = vperm.xlu1 %8070, %v10973_v35  }
 0x351   : > { %3976 = vperm.xlu0 %8069, %v10977_v25  }
 0x352   : > { %3971 = vperm.xlu1 %8070, %v10981_v30  }
 0x355   : > { %4034 = vperm.xlu0 %8069, %v7743_v2   ;;  %v3254_v2 = vsel %vm3226_vm3, %v3253_v59, %v3249_v42  ;;  %v11106_v59 = vld [vmem:[%s8339_s10 + $0x261] sm:$0xff]  ;;  %v11130_v42 = vld [vmem:[%s8339_s10 + $0x212] sm:$0xff] }
 0x356   : > { %3981 = vperm.xlu1 %8070, %v10987_v14   ;;  %v3296_v1 = vsel %vm3295_vm6, %v3254_v2, %v3294_v27  ;;  %v11146_v2 = vld [vmem:[%s8339_s10 + $0x242] sm:$0xff] }
 0x357   : > { %v3298_v11 = vsel %vm3297_vm7, %v3263_v8, %v3296_v1  ;;  %v11154_v8 = vld [vmem:[%s8339_s10 + $0x25a] sm:$0xff]  ;;  %v11163_v27 = vld [vmem:[%s8339_s10 + $0x262] sm:$0xff] }
 0x358   : > { %v3300_v12 = vsel %vm3299_vm8, %v3272_v10, %v3298_v11 }
 0x359   : > { %4044 = vperm.xlu0 %8069, %v10990_v58  }
 0x35a   : > { %4039 = vperm.xlu1 %8070, %v7744_v13   ;;  %v3276_v13 = vrot.slane %v3195_v54, %v11011_v33  ;;  %v11118_v54 = vld [vmem:[%s8339_s10 + $0x1d2] sm:$0xff] }
 0x35c   : > { %v3281_v46 = vsel %vm3226_vm3, %v3280_v57, %v3276_v13  ;;  %v11158_v13 = vld [vmem:[%s8339_s10 + $0x24a] sm:$0xff] }
 0x35d   : > { %4054 = vperm.xlu0 %8069, %v10998_v3   ;;  %v3302_v26 = vsel %vm3301_vm9, %v3281_v46, %v3300_v12 }
 0x35e   : > { %4049 = vperm.xlu1 %8070, %v11003_v51  }
 0x361   : > { %4064 = vperm.xlu0 %8069, %v11016_v6  }
 0x362   : > { %4059 = vperm.xlu1 %8070, %v11028_v7  }
 0x364   : > { %v3181_v29 = vpop.xlane.xlu0 %3180 }
 0x365   : > { %4074 = vperm.xlu0 %8069, %v11039_v45   ;;  %v3178_v16 = vpop.xlane.xlu1 %3177  ;;  %v3198_v5 = vadd.f32 %v10995_v49, %v3181_v29 }
 0x366   : > { %4069 = vperm.xlu1 %8070, %v11050_v36   ;;  %v3197_v15 = vadd.f32 %v10995_v49, %v3178_v16 }
 0x367   : > { %v3289_v0 = vrot.slane %v3198_v5, %v11006_v22 }
 0x368   : > { %v3285_v63 = vrot.slane %v3197_v15, %v11011_v33 }
 0x369   : > { %4084 = vperm.xlu0 %8069, %v11061_v38  }
 0x36a   : > { %4079 = vperm.xlu1 %8070, %v11073_v56   ;;  %v3290_v20 = vsel %vm3226_vm3, %v3289_v0, %v3285_v63 }
 0x36b   : > { %v3304_v4 = vsel %vm3303_vm10, %v3290_v20, %v3302_v26 }
 0x36c   : > { %3307 = vst.msk [vmem:[%s11091_s9] sm:$0xff] %vm3306_vm11, %v3304_v4  ;;  %v3731_v52 = vpop.xlane.xlu0 %3730 }
 0x36d   : > { %4094 = vperm.xlu0 %8069, %v11081_v21   ;;  %v3775_v20 = vadd.f32 %v3731_v52, %v10995_v49 }
 0x36e   : > { %4089 = vperm.xlu1 %8070, %v11087_v17  }
 0x36f   : > { %v3728_v57 = vpop.xlane.xlu1 %3727 }
 0x370   : > { %v3774_v26 = vadd.f32 %v3728_v57, %v10995_v49 }
 0x371   : > { %4104 = vperm.xlu0 %8069, %v11096_v19  }
 0x372   : > { %4099 = vperm.xlu1 %8070, %v11100_v44  }
 0x375   : > { %4162 = vperm.xlu0 %8069, %v7759_v48  }
 0x376   : > { %4109 = vperm.xlu1 %8070, %v11106_v59  }
 0x379   : > { %4172 = vperm.xlu0 %8069, %v11109_v23   ;;  %v3737_v29 = vpop.xlane.xlu0 %3736 }
 0x37a   : > { %4167 = vperm.xlu1 %8070, %v7760_v47  }
 0x37d   : > { %4182 = vperm.xlu0 %8069, %v11115_v61  }
 0x37e   : > { %4177 = vperm.xlu1 %8070, %v11118_v54  }
 0x37f   : > { %v3734_v55 = vpop.xlane.xlu1 %3733 }
 0x380   : > { %v3776_v11 = vadd.f32 %v3734_v55, %v10995_v49 }
 0x381   : > { %4192 = vperm.xlu0 %8069, %v11122_v18  }
 0x382   : > { %4187 = vperm.xlu1 %8070, %v11126_v9  }
 0x384   : > { %v3743_v16 = vpop.xlane.xlu0 %3742 }
 0x385   : > { %4202 = vperm.xlu0 %8069, %v11130_v42   ;;  %v3779_v12 = vadd.f32 %v3743_v16, %v10995_v49  ;;  %v3818_v16 = vrot.slane %v3776_v11, %v11011_v33  ;;  %v3813_v11 = vrot.slane %v3775_v20, %v11006_v22 }
 0x386   : > { %4197 = vperm.xlu1 %8070, %v11134_v53  }
 0x387   : > { %v3740_v5 = vpop.xlane.xlu1 %3739 }
 0x388   : > { %v3778_v63 = vadd.f32 %v3740_v5, %v10995_v49 }
 0x389   : > { %4212 = vperm.xlu0 %8069, %v11138_v50  }
 0x38a   : > { %4207 = vperm.xlu1 %8070, %v11142_v60   ;;  %v3749_v10 = vpop.xlane.xlu0 %3748 }
 0x38b   : > { %v3781_v48 = vadd.f32 %v3749_v10, %v10995_v49  ;;  %v3831_v10 = vrot.slane %v3779_v12, %v11006_v22 }
 0x38d   : > { %4222 = vperm.xlu0 %8069, %v11146_v2  }
 0x38e   : > { %4217 = vperm.xlu1 %8070, %v11150_v31  }
 0x38f   : > { %v3746_v15 = vpop.xlane.xlu1 %3745 }
 0x390   : > { %v3780_v4 = vadd.f32 %v3746_v15, %v10995_v49  ;;  %v3827_v15 = vrot.slane %v3778_v63, %v11011_v33 }
 0x391   : > { %4232 = vperm.xlu0 %8069, %v11154_v8  }
 0x392   : > { %4227 = vperm.xlu1 %8070, %v11158_v13   ;;  %v3832_v20 = vsel %vm3226_vm3, %v3831_v10, %v3827_v15 }
 0x394   : > { %v3755_v1 = vpop.xlane.xlu0 %3754 }
 0x395   : > { %4291 = vperm.xlu0 %8069, %v10934_v32   ;;  %v3783_v55 = vadd.f32 %v3755_v1, %v10995_v49 }
 0x396   : > { %4237 = vperm.xlu1 %8070, %v11163_v27  }
 0x397   : > { %v3849_v63 = vrot.slane %v3783_v55, %v11006_v22 }
 0x399   : > { %4301 = vperm.xlu0 %8069, %v10937_v39  }
 0x39a   : > { %4296 = vperm.xlu1 %8070, %v10941_v41   ;;  %v3752_v46 = vpop.xlane.xlu1 %3751  ;;  %v3777_v41 = vadd.f32 %v3737_v29, %v10995_v49 }
 0x39c   : > { %v3822_v5 = vrot.slane %v3777_v41, %v11006_v22  ;;  %v3836_v41 = vrot.slane %v3780_v4, %v11011_v33 }
 0x39d   : > { %4311 = vperm.xlu0 %8069, %v10945_v43   ;;  %v3761_v0 = vpop.xlane.xlu0 %3760 }
 0x39e   : > { %4306 = vperm.xlu1 %8070, %v10949_v62   ;;  %v3785_v52 = vadd.f32 %v3761_v0, %v10995_v49  ;;  %v3823_v12 = vsel %vm3226_vm3, %v3822_v5, %v3818_v16 }
 0x3a1   : > { %4321 = vperm.xlu0 %8069, %v10953_v24  }
 0x3a2   : > { %4316 = vperm.xlu1 %8070, %v10957_v34  }
 0x3a3   : > { %v3758_v32 = vpop.xlane.xlu1 %3757 }
 0x3a4   : > { %v3784_v57 = vadd.f32 %v3758_v32, %v10995_v49  ;;  %v3840_v32 = vrot.slane %v3781_v48, %v11006_v22 }
 0x3a5   : > { %4331 = vperm.xlu0 %8069, %v10961_v40  }
 0x3a6   : > { %4326 = vperm.xlu1 %8070, %v10965_v28   ;;  %v3767_v47 = vpop.xlane.xlu0 %3766  ;;  %v3782_v28 = vadd.f32 %v3752_v46, %v10995_v49  ;;  %v3841_v16 = vsel %vm3226_vm3, %v3840_v32, %v3836_v41 }
 0x3a7   : > { %v3787_v1 = vadd.f32 %v3767_v47, %v10995_v49  ;;  %v3854_v47 = vrot.slane %v3784_v57, %v11011_v33 }
 0x3a8   : > { %v3845_v0 = vrot.slane %v3782_v28, %v11011_v33 }
 0x3a9   : > { %4341 = vperm.xlu0 %8069, %v10969_v37   ;;  %v11201_v37 = vld [vmem:[%s8339_s10 + $0x270] sm:$0xff]  ;;  %v3867_v48 = vrot.slane %v3787_v1, %v11006_v22 }
 0x3aa   : > { %4336 = vperm.xlu1 %8070, %v10973_v35   ;;  %v3764_v29 = vpop.xlane.xlu1 %3763  ;;  %v3809_v35 = vrot.slane %v3774_v26, %v11011_v33  ;;  %v3858_v26 = vrot.slane %v3785_v52, %v11006_v22  ;;  %v3850_v57 = vsel %vm3226_vm3, %v3849_v63, %v3845_v0 }
 0x3ab   : > { %v3786_v46 = vadd.f32 %v3764_v29, %v10995_v49 }
 0x3ac   : > { %v3814_v55 = vsel %vm3226_vm3, %v3813_v11, %v3809_v35  ;;  %v3859_v10 = vsel %vm3226_vm3, %v3858_v26, %v3854_v47 }
 0x3ad   : > { %4351 = vperm.xlu0 %8069, %v10977_v25   ;;  %v3863_v4 = vrot.slane %v3786_v46, %v11011_v33  ;;  %v3878_v5 = vsel %vm3291_vm4, %v3823_v12, %v3814_v55 }
 0x3ae   : > { %4346 = vperm.xlu1 %8070, %v10981_v30   ;;  %v3879_v15 = vsel %vm3293_vm5, %v3832_v20, %v3878_v5 }
 0x3af   : > { %v3880_v35 = vsel %vm3295_vm6, %v3841_v16, %v3879_v15  ;;  %v3868_v11 = vsel %vm3226_vm3, %v3867_v48, %v3863_v4  ;;  %v11274_v15 = vld [vmem:[%s8339_s10 + $0x271] sm:$0xff] }
 0x3b0   : > { %v3773_v29 = vpop.xlane.xlu0 %3772  ;;  %v3881_v41 = vsel %vm3297_vm7, %v3850_v57, %v3880_v35  ;;  %v11286_v35 = vld [vmem:[%s8339_s10 + $0x279] sm:$0xff] }
 0x3b1   : > { %v3789_v28 = vadd.f32 %v3773_v29, %v10995_v49  ;;  %4361 = vperm.xlu0 %8069, %v11201_v37   ;;  %v11224_v29 = vld [vmem:[%s8339_s10 + $0x278] sm:$0xff]  ;;  %v3882_v0 = vsel %vm3299_vm8, %v3859_v10, %v3881_v41 }
 0x3b2   : > { %4356 = vperm.xlu1 %8070, %v10987_v14   ;;  %v3770_v52 = vpop.xlane.xlu1 %3769  ;;  %v3883_v12 = vsel %vm3301_vm9, %v3868_v11, %v3882_v0 }
 0x3b3   : > { %v3788_v46 = vadd.f32 %v3770_v52, %v10995_v49  ;;  %v3876_v1 = vrot.slane %v3789_v28, %v11006_v22 }
 0x3b5   : > { %4419 = vperm.xlu0 %8069, %v10990_v58   ;;  %v3872_v32 = vrot.slane %v3788_v46, %v11011_v33 }
 0x3b6   : > { %4366 = vperm.xlu1 %8070, %v11224_v29   ;;  %v11233_v63 = vpop.permute.xlu1 %3906 }
 0x3b7   : > { %v3877_v47 = vsel %vm3226_vm3, %v3876_v1, %v3872_v32 }
 0x3b8   : > { %v11237_v26 = vpop.permute.xlu0 %3911  ;;  %v3884_v20 = vsel %vm3303_vm10, %v3877_v47, %v3883_v12 }
 0x3b9   : > { %4429 = vperm.xlu0 %8069, %v10998_v3   ;;  %3886 = vst.msk [vmem:[%s11091_s9 + $0x8] sm:$0xff] %vm3306_vm11, %v3884_v20 }
 0x3ba   : > { %4424 = vperm.xlu1 %8070, %v11003_v51   ;;  %v11244_v58 = vpop.permute.xlu1 %3916 }
 0x3bc   : > { %v11246_v4 = vpop.permute.xlu0 %3926 }
 0x3bd   : > { %4439 = vperm.xlu0 %8069, %v11016_v6  }
 0x3be   : > { %4434 = vperm.xlu1 %8070, %v11028_v7   ;;  %v11250_v48 = vpop.permute.xlu1 %3921 }
 0x3c0   : > { %v11252_v28 = vpop.permute.xlu0 %3936 }
 0x3c1   : > { %4449 = vperm.xlu0 %8069, %v11039_v45  }
 0x3c2   : > { %4444 = vperm.xlu1 %8070, %v11050_v36   ;;  %v11256_v55 = vpop.permute.xlu1 %3931 }
 0x3c4   : > { %v11258_v51 = vpop.permute.xlu0 %3946 }
 0x3c5   : > { %4459 = vperm.xlu0 %8069, %v11061_v38  }
 0x3c6   : > { %4454 = vperm.xlu1 %8070, %v11073_v56   ;;  %v11262_v16 = vpop.permute.xlu1 %3941 }
 0x3c8   : > { %v11264_v5 = vpop.permute.xlu0 %3956 }
 0x3c9   : > { %4469 = vperm.xlu0 %8069, %v11081_v21  }
 0x3ca   : > { %4464 = vperm.xlu1 %8070, %v11087_v17   ;;  %v11268_v57 = vpop.permute.xlu1 %3951 }
 0x3cc   : > { %v11270_v52 = vpop.permute.xlu0 %3966 }
 0x3cd   : > { %4479 = vperm.xlu0 %8069, %v11096_v19  }
 0x3ce   : > { %4474 = vperm.xlu1 %8070, %v11100_v44   ;;  %v11277_v10 = vpop.permute.xlu1 %3961 }
 0x3d0   : > { %v11279_v46 = vpop.permute.xlu0 %3976 }
 0x3d1   : > { %4489 = vperm.xlu0 %8069, %v11274_v15  }
 0x3d2   : > { %4484 = vperm.xlu1 %8070, %v11106_v59   ;;  %v11283_v1 = vpop.permute.xlu1 %3971 }
 0x3d4   : > { %v11288_v11 = vpop.permute.xlu0 %4034 }
 0x3d5   : > { %4547 = vperm.xlu0 %8069, %v11109_v23  }
 0x3d6   : > { %4494 = vperm.xlu1 %8070, %v11286_v35   ;;  %v11292_v41 = vpop.permute.xlu1 %3981 }
 0x3d8   : > { %v11294_v32 = vpop.permute.xlu0 %4044 }
 0x3d9   : > { %4557 = vperm.xlu0 %8069, %v11115_v61  }
 0x3da   : > { %4552 = vperm.xlu1 %8070, %v11118_v54   ;;  %v11298_v0 = vpop.permute.xlu1 %4039 }
 0x3dc   : > { %v11300_v12 = vpop.permute.xlu0 %4054 }
 0x3dd   : > { %14413 = vst [vmem:[#allocation66_spill] sm:$0xff] %v11300_v12  ;;  %4567 = vperm.xlu0 %8069, %v11122_v18  }
 0x3de   : > { %4562 = vperm.xlu1 %8070, %v11126_v9   ;;  %v11304_v23 = vpop.permute.xlu1 %4049 }
 0x3df   : > { %14414 = vst [vmem:[#allocation67_spill] sm:$0xff] %v11304_v23 }
 0x3e0   : > { %v11306_v47 = vpop.permute.xlu0 %4064 }
 0x3e1   : > { %14415 = vst [vmem:[#allocation84_spill] sm:$0xff] %v11306_v47  ;;  %4577 = vperm.xlu0 %8069, %v11130_v42  }
 0x3e2   : > { %4572 = vperm.xlu1 %8070, %v11134_v53   ;;  %v11310_v20 = vpop.permute.xlu1 %4059 }
 0x3e3   : > { %14416 = vst [vmem:[#allocation101_spill] sm:$0xff] %v11310_v20 }
 0x3e4   : > { %v11312_v54 = vpop.permute.xlu0 %4074 }
 0x3e5   : > { %14417 = vst [vmem:[#allocation80_spill] sm:$0xff] %v11312_v54  ;;  %4587 = vperm.xlu0 %8069, %v11138_v50   ;;  %v11328_v54 = vld [vmem:[%s8339_s10 + $0x272] sm:$0xff] }
 0x3e6   : > { %4582 = vperm.xlu1 %8070, %v11142_v60   ;;  %v11316_v33 = vpop.permute.xlu1 %4069 }
 0x3e7   : > { %14418 = vst [vmem:[#allocation19_spill] sm:$0xff] %v11316_v33  ;;  %v11340_v33 = vld [vmem:[%s8339_s10 + $0x27a] sm:$0xff] }
 0x3e8   : > { %v11318_v22 = vpop.permute.xlu0 %4084 }
 0x3e9   : > { %14419 = vst [vmem:[#allocation20_spill] sm:$0xff] %v11318_v22  ;;  %4597 = vperm.xlu0 %8069, %v11146_v2  }
 0x3ea   : > { %4592 = vperm.xlu1 %8070, %v11150_v31   ;;  %v11322_v49 = vpop.permute.xlu1 %4079 }
 0x3eb   : > { %14420 = vst [vmem:[#allocation21_spill] sm:$0xff] %v11322_v49 }
 0x3ec   : > { %v11324_v47 = vpop.permute.xlu0 %4094 }
 0x3ed   : > { %14421 = vst [vmem:[#allocation22_spill] sm:$0xff] %v11324_v47  ;;  %4607 = vperm.xlu0 %8069, %v11154_v8  }
 0x3ee   : > { %4602 = vperm.xlu1 %8070, %v11158_v13   ;;  %v11331_v20 = vpop.permute.xlu1 %4089 }
 0x3ef   : > { %14422 = vst [vmem:[#allocation23_spill] sm:$0xff] %v11331_v20 }
 0x3f0   : > { %v11333_v23 = vpop.permute.xlu0 %4104 }
 0x3f1   : > { %14423 = vst [vmem:[#allocation24_spill] sm:$0xff] %v11333_v23  ;;  %4617 = vperm.xlu0 %8069, %v11328_v54  }
 0x3f2   : > { %4612 = vperm.xlu1 %8070, %v11163_v27   ;;  %v11337_v22 = vpop.permute.xlu1 %4099 }
 0x3f4   : > { %v11342_v49 = vpop.permute.xlu0 %4162 }
 0x3f5   : > { %14424 = vst [vmem:[#allocation70_spill] sm:$0xff] %v11342_v49  ;;  %4676 = vperm.xlu0 %8069, %v10937_v39  }
 0x3f6   : > { %4622 = vperm.xlu1 %8070, %v11340_v33   ;;  %v11346_v47 = vpop.permute.xlu1 %4109 }
 0x3f8   : > { %v11348_v12 = vpop.permute.xlu0 %4172 }
 0x3f9   : > { %14425 = vst [vmem:[#allocation104_spill] sm:$0xff] %v11348_v12  ;;  %4686 = vperm.xlu0 %8069, %v10945_v43   ;;  %v14428_v12 = vld [vmem:[#allocation16_spill] sm:$0xff] }
 0x3fa   : > { %4681 = vperm.xlu1 %8070, %v10949_v62   ;;  %v11352_v23 = vpop.permute.xlu1 %4167 }
 0x3fb   : > { %14426 = vst [vmem:[#allocation25_spill] sm:$0xff] %v11352_v23  ;;  %v14430_v23 = vld [vmem:[#allocation63_spill] sm:$0xff] }
 0x3fc   : > { %v11354_v20 = vpop.permute.xlu0 %4182 }
 0x3fd   : > { %14427 = vst [vmem:[#allocation74_spill] sm:$0xff] %v11354_v20  ;;  %4696 = vperm.xlu0 %8069, %v10953_v24   ;;  %v14431_v20 = vld [vmem:[#allocation96_spill] sm:$0xff] }
 0x3fe   : > { %4691 = vperm.xlu1 %8070, %v10957_v34   ;;  %v11358_v39 = vpop.permute.xlu1 %4177 }
 0x400   : > { %v11360_v49 = vpop.permute.xlu0 %4192 }
 0x401   : > { %4706 = vperm.xlu0 %8069, %v10961_v40  }
 0x402   : > { %4701 = vperm.xlu1 %8070, %v14428_v12   ;;  %v11364_v43 = vpop.permute.xlu1 %4187 }
 0x404   : > { %v11366_v62 = vpop.permute.xlu0 %4202 }
 0x405   : > { %14429 = vst [vmem:[#allocation75_spill] sm:$0xff] %v11366_v62  ;;  %4716 = vperm.xlu0 %8069, %v14430_v23   ;;  %v11382_v62 = vld [vmem:[%s8339_s10 + $0x288] sm:$0xff] }
 0x406   : > { %4711 = vperm.xlu1 %8070, %v14431_v20   ;;  %v11370_v24 = vpop.permute.xlu1 %4197  ;;  %14434 = vst [vmem:[#allocation30_spill] sm:$0xff] %v11382_v62 }
 0x408   : > { %v11372_v34 = vpop.permute.xlu0 %4212 }
 0x409   : > { %4726 = vperm.xlu0 %8069, %v10977_v25  }
 0x40a   : > { %4721 = vperm.xlu1 %8070, %v10981_v30   ;;  %v11376_v40 = vpop.permute.xlu1 %4207  ;;  %v11394_v30 = vld [vmem:[%s8339_s10 + $0x290] sm:$0xff] }
 0x40b   : > { %14432 = vst [vmem:[#allocation26_spill] sm:$0xff] %v11376_v40  ;;  %14437 = vst [vmem:[#allocation33_spill] sm:$0xff] %v11394_v30 }
 0x40c   : > { %v11378_v12 = vpop.permute.xlu0 %4222 }
 0x40d   : > { %14433 = vst [vmem:[#allocation29_spill] sm:$0xff] %v11378_v12  ;;  %4736 = vperm.xlu0 %8069, %v11201_v37  }
 0x40e   : > { %4731 = vperm.xlu1 %8070, %v10987_v14   ;;  %v11385_v23 = vpop.permute.xlu1 %4217 }
 0x40f   : > { %14435 = vst [vmem:[#allocation31_spill] sm:$0xff] %v11385_v23 }
 0x410   : > { %v11387_v20 = vpop.permute.xlu0 %4232 }
 0x411   : > { %14436 = vst [vmem:[#allocation32_spill] sm:$0xff] %v11387_v20  ;;  %4746 = vperm.xlu0 %8069, %v11382_v62  }
 0x412   : > { %4741 = vperm.xlu1 %8070, %v11224_v29   ;;  %v11391_v25 = vpop.permute.xlu1 %4227 }
 0x414   : > { %v11396_v40 = vpop.permute.xlu0 %4291 }
 0x415   : > { %14438 = vst [vmem:[#allocation34_spill] sm:$0xff] %v11396_v40  ;;  %4804 = vperm.xlu0 %8069, %v10998_v3  }
 0x416   : > { %4751 = vperm.xlu1 %8070, %v11394_v30   ;;  %v11400_v12 = vpop.permute.xlu1 %4237 }
 0x418   : > { %v11402_v14 = vpop.permute.xlu0 %4301 }
 0x419   : > { %4814 = vperm.xlu0 %8069, %v11016_v6  }
 0x41a   : > { %4809 = vperm.xlu1 %8070, %v11028_v7   ;;  %v11406_v20 = vpop.permute.xlu1 %4296 }
 0x41c   : > { %v11408_v23 = vpop.permute.xlu0 %4311 }
 0x41d   : > { %4824 = vperm.xlu0 %8069, %v11039_v45  }
 0x41e   : > { %4819 = vperm.xlu1 %8070, %v11050_v36   ;;  %v11412_v3 = vpop.permute.xlu1 %4306 }
 0x420   : > { %v11414_v40 = vpop.permute.xlu0 %4321 }
 0x421   : > { %4834 = vperm.xlu0 %8069, %v11061_v38  }
 0x422   : > { %4829 = vperm.xlu1 %8070, %v11073_v56   ;;  %v11418_v6 = vpop.permute.xlu1 %4316 }
 0x424   : > { %v11420_v7 = vpop.permute.xlu0 %4331 }
 0x425   : > { %14439 = vst [vmem:[#allocation35_spill] sm:$0xff] %v11420_v7  ;;  %4844 = vperm.xlu0 %8069, %v11081_v21   ;;  %v11436_v7 = vld [vmem:[%s8339_s10 + $0x289] sm:$0xff] }
 0x426   : > { %4839 = vperm.xlu1 %8070, %v11087_v17   ;;  %v11424_v45 = vpop.permute.xlu1 %4326  ;;  %14442 = vst [vmem:[#allocation38_spill] sm:$0xff] %v11436_v7 }
 0x428   : > { %v11426_v36 = vpop.permute.xlu0 %4341 }
 0x429   : > { %4854 = vperm.xlu0 %8069, %v11096_v19  }
 0x42a   : > { %4849 = vperm.xlu1 %8070, %v11100_v44   ;;  %v11430_v38 = vpop.permute.xlu1 %4336  ;;  %v11448_v44 = vld [vmem:[%s8339_s10 + $0x291] sm:$0xff] }
 0x42b   : > { %14440 = vst [vmem:[#allocation36_spill] sm:$0xff] %v11430_v38 }
 0x42c   : > { %v11432_v56 = vpop.permute.xlu0 %4351 }
 0x42d   : > { %14441 = vst [vmem:[#allocation37_spill] sm:$0xff] %v11432_v56  ;;  %4864 = vperm.xlu0 %8069, %v11274_v15  }
 0x42e   : > { %4859 = vperm.xlu1 %8070, %v11106_v59   ;;  %v11439_v21 = vpop.permute.xlu1 %4346 }
 0x42f   : > { %14443 = vst [vmem:[#allocation39_spill] sm:$0xff] %v11439_v21 }
 0x430   : > { %v11441_v17 = vpop.permute.xlu0 %4361 }
 0x431   : > { %14444 = vst [vmem:[#allocation40_spill] sm:$0xff] %v11441_v17  ;;  %4874 = vperm.xlu0 %8069, %v11436_v7  }
 0x432   : > { %4869 = vperm.xlu1 %8070, %v11286_v35   ;;  %v11445_v19 = vpop.permute.xlu1 %4356 }
 0x434   : > { %v11450_v38 = vpop.permute.xlu0 %4419 }
 0x435   : > { %14445 = vst [vmem:[#allocation41_spill] sm:$0xff] %v11450_v38  ;;  %4932 = vperm.xlu0 %8069, %v11115_v61  }
 0x436   : > { %4879 = vperm.xlu1 %8070, %v11448_v44   ;;  %v11454_v56 = vpop.permute.xlu1 %4366 }
 0x437   : > { %14446 = vst [vmem:[#allocation42_spill] sm:$0xff] %v11454_v56 }
 0x438   : > { %v11456_v59 = vpop.permute.xlu0 %4429 }
 0x439   : > { %14447 = vst [vmem:[#allocation43_spill] sm:$0xff] %v11456_v59  ;;  %4942 = vperm.xlu0 %8069, %v11122_v18   ;;  %v14524_v59 = vld [vmem:[#allocation21_spill] sm:$0xff] }
 0x43a   : > { %4937 = vperm.xlu1 %8070, %v11126_v9   ;;  %v11460_v17 = vpop.permute.xlu1 %4424 }
 0x43b   : > { %14448 = vst [vmem:[#allocation44_spill] sm:$0xff] %v11460_v17 }
 0x43c   : > { %v11462_v21 = vpop.permute.xlu0 %4439 }
 0x43d   : > { %14449 = vst [vmem:[#allocation45_spill] sm:$0xff] %v11462_v21  ;;  %4952 = vperm.xlu0 %8069, %v11130_v42  }
 0x43e   : > { %4947 = vperm.xlu1 %8070, %v11134_v53   ;;  %v11466_v61 = vpop.permute.xlu1 %4434 }
 0x43f   : > { %14450 = vst [vmem:[#allocation46_spill] sm:$0xff] %v11466_v61 }
 0x440   : > { %v11468_v38 = vpop.permute.xlu0 %4449 }
 0x441   : > { %14451 = vst [vmem:[#allocation47_spill] sm:$0xff] %v11468_v38  ;;  %4962 = vperm.xlu0 %8069, %v11138_v50  }
 0x442   : > { %4957 = vperm.xlu1 %8070, %v11142_v60   ;;  %v11472_v18 = vpop.permute.xlu1 %4444 }
 0x443   : > { %14452 = vst [vmem:[#allocation48_spill] sm:$0xff] %v11472_v18  ;;  %v14523_v18 = vld [vmem:[#allocation20_spill] sm:$0xff] }
 0x444   : > { %v11474_v9 = vpop.permute.xlu0 %4459 }
 0x445   : > { %14453 = vst [vmem:[#allocation49_spill] sm:$0xff] %v11474_v9  ;;  %4972 = vperm.xlu0 %8069, %v11146_v2   ;;  %v11490_v9 = vld [vmem:[%s8339_s10 + $0x28a] sm:$0xff] }
 0x446   : > { %4967 = vperm.xlu1 %8070, %v11150_v31   ;;  %v11478_v42 = vpop.permute.xlu1 %4454 }
 0x447   : > { %14454 = vst [vmem:[#allocation50_spill] sm:$0xff] %v11478_v42 }
 0x448   : > { %v11480_v53 = vpop.permute.xlu0 %4469 }
 0x449   : > { %14455 = vst [vmem:[#allocation51_spill] sm:$0xff] %v11480_v53  ;;  %4982 = vperm.xlu0 %8069, %v11154_v8   ;;  %v11681_v53 = vld [vmem:[%s8339_s10 + $0x309] sm:$0xff] }
 0x44a   : > { %4977 = vperm.xlu1 %8070, %v11158_v13   ;;  %v11484_v50 = vpop.permute.xlu1 %4464  ;;  %v11502_v13 = vld [vmem:[%s8339_s10 + $0x292] sm:$0xff]  ;;  %14513 = vst [vmem:[#allocation107_spill] sm:$0xff] %v11681_v53 }
 0x44b   : > { %14456 = vst [vmem:[#allocation52_spill] sm:$0xff] %v11484_v50 }
 0x44c   : > { %v11486_v60 = vpop.permute.xlu0 %4479 }
 0x44d   : > { %14457 = vst [vmem:[#allocation53_spill] sm:$0xff] %v11486_v60  ;;  %4992 = vperm.xlu0 %8069, %v11328_v54  }
 0x44e   : > { %4987 = vperm.xlu1 %8070, %v11163_v27   ;;  %v11493_v2 = vpop.permute.xlu1 %4474 }
 0x44f   : > { %14458 = vst [vmem:[#allocation54_spill] sm:$0xff] %v11493_v2  ;;  %v11514_v2 = vld [vmem:[%s8339_s10 + $0x2a0] sm:$0xff] }
 0x450   : > { %v11495_v31 = vpop.permute.xlu0 %4489  ;;  %14464 = vst [vmem:[#allocation61_spill] sm:$0xff] %v11514_v2 }
 0x451   : > { %14459 = vst [vmem:[#allocation55_spill] sm:$0xff] %v11495_v31  ;;  %5002 = vperm.xlu0 %8069, %v11490_v9  }
 0x452   : > { %4997 = vperm.xlu1 %8070, %v11340_v33   ;;  %v11499_v8 = vpop.permute.xlu1 %4484 }
 0x453   : > { %14460 = vst [vmem:[#allocation58_spill] sm:$0xff] %v11499_v8 }
 0x454   : > { %v11504_v60 = vpop.permute.xlu0 %4547 }
 0x455   : > { %14461 = vst [vmem:[#allocation59_spill] sm:$0xff] %v11504_v60  ;;  %5077 = vperm.xlu0 %8069, %v11201_v37   ;;  %v11523_v37 = vld [vmem:[%s8339_s10 + $0x2b8] sm:$0xff] }
 0x456   : > { %5007 = vperm.xlu1 %8070, %v11502_v13   ;;  %v11508_v27 = vpop.permute.xlu1 %4494  ;;  %14467 = vst [vmem:[#allocation64_spill] sm:$0xff] %v11523_v37 }
 0x457   : > { %14462 = vst [vmem:[#allocation56_spill] sm:$0xff] %v11508_v27 }
 0x458   : > { %v11510_v31 = vpop.permute.xlu0 %4557 }
 0x459   : > { %14463 = vst [vmem:[#allocation60_spill] sm:$0xff] %v11510_v31  ;;  %5087 = vperm.xlu0 %8069, %v11382_v62   ;;  %v11529_v62 = vld [vmem:[%s8339_s10 + $0x2a8] sm:$0xff] }
 0x45a   : > { %5082 = vperm.xlu1 %8070, %v11224_v29   ;;  %v11517_v8 = vpop.permute.xlu1 %4552  ;;  %14469 = vst [vmem:[#allocation68_spill] sm:$0xff] %v11529_v62  ;;  %v11535_v29 = vld [vmem:[%s8339_s10 + $0x2d0] sm:$0xff] }
 0x45b   : > { %14465 = vst [vmem:[#allocation86_spill] sm:$0xff] %v11517_v8  ;;  %14471 = vst [vmem:[#allocation88_spill] sm:$0xff] %v11535_v29 }
 0x45c   : > { %v11519_v50 = vpop.permute.xlu0 %4567 }
 0x45d   : > { %14466 = vst [vmem:[#allocation87_spill] sm:$0xff] %v11519_v50  ;;  %5097 = vperm.xlu0 %8069, %v11514_v2   ;;  %v11541_v50 = vld [vmem:[%s8339_s10 + $0x2c0] sm:$0xff] }
 0x45e   : > { %5092 = vperm.xlu1 %8070, %v11394_v30   ;;  %v11526_v27 = vpop.permute.xlu1 %4562  ;;  %14473 = vst [vmem:[#allocation89_spill] sm:$0xff] %v11541_v50 }
 0x45f   : > { %14468 = vst [vmem:[#allocation65_spill] sm:$0xff] %v11526_v27  ;;  %v11547_v27 = vld [vmem:[%s8339_s10 + $0x2e8] sm:$0xff] }
 0x460   : > { %v11531_v31 = vpop.permute.xlu0 %4577  ;;  %14475 = vst [vmem:[#allocation28_spill] sm:$0xff] %v11547_v27 }
 0x461   : > { %14470 = vst [vmem:[#allocation57_spill] sm:$0xff] %v11531_v31  ;;  %5107 = vperm.xlu0 %8069, %v11523_v37   ;;  %v11553_v31 = vld [vmem:[%s8339_s10 + $0x2d8] sm:$0xff] }
 0x462   : > { %5102 = vperm.xlu1 %8070, %v11529_v62   ;;  %v11538_v2 = vpop.permute.xlu1 %4572  ;;  %14477 = vst [vmem:[#allocation92_spill] sm:$0xff] %v11553_v31  ;;  %v11559_v62 = vld [vmem:[%s8339_s10 + $0x300] sm:$0xff] }
 0x463   : > { %14472 = vst [vmem:[#allocation69_spill] sm:$0xff] %v11538_v2  ;;  %14479 = vst [vmem:[#allocation73_spill] sm:$0xff] %v11559_v62 }
 0x464   : > { %v11543_v30 = vpop.permute.xlu0 %4587 }
 0x465   : > { %14474 = vst [vmem:[#allocation27_spill] sm:$0xff] %v11543_v30  ;;  %5117 = vperm.xlu0 %8069, %v11535_v29   ;;  %v11565_v29 = vld [vmem:[%s8339_s10 + $0x2f0] sm:$0xff] }
 0x466   : > { %5112 = vperm.xlu1 %8070, %v11541_v50   ;;  %v11550_v37 = vpop.permute.xlu1 %4582  ;;  %14481 = vst [vmem:[#allocation76_spill] sm:$0xff] %v11565_v29  ;;  %v11571_v50 = vld [vmem:[%s8339_s10 + $0x318] sm:$0xff] }
 0x467   : > { %14476 = vst [vmem:[#allocation72_spill] sm:$0xff] %v11550_v37  ;;  %14483 = vst [vmem:[#allocation77_spill] sm:$0xff] %v11571_v50 }
 0x468   : > { %v11555_v8 = vpop.permute.xlu0 %4597 }
 0x469   : > { %14478 = vst [vmem:[#allocation93_spill] sm:$0xff] %v11555_v8  ;;  %5127 = vperm.xlu0 %8069, %v11547_v27   ;;  %v11577_v27 = vld [vmem:[%s8339_s10 + $0x308] sm:$0xff] }
 0x46a   : > { %5122 = vperm.xlu1 %8070, %v11553_v31   ;;  %v11562_v30 = vpop.permute.xlu1 %4592  ;;  %14485 = vst [vmem:[#allocation71_spill] sm:$0xff] %v11577_v27 }
 0x46b   : > { %14480 = vst [vmem:[#allocation62_spill] sm:$0xff] %v11562_v30 }
 0x46c   : > { %v11567_v2 = vpop.permute.xlu0 %4607 }
 0x46d   : > { %14482 = vst [vmem:[#allocation97_spill] sm:$0xff] %v11567_v2  ;;  %5137 = vperm.xlu0 %8069, %v11559_v62   ;;  %v11586_v62 = vld [vmem:[%s8339_s10 + $0x320] sm:$0xff] }
 0x46e   : > { %5132 = vperm.xlu1 %8070, %v11565_v29   ;;  %v11574_v8 = vpop.permute.xlu1 %4602  ;;  %14488 = vst [vmem:[#allocation9_spill] sm:$0xff] %v11586_v62 }
 0x46f   : > { %14484 = vst [vmem:[#allocation100_spill] sm:$0xff] %v11574_v8 }
 0x470   : > { %v11579_v37 = vpop.permute.xlu0 %4617 }
 0x471   : > { %14486 = vst [vmem:[#allocation81_spill] sm:$0xff] %v11579_v37  ;;  %5147 = vperm.xlu0 %8069, %v11571_v50  }
 0x472   : > { %5142 = vperm.xlu1 %8070, %v11577_v27   ;;  %v11583_v31 = vpop.permute.xlu1 %4612  ;;  %v11598_v27 = vld [vmem:[%s8339_s10 + $0x2a1] sm:$0xff] }
 0x473   : > { %14487 = vst [vmem:[#allocation8_spill] sm:$0xff] %v11583_v31  ;;  %14492 = vst [vmem:[#allocation10_spill] sm:$0xff] %v11598_v27 }
 0x474   : > { %v11588_v2 = vpop.permute.xlu0 %4676 }
 0x475   : > { %14489 = vst [vmem:[#allocation85_spill] sm:$0xff] %v11588_v2  ;;  %5205 = vperm.xlu0 %8069, %v11274_v15   ;;  %v11607_v15 = vld [vmem:[%s8339_s10 + $0x2b9] sm:$0xff] }
 0x476   : > { %5152 = vperm.xlu1 %8070, %v11586_v62   ;;  %v11592_v29 = vpop.permute.xlu1 %4622  ;;  %14495 = vst [vmem:[#allocation83_spill] sm:$0xff] %v11607_v15 }
 0x477   : > { %14490 = vst [vmem:[#allocation78_spill] sm:$0xff] %v11592_v29 }
 0x478   : > { %v11594_v37 = vpop.permute.xlu0 %4686 }
 0x479   : > { %14491 = vst [vmem:[#allocation79_spill] sm:$0xff] %v11594_v37  ;;  %5215 = vperm.xlu0 %8069, %v11436_v7   ;;  %v11613_v7 = vld [vmem:[%s8339_s10 + $0x2a9] sm:$0xff] }
 0x47a   : > { %5210 = vperm.xlu1 %8070, %v11286_v35   ;;  %v11601_v50 = vpop.permute.xlu1 %4681  ;;  %14497 = vst [vmem:[#allocation7_spill] sm:$0xff] %v11613_v7  ;;  %v11619_v35 = vld [vmem:[%s8339_s10 + $0x2d1] sm:$0xff] }
 0x47b   : > { %14493 = vst [vmem:[#allocation11_spill] sm:$0xff] %v11601_v50  ;;  %14499 = vst [vmem:[#allocation106_spill] sm:$0xff] %v11619_v35 }
 0x47c   : > { %v11603_v31 = vpop.permute.xlu0 %4696 }
 0x47d   : > { %14494 = vst [vmem:[#allocation82_spill] sm:$0xff] %v11603_v31  ;;  %5225 = vperm.xlu0 %8069, %v11598_v27   ;;  %v11625_v27 = vld [vmem:[%s8339_s10 + $0x2c1] sm:$0xff] }
 0x47e   : > { %5220 = vperm.xlu1 %8070, %v11448_v44   ;;  %v11610_v62 = vpop.permute.xlu1 %4691  ;;  %14501 = vst [vmem:[#allocation94_spill] sm:$0xff] %v11625_v27  ;;  %v11631_v44 = vld [vmem:[%s8339_s10 + $0x2e9] sm:$0xff] }
 0x47f   : > { %14496 = vst [vmem:[#allocation103_spill] sm:$0xff] %v11610_v62  ;;  %14503 = vst [vmem:[#allocation13_spill] sm:$0xff] %v11631_v44 }
 0x480   : > { %v11615_v29 = vpop.permute.xlu0 %4706 }
 0x481   : > { %14498 = vst [vmem:[#allocation90_spill] sm:$0xff] %v11615_v29  ;;  %5235 = vperm.xlu0 %8069, %v11607_v15   ;;  %v11637_v15 = vld [vmem:[%s8339_s10 + $0x2d9] sm:$0xff] }
 0x482   : > { %5230 = vperm.xlu1 %8070, %v11613_v7   ;;  %v11622_v8 = vpop.permute.xlu1 %4701  ;;  %14505 = vst [vmem:[#allocation15_spill] sm:$0xff] %v11637_v15  ;;  %v11643_v7 = vld [vmem:[%s8339_s10 + $0x301] sm:$0xff] }
 0x483   : > { %14500 = vst [vmem:[#allocation91_spill] sm:$0xff] %v11622_v8  ;;  %14507 = vst [vmem:[#allocation99_spill] sm:$0xff] %v11643_v7 }
 0x484   : > { %v11627_v30 = vpop.permute.xlu0 %4716 }
 0x485   : > { %14502 = vst [vmem:[#allocation12_spill] sm:$0xff] %v11627_v30  ;;  %5245 = vperm.xlu0 %8069, %v11619_v35   ;;  %v8114_v30 = vld [vmem:[%s13887_s1] ss:$0 sm:$0xff] }
 0x486   : > { %5240 = vperm.xlu1 %8070, %v11625_v27   ;;  %v11634_v29 = vpop.permute.xlu1 %4711  ;;  %v3984_v35 = vmul.f32 %v8114_v30, %v11233_v63  ;;  %v3985_v8 = vmul.f32 %v8114_v30, %v11237_v26  ;;  %v3987_v50 = vmul.f32 %v8114_v30, %v11250_v48  ;;  %v3989_v37 = vmul.f32 %v8114_v30, %v11256_v55 }
 0x487   : > { %14504 = vst [vmem:[#allocation14_spill] sm:$0xff] %v11634_v29  ;;  %v3986_v29 = vmul.f32 %v8114_v30, %v11244_v58  ;;  %v3990_v63 = vmul.f32 %v8114_v30, %v11252_v28  ;;  %v3991_v26 = vmul.f32 %v8114_v30, %v11262_v16  ;;  %v3994_v58 = vmul.f32 %v8114_v30, %v11264_v5 }
 0x488   : > { %v11639_v62 = vpop.permute.xlu0 %4726  ;;  %v3993_v55 = vmul.f32 %v8114_v30, %v11268_v57  ;;  %v3996_v28 = vmul.f32 %v8114_v30, %v11270_v52  ;;  %v3995_v5 = vmul.f32 %v8114_v30, %v11277_v10  ;;  %v3998_v2 = vmul.f32 %v8114_v30, %v11279_v46  ;;  %v8116_v10 = vld [vmem:[%s13887_s1 + $0x1] ss:$0 sm:$0xff] }
 0x489   : > { %14506 = vst [vmem:[#allocation95_spill] sm:$0xff] %v11639_v62  ;;  %5255 = vperm.xlu0 %8069, %v11631_v44   ;;  %v3988_v62 = vmul.f32 %v8114_v30, %v11246_v4  ;;  %v11656_v44 = vld [vmem:[%s8339_s10 + $0x2f1] sm:$0xff]  ;;  %v11668_v4 = vld [vmem:[%s8339_s10 + $0x319] sm:$0xff]  ;;  %v3997_v57 = vmul.f32 %v8114_v30, %v11283_v1  ;;  %v4112_v46 = vmul.f32 %v8116_v10, %v11288_v11 }
 0x48a   : > { %5250 = vperm.xlu1 %8070, %v11637_v15   ;;  %v11651_v27 = vpop.permute.xlu1 %4721  ;;  %14509 = vst [vmem:[#allocation102_spill] sm:$0xff] %v11656_v44  ;;  %v3992_v15 = vmul.f32 %v8114_v30, %v11258_v51  ;;  %14511 = vst [vmem:[#allocation63_spill] sm:$0xff] %v11668_v4 }
 0x48b   : > { %14508 = vst [vmem:[#allocation98_spill] sm:$0xff] %v11651_v27 }
 0x48c   : > { %v11658_v31 = vpop.permute.xlu0 %4736 }
 0x48d   : > { %14510 = vst [vmem:[#allocation16_spill] sm:$0xff] %v11658_v31  ;;  %5265 = vperm.xlu0 %8069, %v11643_v7   ;;  %v8115_v31 = vld [vmem:[%s13888_s2] ss:$0 sm:$0xff] }
 0x48e   : > { %v4000_v48 = vadd.f32 %v8115_v31, %v3984_v35  ;;  %v4001_v27 = vadd.f32 %v8115_v31, %v3985_v8  ;;  %5260 = vperm.xlu1 %8070, %v11656_v44   ;;  %v11676_v7 = vpop.permute.xlu1 %4731  ;;  %v4002_v16 = vadd.f32 %v8115_v31, %v3986_v29  ;;  %v4004_v51 = vadd.f32 %v8115_v31, %v3988_v62 }
 0x48f   : > { %14512 = vst [vmem:[#allocation96_spill] sm:$0xff] %v11676_v7  ;;  %v4003_v35 = vadd.f32 %v8115_v31, %v3987_v50  ;;  %v4005_v8 = vadd.f32 %v8115_v31, %v3989_v37  ;;  %v4006_v56 = vadd.f32 %v8115_v31, %v3990_v63  ;;  %v4007_v52 = vadd.f32 %v8115_v31, %v3991_v26 }
 0x490   : > { %v11683_v42 = vpop.permute.xlu0 %4746  ;;  %v4008_v44 = vadd.f32 %v8115_v31, %v3992_v15  ;;  %v4010_v29 = vadd.f32 %v8115_v31, %v3994_v58  ;;  %v4009_v62 = vadd.f32 %v8115_v31, %v3993_v55  ;;  %v4012_v7 = vadd.f32 %v8115_v31, %v3996_v28  ;;  %v14516_v58 = vld [vmem:[#allocation66_spill] sm:$0xff]  ;;  %v14518_v55 = vld [vmem:[#allocation67_spill] sm:$0xff] }
 0x491   : > { %14514 = vst [vmem:[#allocation108_spill] sm:$0xff] %v11683_v42  ;;  %5275 = vperm.xlu0 %8069, %v11668_v4   ;;  %v3999_v50 = vmul.f32 %v8114_v30, %v11292_v41  ;;  %v4114_v37 = vmul.f32 %v8116_v10, %v11294_v32  ;;  %v4011_v63 = vadd.f32 %v8115_v31, %v3995_v5  ;;  %v11699_v42 = vld [vmem:[%s8339_s10 + $0x321] sm:$0xff]  ;;  %v14520_v32 = vld [vmem:[#allocation84_spill] sm:$0xff]  ;;  %v14521_v5 = vld [vmem:[#allocation19_spill] sm:$0xff] }
 0x492   : > { %5270 = vperm.xlu1 %8070, %v11681_v53   ;;  %v11694_v1 = vpop.permute.xlu1 %4741  ;;  %v4014_v26 = vadd.f32 %v8115_v31, %v3998_v2  ;;  %v4113_v15 = vmul.f32 %v8116_v10, %v11298_v0  ;;  %v4116_v4 = vmul.f32 %v8116_v10, %v14516_v58  ;;  %v4013_v11 = vadd.f32 %v8115_v31, %v3997_v57  ;;  %v14519_v41 = vld [vmem:[#allocation101_spill] sm:$0xff]  ;;  %v14525_v57 = vld [vmem:[#allocation22_spill] sm:$0xff] }
 0x493   : > { %14515 = vst [vmem:[#allocation109_spill] sm:$0xff] %v11694_v1  ;;  %v4115_v28 = vmul.f32 %v8116_v10, %v14518_v55  ;;  %v4117_v30 = vmul.f32 %v8116_v10, %v14519_v41  ;;  %v4118_v38 = vmul.f32 %v8116_v10, %v14520_v32  ;;  %v4128_v53 = vadd.f32 %v4112_v46, %v4000_v48  ;;  %v14522_v1 = vld [vmem:[#allocation80_spill] sm:$0xff]  ;;  %v14526_v48 = vld [vmem:[#allocation23_spill] sm:$0xff] }
 0x494   : > { %v11701_v60 = vpop.permute.xlu0 %4804  ;;  %v4119_v2 = vmul.f32 %v8116_v10, %v14521_v5  ;;  %v4120_v0 = vmul.f32 %v8116_v10, %v14522_v1  ;;  %v4122_v58 = vmul.f32 %v8116_v10, %v14523_v18  ;;  %v4015_v21 = vadd.f32 %v8115_v31, %v3999_v50  ;;  %v14527_v32 = vld [vmem:[#allocation24_spill] sm:$0xff] }
 0x495   : > { %14517 = vst [vmem:[#allocation66_spill] sm:$0xff] %v11701_v60  ;;  %5333 = vperm.xlu0 %8069, %v11328_v54   ;;  %v4130_v61 = vadd.f32 %v4114_v37, %v4002_v16  ;;  %v4121_v60 = vmul.f32 %v8116_v10, %v14524_v59  ;;  %v4124_v17 = vmul.f32 %v8116_v10, %v14525_v57 }
 0x496   : > { %5280 = vperm.xlu1 %8070, %v11699_v42   ;;  %v11713_v55 = vpop.permute.xlu1 %4751  ;;  %v4129_v41 = vadd.f32 %v4113_v15, %v4001_v27  ;;  %v4132_v54 = vadd.f32 %v4116_v4, %v4004_v51  ;;  %v4123_v46 = vmul.f32 %v8116_v10, %v14526_v48  ;;  %v4126_v5 = vmul.f32 %v8116_v10, %v14527_v32  ;;  %v8117_v27 = vld [vmem:[%s13887_s1 + $0x2] ss:$0 sm:$0xff]  ;;  %v14528_v4 = vld [vmem:[#allocation70_spill] sm:$0xff] }
 0x497   : > { %v4131_v18 = vadd.f32 %v4115_v28, %v4003_v35  ;;  %v4133_v31 = vadd.f32 %v4117_v30, %v4005_v8  ;;  %v4134_v16 = vadd.f32 %v4118_v38, %v4006_v56  ;;  %v4125_v59 = vmul.f32 %v8116_v10, %v11337_v22  ;;  %v11726_v15 = vld [vmem:[%s8339_s10 + $0x2a2] sm:$0xff]  ;;  %v14529_v38 = vld [vmem:[#allocation104_spill] sm:$0xff] }
 0x498   : > { %v11717_v1 = vpop.permute.xlu0 %4814  ;;  %v4135_v50 = vadd.f32 %v4119_v2, %v4007_v52  ;;  %v4136_v37 = vadd.f32 %v4120_v0, %v4008_v44  ;;  %v4138_v57 = vadd.f32 %v4122_v58, %v4010_v29  ;;  %v4240_v51 = vmul.f32 %v8117_v27, %v14528_v4  ;;  %v14530_v8 = vld [vmem:[#allocation25_spill] sm:$0xff]  ;;  %v14531_v29 = vld [vmem:[#allocation74_spill] sm:$0xff]  ;;  %v14536_v4 = vld [vmem:[#allocation32_spill] sm:$0xff] }
 0x499   : > { %5343 = vperm.xlu0 %8069, %v11490_v9   ;;  %v4137_v48 = vadd.f32 %v4121_v60, %v4009_v62  ;;  %v4140_v32 = vadd.f32 %v4124_v17, %v4012_v7  ;;  %v4127_v35 = vmul.f32 %v8116_v10, %v11346_v47  ;;  %v4242_v56 = vmul.f32 %v8117_v27, %v14529_v38  ;;  %v14532_v10 = vld [vmem:[#allocation75_spill] sm:$0xff]  ;;  %v14533_v58 = vld [vmem:[#allocation26_spill] sm:$0xff] }
 0x49a   : > { %5338 = vperm.xlu1 %8070, %v11340_v33   ;;  %v11731_v22 = vpop.permute.xlu1 %4809  ;;  %v4139_v9 = vadd.f32 %v4123_v46, %v4011_v63  ;;  %v4142_v44 = vadd.f32 %v4126_v5, %v4014_v26  ;;  %v4241_v52 = vmul.f32 %v8117_v27, %v14530_v8  ;;  %v4244_v28 = vmul.f32 %v8117_v27, %v14531_v29  ;;  %v11745_v26 = vld [vmem:[%s8339_s10 + $0x2ba] sm:$0xff] }
 0x49b   : > { %v4141_v2 = vadd.f32 %v4125_v59, %v4013_v11  ;;  %v4243_v7 = vmul.f32 %v8117_v27, %v11358_v39  ;;  %v4245_v47 = vmul.f32 %v8117_v27, %v11364_v43  ;;  %v4246_v17 = vmul.f32 %v8117_v27, %v11360_v49  ;;  %v14534_v46 = vld [vmem:[#allocation29_spill] sm:$0xff] }
 0x49c   : > { %v11735_v30 = vpop.permute.xlu0 %4824  ;;  %v4256_v33 = vadd.f32 %v4240_v51, %v4128_v53  ;;  %v4247_v60 = vmul.f32 %v8117_v27, %v11370_v24  ;;  %v4248_v62 = vmul.f32 %v8117_v27, %v14532_v10  ;;  %v4250_v63 = vmul.f32 %v8117_v27, %v11372_v34  ;;  %v14535_v24 = vld [vmem:[#allocation31_spill] sm:$0xff]  ;;  %v14540_v10 = vld [vmem:[#allocation36_spill] sm:$0xff] }
 0x49d   : > { %5353 = vperm.xlu0 %8069, %v11726_v15   ;;  %v4143_v0 = vadd.f32 %v4127_v35, %v4015_v21  ;;  %v4258_v11 = vadd.f32 %v4242_v56, %v4130_v61  ;;  %v4249_v39 = vmul.f32 %v8117_v27, %v14533_v58  ;;  %v4252_v43 = vmul.f32 %v8117_v27, %v14534_v46  ;;  %v11755_v34 = vld [vmem:[%s8339_s10 + $0x2aa] sm:$0xff]  ;;  %v14543_v46 = vld [vmem:[#allocation40_spill] sm:$0xff] }
 0x49e   : > { %5348 = vperm.xlu1 %8070, %v11502_v13   ;;  %v11750_v49 = vpop.permute.xlu1 %4819  ;;  %v4257_v5 = vadd.f32 %v4241_v52, %v4129_v41  ;;  %v4260_v53 = vadd.f32 %v4244_v28, %v4132_v54  ;;  %v4251_v59 = vmul.f32 %v8117_v27, %v14535_v24  ;;  %v4254_v51 = vmul.f32 %v8117_v27, %v14536_v4  ;;  %v11764_v54 = vld [vmem:[%s13887_s1 + $0x3] ss:$0 sm:$0xff]  ;;  %v14537_v52 = vld [vmem:[#allocation34_spill] sm:$0xff]  ;;  %v11769_v28 = vld [vmem:[%s8339_s10 + $0x2d2] sm:$0xff] }
 0x49f   : > { %v4259_v21 = vadd.f32 %v4243_v7, %v4131_v18  ;;  %v4261_v61 = vadd.f32 %v4245_v47, %v4133_v31  ;;  %v4262_v35 = vadd.f32 %v4246_v17, %v4134_v16  ;;  %v4253_v56 = vmul.f32 %v8117_v27, %v11391_v25 }
 0x4a0   : > { %v11757_v38 = vpop.permute.xlu0 %4834  ;;  %v4263_v13 = vadd.f32 %v4247_v60, %v4135_v50  ;;  %v4264_v41 = vadd.f32 %v4248_v62, %v4136_v37  ;;  %v4266_v8 = vadd.f32 %v4250_v63, %v4138_v57  ;;  %v4369_v29 = vmul.f32 %v11764_v54, %v14537_v52  ;;  %v14541_v62 = vld [vmem:[#allocation37_spill] sm:$0xff] }
 0x4a1   : > { %5363 = vperm.xlu0 %8069, %v11745_v26   ;;  %v4265_v18 = vadd.f32 %v4249_v39, %v4137_v48  ;;  %v4268_v31 = vadd.f32 %v4252_v43, %v4140_v32  ;;  %v4255_v25 = vmul.f32 %v8117_v27, %v11400_v12  ;;  %v4371_v16 = vmul.f32 %v11764_v54, %v11402_v14  ;;  %v11782_v48 = vld [vmem:[%s8339_s10 + $0x2c2] sm:$0xff]  ;;  %v14542_v39 = vld [vmem:[#allocation39_spill] sm:$0xff] }
 0x4a2   : > { %5358 = vperm.xlu1 %8070, %v11755_v34   ;;  %v11775_v50 = vpop.permute.xlu1 %4829  ;;  %v4267_v37 = vadd.f32 %v4251_v59, %v4139_v9  ;;  %v4270_v57 = vadd.f32 %v4254_v51, %v4142_v44  ;;  %v4370_v7 = vmul.f32 %v11764_v54, %v11406_v20  ;;  %v4373_v47 = vmul.f32 %v11764_v54, %v11408_v23  ;;  %v14538_v44 = vld [vmem:[#allocation35_spill] sm:$0xff]  ;;  %v11826_v52 = vld [vmem:[%s13887_s1 + $0x4] ss:$0 sm:$0xff] }
 0x4a3   : > { %v4269_v12 = vadd.f32 %v4253_v56, %v4141_v2  ;;  %v4372_v14 = vmul.f32 %v11764_v54, %v11412_v3  ;;  %v4374_v27 = vmul.f32 %v11764_v54, %v11418_v6  ;;  %v4375_v9 = vmul.f32 %v11764_v54, %v11414_v40  ;;  %v11800_v3 = vld [vmem:[%s8339_s10 + $0x2ea] sm:$0xff] }
 0x4a4   : > { %v11784_v32 = vpop.permute.xlu0 %4844  ;;  %v4385_v20 = vadd.f32 %v4369_v29, %v4256_v33  ;;  %v4376_v23 = vmul.f32 %v11764_v54, %v11424_v45  ;;  %v4377_v17 = vmul.f32 %v11764_v54, %v14538_v44  ;;  %v4379_v2 = vmul.f32 %v11764_v54, %v11426_v36  ;;  %14539 = vst [vmem:[#allocation67_spill] sm:$0xff] %v11800_v3  ;;  %v14545_v29 = vld [vmem:[#allocation41_spill] sm:$0xff] }
 0x4a5   : > { %5373 = vperm.xlu0 %8069, %v11769_v28   ;;  %v11802_v60 = vadd.f32 %v4255_v25, %v4143_v0  ;;  %v4387_v6 = vadd.f32 %v4371_v16, %v4258_v11  ;;  %v4378_v40 = vmul.f32 %v11764_v54, %v14540_v10  ;;  %v4381_v33 = vmul.f32 %v11764_v54, %v14541_v62  ;;  %v11816_v11 = vld [vmem:[%s8339_s10 + $0x2da] sm:$0xff]  ;;  %v14553_v10 = vld [vmem:[#allocation47_spill] sm:$0xff] }
 0x4a6   : > { %5368 = vperm.xlu1 %8070, %v11782_v48   ;;  %v11809_v45 = vpop.permute.xlu1 %4839  ;;  %v4386_v63 = vadd.f32 %v4370_v7, %v4257_v5  ;;  %v4389_v58 = vadd.f32 %v4373_v47, %v4260_v53  ;;  %v4380_v36 = vmul.f32 %v11764_v54, %v14542_v39  ;;  %v4383_v0 = vmul.f32 %v11764_v54, %v14543_v46 }
 0x4a7   : > { %14544 = vst [vmem:[#allocation101_spill] sm:$0xff] %v11816_v11  ;;  %v4388_v24 = vadd.f32 %v4372_v14, %v4259_v21  ;;  %v4390_v59 = vadd.f32 %v4374_v27, %v4261_v61  ;;  %v4391_v4 = vadd.f32 %v4375_v9, %v4262_v35  ;;  %v4382_v51 = vmul.f32 %v11764_v54, %v11445_v19  ;;  %v11831_v21 = vld [vmem:[%s8339_s10 + $0x302] sm:$0xff]  ;;  %v14547_v19 = vld [vmem:[#allocation44_spill] sm:$0xff] }
 0x4a8   : > { %v11818_v43 = vpop.permute.xlu0 %4854  ;;  %v4392_v5 = vadd.f32 %v4376_v23, %v4263_v13  ;;  %v4393_v53 = vadd.f32 %v4377_v17, %v4264_v41  ;;  %v4395_v56 = vadd.f32 %v4379_v2, %v4266_v8  ;;  %v4497_v25 = vmul.f32 %v11826_v52, %v14545_v29  ;;  %14546 = vst [vmem:[#allocation84_spill] sm:$0xff] %v11831_v21  ;;  %v14548_v13 = vld [vmem:[#allocation43_spill] sm:$0xff]  ;;  %v14549_v14 = vld [vmem:[#allocation46_spill] sm:$0xff]  ;;  %v14550_v9 = vld [vmem:[#allocation45_spill] sm:$0xff] }
 0x4a9   : > { %5383 = vperm.xlu0 %8069, %v11800_v3   ;;  %v4394_v61 = vadd.f32 %v4378_v40, %v4265_v18  ;;  %v11833_v35 = vadd.f32 %v4381_v33, %v4268_v31  ;;  %v4498_v16 = vmul.f32 %v11826_v52, %v14547_v19  ;;  %v4499_v41 = vmul.f32 %v11826_v52, %v14548_v13  ;;  %v11847_v31 = vld [vmem:[%s8339_s10 + $0x2f2] sm:$0xff]  ;;  %v14555_v33 = vld [vmem:[#allocation42_spill] sm:$0xff]  ;;  %v11872_v29 = vld [vmem:[%s8339_s10 + $0x31a] sm:$0xff] }
 0x4aa   : > { %5378 = vperm.xlu1 %8070, %v11816_v11   ;;  %v11840_v8 = vpop.permute.xlu1 %4849  ;;  %v4396_v7 = vadd.f32 %v4380_v36, %v4267_v37  ;;  %v4399_v47 = vadd.f32 %v4383_v0, %v4270_v57  ;;  %v4500_v27 = vmul.f32 %v11826_v52, %v14549_v14  ;;  %v4501_v18 = vmul.f32 %v11826_v52, %v14550_v9  ;;  %v14552_v17 = vld [vmem:[#allocation48_spill] sm:$0xff]  ;;  %v11858_v37 = vld [vmem:[%s13887_s1 + $0x5] ss:$0 sm:$0xff]  ;;  %v14554_v57 = vld [vmem:[#allocation59_spill] sm:$0xff] }
 0x4ab   : > { %14551 = vst [vmem:[#allocation19_spill] sm:$0xff] %v11847_v31  ;;  %v4398_v44 = vadd.f32 %v4382_v51, %v4269_v12  ;;  %v4502_v2 = vmul.f32 %v11826_v52, %v14552_v17  ;;  %v4503_v40 = vmul.f32 %v11826_v52, %v14553_v10  ;;  %v4625_v62 = vmul.f32 %v11858_v37, %v14554_v57  ;;  %v14556_v36 = vld [vmem:[#allocation50_spill] sm:$0xff]  ;;  %v14557_v0 = vld [vmem:[#allocation49_spill] sm:$0xff]  ;;  %v14559_v14 = vld [vmem:[#allocation51_spill] sm:$0xff] }
 0x4ac   : > { %v11849_v23 = vpop.permute.xlu0 %4864  ;;  %v11865_v39 = vmul.f32 %v11764_v54, %v14555_v33  ;;  %v4513_v12 = vadd.f32 %v4497_v25, %v4385_v20  ;;  %v4504_v46 = vmul.f32 %v11826_v52, %v14556_v36  ;;  %v4505_v51 = vmul.f32 %v11826_v52, %v14557_v0  ;;  %14558 = vst [vmem:[#allocation80_spill] sm:$0xff] %v11872_v29  ;;  %v11879_v54 = vld [vmem:[%s13887_s1 + $0x6] ss:$0 sm:$0xff]  ;;  %v14561_v33 = vld [vmem:[#allocation52_spill] sm:$0xff]  ;;  %v14575_v11 = vld [vmem:[#allocation82_spill] sm:$0xff] }
 0x4ad   : > { %5393 = vperm.xlu0 %8069, %v11831_v21   ;;  %v4514_v19 = vadd.f32 %v4498_v16, %v4386_v63  ;;  %v4515_v13 = vadd.f32 %v4499_v41, %v4387_v6  ;;  %v4507_v9 = vmul.f32 %v11826_v52, %v14559_v14  ;;  %v14560_v17 = vld [vmem:[#allocation85_spill] sm:$0xff]  ;;  %v4516_v10 = vadd.f32 %v4500_v27, %v4388_v24  ;;  %v14562_v63 = vld [vmem:[#allocation60_spill] sm:$0xff]  ;;  %v11891_v41 = vld [vmem:[%s8339_s10 + $0x30a] sm:$0xff] }
 0x4ae   : > { %v4754_v20 = vmul.f32 %v11879_v54, %v14560_v17  ;;  %5388 = vperm.xlu1 %8070, %v11847_v31   ;;  %v11884_v25 = vpop.permute.xlu1 %4859  ;;  %v4517_v57 = vadd.f32 %v4501_v18, %v4389_v58  ;;  %v4506_v6 = vmul.f32 %v11826_v52, %v14561_v33  ;;  %v4627_v16 = vmul.f32 %v11858_v37, %v14562_v63  ;;  %v11900_v31 = vld [vmem:[%s13887_s1 + $0x7] ss:$0 sm:$0xff]  ;;  %v14564_v58 = vld [vmem:[#allocation66_spill] sm:$0xff] }
 0x4af   : > { %14563 = vst [vmem:[#allocation20_spill] sm:$0xff] %v11891_v41  ;;  %v11895_v0 = vadd.f32 %v4502_v2, %v4390_v59  ;;  %v4519_v14 = vadd.f32 %v4503_v40, %v4391_v4  ;;  %v4641_v17 = vadd.f32 %v4625_v62, %v4513_v12  ;;  %v4882_v24 = vmul.f32 %v11900_v31, %v14564_v58  ;;  %v14565_v33 = vld [vmem:[#allocation54_spill] sm:$0xff]  ;;  %v14566_v4 = vld [vmem:[#allocation53_spill] sm:$0xff]  ;;  %v14567_v62 = vld [vmem:[#allocation55_spill] sm:$0xff] }
 0x4b0   : > { %v11893_v36 = vpop.permute.xlu0 %4874  ;;  %v11905_v27 = vadd.f32 %v4504_v46, %v4392_v5  ;;  %v11907_v18 = vadd.f32 %v4505_v51, %v4393_v53  ;;  %v4508_v59 = vmul.f32 %v11826_v52, %v14565_v33  ;;  %v4509_v2 = vmul.f32 %v11826_v52, %v14566_v4  ;;  %v14568_v58 = vld [vmem:[#allocation79_spill] sm:$0xff]  ;;  %v14569_v46 = vld [vmem:[#allocation58_spill] sm:$0xff] }
 0x4b1   : > { %5403 = vperm.xlu0 %8069, %v11872_v29   ;;  %v11913_v40 = vadd.f32 %v4507_v9, %v4395_v56  ;;  %v4511_v12 = vmul.f32 %v11826_v52, %v14567_v62  ;;  %v4770_v63 = vadd.f32 %v4754_v20, %v4641_v17  ;;  %v4756_v21 = vmul.f32 %v11879_v54, %v14568_v58  ;;  %v14570_v33 = vld [vmem:[#allocation86_spill] sm:$0xff]  ;;  %v14571_v20 = vld [vmem:[#allocation87_spill] sm:$0xff] }
 0x4b2   : > { %5398 = vperm.xlu1 %8070, %v11891_v41   ;;  %v11920_v5 = vpop.permute.xlu1 %4869  ;;  %v11922_v53 = vadd.f32 %v4506_v6, %v4394_v61  ;;  %v4510_v51 = vmul.f32 %v11826_v52, %v14569_v46  ;;  %v4626_v56 = vmul.f32 %v11858_v37, %v14570_v33  ;;  %v4643_v9 = vadd.f32 %v4627_v16, %v4515_v13  ;;  %v11929_v4 = vld [vmem:[%s8339_s10 + $0x322] sm:$0xff] }
 0x4b3   : > { %v4629_v17 = vmul.f32 %v11858_v37, %v14571_v20  ;;  %v4898_v58 = vadd.f32 %v4882_v24, %v4770_v63  ;;  %v4884_v41 = vmul.f32 %v11900_v31, %v11717_v1  ;;  %v11938_v61 = vld [vmem:[%s13887_s1 + $0x8] ss:$0 sm:$0xff]  ;;  %v11942_v13 = vadd.f32 %v4508_v59, %v4396_v7  ;;  %v14573_v33 = vld [vmem:[#allocation65_spill] sm:$0xff]  ;;  %v14574_v63 = vld [vmem:[#allocation11_spill] sm:$0xff] }
 0x4b4   : > { %v4933_v62 = vpop.permute.xlu0 %4932  ;;  %v14572_v46 = vld [vmem:[#allocation30_spill] sm:$0xff]  ;;  %v11945_v16 = vadd.f32 %v4509_v2, %v11833_v35  ;;  %v4628_v24 = vmul.f32 %v11858_v37, %v14573_v33  ;;  %v4755_v1 = vmul.f32 %v11879_v54, %v14574_v63  ;;  %v11951_v20 = vadd.f32 %v4511_v12, %v4399_v47  ;;  %v14576_v2 = vld [vmem:[#allocation57_spill] sm:$0xff] }
 0x4b5   : > { %v5010_v6 = vmul.f32 %v11938_v61, %v4933_v62  ;;  %5462 = vperm.xlu0 %8069, %v14572_v46   ;;  %v4772_v29 = vadd.f32 %v4756_v21, %v4643_v9  ;;  %v4758_v3 = vmul.f32 %v11879_v54, %v14575_v11  ;;  %v11958_v59 = vadd.f32 %v4510_v51, %v4398_v44  ;;  %v14578_v44 = vld [vmem:[#allocation56_spill] sm:$0xff]  ;;  %v14582_v63 = vld [vmem:[#allocation33_spill] sm:$0xff] }
 0x4b6   : > { %5408 = vperm.xlu1 %8070, %v11929_v4   ;;  %v11956_v62 = vpop.permute.xlu1 %4879  ;;  %v4642_v35 = vadd.f32 %v4626_v56, %v4514_v19  ;;  %v4631_v46 = vmul.f32 %v11858_v37, %v14576_v2  ;;  %v4883_v33 = vmul.f32 %v11900_v31, %v11731_v22  ;;  %v4645_v12 = vadd.f32 %v4629_v17, %v4517_v57  ;;  %v14580_v57 = vld [vmem:[#allocation69_spill] sm:$0xff] }
 0x4b7   : > { %v5026_v7 = vadd.f32 %v5010_v6, %v4898_v58  ;;  %v4900_v21 = vadd.f32 %v4884_v41, %v4772_v29  ;;  %v4886_v11 = vmul.f32 %v11900_v31, %v11735_v30  ;;  %v14577_v58 = vld [vmem:[#allocation61_spill] sm:$0xff]  ;;  %v11971_v19 = vmul.f32 %v11826_v52, %v14578_v44  ;;  %v14579_v6 = vld [vmem:[#allocation103_spill] sm:$0xff]  ;;  %v14581_v30 = vld [vmem:[#allocation90_spill] sm:$0xff] }
 0x4b8   : > { %v4943_v47 = vpop.permute.xlu0 %4942  ;;  %v4644_v51 = vadd.f32 %v4628_v24, %v4516_v10  ;;  %v4771_v56 = vadd.f32 %v4755_v1, %v4642_v35  ;;  %v4757_v22 = vmul.f32 %v11879_v54, %v14579_v6  ;;  %v4630_v29 = vmul.f32 %v11858_v37, %v14580_v57  ;;  %v14583_v1 = vld [vmem:[#allocation27_spill] sm:$0xff]  ;;  %v14587_v57 = vld [vmem:[#allocation12_spill] sm:$0xff] }
 0x4b9   : > { %5042 = vst.msk [vmem:[#allocation2 + $0x19] sm:$0xff] %vm250_vm0, %v5026_v7  ;;  %v5012_v9 = vmul.f32 %v11938_v61, %v4943_v47  ;;  %5472 = vperm.xlu0 %8069, %v14577_v58   ;;  %v4774_v41 = vadd.f32 %v4758_v3, %v4645_v12  ;;  %v4760_v17 = vmul.f32 %v11879_v54, %v14581_v30 }
 0x4ba   : > { %5467 = vperm.xlu1 %8070, %v14582_v63   ;;  %v4938_v7 = vpop.permute.xlu1 %4937  ;;  %v4647_v47 = vadd.f32 %v4631_v46, %v4519_v14  ;;  %v4899_v58 = vadd.f32 %v4883_v33, %v4771_v56  ;;  %v4885_v52 = vmul.f32 %v11900_v31, %v11750_v49  ;;  %v4633_v35 = vmul.f32 %v11858_v37, %v14583_v1  ;;  %v14585_v14 = vld [vmem:[#allocation72_spill] sm:$0xff]  ;;  %v14586_v33 = vld [vmem:[#allocation91_spill] sm:$0xff]  ;;  %v14591_v1 = vld [vmem:[#allocation14_spill] sm:$0xff] }
 0x4bb   : > { %v5028_v2 = vadd.f32 %v5012_v9, %v4900_v21  ;;  %v5011_v10 = vmul.f32 %v11938_v61, %v4938_v7  ;;  %v4902_v44 = vadd.f32 %v4886_v11, %v4774_v41  ;;  %v4888_v3 = vmul.f32 %v11900_v31, %v11757_v38  ;;  %v14584_v21 = vld [vmem:[#allocation64_spill] sm:$0xff]  ;;  %v14589_v7 = vld [vmem:[#allocation93_spill] sm:$0xff] }
 0x4bc   : > { %v4953_v24 = vpop.permute.xlu0 %4952  ;;  %v4632_v46 = vmul.f32 %v11858_v37, %v14585_v14  ;;  %v4773_v49 = vadd.f32 %v4757_v22, %v4644_v51  ;;  %v4759_v9 = vmul.f32 %v11879_v54, %v14586_v33  ;;  %v4646_v6 = vadd.f32 %v4630_v29, %v11895_v0  ;;  %v14588_v41 = vld [vmem:[#allocation68_spill] sm:$0xff]  ;;  %v14594_v14 = vld [vmem:[#allocation89_spill] sm:$0xff] }
 0x4bd   : > { %5044 = vst.msk [vmem:[#allocation2 + $0x31] sm:$0xff] %vm250_vm0, %v5028_v2  ;;  %v5014_v12 = vmul.f32 %v11938_v61, %v4953_v24  ;;  %5482 = vperm.xlu0 %8069, %v14584_v21   ;;  %v5027_v56 = vadd.f32 %v5011_v10, %v4899_v58  ;;  %v4776_v11 = vadd.f32 %v4760_v17, %v4647_v47  ;;  %v14590_v10 = vld [vmem:[#allocation88_spill] sm:$0xff]  ;;  %v14592_v21 = vld [vmem:[#allocation62_spill] sm:$0xff] }
 0x4be   : > { %v4762_v38 = vmul.f32 %v11879_v54, %v14587_v57  ;;  %5477 = vperm.xlu1 %8070, %v14588_v41   ;;  %v4948_v30 = vpop.permute.xlu1 %4947  ;;  %v4635_v2 = vmul.f32 %v11858_v37, %v14589_v7  ;;  %v4901_v24 = vadd.f32 %v4885_v52, %v4773_v49  ;;  %v4887_v51 = vmul.f32 %v11900_v31, %v11775_v50 }
 0x4bf   : > { %v5030_v63 = vadd.f32 %v5014_v12, %v4902_v44  ;;  %5043 = vst.msk [vmem:[#allocation2 + $0x21] sm:$0xff] %vm250_vm0, %v5027_v56  ;;  %v5013_v22 = vmul.f32 %v11938_v61, %v4948_v30  ;;  %v4649_v29 = vadd.f32 %v4633_v35, %v11907_v18  ;;  %v4904_v17 = vadd.f32 %v4888_v3, %v4776_v11  ;;  %v14593_v3 = vld [vmem:[#allocation95_spill] sm:$0xff]  ;;  %v14596_v30 = vld [vmem:[#allocation28_spill] sm:$0xff] }
 0x4c0   : > { %v4963_v0 = vpop.permute.xlu0 %4962  ;;  %v4890_v47 = vmul.f32 %v11900_v31, %v11784_v32  ;;  %v4648_v52 = vadd.f32 %v4632_v46, %v11905_v27  ;;  %v4775_v50 = vadd.f32 %v4759_v9, %v4646_v6  ;;  %v4761_v44 = vmul.f32 %v11879_v54, %v14591_v1  ;;  %v14595_v6 = vld [vmem:[#allocation97_spill] sm:$0xff] }
 0x4c1   : > { %5046 = vst.msk [vmem:[#allocation2 + $0x49] sm:$0xff] %vm250_vm0, %v5030_v63  ;;  %v5016_v58 = vmul.f32 %v11938_v61, %v4963_v0  ;;  %5492 = vperm.xlu0 %8069, %v14590_v10   ;;  %v5029_v12 = vadd.f32 %v5013_v22, %v4901_v24  ;;  %v4634_v18 = vmul.f32 %v11858_v37, %v14592_v21  ;;  %v14597_v63 = vld [vmem:[#allocation100_spill] sm:$0xff]  ;;  %v14601_v10 = vld [vmem:[#allocation81_spill] sm:$0xff] }
 0x4c2   : > { %v4778_v35 = vadd.f32 %v4762_v38, %v4649_v29  ;;  %v4764_v32 = vmul.f32 %v11879_v54, %v14593_v3  ;;  %5487 = vperm.xlu1 %8070, %v14594_v14   ;;  %v4958_v49 = vpop.permute.xlu1 %4957  ;;  %v4651_v56 = vadd.f32 %v4635_v2, %v11913_v40  ;;  %v4903_v11 = vadd.f32 %v4887_v51, %v4775_v50  ;;  %v14598_v2 = vld [vmem:[#allocation98_spill] sm:$0xff]  ;;  %v14599_v29 = vld [vmem:[#allocation16_spill] sm:$0xff]  ;;  %v14602_v3 = vld [vmem:[#allocation73_spill] sm:$0xff] }
 0x4c3   : > { %v5032_v33 = vadd.f32 %v5016_v58, %v4904_v17  ;;  %v4889_v27 = vmul.f32 %v11900_v31, %v11809_v45  ;;  %5045 = vst.msk [vmem:[#allocation2 + $0x39] sm:$0xff] %vm250_vm0, %v5029_v12  ;;  %v5015_v46 = vmul.f32 %v11938_v61, %v4958_v49  ;;  %v4637_v57 = vmul.f32 %v11858_v37, %v14595_v6  ;;  %v14600_v17 = vld [vmem:[#allocation92_spill] sm:$0xff] }
 0x4c4   : > { %v4973_v9 = vpop.permute.xlu0 %4972  ;;  %v4906_v38 = vadd.f32 %v4890_v47, %v4778_v35  ;;  %v4892_v41 = vmul.f32 %v11900_v31, %v11818_v43  ;;  %v4636_v45 = vmul.f32 %v11858_v37, %v14597_v63  ;;  %v4777_v7 = vadd.f32 %v4761_v44, %v4648_v52  ;;  %v14603_v14 = vld [vmem:[#allocation96_spill] sm:$0xff] }
 0x4c5   : > { %5048 = vst.msk [vmem:[#allocation2 + $0x61] sm:$0xff] %vm250_vm0, %v5032_v33  ;;  %v5018_v40 = vmul.f32 %v11938_v61, %v4973_v9  ;;  %5502 = vperm.xlu0 %8069, %v14596_v30   ;;  %v4763_v24 = vmul.f32 %v11879_v54, %v14598_v2  ;;  %v5031_v51 = vadd.f32 %v5015_v46, %v4903_v11  ;;  %v14606_v46 = vld [vmem:[#allocation76_spill] sm:$0xff]  ;;  %v14607_v30 = vld [vmem:[#allocation109_spill] sm:$0xff] }
 0x4c6   : > { %v4650_v22 = vadd.f32 %v4634_v18, %v11922_v53  ;;  %v4780_v0 = vadd.f32 %v4764_v32, %v4651_v56  ;;  %v4766_v43 = vmul.f32 %v11879_v54, %v14599_v29  ;;  %5497 = vperm.xlu1 %8070, %v14600_v17   ;;  %v4968_v47 = vpop.permute.xlu1 %4967  ;;  %v4639_v50 = vmul.f32 %v11858_v37, %v14601_v10  ;;  %v14604_v56 = vld [vmem:[#allocation8_spill] sm:$0xff]  ;;  %v14608_v2 = vld [vmem:[#allocation77_spill] sm:$0xff]  ;;  %v14610_v10 = vld [vmem:[#allocation78_spill] sm:$0xff] }
 0x4c7   : > { %v5034_v58 = vadd.f32 %v5018_v40, %v4906_v38  ;;  %v4905_v1 = vadd.f32 %v4889_v27, %v4777_v7  ;;  %v4891_v52 = vmul.f32 %v11900_v31, %v11840_v8  ;;  %5047 = vst.msk [vmem:[#allocation2 + $0x51] sm:$0xff] %vm250_vm0, %v5031_v51  ;;  %v5017_v44 = vmul.f32 %v11938_v61, %v4968_v47  ;;  %v14605_v27 = vld [vmem:[#allocation108_spill] sm:$0xff]  ;;  %v12071_v51 = vld [vmem:[%s8339_s10 + $0x330] sm:$0xff] }
 0x4c8   : > { %v4983_v53 = vpop.permute.xlu0 %4982  ;;  %v4653_v12 = vadd.f32 %v4637_v57, %v11945_v16  ;;  %v4908_v21 = vadd.f32 %v4892_v41, %v4780_v0  ;;  %v4894_v18 = vmul.f32 %v11900_v31, %v11849_v23  ;;  %v4652_v32 = vadd.f32 %v4636_v45, %v11942_v13  ;;  %v12077_v47 = vld [vmem:[#allocation2 + $0x30] sm:$0xff] }
 0x4c9   : > { %5050 = vst.msk [vmem:[#allocation2 + $0x79] sm:$0xff] %vm250_vm0, %v5034_v58  ;;  %v5020_v35 = vmul.f32 %v11938_v61, %v4983_v53  ;;  %5512 = vperm.xlu0 %8069, %v14602_v3   ;;  %v4779_v8 = vadd.f32 %v4763_v24, %v4650_v22  ;;  %v4765_v49 = vmul.f32 %v11879_v54, %v14603_v14  ;;  %v12079_v58 = vld [vmem:[#allocation2 + $0x31] sm:$0xff]  ;;  %v14611_v3 = vld [vmem:[#allocation9_spill] sm:$0xff] }
 0x4ca   : > { %v5033_v33 = vadd.f32 %v5017_v44, %v4905_v1  ;;  %v4638_v16 = vmul.f32 %v11858_v37, %v14604_v56  ;;  %v4782_v11 = vadd.f32 %v4766_v43, %v4653_v12  ;;  %v4768_v23 = vmul.f32 %v11879_v54, %v14605_v27  ;;  %5507 = vperm.xlu1 %8070, %v14606_v46   ;;  %v4978_v9 = vpop.permute.xlu1 %4977  ;;  %v14609_v43 = vld [vmem:[#allocation71_spill] sm:$0xff]  ;;  %v12115_v56 = vld [vmem:[%s8339_s10 + $0x338] sm:$0xff]  ;;  %v12121_v27 = vld [vmem:[#allocation2 + $0x48] sm:$0xff] }
 0x4cb   : > { %v5036_v6 = vadd.f32 %v5020_v35, %v4908_v21  ;;  %v4655_v57 = vadd.f32 %v4639_v50, %v11951_v20  ;;  %v4907_v13 = vadd.f32 %v4891_v52, %v4779_v8  ;;  %v4893_v38 = vmul.f32 %v11900_v31, %v11884_v25  ;;  %v12096_v21 = vld [vmem:[%s13889_s3] ss:$0 sm:$0xff] }
 0x4cc   : > { %5049 = vst.msk [vmem:[#allocation2 + $0x69] sm:$0xff] %vm250_vm0, %v5033_v33  ;;  %v5019_v41 = vmul.f32 %v11938_v61, %v4978_v9  ;;  %v4993_v40 = vpop.permute.xlu0 %4992  ;;  %v4767_v63 = vmul.f32 %v11879_v54, %v14607_v30  ;;  %v4910_v45 = vadd.f32 %v4894_v18, %v4782_v11  ;;  %v4896_v7 = vmul.f32 %v11900_v31, %v11893_v36  ;;  %v12103_v18 = vld [vmem:[%s13889_s3 + $0x1] ss:$0 sm:$0xff]  ;;  %v14612_v11 = vld [vmem:[#allocation38_spill] sm:$0xff]  ;;  %v12139_v30 = vld [vmem:[#allocation2 + $0x39] sm:$0xff] }
 0x4cd   : > { %5052 = vst.msk [vmem:[#allocation2 + $0x91] sm:$0xff] %vm250_vm0, %v5036_v6  ;;  %v5022_v20 = vmul.f32 %v11938_v61, %v4993_v40  ;;  %5522 = vperm.xlu0 %8069, %v14608_v2   ;;  %v4781_v24 = vadd.f32 %v4765_v49, %v4652_v32  ;;  %v4400_v22 = vadd.f32 %v11865_v39, %v11802_v60  ;;  %v12108_v32 = vld [vmem:[#allocation2 + $0x32] sm:$0xff] }
 0x4ce   : > { %v5035_v25 = vadd.f32 %v5019_v41, %v4907_v13  ;;  %v4654_v0 = vadd.f32 %v4638_v16, %v11958_v59  ;;  %v4784_v29 = vadd.f32 %v4768_v23, %v4655_v57  ;;  %5517 = vperm.xlu1 %8070, %v14609_v43   ;;  %v4988_v17 = vpop.permute.xlu1 %4987  ;;  %v4640_v50 = vmul.f32 %v11858_v37, %v14610_v10  ;;  %v12131_v57 = vld [vmem:[#allocation2 + $0x49] sm:$0xff]  ;;  %v12137_v40 = vld [vmem:[#allocation2 + $0x38] sm:$0xff] }
 0x4cf   : > { %v5038_v36 = vadd.f32 %v5022_v20, %v4910_v45  ;;  %v4909_v1 = vadd.f32 %v4893_v38, %v4781_v24  ;;  %v4895_v52 = vmul.f32 %v11900_v31, %v11920_v5  ;;  %v5021_v60 = vmul.f32 %v11938_v61, %v4988_v17  ;;  %v12144_v45 = vld [vmem:[%s13889_s3 + $0x3] ss:$0 sm:$0xff]  ;;  %v14613_v20 = vld [vmem:[#allocation10_spill] sm:$0xff]  ;;  %v12161_v43 = vld [vmem:[#allocation2 + $0x3a] sm:$0xff] }
 0x4d0   : > { %5051 = vst.msk [vmem:[#allocation2 + $0x81] sm:$0xff] %vm250_vm0, %v5035_v25  ;;  %v5003_v39 = vpop.permute.xlu0 %5002  ;;  %v4528_v59 = vadd.f32 %v11971_v19, %v4400_v22  ;;  %v4783_v44 = vadd.f32 %v4767_v63, %v4654_v0  ;;  %v4912_v53 = vadd.f32 %v4896_v7, %v4784_v29  ;;  %v4769_v37 = vmul.f32 %v11879_v54, %v11713_v55  ;;  %v12149_v2 = vld [vmem:[#allocation2 + $0x4a] sm:$0xff]  ;;  %v12154_v25 = vld [vmem:[%s13889_s3 + $0x4] ss:$0 sm:$0xff] }
 0x4d1   : > { %5054 = vst.msk [vmem:[#allocation2 + $0xa9] sm:$0xff] %vm250_vm0, %v5038_v36  ;;  %v5024_v12 = vmul.f32 %v11938_v61, %v5003_v39  ;;  %5532 = vperm.xlu0 %8069, %v12071_v51   ;;  %v5037_v5 = vadd.f32 %v5021_v60, %v4909_v1  ;;  %v6249_v19 = vmul.f32 %v12096_v21, %v12077_v47  ;;  %v8129_v0 = vld [vmem:[%s8339_s10 + $0x291] sm:$0xff] }
 0x4d2   : > { %v6281_v35 = vmul.f32 %v12103_v18, %v12079_v58  ;;  %5527 = vperm.xlu1 %8070, %v14611_v3   ;;  %v4998_v55 = vpop.permute.xlu1 %4997  ;;  %v4656_v8 = vadd.f32 %v4640_v50, %v4528_v59  ;;  %v4911_v14 = vadd.f32 %v4895_v52, %v4783_v44  ;;  %v4897_v49 = vmul.f32 %v11900_v31, %v11956_v62  ;;  %v12126_v31 = vld [vmem:[%s13889_s3 + $0x2] ss:$0 sm:$0xff]  ;;  %v12163_v17 = vld [vmem:[#allocation2 + $0x50] sm:$0xff]  ;;  %v12175_v52 = vld [vmem:[%s13889_s3 + $0x5] ss:$0 sm:$0xff] }
 0x4d3   : > { %v5040_v54 = vadd.f32 %v5024_v12, %v4912_v53  ;;  %5053 = vst.msk [vmem:[#allocation2 + $0x99] sm:$0xff] %vm250_vm0, %v5037_v5  ;;  %v5023_v33 = vmul.f32 %v11938_v61, %v4998_v55  ;;  %v6329_v62 = vmul.f32 %v12126_v31, %v12108_v32  ;;  %v6377_v7 = vmul.f32 %v12144_v45, %v12121_v27  ;;  %v14614_v39 = vld [vmem:[#allocation83_spill] sm:$0xff]  ;;  %v14616_v55 = vld [vmem:[#allocation106_spill] sm:$0xff] }
 0x4d4   : > { %v12117_v16 = vpop.permute.xlu0 %5077  ;;  %v4785_v23 = vadd.f32 %v4769_v37, %v4656_v8  ;;  %v6297_v9 = vadd.f32 %v6281_v35, %v6249_v19  ;;  %v6425_v22 = vmul.f32 %v12154_v25, %v12131_v57  ;;  %v6250_v36 = vmul.f32 %v12096_v21, %v12137_v40  ;;  %v14615_v37 = vld [vmem:[#allocation7_spill] sm:$0xff] }
 0x4d5   : > { %5056 = vst.msk [vmem:[#allocation2 + $0xc1] sm:$0xff] %vm250_vm0, %v5040_v54  ;;  %5590 = vperm.xlu0 %8069, %v14612_v11   ;;  %v5039_v46 = vadd.f32 %v5023_v33, %v4911_v14  ;;  %v6282_v10 = vmul.f32 %v12103_v18, %v12139_v30  ;;  %v6473_v60 = vmul.f32 %v12175_v52, %v12149_v2  ;;  %v12191_v35 = vld [vmem:[#allocation2 + $0x51] sm:$0xff] }
 0x4d6   : > { %5537 = vperm.xlu1 %8070, %v12115_v56   ;;  %v5008_v6 = vpop.permute.xlu1 %5007  ;;  %v4913_v13 = vadd.f32 %v4897_v49, %v4785_v23  ;;  %v6345_v63 = vadd.f32 %v6329_v62, %v6297_v9  ;;  %v6330_v53 = vmul.f32 %v12126_v31, %v12161_v43  ;;  %v6378_v12 = vmul.f32 %v12144_v45, %v12163_v17  ;;  %v12194_v54 = vld [vmem:[#allocation2 + $0x52] sm:$0xff]  ;;  %v14617_v49 = vld [vmem:[#allocation94_spill] sm:$0xff]  ;;  %v14620_v62 = vld [vmem:[#allocation13_spill] sm:$0xff] }
 0x4d7   : > { %5055 = vst.msk [vmem:[#allocation2 + $0xb1] sm:$0xff] %vm250_vm0, %v5039_v46  ;;  %v5025_v38 = vmul.f32 %v11938_v61, %v5008_v6  ;;  %v6298_v44 = vadd.f32 %v6282_v10, %v6250_v36  ;;  %v6251_v14 = vmul.f32 %v12096_v21, %v12121_v27  ;;  %v6426_v11 = vmul.f32 %v12154_v25, %v12191_v35  ;;  %v14626_v36 = vld [vmem:[#allocation102_spill] sm:$0xff] }
 0x4d8   : > { %v12135_v41 = vpop.permute.xlu0 %5087  ;;  %v6393_v24 = vadd.f32 %v6377_v7, %v6345_v63  ;;  %v6283_v23 = vmul.f32 %v12103_v18, %v12131_v57  ;;  %v6331_v9 = vmul.f32 %v12126_v31, %v12149_v2  ;;  %v14621_v63 = vld [vmem:[#allocation15_spill] sm:$0xff] }
 0x4d9   : > { %5600 = vperm.xlu0 %8069, %v14613_v20   ;;  %v5041_v61 = vadd.f32 %v5025_v38, %v4913_v13  ;;  %v6346_v3 = vadd.f32 %v6330_v53, %v6298_v44  ;;  %v6474_v13 = vmul.f32 %v12175_v52, %v12194_v54  ;;  %v6332_v53 = vmul.f32 %v12126_v31, %v12194_v54 }
 0x4da   : > { %5595 = vperm.xlu1 %8070, %v8129_v0   ;;  %v12159_v29 = vpop.permute.xlu1 %5082  ;;  %v6441_v1 = vadd.f32 %v6425_v22, %v6393_v24  ;;  %v6299_v38 = vadd.f32 %v6283_v23, %v6251_v14  ;;  %v14625_v22 = vld [vmem:[#allocation99_spill] sm:$0xff]  ;;  %v6252_v0 = vmul.f32 %v12096_v21, %v12163_v17 }
 0x4db   : > { %5057 = vst.msk [vmem:[#allocation2 + $0xc9] sm:$0xff] %vm250_vm0, %v5041_v61  ;;  %v6394_v8 = vadd.f32 %v6378_v12, %v6346_v3  ;;  %v12235_v12 = vld [vmem:[%s8339_s10 + $0x331] sm:$0xff] }
 0x4dc   : > { %v12170_v50 = vpop.permute.xlu0 %5097  ;;  %v12180_v59 = vadd.f32 %v6473_v60, %v6441_v1  ;;  %v12219_v24 = vadd.f32 %v6331_v9, %v6299_v38  ;;  %v6284_v1 = vmul.f32 %v12103_v18, %v12191_v35  ;;  %v8131_v23 = vld [vmem:[%s8339_s10 + $0x28a] sm:$0xff] }
 0x4dd   : > { %5610 = vperm.xlu0 %8069, %v14614_v39   ;;  %v6442_v6 = vadd.f32 %v6426_v11, %v6394_v8  ;;  %v14629_v39 = vld [vmem:[#allocation63_spill] sm:$0xff] }
 0x4de   : > { %5605 = vperm.xlu1 %8070, %v14615_v37   ;;  %v12187_v5 = vpop.permute.xlu1 %5092  ;;  %v6300_v44 = vadd.f32 %v6284_v1, %v6252_v0  ;;  %v14630_v37 = vld [vmem:[#allocation107_spill] sm:$0xff]  ;;  %v14644_v1 = vld [vmem:[#allocation101_spill] sm:$0xff] }
 0x4df   : > { %v12215_v20 = vadd.f32 %v6474_v13, %v6442_v6  ;;  %v8132_v6 = vld [vmem:[%s8339_s10 + $0x292] sm:$0xff] }
 0x4e0   : > { %v12189_v19 = vpop.permute.xlu0 %5107 }
 0x4e1   : > { %5620 = vperm.xlu0 %8069, %v14616_v55   ;;  %14623 = vst [vmem:[#allocation24_spill] sm:$0xff] %v12215_v20  ;;  %v12240_v55 = vadd.f32 %v6332_v53, %v6300_v44  ;;  %v14647_v53 = vld [vmem:[#allocation84_spill] sm:$0xff] }
 0x4e2   : > { %5615 = vperm.xlu1 %8070, %v14617_v49   ;;  %v12199_v33 = vpop.permute.xlu1 %5102  ;;  %v12249_v49 = vld [vmem:[%s8339_s10 + $0x339] sm:$0xff] }
 0x4e3   : > { %14618 = vst [vmem:[#allocation21_spill] sm:$0xff] %v12199_v33 }
 0x4e4   : > { %v12205_v46 = vpop.permute.xlu0 %5117 }
 0x4e5   : > { %14619 = vst [vmem:[#allocation22_spill] sm:$0xff] %v12205_v46  ;;  %5630 = vperm.xlu0 %8069, %v14620_v62  }
 0x4e6   : > { %5625 = vperm.xlu1 %8070, %v14621_v63   ;;  %v12213_v7 = vpop.permute.xlu1 %5112 }
 0x4e7   : > { %14622 = vst [vmem:[#allocation23_spill] sm:$0xff] %v12213_v7 }
 0x4e8   : > { %v12217_v61 = vpop.permute.xlu0 %5127 }
 0x4e9   : > { %14624 = vst [vmem:[#allocation70_spill] sm:$0xff] %v12217_v61  ;;  %5640 = vperm.xlu0 %8069, %v14625_v22   ;;  %v6406_v61 = vld [vmem:[#allocation2 + $0x21] sm:$0xff] }
 0x4ea   : > { %5635 = vperm.xlu1 %8070, %v14626_v36   ;;  %v12225_v10 = vpop.permute.xlu1 %5122  ;;  %v14643_v36 = vld [vmem:[#allocation67_spill] sm:$0xff]  ;;  %v6280_v46 = vmul.f32 %v12103_v18, %v6406_v61 }
 0x4eb   : > { %14627 = vst [vmem:[#allocation104_spill] sm:$0xff] %v12225_v10 }
 0x4ec   : > { %v12229_v60 = vpop.permute.xlu0 %5137 }
 0x4ed   : > { %14628 = vst [vmem:[#allocation25_spill] sm:$0xff] %v12229_v60  ;;  %5650 = vperm.xlu0 %8069, %v14629_v39   ;;  %v6310_v60 = vld [vmem:[#allocation2 + $0xa] sm:$0xff] }
 0x4ee   : > { %5645 = vperm.xlu1 %8070, %v14630_v37   ;;  %v12238_v3 = vpop.permute.xlu1 %5132  ;;  %v14648_v37 = vld [vmem:[#allocation19_spill] sm:$0xff] }
 0x4ef   : > { %14631 = vst [vmem:[#allocation74_spill] sm:$0xff] %v12238_v3 }
 0x4f0   : > { %v12242_v8 = vpop.permute.xlu0 %5147 }
 0x4f1   : > { %14632 = vst [vmem:[#allocation75_spill] sm:$0xff] %v12242_v8  ;;  %5660 = vperm.xlu0 %8069, %v12235_v12  }
 0x4f2   : > { %5655 = vperm.xlu1 %8070, %v11699_v42   ;;  %v12246_v14 = vpop.permute.xlu1 %5142 }
 0x4f3   : > { %14633 = vst [vmem:[#allocation26_spill] sm:$0xff] %v12246_v14  ;;  %v8151_v14 = vld [vmem:[%s8339_s10 + $0x2d9] sm:$0xff] }
 0x4f4   : > { %v12251_v11 = vpop.permute.xlu0 %5205 }
 0x4f5   : > { %14634 = vst [vmem:[#allocation29_spill] sm:$0xff] %v12251_v11  ;;  %5718 = vperm.xlu0 %8069, %v8131_v23  }
 0x4f6   : > { %5665 = vperm.xlu1 %8070, %v12249_v49   ;;  %v12255_v9 = vpop.permute.xlu1 %5152 }
 0x4f7   : > { %14635 = vst [vmem:[#allocation31_spill] sm:$0xff] %v12255_v9 }
 0x4f8   : > { %v12257_v62 = vpop.permute.xlu0 %5215 }
 0x4f9   : > { %14636 = vst [vmem:[#allocation32_spill] sm:$0xff] %v12257_v62  ;;  %5728 = vperm.xlu0 %8069, %v11726_v15   ;;  %v8135_v62 = vld [vmem:[%s8339_s10 + $0x2a8] sm:$0xff] }
 0x4fa   : > { %5723 = vperm.xlu1 %8070, %v8132_v6   ;;  %v12261_v13 = vpop.permute.xlu1 %5210 }
 0x4fb   : > { %14637 = vst [vmem:[#allocation34_spill] sm:$0xff] %v12261_v13  ;;  %v8134_v13 = vld [vmem:[%s8339_s10 + $0x2b8] sm:$0xff] }
 0x4fc   : > { %v12263_v42 = vpop.permute.xlu0 %5225 }
 0x4fd   : > { %14638 = vst [vmem:[#allocation35_spill] sm:$0xff] %v12263_v42  ;;  %5738 = vperm.xlu0 %8069, %v11745_v26   ;;  %v8133_v42 = vld [vmem:[%s8339_s10 + $0x2a0] sm:$0xff] }
 0x4fe   : > { %5733 = vperm.xlu1 %8070, %v11755_v34   ;;  %v12267_v38 = vpop.permute.xlu1 %5220 }
 0x4ff   : > { %14639 = vst [vmem:[#allocation36_spill] sm:$0xff] %v12267_v38 }
 0x500   : > { %v12269_v63 = vpop.permute.xlu0 %5235 }
 0x501   : > { %14640 = vst [vmem:[#allocation37_spill] sm:$0xff] %v12269_v63  ;;  %5748 = vperm.xlu0 %8069, %v11769_v28   ;;  %v14652_v63 = vld [vmem:[#allocation20_spill] sm:$0xff] }
 0x502   : > { %5743 = vperm.xlu1 %8070, %v11782_v48   ;;  %v12273_v22 = vpop.permute.xlu1 %5230 }
 0x503   : > { %14641 = vst [vmem:[#allocation39_spill] sm:$0xff] %v12273_v22  ;;  %v14651_v22 = vld [vmem:[#allocation80_spill] sm:$0xff] }
 0x504   : > { %v12275_v0 = vpop.permute.xlu0 %5245 }
 0x505   : > { %14642 = vst [vmem:[#allocation40_spill] sm:$0xff] %v12275_v0  ;;  %5758 = vperm.xlu0 %8069, %v14643_v36   ;;  %v12291_v0 = vld [vmem:[%s8339_s10 + $0x332] sm:$0xff] }
 0x506   : > { %5753 = vperm.xlu1 %8070, %v14644_v1   ;;  %v12279_v39 = vpop.permute.xlu1 %5240 }
 0x507   : > { %14645 = vst [vmem:[#allocation41_spill] sm:$0xff] %v12279_v39 }
 0x508   : > { %v12281_v44 = vpop.permute.xlu0 %5255 }
 0x509   : > { %14646 = vst [vmem:[#allocation44_spill] sm:$0xff] %v12281_v44  ;;  %5768 = vperm.xlu0 %8069, %v14647_v53  }
 0x50a   : > { %5763 = vperm.xlu1 %8070, %v14648_v37   ;;  %v12285_v23 = vpop.permute.xlu1 %5250 }
 0x50b   : > { %14649 = vst [vmem:[#allocation43_spill] sm:$0xff] %v12285_v23 }
 0x50c   : > { %v12287_v6 = vpop.permute.xlu0 %5265 }
 0x50d   : > { %14650 = vst [vmem:[#allocation46_spill] sm:$0xff] %v12287_v6  ;;  %5778 = vperm.xlu0 %8069, %v14651_v22   ;;  %v12303_v6 = vld [vmem:[%s8339_s10 + $0x33a] sm:$0xff] }
 0x50e   : > { %5773 = vperm.xlu1 %8070, %v14652_v63   ;;  %v12294_v39 = vpop.permute.xlu1 %5260 }
 0x50f   : > { %14653 = vst [vmem:[#allocation45_spill] sm:$0xff] %v12294_v39 }
 0x510   : > { %v12296_v38 = vpop.permute.xlu0 %5275 }
 0x511   : > { %14654 = vst [vmem:[#allocation48_spill] sm:$0xff] %v12296_v38  ;;  %5788 = vperm.xlu0 %8069, %v12291_v0  }
 0x512   : > { %5783 = vperm.xlu1 %8070, %v11929_v4   ;;  %v12300_v23 = vpop.permute.xlu1 %5270 }
 0x513   : > { %14655 = vst [vmem:[#allocation47_spill] sm:$0xff] %v12300_v23 }
 0x514   : > { %v12305_v44 = vpop.permute.xlu0 %5333 }
 0x515   : > { %14656 = vst [vmem:[#allocation59_spill] sm:$0xff] %v12305_v44  ;;  %5847 = vperm.xlu0 %8069, %v8133_v42   ;;  %v8136_v44 = vld [vmem:[%s8339_s10 + $0x2d0] sm:$0xff]  ;;  %v8137_v42 = vld [vmem:[%s8339_s10 + $0x2c0] sm:$0xff] }
 0x516   : > { %5793 = vperm.xlu1 %8070, %v12303_v6   ;;  %v12309_v39 = vpop.permute.xlu1 %5280 }
 0x517   : > { %14657 = vst [vmem:[#allocation42_spill] sm:$0xff] %v12309_v39 }
 0x518   : > { %v12311_v38 = vpop.permute.xlu0 %5343 }
 0x519   : > { %14658 = vst [vmem:[#allocation50_spill] sm:$0xff] %v12311_v38  ;;  %5857 = vperm.xlu0 %8069, %v8134_v13   ;;  %v8138_v38 = vld [vmem:[%s8339_s10 + $0x2e8] sm:$0xff]  ;;  %v8139_v13 = vld [vmem:[%s8339_s10 + $0x2d8] sm:$0xff] }
 0x51a   : > { %5852 = vperm.xlu1 %8070, %v8135_v62   ;;  %v12315_v23 = vpop.permute.xlu1 %5338 }
 0x51b   : > { %14659 = vst [vmem:[#allocation49_spill] sm:$0xff] %v12315_v23 }
 0x51c   : > { %v12317_v9 = vpop.permute.xlu0 %5353 }
 0x51d   : > { %14660 = vst [vmem:[#allocation51_spill] sm:$0xff] %v12317_v9  ;;  %5867 = vperm.xlu0 %8069, %v8136_v44   ;;  %v8140_v9 = vld [vmem:[%s8339_s10 + $0x300] sm:$0xff]  ;;  %v8141_v44 = vld [vmem:[%s8339_s10 + $0x2f0] sm:$0xff] }
 0x51e   : > { %5862 = vperm.xlu1 %8070, %v8137_v42   ;;  %v12321_v11 = vpop.permute.xlu1 %5348 }
 0x51f   : > { %14661 = vst [vmem:[#allocation85_spill] sm:$0xff] %v12321_v11 }
 0x520   : > { %v12323_v39 = vpop.permute.xlu0 %5363 }
 0x521   : > { %14662 = vst [vmem:[#allocation52_spill] sm:$0xff] %v12323_v39  ;;  %5877 = vperm.xlu0 %8069, %v8138_v38   ;;  %v8142_v39 = vld [vmem:[%s8339_s10 + $0x318] sm:$0xff]  ;;  %v8143_v38 = vld [vmem:[%s8339_s10 + $0x308] sm:$0xff] }
 0x522   : > { %5872 = vperm.xlu1 %8070, %v8139_v13   ;;  %v12327_v62 = vpop.permute.xlu1 %5358 }
 0x523   : > { %14663 = vst [vmem:[#allocation60_spill] sm:$0xff] %v12327_v62 }
 0x524   : > { %v12329_v23 = vpop.permute.xlu0 %5373 }
 0x525   : > { %14664 = vst [vmem:[#allocation66_spill] sm:$0xff] %v12329_v23  ;;  %5887 = vperm.xlu0 %8069, %v8140_v9   ;;  %v7981_v9 = vld [vmem:[%s8339_s10 + $0x348] sm:$0xff]  ;;  %v8144_v23 = vld [vmem:[%s8339_s10 + $0x320] sm:$0xff] }
 0x526   : > { %5882 = vperm.xlu1 %8070, %v8141_v44   ;;  %v12333_v42 = vpop.permute.xlu1 %5368 }
 0x527   : > { %14665 = vst [vmem:[#allocation54_spill] sm:$0xff] %v12333_v42  ;;  %v8148_v42 = vld [vmem:[%s8339_s10 + $0x2d1] sm:$0xff] }
 0x528   : > { %v12335_v11 = vpop.permute.xlu0 %5383 }
 0x529   : > { %14666 = vst [vmem:[#allocation53_spill] sm:$0xff] %v12335_v11  ;;  %5897 = vperm.xlu0 %8069, %v8142_v39  }
 0x52a   : > { %5892 = vperm.xlu1 %8070, %v8143_v38   ;;  %v12339_v13 = vpop.permute.xlu1 %5378  ;;  %v7982_v38 = vld [vmem:[%s8339_s10 + $0x350] sm:$0xff] }
 0x52b   : > { %14667 = vst [vmem:[#allocation55_spill] sm:$0xff] %v12339_v13 }
 0x52c   : > { %v12341_v62 = vpop.permute.xlu0 %5393 }
 0x52d   : > { %14668 = vst [vmem:[#allocation79_spill] sm:$0xff] %v12341_v62  ;;  %5907 = vperm.xlu0 %8069, %v12071_v51   ;;  %v8145_v51 = vld [vmem:[%s8339_s10 + $0x2a1] sm:$0xff] }
 0x52e   : > { %5902 = vperm.xlu1 %8070, %v8144_v23   ;;  %v12346_v44 = vpop.permute.xlu1 %5388 }
 0x52f   : > { %14669 = vst [vmem:[#allocation58_spill] sm:$0xff] %v12346_v44  ;;  %v8146_v44 = vld [vmem:[%s8339_s10 + $0x2b9] sm:$0xff] }
 0x530   : > { %v12348_v11 = vpop.permute.xlu0 %5403 }
 0x531   : > { %14670 = vst [vmem:[#allocation86_spill] sm:$0xff] %v12348_v11  ;;  %5917 = vperm.xlu0 %8069, %v7981_v9   ;;  %v8147_v9 = vld [vmem:[%s8339_s10 + $0x2a9] sm:$0xff] }
 0x532   : > { %5912 = vperm.xlu1 %8070, %v12115_v56   ;;  %v12351_v39 = vpop.permute.xlu1 %5398 }
 0x533   : > { %14671 = vst [vmem:[#allocation87_spill] sm:$0xff] %v12351_v39  ;;  %v6261_v39 = vld [vmem:[#allocation2 + $0x1] sm:$0xff] }
 0x534   : > { %v12354_v62 = vpop.permute.xlu0 %5462 }
 0x535   : > { %14672 = vst [vmem:[#allocation30_spill] sm:$0xff] %v12354_v62  ;;  %5975 = vperm.xlu0 %8069, %v8145_v51   ;;  %v8149_v62 = vld [vmem:[%s8339_s10 + $0x2c1] sm:$0xff] }
 0x536   : > { %5922 = vperm.xlu1 %8070, %v7982_v38   ;;  %v12357_v13 = vpop.permute.xlu1 %5408 }
 0x537   : > { %14673 = vst [vmem:[#allocation65_spill] sm:$0xff] %v12357_v13  ;;  %v6229_v13 = vld [vmem:[#allocation2] sm:$0xff] }
 0x538   : > { %v12359_v23 = vpop.permute.xlu0 %5472 }
 0x539   : > { %14674 = vst [vmem:[#allocation11_spill] sm:$0xff] %v12359_v23  ;;  %5985 = vperm.xlu0 %8069, %v8146_v44   ;;  %v8150_v23 = vld [vmem:[%s8339_s10 + $0x2e9] sm:$0xff] }
 0x53a   : > { %5980 = vperm.xlu1 %8070, %v8147_v9   ;;  %v12363_v56 = vpop.permute.xlu1 %5467  ;;  %v6245_v9 = vmul.f32 %v12096_v21, %v6229_v13 }
 0x53b   : > { %14675 = vst [vmem:[#allocation82_spill] sm:$0xff] %v12363_v56  ;;  %v6230_v56 = vld [vmem:[#allocation2 + $0x8] sm:$0xff] }
 0x53c   : > { %v12365_v11 = vpop.permute.xlu0 %5482  ;;  %v6246_v3 = vmul.f32 %v12096_v21, %v6230_v56  ;;  %v6358_v56 = vld [vmem:[#allocation2 + $0x20] sm:$0xff] }
 0x53d   : > { %14676 = vst [vmem:[#allocation57_spill] sm:$0xff] %v12365_v11  ;;  %5995 = vperm.xlu0 %8069, %v8148_v42   ;;  %v6277_v11 = vmul.f32 %v12103_v18, %v6261_v39  ;;  %v6262_v42 = vld [vmem:[#allocation2 + $0x9] sm:$0xff]  ;;  %v6248_v7 = vmul.f32 %v12096_v21, %v6358_v56 }
 0x53e   : > { %5990 = vperm.xlu1 %8070, %v8149_v62   ;;  %v12369_v51 = vpop.permute.xlu1 %5477  ;;  %v6309_v62 = vld [vmem:[#allocation2 + $0x2] sm:$0xff] }
 0x53f   : > { %14677 = vst [vmem:[#allocation61_spill] sm:$0xff] %v12369_v51  ;;  %v6405_v51 = vld [vmem:[#allocation2 + $0x19] sm:$0xff]  ;;  %v6293_v13 = vadd.f32 %v6277_v11, %v6245_v9  ;;  %v6325_v39 = vmul.f32 %v12126_v31, %v6309_v62  ;;  %v6326_v11 = vmul.f32 %v12126_v31, %v6310_v60  ;;  %v8152_v9 = vld [vmem:[%s8339_s10 + $0x2f1] sm:$0xff]  ;;  %v6374_v60 = vmul.f32 %v12144_v45, %v6358_v56 }
 0x540   : > { %v12371_v38 = vpop.permute.xlu0 %5492  ;;  %v6279_v10 = vmul.f32 %v12103_v18, %v6405_v51 }
 0x541   : > { %14678 = vst [vmem:[#allocation56_spill] sm:$0xff] %v12371_v38  ;;  %6005 = vperm.xlu0 %8069, %v8150_v23   ;;  %v6357_v38 = vld [vmem:[#allocation2 + $0x18] sm:$0xff]  ;;  %v6278_v23 = vmul.f32 %v12103_v18, %v6262_v42 }
 0x542   : > { %6000 = vperm.xlu1 %8070, %v8151_v14   ;;  %v12375_v44 = vpop.permute.xlu1 %5487 }
 0x543   : > { %14679 = vst [vmem:[#allocation103_spill] sm:$0xff] %v12375_v44  ;;  %v6453_v44 = vld [vmem:[#allocation2 + $0x1a] sm:$0xff]  ;;  %v6294_v42 = vadd.f32 %v6278_v23, %v6246_v3 }
 0x544   : > { %v12379_v8 = vpop.permute.xlu0 %5502 }
 0x545   : > { %14680 = vst [vmem:[#allocation69_spill] sm:$0xff] %v12379_v8  ;;  %6108 = vperm.xlu0 %8069, %v11755_v34   ;;  %v6247_v34 = vmul.f32 %v12096_v21, %v6357_v38  ;;  %v6342_v23 = vadd.f32 %v6326_v11, %v6294_v42 }
 0x546   : > { %6103 = vperm.xlu1 %8070, %v11726_v15   ;;  %v12385_v14 = vpop.permute.xlu1 %5497  ;;  %v6327_v15 = vmul.f32 %v12126_v31, %v6453_v44 }
 0x547   : > { %14681 = vst [vmem:[#allocation90_spill] sm:$0xff] %v12385_v14  ;;  %v6341_v14 = vadd.f32 %v6325_v39, %v6293_v13  ;;  %v6295_v33 = vadd.f32 %v6279_v10, %v6247_v34  ;;  %v6296_v39 = vadd.f32 %v6280_v46, %v6248_v7  ;;  %v6390_v56 = vadd.f32 %v6374_v60, %v6342_v23 }
 0x548   : > { %v12388_v8 = vpop.permute.xlu0 %5512  ;;  %v6469_v46 = vmul.f32 %v12175_v52, %v6453_v44 }
 0x549   : > { %14682 = vst [vmem:[#allocation33_spill] sm:$0xff] %v12388_v8  ;;  %6113 = vperm.xlu0 %8069, %v11745_v26   ;;  %v6373_v8 = vmul.f32 %v12144_v45, %v6357_v38  ;;  %v8153_v26 = vld [vmem:[%s8339_s10 + $0x301] sm:$0xff]  ;;  %v6343_v3 = vadd.f32 %v6327_v15, %v6295_v33  ;;  %v6421_v33 = vmul.f32 %v12154_v25, %v6405_v51  ;;  %v8154_v15 = vld [vmem:[%s8339_s10 + $0x309] sm:$0xff] }
 0x54a   : > { %6010 = vperm.xlu1 %8070, %v8152_v9   ;;  %v12396_v62 = vpop.permute.xlu1 %5507  ;;  %v6454_v9 = vld [vmem:[#allocation2 + $0x22] sm:$0xff]  ;;  %v6422_v51 = vmul.f32 %v12154_v25, %v6406_v61 }
 0x54b   : > { %14683 = vst [vmem:[#allocation27_spill] sm:$0xff] %v12396_v62  ;;  %v6389_v38 = vadd.f32 %v6373_v8, %v6341_v14  ;;  %v6328_v10 = vmul.f32 %v12126_v31, %v6454_v9  ;;  %v6376_v14 = vmul.f32 %v12144_v45, %v12137_v40  ;;  %v12439_v61 = vld [vmem:[%s13889_s3 + $0x6] ss:$0 sm:$0xff] }
 0x54c   : > { %v12401_v20 = vpop.permute.xlu0 %5522 }
 0x54d   : > { %14684 = vst [vmem:[#allocation64_spill] sm:$0xff] %v12401_v20  ;;  %6015 = vperm.xlu0 %8069, %v8153_v26   ;;  %v6375_v20 = vmul.f32 %v12144_v45, %v12077_v47  ;;  %v6437_v8 = vadd.f32 %v6421_v33, %v6389_v38  ;;  %v6344_v7 = vadd.f32 %v6328_v10, %v6296_v39 }
 0x54e   : > { %6118 = vperm.xlu1 %8070, %v11782_v48   ;;  %v12406_v13 = vpop.permute.xlu1 %5517  ;;  %v6438_v26 = vadd.f32 %v6422_v51, %v6390_v56  ;;  %v6471_v38 = vmul.f32 %v12175_v52, %v12108_v32  ;;  %v6470_v39 = vmul.f32 %v12175_v52, %v6454_v9  ;;  %v6424_v33 = vmul.f32 %v12154_v25, %v12139_v30  ;;  %v8157_v56 = vld [vmem:[%s8339_s10 + $0x321] sm:$0xff] }
 0x54f   : > { %14685 = vst [vmem:[#allocation72_spill] sm:$0xff] %v12406_v13  ;;  %v6391_v34 = vadd.f32 %v6375_v20, %v6343_v3  ;;  %v8155_v20 = vld [vmem:[%s8339_s10 + $0x319] sm:$0xff]  ;;  %v6485_v44 = vadd.f32 %v6469_v46, %v6437_v8  ;;  %v6392_v23 = vadd.f32 %v6376_v14, %v6344_v7  ;;  %v6519_v46 = vmul.f32 %v12439_v61, %v12121_v27 }
 0x550   : > { %v12408_v62 = vpop.permute.xlu0 %5532  ;;  %v6518_v7 = vmul.f32 %v12439_v61, %v12137_v40 }
 0x551   : > { %14686 = vst [vmem:[#allocation91_spill] sm:$0xff] %v12408_v62  ;;  %6123 = vperm.xlu0 %8069, %v11769_v28   ;;  %v6423_v28 = vmul.f32 %v12154_v25, %v12079_v58  ;;  %v6440_v8 = vadd.f32 %v6424_v33, %v6392_v23  ;;  %v6520_v23 = vmul.f32 %v12439_v61, %v12163_v17 }
 0x552   : > { %6020 = vperm.xlu1 %8070, %v8154_v15   ;;  %v12416_v48 = vpop.permute.xlu1 %5527 }
 0x553   : > { %v6439_v11 = vadd.f32 %v6423_v28, %v6391_v34  ;;  %v6486_v34 = vadd.f32 %v6470_v39, %v6438_v26  ;;  %v6472_v28 = vmul.f32 %v12175_v52, %v12161_v43 }
 0x554   : > { %v12421_v42 = vpop.permute.xlu0 %5590 }
 0x555   : > { %14687 = vst [vmem:[#allocation12_spill] sm:$0xff] %v12421_v42  ;;  %6025 = vperm.xlu0 %8069, %v8155_v20   ;;  %v6487_v10 = vadd.f32 %v6471_v38, %v6439_v11  ;;  %v6534_v20 = vadd.f32 %v6518_v7, %v6486_v34  ;;  %v6488_v11 = vadd.f32 %v6472_v28, %v6440_v8  ;;  %v6807_v8 = vld [vmem:[#allocation2 + $0xc0] sm:$0xff]  ;;  %v14724_v42 = vld [vmem:[#allocation31_spill] sm:$0xff] }
 0x556   : > { %6128 = vperm.xlu1 %8070, %v14644_v1   ;;  %v12428_v3 = vpop.permute.xlu1 %5537  ;;  %v6517_v1 = vmul.f32 %v12439_v61, %v12077_v47  ;;  %v12458_v47 = vld [vmem:[%s13889_s3 + $0x7] ss:$0 sm:$0xff]  ;;  %v12516_v28 = vld [vmem:[%s13888_s2] ss:$0 sm:$0xff] }
 0x557   : > { %v6565_v14 = vmul.f32 %v12458_v47, %v12079_v58  ;;  %v6535_v51 = vadd.f32 %v6519_v46, %v6487_v10  ;;  %v6567_v26 = vmul.f32 %v12458_v47, %v12131_v57  ;;  %v12477_v58 = vld [vmem:[%s13889_s3 + $0x8] ss:$0 sm:$0xff]  ;;  %v6505_v10 = vld [vmem:[#allocation2 + $0x60] sm:$0xff]  ;;  %v6568_v34 = vmul.f32 %v12458_v47, %v12191_v35 }
 0x558   : > { %v12430_v60 = vpop.permute.xlu0 %5600  ;;  %v6533_v9 = vadd.f32 %v6517_v1, %v6485_v44  ;;  %v6566_v44 = vmul.f32 %v12458_v47, %v12139_v30  ;;  %v6536_v1 = vadd.f32 %v6520_v23, %v6488_v11  ;;  %v6615_v17 = vmul.f32 %v12477_v58, %v12149_v2  ;;  %v6839_v46 = vld [vmem:[#allocation2 + $0xc1] sm:$0xff] }
 0x559   : > { %14688 = vst [vmem:[#allocation68_spill] sm:$0xff] %v12430_v60  ;;  %6133 = vperm.xlu0 %8069, %v14643_v36   ;;  %v6583_v38 = vadd.f32 %v6567_v26, %v6535_v51  ;;  %v6379_v35 = vmul.f32 %v12144_v45, %v6505_v10  ;;  %v6601_v11 = vld [vmem:[#allocation2 + $0x62] sm:$0xff] }
 0x55a   : > { %6030 = vperm.xlu1 %8070, %v8157_v56   ;;  %v12446_v15 = vpop.permute.xlu1 %5595  ;;  %v6581_v40 = vadd.f32 %v6565_v14, %v6533_v9  ;;  %v6582_v39 = vadd.f32 %v6566_v44, %v6534_v20  ;;  %v6584_v2 = vadd.f32 %v6568_v34, %v6536_v1  ;;  %v12510_v14 = vld [vmem:[#allocation2 + $0x68] sm:$0xff]  ;;  %v6823_v44 = vmul.f32 %v12096_v21, %v6807_v8 }
 0x55b   : > { %14689 = vst [vmem:[#allocation93_spill] sm:$0xff] %v12446_v15  ;;  %v6631_v56 = vadd.f32 %v6615_v17, %v6583_v38  ;;  %v6395_v23 = vadd.f32 %v6379_v35, %v12219_v24  ;;  %v6617_v24 = vmul.f32 %v12477_v58, %v6601_v11 }
 0x55c   : > { %v12448_v36 = vpop.permute.xlu0 %5610 }
 0x55d   : > { %14690 = vst [vmem:[#allocation88_spill] sm:$0xff] %v12448_v36  ;;  %6035 = vperm.xlu0 %8069, %v12235_v12   ;;  %v12536_v38 = vsel %vm250_vm0, %v6631_v56, 0.0  ;;  %v12558_v56 = vld [vmem:[#allocation2 + $0x69] sm:$0xff] }
 0x55e   : > { %6138 = vperm.xlu1 %8070, %v14648_v37   ;;  %v12465_v27 = vpop.permute.xlu1 %5605  ;;  %v6613_v37 = vmul.f32 %v12477_v58, %v12108_v32 }
 0x55f   : > { %14691 = vst [vmem:[#allocation14_spill] sm:$0xff] %v12465_v27 }
 0x560   : > { %v12467_v12 = vpop.permute.xlu0 %5620  ;;  %v6629_v30 = vadd.f32 %v6613_v37, %v6581_v40  ;;  %v6521_v40 = vmul.f32 %v12439_v61, %v6505_v10  ;;  %v6855_v37 = vmul.f32 %v12103_v18, %v6839_v46 }
 0x561   : > { %14692 = vst [vmem:[#allocation62_spill] sm:$0xff] %v12467_v12  ;;  %6143 = vperm.xlu0 %8069, %v14647_v53   ;;  %v12489_v53 = vld [vmem:[%s13887_s1] ss:$0 sm:$0xff] }
 0x562   : > { %6040 = vperm.xlu1 %8070, %v12249_v49   ;;  %v12484_v57 = vpop.permute.xlu1 %5615  ;;  %v5155_v33 = vmul.f32 %v12489_v53, %v12117_v16  ;;  %v6614_v49 = vmul.f32 %v12477_v58, %v12161_v43  ;;  %v12506_v7 = vsel %vm250_vm0, %v6629_v30, 0.0  ;;  %v6616_v43 = vmul.f32 %v12477_v58, %v12194_v54 }
 0x563   : > { %14693 = vst [vmem:[#allocation95_spill] sm:$0xff] %v12484_v57  ;;  %v5156_v51 = vmul.f32 %v12489_v53, %v12159_v29  ;;  %v5157_v54 = vmul.f32 %v12489_v53, %v12135_v41  ;;  %v5159_v26 = vmul.f32 %v12489_v53, %v12170_v50  ;;  %v7997_v29 = vld [vmem:[%s8339_s10 + $0x349] sm:$0xff]  ;;  %v6380_v50 = vmul.f32 %v12144_v45, %v12510_v14 }
 0x564   : > { %v12493_v32 = vpop.permute.xlu0 %5630  ;;  %v6630_v9 = vadd.f32 %v6614_v49, %v6582_v39  ;;  %v6632_v30 = vadd.f32 %v6616_v43, %v6584_v2  ;;  %v6537_v1 = vadd.f32 %v6521_v40, %v12180_v59  ;;  %v5158_v59 = vmul.f32 %v12489_v53, %v12187_v5  ;;  %v6887_v2 = vld [vmem:[#allocation2 + $0xc2] sm:$0xff] }
 0x565   : > { %14694 = vst [vmem:[#allocation89_spill] sm:$0xff] %v12493_v32  ;;  %6153 = vperm.xlu0 %8069, %v14651_v22   ;;  %v6553_v22 = vld [vmem:[#allocation2 + $0x61] sm:$0xff]  ;;  %v12551_v17 = vadd.f32 %v12516_v28, %v5156_v51  ;;  %v12554_v49 = vadd.f32 %v12516_v28, %v5157_v54  ;;  %v12565_v8 = vadd.f32 %v12516_v28, %v5159_v26  ;;  %v8013_v51 = vld [vmem:[%s8339_s10 + $0x34a] sm:$0xff] }
 0x566   : > { %6148 = vperm.xlu1 %8070, %v14652_v63   ;;  %v12503_v16 = vpop.permute.xlu1 %5625  ;;  %v12519_v63 = vadd.f32 %v12516_v28, %v5155_v33  ;;  %v12539_v41 = vsel %vm250_vm0, %v6630_v9, 0.0  ;;  %v6569_v39 = vmul.f32 %v12458_v47, %v6553_v22  ;;  %v6427_v33 = vmul.f32 %v12154_v25, %v6553_v22  ;;  %v6808_v54 = vld [vmem:[#allocation2 + $0xc8] sm:$0xff] }
 0x567   : > { %14695 = vst [vmem:[#allocation97_spill] sm:$0xff] %v12503_v16  ;;  %v6285_v9 = vmul.f32 %v12103_v18, %v6553_v22  ;;  %v6871_v46 = vadd.f32 %v6855_v37, %v6823_v44  ;;  %v5161_v35 = vmul.f32 %v12489_v53, %v12189_v19  ;;  %v6840_v40 = vld [vmem:[#allocation2 + $0xc9] sm:$0xff]  ;;  %v6396_v22 = vadd.f32 %v6380_v50, %v12240_v55  ;;  %v7998_v50 = vld [vmem:[%s8339_s10 + $0x351] sm:$0xff] }
 0x568   : > { %v12525_v20 = vpop.permute.xlu0 %5640  ;;  %v6443_v43 = vadd.f32 %v6427_v33, %v6395_v23  ;;  %v6333_v5 = vmul.f32 %v12126_v31, %v6601_v11  ;;  %v12578_v44 = vsel %vm250_vm0, %v6632_v30, 0.0  ;;  %v6585_v37 = vadd.f32 %v6569_v39, %v6537_v1  ;;  %v12582_v23 = vld [vmem:[#allocation2 + $0x6a] sm:$0xff]  ;;  %v14700_v33 = vld [vmem:[#allocation21_spill] sm:$0xff] }
 0x569   : > { %14696 = vst [vmem:[#allocation28_spill] sm:$0xff] %v12525_v20  ;;  %6163 = vperm.xlu0 %8069, %v12291_v0   ;;  %v6570_v19 = vmul.f32 %v12458_v47, %v12558_v56  ;;  %v5160_v55 = vmul.f32 %v12489_v53, %v14700_v33  ;;  %v6428_v39 = vmul.f32 %v12154_v25, %v12558_v56  ;;  %v14702_v20 = vld [vmem:[#allocation24_spill] sm:$0xff]  ;;  %v14703_v32 = vld [vmem:[#allocation22_spill] sm:$0xff] }
 0x56a   : > { %6158 = vperm.xlu1 %8070, %v11929_v4   ;;  %v12545_v0 = vpop.permute.xlu1 %5635  ;;  %v6253_v4 = vmul.f32 %v12096_v21, %v6505_v10  ;;  %v6522_v10 = vmul.f32 %v12439_v61, %v12510_v14  ;;  %v6824_v1 = vmul.f32 %v12096_v21, %v6808_v54  ;;  %v12603_v36 = vadd.f32 %v12516_v28, %v5158_v59  ;;  %v12619_v59 = vld [vmem:[#allocation2 + $0x79] sm:$0xff] }
 0x56b   : > { %14697 = vst [vmem:[#allocation100_spill] sm:$0xff] %v12545_v0  ;;  %v12591_v0 = vld [vmem:[#allocation2 + $0x78] sm:$0xff]  ;;  %v6444_v12 = vadd.f32 %v6428_v39, %v6396_v22 }
 0x56c   : > { %v12556_v34 = vpop.permute.xlu0 %5650  ;;  %v6301_v30 = vadd.f32 %v6285_v9, %v6253_v4  ;;  %v6538_v33 = vadd.f32 %v6522_v10, %v14702_v20  ;;  %v12606_v4 = vadd.f32 %v12516_v28, %v5161_v35  ;;  %v6476_v35 = vmul.f32 %v12175_v52, %v12582_v23 }
 0x56d   : > { %14698 = vst [vmem:[#allocation98_spill] sm:$0xff] %v12556_v34  ;;  %6045 = vperm.xlu0 %8069, %v7997_v29   ;;  %v6475_v29 = vmul.f32 %v12175_v52, %v6601_v11  ;;  %v6856_v11 = vmul.f32 %v12103_v18, %v6840_v40  ;;  %v6633_v40 = vadd.f32 %v6617_v24, %v6585_v37 }
 0x56e   : > { %6168 = vperm.xlu1 %8070, %v12303_v6   ;;  %v12575_v26 = vpop.permute.xlu1 %5645  ;;  %v6903_v6 = vmul.f32 %v12126_v31, %v6887_v2  ;;  %v6618_v2 = vmul.f32 %v12477_v58, %v12582_v23  ;;  %v6349_v57 = vadd.f32 %v6333_v5, %v6301_v30  ;;  %v6381_v10 = vmul.f32 %v12144_v45, %v12591_v0 }
 0x56f   : > { %14699 = vst [vmem:[#allocation16_spill] sm:$0xff] %v12575_v26  ;;  %v6888_v26 = vld [vmem:[#allocation2 + $0xca] sm:$0xff]  ;;  %v6491_v16 = vadd.f32 %v6475_v29, %v6443_v43  ;;  %v6523_v43 = vmul.f32 %v12439_v61, %v12591_v0  ;;  %v6872_v5 = vadd.f32 %v6856_v11, %v6824_v1  ;;  %v6492_v37 = vadd.f32 %v6476_v35, %v6444_v12  ;;  %v12661_v35 = vld [vmem:[#allocation2 + $0x81] sm:$0xff] }
 0x570   : > { %v12588_v34 = vpop.permute.xlu0 %5660  ;;  %v6904_v20 = vmul.f32 %v12126_v31, %v6888_v26  ;;  %v12625_v22 = vadd.f32 %v6903_v6, %v6871_v46  ;;  %v6586_v26 = vadd.f32 %v6570_v19, %v6538_v33  ;;  %v6397_v30 = vadd.f32 %v6381_v10, %v6349_v57  ;;  %v14708_v6 = vld [vmem:[#allocation104_spill] sm:$0xff]  ;;  %v14709_v57 = vld [vmem:[#allocation25_spill] sm:$0xff] }
 0x571   : > { %14701 = vst [vmem:[#allocation92_spill] sm:$0xff] %v12588_v34  ;;  %6173 = vperm.xlu0 %8069, %v8013_v51   ;;  %v5163_v34 = vmul.f32 %v12489_v53, %v14703_v32  ;;  %v12614_v32 = vadd.f32 %v12516_v28, %v5160_v55  ;;  %v8014_v51 = vld [vmem:[%s8339_s10 + $0x352] sm:$0xff]  ;;  %v6539_v29 = vadd.f32 %v6523_v43, %v6491_v16  ;;  %v12640_v16 = vld [vmem:[#allocation2 + $0x7a] sm:$0xff] }
 0x572   : > { %6050 = vperm.xlu1 %8070, %v7998_v50   ;;  %v12608_v9 = vpop.permute.xlu1 %5655  ;;  %14705 = vst [vmem:[#allocation73_spill] sm:$0xff] %v12625_v22  ;;  %v12627_v50 = vld [vmem:[#allocation2 + $0x80] sm:$0xff]  ;;  %v14706_v55 = vld [vmem:[#allocation23_spill] sm:$0xff]  ;;  %v6571_v46 = vmul.f32 %v12458_v47, %v12619_v59  ;;  %v6254_v19 = vmul.f32 %v12096_v21, %v12510_v14  ;;  %v5164_v12 = vmul.f32 %v12489_v53, %v14708_v6  ;;  %v12659_v14 = vsel %vm250_vm0, %v6633_v40, 0.0 }
 0x573   : > { %v5162_v39 = vmul.f32 %v12489_v53, %v14706_v55  ;;  %v12632_v24 = vadd.f32 %v12516_v28, %v5163_v34  ;;  %v6286_v34 = vmul.f32 %v12103_v18, %v12558_v56  ;;  %v5167_v1 = vmul.f32 %v12489_v53, %v14709_v57  ;;  %14712 = vst [vmem:[#allocation108_spill] sm:$0xff] %v12659_v14  ;;  %v14714_v40 = vld [vmem:[#allocation75_spill] sm:$0xff] }
 0x574   : > { %v12617_v54 = vpop.permute.xlu0 %5718  ;;  %v6524_v33 = vmul.f32 %v12439_v61, %v12627_v50  ;;  %v6429_v43 = vmul.f32 %v12154_v25, %v12619_v59  ;;  %v6634_v56 = vadd.f32 %v6618_v2, %v6586_v26  ;;  %v6619_v55 = vmul.f32 %v12477_v58, %v12640_v16 }
 0x575   : > { %14704 = vst [vmem:[#allocation81_spill] sm:$0xff] %v12617_v54  ;;  %v14707_v54 = vld [vmem:[#allocation70_spill] sm:$0xff]  ;;  %v12664_v10 = vadd.f32 %v12516_v28, %v5162_v39  ;;  %v5169_v2 = vmul.f32 %v12489_v53, %v14714_v40  ;;  %v6302_v39 = vadd.f32 %v6286_v34, %v6254_v19  ;;  %v12696_v34 = vld [vmem:[#allocation2 + $0x90] sm:$0xff]  ;;  %v6334_v14 = vmul.f32 %v12126_v31, %v12582_v23 }
 0x576   : > { %v5165_v27 = vmul.f32 %v12489_v53, %v14707_v54  ;;  %6178 = vperm.xlu1 %8070, %v8014_v51   ;;  %v12636_v60 = vpop.permute.xlu1 %5665  ;;  %v12656_v51 = vadd.f32 %v6904_v20, %v6872_v5  ;;  %v6587_v54 = vadd.f32 %v6571_v46, %v6539_v29  ;;  %v6540_v6 = vadd.f32 %v6524_v33, %v6492_v37  ;;  %v14713_v20 = vld [vmem:[#allocation74_spill] sm:$0xff] }
 0x577   : > { %v6445_v57 = vadd.f32 %v6429_v43, %v6397_v30  ;;  %v5166_v5 = vmul.f32 %v12489_v53, %v14713_v20  ;;  %v12677_v29 = vld [vmem:[#allocation2 + $0x82] sm:$0xff]  ;;  %v12680_v46 = vadd.f32 %v12516_v28, %v5164_v12  ;;  %v12683_v37 = vadd.f32 %v12516_v28, %v5167_v1  ;;  %v12698_v12 = vld [vmem:[#allocation2 + $0x91] sm:$0xff] }
 0x578   : > { %v12650_v11 = vpop.permute.xlu0 %5728  ;;  %14711 = vst [vmem:[#allocation8_spill] sm:$0xff] %v12656_v51  ;;  %v12669_v22 = vadd.f32 %v12516_v28, %v5165_v27  ;;  %v6572_v27 = vmul.f32 %v12458_v47, %v12661_v35  ;;  %v6477_v33 = vmul.f32 %v12175_v52, %v12640_v16  ;;  %v14718_v43 = vld [vmem:[#allocation26_spill] sm:$0xff]  ;;  %v12694_v40 = vsel %vm250_vm0, %v6634_v56, 0.0  ;;  %v12700_v1 = vld [vmem:[#allocation2 + $0x92] sm:$0xff]  ;;  %v12707_v51 = vld [vmem:[%s13887_s1 + $0x1] ss:$0 sm:$0xff] }
 0x579   : > { %14710 = vst [vmem:[#allocation96_spill] sm:$0xff] %v12650_v11  ;;  %14716 = vst [vmem:[#allocation109_spill] sm:$0xff] %v12683_v37  ;;  %v5168_v20 = vmul.f32 %v12489_v53, %v14718_v43  ;;  %v6635_v19 = vadd.f32 %v6619_v55, %v6587_v54  ;;  %v6620_v54 = vmul.f32 %v12477_v58, %v12677_v29 }
 0x57a   : > { %v12675_v26 = vpop.permute.xlu1 %5723  ;;  %14719 = vst [vmem:[#allocation71_spill] sm:$0xff] %v12694_v40  ;;  %v6588_v56 = vadd.f32 %v6572_v27, %v6540_v6  ;;  %v6493_v55 = vadd.f32 %v6477_v33, %v6445_v57  ;;  %v12714_v40 = vadd.f32 %v12516_v28, %v5166_v5  ;;  %v6350_v11 = vadd.f32 %v6334_v14, %v6302_v39  ;;  %v6510_v39 = vld [vmem:[#allocation2 + $0x98] sm:$0xff] }
 0x57b   : > { %14715 = vst [vmem:[#allocation76_spill] sm:$0xff] %v12675_v26  ;;  %v12717_v26 = vadd.f32 %v12516_v28, %v5169_v2  ;;  %v6382_v15 = vmul.f32 %v12144_v45, %v12627_v50  ;;  %v6525_v57 = vmul.f32 %v12439_v61, %v12696_v34  ;;  %v6573_v5 = vmul.f32 %v12458_v47, %v12698_v12 }
 0x57c   : > { %v12685_v30 = vpop.permute.xlu0 %5738  ;;  %14721 = vst [vmem:[#allocation78_spill] sm:$0xff] %v12714_v40  ;;  %v6621_v2 = vmul.f32 %v12477_v58, %v12700_v1  ;;  %v12734_v27 = vadd.f32 %v12516_v28, %v5168_v20  ;;  %v12737_v14 = vsel %vm250_vm0, %v6635_v19, 0.0  ;;  %v6636_v62 = vadd.f32 %v6620_v54, %v6588_v56  ;;  %v12748_v20 = vld [vmem:[#allocation2 + $0x99] sm:$0xff]  ;;  %v14731_v56 = vld [vmem:[#allocation35_spill] sm:$0xff] }
 0x57d   : > { %14717 = vst [vmem:[#allocation77_spill] sm:$0xff] %v12685_v30  ;;  %v14720_v30 = vld [vmem:[#allocation29_spill] sm:$0xff]  ;;  %14722 = vst [vmem:[#allocation9_spill] sm:$0xff] %v12717_v26  ;;  %v6541_v13 = vadd.f32 %v6525_v57, %v6493_v55  ;;  %v14729_v26 = vld [vmem:[#allocation34_spill] sm:$0xff]  ;;  %v6398_v37 = vadd.f32 %v6382_v15, %v6350_v11  ;;  %v5287_v54 = vmul.f32 %v12707_v51, %v14731_v56 }
 0x57e   : > { %v5283_v43 = vmul.f32 %v12707_v51, %v14720_v30  ;;  %v12719_v23 = vpop.permute.xlu1 %5733  ;;  %v5170_v30 = vmul.f32 %v12489_v53, %v14724_v42  ;;  %14726 = vst [vmem:[#allocation83_spill] sm:$0xff] %v12737_v14  ;;  %v6255_v42 = vmul.f32 %v12096_v21, %v12591_v0  ;;  %v6287_v53 = vmul.f32 %v12103_v18, %v12619_v59  ;;  %v12756_v59 = vld [vmem:[#allocation2 + $0x9a] sm:$0xff]  ;;  %v12774_v57 = vld [vmem:[#allocation2 + $0xa8] sm:$0xff]  ;;  %v6512_v40 = vld [vmem:[#allocation2 + $0xb0] sm:$0xff] }
 0x57f   : > { %14723 = vst [vmem:[#allocation38_spill] sm:$0xff] %v12719_v23  ;;  %v5284_v19 = vmul.f32 %v12707_v51, %v14729_v26  ;;  %v6430_v0 = vmul.f32 %v12154_v25, %v12661_v35  ;;  %v6478_v26 = vmul.f32 %v12175_v52, %v12677_v29  ;;  %v6526_v15 = vmul.f32 %v12439_v61, %v6510_v39 }
 0x580   : > { %v12725_v6 = vpop.permute.xlu0 %5748  ;;  %v12744_v33 = vadd.f32 %v5283_v43, %v12519_v63  ;;  %v6335_v63 = vmul.f32 %v12126_v31, %v12640_v16  ;;  %v12761_v43 = vadd.f32 %v12516_v28, %v5170_v30  ;;  %v12772_v11 = vmul.f32 %v12458_v47, %v12748_v20 }
 0x581   : > { %14725 = vst [vmem:[#allocation10_spill] sm:$0xff] %v12725_v6  ;;  %v14728_v6 = vld [vmem:[#allocation32_spill] sm:$0xff]  ;;  %v6256_v28 = vmul.f32 %v12096_v21, %v12627_v50  ;;  %v6288_v16 = vmul.f32 %v12103_v18, %v12661_v35  ;;  %v12784_v56 = vsel %vm250_vm0, %v6636_v62, 0.0  ;;  %v6446_v50 = vadd.f32 %v6430_v0, %v6398_v37  ;;  %v12814_v0 = vld [vmem:[#allocation2 + $0xaa] sm:$0xff] }
 0x582   : > { %14727 = vst [vmem:[#allocation7_spill] sm:$0xff] %v12744_v33  ;;  %v5285_v23 = vmul.f32 %v12707_v51, %v14728_v6  ;;  %v12752_v14 = vpop.permute.xlu1 %5743  ;;  %v6303_v6 = vadd.f32 %v6287_v53, %v6255_v42  ;;  %14734 = vst [vmem:[#allocation15_spill] sm:$0xff] %v12784_v56  ;;  %v12791_v42 = vadd.f32 %v5284_v19, %v12551_v17  ;;  %v14739_v37 = vld [vmem:[#allocation36_spill] sm:$0xff]  ;;  %v12812_v19 = vld [vmem:[#allocation2 + $0xa9] sm:$0xff] }
 0x583   : > { %14730 = vst [vmem:[#allocation106_spill] sm:$0xff] %v12752_v14  ;;  %v12788_v14 = vmul.f32 %v12477_v58, %v12756_v59  ;;  %v6383_v35 = vmul.f32 %v12144_v45, %v12696_v34  ;;  %v12808_v17 = vmul.f32 %v12439_v61, %v12774_v57 }
 0x584   : > { %v12765_v55 = vpop.permute.xlu0 %5758  ;;  %v12781_v30 = vadd.f32 %v5285_v23, %v12554_v49  ;;  %14735 = vst [vmem:[#allocation99_spill] sm:$0xff] %v12791_v42  ;;  %v6351_v33 = vadd.f32 %v6335_v63, %v6303_v6  ;;  %v12798_v49 = vadd.f32 %v5287_v54, %v12565_v8  ;;  %v6479_v23 = vmul.f32 %v12175_v52, %v12700_v1  ;;  %v14740_v6 = vld [vmem:[#allocation47_spill] sm:$0xff] }
 0x585   : > { %14732 = vst [vmem:[#allocation94_spill] sm:$0xff] %v12765_v55  ;;  %v6589_v55 = vadd.f32 %v6573_v5, %v6541_v13  ;;  %v6431_v13 = vmul.f32 %v12154_v25, %v12698_v12  ;;  %v5286_v5 = vmul.f32 %v12707_v51, %v14739_v37  ;;  %v6304_v8 = vadd.f32 %v6288_v16, %v6256_v28 }
 0x586   : > { %14733 = vst [vmem:[#allocation13_spill] sm:$0xff] %v12781_v30  ;;  %v12793_v53 = vpop.permute.xlu1 %5753  ;;  %14737 = vst [vmem:[#allocation63_spill] sm:$0xff] %v12798_v49  ;;  %v6257_v63 = vmul.f32 %v12096_v21, %v12696_v34  ;;  %v6289_v54 = vmul.f32 %v12103_v18, %v12698_v12  ;;  %v5296_v56 = vmul.f32 %v12707_v51, %v14740_v6  ;;  %v14742_v12 = vld [vmem:[#allocation37_spill] sm:$0xff] }
 0x587   : > { %14736 = vst [vmem:[#allocation102_spill] sm:$0xff] %v12793_v53  ;;  %v6258_v53 = vmul.f32 %v12096_v21, %v6510_v39  ;;  %v6290_v37 = vmul.f32 %v12103_v18, %v12748_v20  ;;  %v6494_v42 = vadd.f32 %v6478_v26, %v6446_v50  ;;  %v6399_v30 = vadd.f32 %v6383_v35, %v6351_v33  ;;  %v12836_v21 = vld [vmem:[%s13887_s1 + $0x2] ss:$0 sm:$0xff] }
 0x588   : > { %v12800_v62 = vpop.permute.xlu0 %5768  ;;  %v6336_v28 = vmul.f32 %v12126_v31, %v12677_v29  ;;  %v6337_v34 = vmul.f32 %v12126_v31, %v12700_v1  ;;  %v5289_v16 = vmul.f32 %v12707_v51, %v14742_v12  ;;  %v12844_v33 = vmul.f32 %v12458_v47, %v12812_v19  ;;  %v14745_v12 = vld [vmem:[#allocation42_spill] sm:$0xff] }
 0x589   : > { %14738 = vst [vmem:[#allocation107_spill] sm:$0xff] %v12800_v62  ;;  %v6637_v62 = vadd.f32 %v6621_v2, %v6589_v55  ;;  %v14743_v2 = vld [vmem:[#allocation87_spill] sm:$0xff]  ;;  %v12848_v29 = vmul.f32 %v12477_v58, %v12814_v0  ;;  %v12851_v1 = vadd.f32 %v5286_v5, %v12603_v36  ;;  %v6384_v50 = vmul.f32 %v12144_v45, %v6510_v39 }
 0x58a   : > { %v12825_v49 = vpop.permute.xlu1 %5763  ;;  %v5424_v18 = vmul.f32 %v12836_v21, %v14743_v2  ;;  %v6352_v26 = vadd.f32 %v6336_v28, %v6304_v8  ;;  %v6305_v35 = vadd.f32 %v6289_v54, %v6257_v63  ;;  %v5312_v6 = vadd.f32 %v5296_v56, %v12734_v27  ;;  %v14747_v54 = vld [vmem:[#allocation65_spill] sm:$0xff] }
 0x58b   : > { %14741 = vst [vmem:[#allocation67_spill] sm:$0xff] %v12825_v49  ;;  %v5298_v2 = vmul.f32 %v12707_v51, %v14745_v12  ;;  %v6306_v36 = vadd.f32 %v6290_v37, %v6258_v53  ;;  %v12867_v39 = vsel %vm250_vm0, %v6637_v62, 0.0  ;;  %v6542_v8 = vadd.f32 %v6526_v15, %v6494_v42  ;;  %v12874_v12 = vld [vmem:[%s13887_s1 + $0x4] ss:$0 sm:$0xff] }
 0x58c   : > { %v12840_v55 = vpop.permute.xlu0 %5778  ;;  %14746 = vst [vmem:[#allocation84_spill] sm:$0xff] %v12867_v39  ;;  %v6447_v27 = vadd.f32 %v6431_v13, %v6399_v30  ;;  %v6353_v56 = vadd.f32 %v6337_v34, %v6305_v35  ;;  %v5440_v63 = vadd.f32 %v5424_v18, %v5312_v6  ;;  %v5426_v28 = vmul.f32 %v12836_v21, %v14747_v54  ;;  %v14748_v30 = vld [vmem:[#allocation39_spill] sm:$0xff] }
 0x58d   : > { %14744 = vst [vmem:[#allocation101_spill] sm:$0xff] %v12840_v55  ;;  %v12860_v55 = vld [vmem:[%s13887_s1 + $0x3] ss:$0 sm:$0xff]  ;;  %v6338_v15 = vmul.f32 %v12126_v31, %v12756_v59  ;;  %v5288_v42 = vmul.f32 %v12707_v51, %v14748_v30  ;;  %v6400_v62 = vadd.f32 %v6384_v50, %v6352_v26  ;;  %v6385_v13 = vmul.f32 %v12144_v45, %v12774_v57 }
 0x58e   : > { %v5553_v49 = vmul.f32 %v12860_v55, %v12416_v48  ;;  %v12864_v5 = vpop.permute.xlu1 %5773  ;;  %v5681_v48 = vmul.f32 %v12874_v12, %v12608_v9  ;;  %v6386_v37 = vmul.f32 %v12144_v45, %v6512_v40  ;;  %v5314_v34 = vadd.f32 %v5298_v2, %v12761_v43  ;;  %v12899_v43 = vld [vmem:[%s13887_s1 + $0x5] ss:$0 sm:$0xff]  ;;  %v6560_v2 = vld [vmem:[#allocation2 + $0xb1] sm:$0xff] }
 0x58f   : > { %v6354_v9 = vadd.f32 %v6338_v15, %v6306_v36  ;;  %v6590_v6 = vadd.f32 %v12772_v11, %v6542_v8  ;;  %v6495_v31 = vadd.f32 %v6479_v23, %v6447_v27  ;;  %v6432_v54 = vmul.f32 %v12154_v25, %v12748_v20  ;;  %v14749_v20 = vld [vmem:[#allocation40_spill] sm:$0xff] }
 0x590   : > { %6646 = vadd.xlane.f32.xlu0 %v12506_v7  ;;  %v12879_v53 = vpop.permute.xlu0 %5788  ;;  %v5569_v18 = vadd.f32 %v5553_v49, %v5440_v63  ;;  %v5555_v7 = vmul.f32 %v12860_v55, %v12428_v3  ;;  %v6401_v26 = vadd.f32 %v6385_v13, %v6353_v56  ;;  %v5442_v50 = vadd.f32 %v5426_v28, %v5314_v34 }
 0x591   : > { %v5683_v45 = vmul.f32 %v12874_v12, %v12636_v60  ;;  %v12906_v49 = vadd.f32 %v5289_v16, %v12606_v4  ;;  %v5291_v23 = vmul.f32 %v12707_v51, %v14749_v20  ;;  %v6480_v60 = vmul.f32 %v12175_v52, %v12756_v59 }
 0x592   : > { %v5784_v35 = vpop.permute.xlu1 %5783  ;;  %v5697_v30 = vadd.f32 %v5681_v48, %v5569_v18  ;;  %v6433_v36 = vmul.f32 %v12154_v25, %v12812_v19  ;;  %v5571_v8 = vadd.f32 %v5555_v7, %v5442_v50  ;;  %v6448_v56 = vadd.f32 %v6432_v54, %v6400_v62  ;;  %v14753_v18 = vld [vmem:[#allocation41_spill] sm:$0xff] }
 0x593   : > { %v5809_v3 = vmul.f32 %v12899_v43, %v5784_v35  ;;  %v12917_v63 = vadd.f32 %v5288_v42, %v12614_v32  ;;  %v6638_v16 = vadd.f32 %v12788_v14, %v6590_v6  ;;  %v6543_v28 = vadd.f32 %v12808_v17, %v6495_v31  ;;  %v12929_v32 = vld [vmem:[%s13889_s3 + $0x4] ss:$0 sm:$0xff]  ;;  %v6608_v14 = vld [vmem:[#allocation2 + $0xb2] sm:$0xff]  ;;  %v12935_v17 = vld [vmem:[%s13889_s3] ss:$0 sm:$0xff] }
 0x594   : > { %6652 = vadd.xlane.f32.xlu0 %v12536_v38  ;;  %v12903_v11 = vpop.permute.xlu0 %5847  ;;  %v6402_v38 = vadd.f32 %v6386_v37, %v6354_v9  ;;  %v6528_v48 = vmul.f32 %v12439_v61, %v6512_v40  ;;  %v5699_v52 = vadd.f32 %v5683_v45, %v5571_v8  ;;  %v6449_v15 = vadd.f32 %v6433_v36, %v6401_v26  ;;  %v6513_v26 = vld [vmem:[#allocation2 + $0xc0] sm:$0xff]  ;;  %v6514_v8 = vld [vmem:[#allocation2 + $0xc8] sm:$0xff] }
 0x595   : > { %v12914_v27 = vadd.f32 %v5809_v3, %v5697_v30  ;;  %14750 = vst [vmem:[#allocation19_spill] sm:$0xff] %v12929_v32  ;;  %v6434_v42 = vmul.f32 %v12929_v32, %v6560_v2  ;;  %14751 = vst [vmem:[#allocation80_spill] sm:$0xff] %v12935_v17  ;;  %v6259_v62 = vmul.f32 %v12935_v17, %v12774_v57  ;;  %v12967_v50 = vld [vmem:[%s13889_s3 + $0x2] ss:$0 sm:$0xff]  ;;  %v14756_v30 = vld [vmem:[#allocation44_spill] sm:$0xff] }
 0x596   : > { %v5794_v4 = vpop.permute.xlu1 %5793  ;;  %v6260_v37 = vmul.f32 %v12935_v17, %v6512_v40  ;;  %v5290_v7 = vmul.f32 %v12707_v51, %v14753_v18  ;;  %v6496_v35 = vadd.f32 %v6480_v60, %v6448_v56  ;;  %v6591_v31 = vadd.f32 %v12844_v33, %v6543_v28  ;;  %v12960_v40 = vld [vmem:[%s13889_s3 + $0x5] ss:$0 sm:$0xff]  ;;  %14755 = vst [vmem:[#allocation24_spill] sm:$0xff] %v12967_v50  ;;  %v14758_v28 = vld [vmem:[#allocation43_spill] sm:$0xff] }
 0x597   : > { %v5811_v59 = vmul.f32 %v12899_v43, %v5794_v4  ;;  %v6450_v6 = vadd.f32 %v6434_v42, %v6402_v38  ;;  %v6576_v54 = vmul.f32 %v12458_v47, %v6560_v2  ;;  %14754 = vst [vmem:[#allocation21_spill] sm:$0xff] %v12960_v40  ;;  %v12972_v33 = vadd.f32 %v5291_v23, %v12632_v24 }
 0x598   : > { %6655 = vadd.xlane.f32.xlu0 %v12578_v44  ;;  %v12924_v25 = vpop.permute.xlu0 %5857  ;;  %v12942_v44 = vld [vmem:[%s13889_s3 + $0x1] ss:$0 sm:$0xff]  ;;  %v5293_v45 = vmul.f32 %v12707_v51, %v14756_v30  ;;  %v6624_v20 = vmul.f32 %v12477_v58, %v6608_v14  ;;  %v6482_v60 = vmul.f32 %v12960_v40, %v6608_v14  ;;  %v6544_v24 = vadd.f32 %v6528_v48, %v6496_v35 }
 0x599   : > { %14752 = vst [vmem:[#allocation20_spill] sm:$0xff] %v12942_v44  ;;  %v6291_v13 = vmul.f32 %v12942_v44, %v12812_v19  ;;  %v6292_v34 = vmul.f32 %v12942_v44, %v6560_v2  ;;  %v12950_v9 = vadd.f32 %v5811_v59, %v5699_v52  ;;  %v6481_v19 = vmul.f32 %v12960_v40, %v12814_v0  ;;  %v14813_v44 = vld [vmem:[#allocation28_spill] sm:$0xff] }
 0x59a   : > { %v12952_v57 = vpop.permute.xlu1 %5852  ;;  %6649 = vadd.xlane.f32.xlu1 %v12539_v41  ;;  %v6339_v41 = vmul.f32 %v12967_v50, %v12814_v0  ;;  %v12981_v2 = vsel %vm250_vm0, %v6638_v16, 0.0  ;;  %v12984_v0 = vadd.f32 %v5290_v7, %v12664_v10  ;;  %v6529_v23 = vmul.f32 %v12439_v61, %v6513_v26  ;;  %v6561_v16 = vld [vmem:[#allocation2 + $0xc1] sm:$0xff] }
 0x59b   : > { %14757 = vst [vmem:[#allocation22_spill] sm:$0xff] %v12981_v2  ;;  %v6497_v36 = vadd.f32 %v6481_v19, %v6449_v15  ;;  %v6307_v56 = vadd.f32 %v6291_v13, %v6259_v62  ;;  %v6308_v38 = vadd.f32 %v6292_v34, %v6260_v37  ;;  %v6498_v4 = vadd.f32 %v6482_v60, %v6450_v6  ;;  %v14759_v10 = vld [vmem:[#allocation45_spill] sm:$0xff]  ;;  %v14760_v13 = vld [vmem:[#allocation46_spill] sm:$0xff] }
 0x59c   : > { %v12976_v3 = vpop.permute.xlu0 %5867  ;;  %v5292_v52 = vmul.f32 %v12707_v51, %v14758_v28  ;;  %v6639_v42 = vadd.f32 %v12848_v29, %v6591_v31  ;;  %v6340_v15 = vmul.f32 %v12967_v50, %v6608_v14  ;;  %v12994_v62 = vadd.f32 %v5293_v45, %v12669_v22  ;;  %v6609_v7 = vld [vmem:[#allocation2 + $0xc2] sm:$0xff] }
 0x59d   : > { %v6355_v18 = vadd.f32 %v6339_v41, %v6307_v56  ;;  %v5294_v48 = vmul.f32 %v12707_v51, %v14759_v10  ;;  %v5295_v37 = vmul.f32 %v12707_v51, %v14760_v13  ;;  %v6530_v35 = vmul.f32 %v12439_v61, %v6514_v8  ;;  %v6562_v29 = vld [vmem:[#allocation2 + $0xc9] sm:$0xff]  ;;  %v13006_v14 = vld [vmem:[%s13889_s3 + $0x3] ss:$0 sm:$0xff]  ;;  %v14762_v41 = vld [vmem:[#allocation48_spill] sm:$0xff] }
 0x59e   : > { %v12989_v59 = vpop.permute.xlu1 %5862  ;;  %v6545_v6 = vadd.f32 %v6529_v23, %v6497_v36  ;;  %14761 = vst [vmem:[#allocation23_spill] sm:$0xff] %v13006_v14  ;;  %v6387_v22 = vmul.f32 %v13006_v14, %v6513_v26  ;;  %v6356_v31 = vadd.f32 %v6340_v15, %v6308_v38  ;;  %v6388_v19 = vmul.f32 %v13006_v14, %v6514_v8  ;;  %v14764_v38 = vld [vmem:[#allocation78_spill] sm:$0xff]  ;;  %v14765_v8 = vld [vmem:[#allocation109_spill] sm:$0xff]  ;;  %v14766_v13 = vld [vmem:[#allocation59_spill] sm:$0xff] }
 0x59f   : > { %v5297_v30 = vmul.f32 %v12707_v51, %v14762_v41  ;;  %v6592_v45 = vadd.f32 %v6576_v54, %v6544_v24  ;;  %v6577_v60 = vmul.f32 %v12458_v47, %v6561_v16  ;;  %v6546_v56 = vadd.f32 %v6530_v35, %v6498_v4  ;;  %v14815_v14 = vld [vmem:[#allocation98_spill] sm:$0xff] }
 0x5a0   : > { %v13000_v34 = vpop.permute.xlu0 %5877  ;;  %v5308_v61 = vadd.f32 %v5292_v52, %v12680_v46  ;;  %v13017_v23 = vsel %vm250_vm0, %v6639_v42, 0.0  ;;  %v6625_v28 = vmul.f32 %v12477_v58, %v6609_v7  ;;  %v6403_v26 = vadd.f32 %v6387_v22, %v6355_v18  ;;  %v14767_v46 = vld [vmem:[#allocation50_spill] sm:$0xff]  ;;  %v14768_v18 = vld [vmem:[#allocation9_spill] sm:$0xff] }
 0x5a1   : > { %14763 = vst [vmem:[#allocation70_spill] sm:$0xff] %v13017_v23  ;;  %v5310_v15 = vadd.f32 %v5294_v48, %v14764_v38  ;;  %v5311_v10 = vadd.f32 %v5295_v37, %v14765_v8  ;;  %v5411_v51 = vmul.f32 %v12836_v21, %v14766_v13  ;;  %v6578_v24 = vmul.f32 %v12458_v47, %v6562_v29  ;;  %v6610_v42 = vld [vmem:[#allocation2 + $0xca] sm:$0xff]  ;;  %v14769_v48 = vld [vmem:[#allocation49_spill] sm:$0xff] }
 0x5a2   : > { %v13014_v36 = vpop.permute.xlu1 %5872  ;;  %v5413_v4 = vmul.f32 %v12836_v21, %v14767_v46  ;;  %v6593_v52 = vadd.f32 %v6577_v60, %v6545_v6  ;;  %v6435_v35 = vmul.f32 %v12929_v32, %v6561_v16  ;;  %v6404_v41 = vadd.f32 %v6388_v19, %v6356_v31  ;;  %v14771_v13 = vld [vmem:[#allocation85_spill] sm:$0xff]  ;;  %v14772_v47 = vld [vmem:[#allocation51_spill] sm:$0xff] }
 0x5a3   : > { %v5313_v22 = vadd.f32 %v5297_v30, %v14768_v18  ;;  %v5412_v37 = vmul.f32 %v12836_v21, %v14769_v48  ;;  %v13033_v38 = vadd.f32 %v6624_v20, %v6592_v45  ;;  %v6594_v8 = vadd.f32 %v6578_v24, %v6546_v56  ;;  %v14773_v31 = vld [vmem:[#allocation7_spill] sm:$0xff]  ;;  %v14774_v30 = vld [vmem:[#allocation52_spill] sm:$0xff]  ;;  %v14775_v56 = vld [vmem:[#allocation13_spill] sm:$0xff] }
 0x5a4   : > { %v13024_v54 = vpop.permute.xlu0 %5887  ;;  %v5414_v23 = vmul.f32 %v12836_v21, %v14771_v13  ;;  %v5415_v2 = vmul.f32 %v12836_v21, %v14772_v47  ;;  %v6451_v6 = vadd.f32 %v6435_v35, %v6403_v26  ;;  %v6436_v16 = vmul.f32 %v12929_v32, %v6562_v29  ;;  %v14777_v35 = vld [vmem:[#allocation99_spill] sm:$0xff]  ;;  %v14778_v47 = vld [vmem:[#allocation60_spill] sm:$0xff] }
 0x5a5   : > { %14770 = vst [vmem:[#allocation104_spill] sm:$0xff] %v13033_v38  ;;  %v5427_v19 = vadd.f32 %v5411_v51, %v14773_v31  ;;  %v5417_v60 = vmul.f32 %v12836_v21, %v14774_v30  ;;  %v6626_v20 = vmul.f32 %v12477_v58, %v6610_v42  ;;  %v6483_v45 = vmul.f32 %v12960_v40, %v6609_v7  ;;  %v14779_v31 = vld [vmem:[#allocation66_spill] sm:$0xff]  ;;  %v14781_v7 = vld [vmem:[#allocation63_spill] sm:$0xff]  ;;  %v14814_v32 = vld [vmem:[#allocation100_spill] sm:$0xff] }
 0x5a6   : > { %v13039_v46 = vpop.permute.xlu1 %5882  ;;  %v5429_v24 = vadd.f32 %v5413_v4, %v14775_v56  ;;  %v13050_v48 = vadd.f32 %v6625_v28, %v6593_v52  ;;  %v6452_v13 = vadd.f32 %v6436_v16, %v6404_v41  ;;  %v6484_v26 = vmul.f32 %v12960_v40, %v6610_v42  ;;  %v14782_v4 = vld [vmem:[#allocation54_spill] sm:$0xff]  ;;  %v14785_v56 = vld [vmem:[#allocation53_spill] sm:$0xff] }
 0x5a7   : > { %v5428_v29 = vadd.f32 %v5412_v37, %v14777_v35  ;;  %v5416_v51 = vmul.f32 %v12836_v21, %v14778_v47  ;;  %v5419_v30 = vmul.f32 %v12836_v21, %v14779_v31  ;;  %v13058_v38 = vadd.f32 %v6626_v20, %v6594_v8  ;;  %v14784_v37 = vld [vmem:[#allocation55_spill] sm:$0xff]  ;;  %v14788_v47 = vld [vmem:[#allocation86_spill] sm:$0xff] }
 0x5a8   : > { %v13045_v18 = vpop.permute.xlu0 %5897  ;;  %14776 = vst [vmem:[#allocation25_spill] sm:$0xff] %v13050_v48  ;;  %v5430_v58 = vadd.f32 %v5414_v23, %v12851_v1  ;;  %v5431_v39 = vadd.f32 %v5415_v2, %v14781_v7  ;;  %v5418_v28 = vmul.f32 %v12836_v21, %v14782_v4  ;;  %v13066_v42 = vadd.f32 %v6483_v45, %v6451_v6  ;;  %v14786_v20 = vld [vmem:[#allocation79_spill] sm:$0xff]  ;;  %v14787_v2 = vld [vmem:[#allocation58_spill] sm:$0xff] }
 0x5a9   : > { %14780 = vst [vmem:[#allocation74_spill] sm:$0xff] %v13058_v38  ;;  %v5433_v41 = vadd.f32 %v5417_v60, %v12906_v49  ;;  %v5420_v16 = vmul.f32 %v12836_v21, %v14784_v37  ;;  %v5421_v8 = vmul.f32 %v12836_v21, %v14785_v56  ;;  %v5423_v1 = vmul.f32 %v12836_v21, %v14786_v20  ;;  %v14789_v45 = vld [vmem:[#allocation30_spill] sm:$0xff]  ;;  %v14792_v56 = vld [vmem:[#allocation11_spill] sm:$0xff]  ;;  %v14793_v38 = vld [vmem:[#allocation61_spill] sm:$0xff] }
 0x5aa   : > { %v13064_v52 = vpop.permute.xlu1 %5892  ;;  %14783 = vst [vmem:[#allocation75_spill] sm:$0xff] %v13066_v42  ;;  %v5422_v35 = vmul.f32 %v12836_v21, %v14787_v2  ;;  %v5425_v6 = vmul.f32 %v12836_v21, %v14788_v47  ;;  %v5540_v49 = vmul.f32 %v12860_v55, %v14789_v45  ;;  %v13083_v60 = vadd.f32 %v6484_v26, %v6452_v13  ;;  %v14791_v4 = vld [vmem:[#allocation82_spill] sm:$0xff]  ;;  %v14794_v47 = vld [vmem:[#allocation57_spill] sm:$0xff]  ;;  %v14795_v13 = vld [vmem:[#allocation56_spill] sm:$0xff] }
 0x5ab   : > { %v5432_v31 = vadd.f32 %v5416_v51, %v12917_v63  ;;  %v5435_v7 = vadd.f32 %v5419_v30, %v12972_v33  ;;  %v5541_v37 = vmul.f32 %v12860_v55, %v14791_v4  ;;  %v5542_v20 = vmul.f32 %v12860_v55, %v14792_v56  ;;  %v14796_v4 = vld [vmem:[#allocation103_spill] sm:$0xff]  ;;  %v14797_v42 = vld [vmem:[#allocation69_spill] sm:$0xff] }
 0x5ac   : > { %v13075_v23 = vpop.permute.xlu0 %5907  ;;  %14790 = vst [vmem:[#allocation26_spill] sm:$0xff] %v13083_v60  ;;  %v5434_v2 = vadd.f32 %v5418_v28, %v12984_v0  ;;  %v5543_v21 = vmul.f32 %v12860_v55, %v14793_v38  ;;  %v5544_v45 = vmul.f32 %v12860_v55, %v14794_v47  ;;  %v5546_v26 = vmul.f32 %v12860_v55, %v14795_v13  ;;  %v14798_v13 = vld [vmem:[#allocation90_spill] sm:$0xff] }
 0x5ad   : > { %v5436_v33 = vadd.f32 %v5420_v16, %v5308_v61  ;;  %v5437_v51 = vadd.f32 %v5421_v8, %v12994_v62  ;;  %v5439_v30 = vadd.f32 %v5423_v1, %v5311_v10  ;;  %v5545_v56 = vmul.f32 %v12860_v55, %v14796_v4  ;;  %v14799_v61 = vld [vmem:[#allocation33_spill] sm:$0xff]  ;;  %v14800_v1 = vld [vmem:[#allocation27_spill] sm:$0xff] }
 0x5ae   : > { %v13098_v63 = vpop.permute.xlu1 %5902  ;;  %v5438_v0 = vadd.f32 %v5422_v35, %v5310_v15  ;;  %v5441_v28 = vadd.f32 %v5425_v6, %v5313_v22  ;;  %v5556_v38 = vadd.f32 %v5540_v49, %v5427_v19  ;;  %v5548_v47 = vmul.f32 %v12860_v55, %v14797_v42  ;;  %v14801_v19 = vld [vmem:[#allocation72_spill] sm:$0xff]  ;;  %v14803_v35 = vld [vmem:[#allocation91_spill] sm:$0xff] }
 0x5af   : > { %v5557_v48 = vadd.f32 %v5541_v37, %v5428_v29  ;;  %v5558_v17 = vadd.f32 %v5542_v20, %v5429_v24  ;;  %v5547_v50 = vmul.f32 %v12860_v55, %v14798_v13  ;;  %v5550_v62 = vmul.f32 %v12860_v55, %v14799_v61  ;;  %v14802_v29 = vld [vmem:[#allocation64_spill] sm:$0xff]  ;;  %v14805_v37 = vld [vmem:[#allocation93_spill] sm:$0xff] }
 0x5b0   : > { %v13103_v60 = vpop.permute.xlu0 %5917  ;;  %v5559_v10 = vadd.f32 %v5543_v21, %v5430_v58  ;;  %v5560_v16 = vadd.f32 %v5544_v45, %v5431_v39  ;;  %v5562_v8 = vadd.f32 %v5546_v26, %v5433_v41  ;;  %v5549_v4 = vmul.f32 %v12860_v55, %v14800_v1  ;;  %v14804_v39 = vld [vmem:[#allocation12_spill] sm:$0xff] }
 0x5b1   : > { %v5561_v22 = vadd.f32 %v5545_v56, %v5432_v31  ;;  %v5551_v42 = vmul.f32 %v12860_v55, %v14801_v19  ;;  %v5552_v24 = vmul.f32 %v12860_v55, %v14802_v29  ;;  %v5554_v6 = vmul.f32 %v12860_v55, %v14803_v35  ;;  %v14806_v21 = vld [vmem:[#allocation68_spill] sm:$0xff]  ;;  %v14807_v56 = vld [vmem:[#allocation14_spill] sm:$0xff]  ;;  %v14809_v19 = vld [vmem:[#allocation95_spill] sm:$0xff] }
 0x5b2   : > { %v13113_v15 = vpop.permute.xlu1 %5912  ;;  %v5564_v58 = vadd.f32 %v5548_v47, %v5435_v7  ;;  %v5668_v41 = vmul.f32 %v12874_v12, %v14804_v39  ;;  %v5669_v20 = vmul.f32 %v12874_v12, %v14805_v37  ;;  %v5670_v31 = vmul.f32 %v12874_v12, %v14806_v21  ;;  %v14808_v61 = vld [vmem:[#allocation88_spill] sm:$0xff]  ;;  %v14810_v47 = vld [vmem:[#allocation62_spill] sm:$0xff]  ;;  %v14811_v35 = vld [vmem:[#allocation89_spill] sm:$0xff] }
 0x5b3   : > { %v5563_v45 = vadd.f32 %v5547_v50, %v5434_v2  ;;  %v5566_v26 = vadd.f32 %v5550_v62, %v5437_v51  ;;  %v5671_v13 = vmul.f32 %v12874_v12, %v14807_v56  ;;  %v5672_v55 = vmul.f32 %v12874_v12, %v14808_v61  ;;  %v14812_v62 = vld [vmem:[#allocation97_spill] sm:$0xff] }
 0x5b4   : > { %v13121_v49 = vpop.permute.xlu0 %5975  ;;  %v5565_v1 = vadd.f32 %v5549_v4, %v5436_v33  ;;  %v5673_v7 = vmul.f32 %v12874_v12, %v14809_v19  ;;  %v5674_v29 = vmul.f32 %v12874_v12, %v14810_v47  ;;  %v5676_v39 = vmul.f32 %v12874_v12, %v14811_v35 }
 0x5b5   : > { %v5567_v50 = vadd.f32 %v5551_v42, %v5438_v0  ;;  %v5568_v2 = vadd.f32 %v5552_v24, %v5439_v30  ;;  %v5570_v51 = vadd.f32 %v5554_v6, %v5441_v28  ;;  %v5675_v21 = vmul.f32 %v12874_v12, %v14812_v62  ;;  %v14816_v24 = vld [vmem:[#allocation16_spill] sm:$0xff] }
 0x5b6   : > { %v13139_v37 = vpop.permute.xlu1 %5922  ;;  %v5684_v61 = vadd.f32 %v5668_v41, %v5556_v38  ;;  %v5685_v33 = vadd.f32 %v5669_v20, %v5557_v48  ;;  %v5686_v4 = vadd.f32 %v5670_v31, %v5558_v17  ;;  %v5678_v19 = vmul.f32 %v12874_v12, %v14813_v44  ;;  %v14817_v17 = vld [vmem:[#allocation92_spill] sm:$0xff]  ;;  %v14818_v44 = vld [vmem:[#allocation81_spill] sm:$0xff] }
 0x5b7   : > { %v5687_v40 = vadd.f32 %v5671_v13, %v5559_v10  ;;  %v5688_v47 = vadd.f32 %v5672_v55, %v5560_v16  ;;  %v5677_v35 = vmul.f32 %v12874_v12, %v14814_v32  ;;  %v5680_v0 = vmul.f32 %v12874_v12, %v14815_v14  ;;  %v14819_v16 = vld [vmem:[#allocation96_spill] sm:$0xff]  ;;  %v14822_v13 = vld [vmem:[#allocation77_spill] sm:$0xff] }
 0x5b8   : > { %v5986_v56 = vpop.permute.xlu0 %5985  ;;  %v5689_v30 = vadd.f32 %v5673_v7, %v5561_v22  ;;  %v5690_v28 = vadd.f32 %v5674_v29, %v5562_v8  ;;  %v5692_v42 = vadd.f32 %v5676_v39, %v5564_v58  ;;  %v5679_v6 = vmul.f32 %v12874_v12, %v14816_v24  ;;  %v14820_v22 = vld [vmem:[#allocation76_spill] sm:$0xff]  ;;  %v14821_v58 = vld [vmem:[#allocation38_spill] sm:$0xff] }
 0x5b9   : > { %v5691_v48 = vadd.f32 %v5675_v21, %v5563_v45  ;;  %v5682_v41 = vmul.f32 %v12874_v12, %v14817_v17  ;;  %v5796_v10 = vmul.f32 %v12899_v43, %v14818_v44  ;;  %v5798_v32 = vmul.f32 %v12899_v43, %v14819_v16  ;;  %v14823_v7 = vld [vmem:[#allocation106_spill] sm:$0xff]  ;;  %v13176_v44 = vld [vmem:[%s13887_s1 + $0x6] ss:$0 sm:$0xff] }
 0x5ba   : > { %v5981_v38 = vpop.permute.xlu1 %5980  ;;  %v5694_v14 = vadd.f32 %v5678_v19, %v5566_v26  ;;  %v5797_v8 = vmul.f32 %v12899_v43, %v14820_v22  ;;  %v5799_v31 = vmul.f32 %v12899_v43, %v14821_v58  ;;  %v5800_v45 = vmul.f32 %v12899_v43, %v14822_v13  ;;  %v14824_v39 = vld [vmem:[#allocation10_spill] sm:$0xff]  ;;  %v14827_v22 = vld [vmem:[#allocation107_spill] sm:$0xff] }
 0x5bb   : > { %v5693_v55 = vadd.f32 %v5677_v35, %v5565_v1  ;;  %v5696_v12 = vadd.f32 %v5680_v0, %v5568_v2  ;;  %v5801_v29 = vmul.f32 %v12899_v43, %v14823_v7  ;;  %v5802_v62 = vmul.f32 %v12899_v43, %v14824_v39  ;;  %v14825_v24 = vld [vmem:[#allocation102_spill] sm:$0xff]  ;;  %v13187_v39 = vld [vmem:[%s13887_s1 + $0x7] ss:$0 sm:$0xff] }
 0x5bc   : > { %v13157_v20 = vpop.permute.xlu0 %5995  ;;  %v5695_v21 = vadd.f32 %v5679_v6, %v5567_v50  ;;  %v5803_v26 = vmul.f32 %v12899_v43, %v14825_v24  ;;  %v14826_v19 = vld [vmem:[#allocation94_spill] sm:$0xff]  ;;  %v5926_v1 = vmul.f32 %v13176_v44, %v12952_v57  ;;  %v5698_v35 = vadd.f32 %v5682_v41, %v5570_v51  ;;  %v14828_v51 = vld [vmem:[#allocation67_spill] sm:$0xff] }
 0x5bd   : > { %v5804_v17 = vmul.f32 %v12899_v43, %v14826_v19  ;;  %v5812_v0 = vadd.f32 %v5796_v10, %v5684_v61  ;;  %v5814_v16 = vadd.f32 %v5798_v32, %v5686_v4  ;;  %v5806_v50 = vmul.f32 %v12899_v43, %v14827_v22 }
 0x5be   : > { %v5991_v2 = vpop.permute.xlu1 %5990  ;;  %v5813_v58 = vadd.f32 %v5797_v8, %v5685_v33  ;;  %v5815_v13 = vadd.f32 %v5799_v31, %v5687_v40  ;;  %v5816_v7 = vadd.f32 %v5800_v45, %v5688_v47  ;;  %v6054_v24 = vmul.f32 %v13187_v39, %v5981_v38  ;;  %v14829_v38 = vld [vmem:[#allocation101_spill] sm:$0xff] }
 0x5bf   : > { %v5817_v57 = vadd.f32 %v5801_v29, %v5689_v30  ;;  %v5818_v19 = vadd.f32 %v5802_v62, %v5690_v28  ;;  %v5805_v61 = vmul.f32 %v12899_v43, %v14828_v51  ;;  %v5925_v4 = vmul.f32 %v13176_v44, %v12903_v11 }
 0x5c0   : > { %v13182_v6 = vpop.permute.xlu0 %6005  ;;  %v5819_v41 = vadd.f32 %v5803_v26, %v5691_v48  ;;  %v5820_v10 = vadd.f32 %v5804_v17, %v5692_v42  ;;  %v5942_v33 = vadd.f32 %v5926_v1, %v5813_v58  ;;  %v5927_v40 = vmul.f32 %v13176_v44, %v12924_v25  ;;  %v13208_v25 = vld [vmem:[%s13887_s1 + $0x8] ss:$0 sm:$0xff] }
 0x5c1   : > { %v5822_v32 = vadd.f32 %v5806_v50, %v5694_v14  ;;  %v5807_v8 = vmul.f32 %v12899_v43, %v12864_v5  ;;  %v5808_v30 = vmul.f32 %v12899_v43, %v14829_v38  ;;  %v6053_v28 = vmul.f32 %v13187_v39, %v13121_v49 }
 0x5c2   : > { %v6001_v47 = vpop.permute.xlu1 %6000  ;;  %v5810_v11 = vmul.f32 %v12899_v43, %v12879_v53  ;;  %v6070_v42 = vadd.f32 %v6054_v24, %v5942_v33  ;;  %v6055_v48 = vmul.f32 %v13187_v39, %v5986_v56  ;;  %v5821_v14 = vadd.f32 %v5805_v61, %v5693_v55  ;;  %v7093_v24 = vld [vmem:[#allocation2 + $0x198] sm:$0xff] }
 0x5c3   : > { %v5941_v45 = vadd.f32 %v5925_v4, %v5812_v0  ;;  %v5928_v29 = vmul.f32 %v13176_v44, %v12989_v59  ;;  %v5929_v49 = vmul.f32 %v13176_v44, %v12976_v3  ;;  %v5943_v62 = vadd.f32 %v5927_v40, %v5814_v16 }
 0x5c4   : > { %v6109_v31 = vpop.permute.xlu0 %6108  ;;  %v5930_v53 = vmul.f32 %v13176_v44, %v13014_v36  ;;  %v5931_v43 = vmul.f32 %v13176_v44, %v13000_v34  ;;  %v5824_v17 = vadd.f32 %v5808_v30, %v5696_v12  ;;  %v5933_v55 = vmul.f32 %v13176_v44, %v13024_v54 }
 0x5c5   : > { %v6182_v5 = vmul.f32 %v13208_v25, %v6109_v31  ;;  %v6069_v1 = vadd.f32 %v6053_v28, %v5941_v45  ;;  %v5823_v22 = vadd.f32 %v5807_v8, %v5695_v21  ;;  %v5826_v50 = vadd.f32 %v5810_v11, %v5698_v35 }
 0x5c6   : > { %v6104_v56 = vpop.permute.xlu1 %6103  ;;  %v6071_v3 = vadd.f32 %v6055_v48, %v5943_v62  ;;  %v5944_v16 = vadd.f32 %v5928_v29, %v5815_v13  ;;  %v5945_v58 = vadd.f32 %v5929_v49, %v5816_v7  ;;  %v5932_v34 = vmul.f32 %v13176_v44, %v13039_v46 }
 0x5c7   : > { %v6198_v26 = vadd.f32 %v6182_v5, %v6070_v42  ;;  %v6181_v0 = vmul.f32 %v13208_v25, %v6104_v56  ;;  %v5946_v51 = vadd.f32 %v5930_v53, %v5817_v57  ;;  %v5947_v54 = vadd.f32 %v5931_v43, %v5818_v19 }
 0x5c8   : > { %v6114_v59 = vpop.permute.xlu0 %6113  ;;  %v5935_v61 = vmul.f32 %v13176_v44, %v13045_v18  ;;  %v5949_v35 = vadd.f32 %v5933_v55, %v5820_v10  ;;  %v5934_v33 = vmul.f32 %v13176_v44, %v13064_v52  ;;  %v5937_v13 = vmul.f32 %v13176_v44, %v13075_v23  ;;  %v13244_v52 = vld [vmem:[%s13889_s3 + $0x6] ss:$0 sm:$0xff] }
 0x5c9   : > { %6214 = vst.msk [vmem:[#allocation2 + $0xe1] sm:$0xff] %vm250_vm0, %v6198_v26  ;;  %v6183_v36 = vmul.f32 %v13208_v25, %v6114_v59  ;;  %v6197_v12 = vadd.f32 %v6181_v0, %v6069_v1  ;;  %v6056_v7 = vmul.f32 %v13187_v39, %v5991_v2  ;;  %v5936_v57 = vmul.f32 %v13176_v44, %v13098_v63 }
 0x5ca   : > { %v6011_v4 = vpop.permute.xlu1 %6010  ;;  %v5939_v18 = vmul.f32 %v13176_v44, %v13103_v60  ;;  %v6057_v19 = vmul.f32 %v13187_v39, %v13157_v20  ;;  %v13247_v23 = vmul.f32 %v13244_v52, %v7093_v24  ;;  %v5948_v2 = vadd.f32 %v5932_v34, %v5819_v41 }
 0x5cb   : > { %v6199_v21 = vadd.f32 %v6183_v36, %v6071_v3  ;;  %6213 = vst.msk [vmem:[#allocation2 + $0xd9] sm:$0xff] %vm250_vm0, %v6197_v12  ;;  %v5938_v63 = vmul.f32 %v13176_v44, %v13113_v15  ;;  %v5940_v60 = vmul.f32 %v13176_v44, %v13139_v37  ;;  %v6059_v20 = vmul.f32 %v13187_v39, %v13182_v6  ;;  %v14832_v3 = vld [vmem:[#allocation21_spill] sm:$0xff] }
 0x5cc   : > { %v6016_v46 = vpop.permute.xlu0 %6015  ;;  %v13255_v10 = vadd.f32 %v5935_v61, %v5822_v32  ;;  %v6058_v40 = vmul.f32 %v13187_v39, %v6001_v47  ;;  %v6060_v8 = vmul.f32 %v13187_v39, %v6011_v4  ;;  %v5950_v28 = vadd.f32 %v5934_v33, %v5821_v14  ;;  %v14835_v61 = vld [vmem:[#allocation73_spill] sm:$0xff] }
 0x5cd   : > { %6215 = vst.msk [vmem:[#allocation2 + $0xf1] sm:$0xff] %vm250_vm0, %v6199_v21  ;;  %v6061_v30 = vmul.f32 %v13187_v39, %v6016_v46  ;;  %v13260_v41 = vadd.f32 %v5937_v13, %v5824_v17  ;;  %v6072_v31 = vadd.f32 %v6056_v7, %v5944_v16  ;;  %v13263_v37 = vadd.f32 %v5936_v57, %v5823_v22  ;;  %v14831_v22 = vld [vmem:[#allocation19_spill] sm:$0xff]  ;;  %v14833_v16 = vld [vmem:[#allocation20_spill] sm:$0xff] }
 0x5ce   : > { %v6119_v38 = vpop.permute.xlu1 %6118  ;;  %v13265_v44 = vadd.f32 %v5939_v18, %v5826_v50  ;;  %v6073_v6 = vadd.f32 %v6057_v19, %v5945_v58  ;;  %v13269_v48 = vadd.f32 %v5938_v63, %v12914_v27  ;;  %v13272_v5 = vadd.f32 %v5940_v60, %v12950_v9  ;;  %v14830_v27 = vld [vmem:[#allocation23_spill] sm:$0xff]  ;;  %v13299_v18 = vld [vmem:[%s13889_s3 + $0x7] ss:$0 sm:$0xff] }
 0x5cf   : > { %v6184_v15 = vmul.f32 %v13208_v25, %v6119_v38  ;;  %v6075_v14 = vadd.f32 %v6059_v20, %v5947_v54  ;;  %v6074_v29 = vadd.f32 %v6058_v40, %v5946_v51  ;;  %v13274_v49 = vadd.f32 %v6060_v8, %v5948_v2  ;;  %v14834_v51 = vld [vmem:[#allocation24_spill] sm:$0xff] }
 0x5d0   : > { %v6124_v11 = vpop.permute.xlu0 %6123  ;;  %v6984_v47 = vld [vmem:[#allocation2 + $0xe1] sm:$0xff]  ;;  %v13276_v62 = vadd.f32 %v6061_v30, %v5949_v35  ;;  %v14836_v35 = vld [vmem:[#allocation80_spill] sm:$0xff] }
 0x5d1   : > { %v6185_v32 = vmul.f32 %v13208_v25, %v6124_v11  ;;  %v7032_v42 = vld [vmem:[#allocation2 + $0xe2] sm:$0xff]  ;;  %v6200_v45 = vadd.f32 %v6184_v15, %v6072_v31  ;;  %v7000_v50 = vmul.f32 %v14831_v22, %v6984_v47  ;;  %v6858_v58 = vmul.f32 %v14833_v16, %v6984_v47  ;;  %v14837_v2 = vld [vmem:[#allocation8_spill] sm:$0xff] }
 0x5d2   : > { %v6021_v53 = vpop.permute.xlu1 %6020  ;;  %v6935_v56 = vld [vmem:[#allocation2 + $0xd8] sm:$0xff]  ;;  %v6936_v59 = vld [vmem:[#allocation2 + $0xe0] sm:$0xff]  ;;  %v7048_v36 = vmul.f32 %v14832_v3, %v7032_v42  ;;  %v13288_v54 = vmul.f32 %v14834_v51, %v7032_v42 }
 0x5d3   : > { %v6201_v43 = vadd.f32 %v6185_v32, %v6073_v6  ;;  %v6983_v26 = vld [vmem:[#allocation2 + $0xd9] sm:$0xff]  ;;  %6216 = vst.msk [vmem:[#allocation2 + $0xf9] sm:$0xff] %vm250_vm0, %v6200_v45  ;;  %v6951_v1 = vmul.f32 %v14830_v27, %v6935_v56  ;;  %v6062_v34 = vmul.f32 %v13187_v39, %v6021_v53  ;;  %v6952_v24 = vmul.f32 %v14830_v27, %v6936_v59 }
 0x5d4   : > { %v7031_v17 = vld [vmem:[#allocation2 + $0xda] sm:$0xff]  ;;  %v6026_v55 = vpop.permute.xlu0 %6025  ;;  %v7079_v0 = vld [vmem:[#allocation2 + $0xf0] sm:$0xff]  ;;  %v6999_v12 = vmul.f32 %v14831_v22, %v6983_v26  ;;  %v6825_v33 = vmul.f32 %v14836_v35, %v6935_v56  ;;  %v6857_v13 = vmul.f32 %v14833_v16, %v6983_v26  ;;  %v6826_v11 = vmul.f32 %v14836_v35, %v6936_v59 }
 0x5d5   : > { %v7127_v9 = vld [vmem:[#allocation2 + $0xf1] sm:$0xff]  ;;  %6217 = vst.msk [vmem:[#allocation2 + $0x109] sm:$0xff] %vm250_vm0, %v6201_v43  ;;  %v6967_v4 = vadd.f32 %v6951_v1, %v14835_v61  ;;  %v7047_v21 = vmul.f32 %v14832_v3, %v7031_v17  ;;  %v6063_v46 = vmul.f32 %v13187_v39, %v6026_v55  ;;  %v7095_v57 = vmul.f32 %v13244_v52, %v7079_v0 }
 0x5d6   : > { %v6129_v7 = vpop.permute.xlu1 %6128  ;;  %v7143_v19 = vmul.f32 %v13299_v18, %v7127_v9  ;;  %v6968_v63 = vadd.f32 %v6952_v24, %v14837_v2  ;;  %v6873_v8 = vadd.f32 %v6857_v13, %v6825_v33  ;;  %v6905_v38 = vmul.f32 %v14834_v51, %v7031_v17 }
 0x5d7   : > { %v6186_v60 = vmul.f32 %v13208_v25, %v6129_v7  ;;  %v7015_v40 = vadd.f32 %v6999_v12, %v6967_v4  ;;  %v6953_v15 = vmul.f32 %v14830_v27, %v7079_v0  ;;  %v13308_v6 = vadd.f32 %v6062_v34, %v5950_v28 }
 0x5d8   : > { %v6134_v20 = vpop.permute.xlu0 %6133  ;;  %v7016_v31 = vadd.f32 %v7000_v50, %v6968_v63  ;;  %v6921_v42 = vadd.f32 %v6905_v38, %v6873_v8  ;;  %v13311_v45 = vadd.f32 %v6063_v46, %v13255_v10  ;;  %v7001_v55 = vmul.f32 %v14831_v22, %v7127_v9 }
 0x5d9   : > { %v6187_v30 = vmul.f32 %v13208_v25, %v6134_v20  ;;  %v6202_v32 = vadd.f32 %v6186_v60, %v6074_v29  ;;  %v7063_v47 = vadd.f32 %v7047_v21, %v7015_v40  ;;  %v6827_v1 = vmul.f32 %v14836_v35, %v7079_v0  ;;  %v13333_v0 = vld [vmem:[%s13889_s3 + $0x8] ss:$0 sm:$0xff] }
 0x5da   : > { %v6031_v53 = vpop.permute.xlu1 %6030  ;;  %v13313_v56 = vld [vmem:[#allocation2 + $0xf2] sm:$0xff]  ;;  %v7064_v10 = vadd.f32 %v7048_v36, %v7016_v31  ;;  %v13325_v50 = vld [vmem:[#allocation2 + $0xfa] sm:$0xff]  ;;  %v6969_v24 = vadd.f32 %v6953_v15, %v6921_v42  ;;  %v6874_v61 = vadd.f32 %v6858_v58, %v6826_v11  ;;  %v6859_v36 = vmul.f32 %v14833_v16, %v7127_v9 }
 0x5db   : > { %v6203_v43 = vadd.f32 %v6187_v30, %v6075_v14  ;;  %v13315_v26 = vld [vmem:[#allocation2 + $0xf8] sm:$0xff]  ;;  %6218 = vst.msk [vmem:[#allocation2 + $0x111] sm:$0xff] %vm250_vm0, %v6202_v32  ;;  %v6064_v28 = vmul.f32 %v13187_v39, %v6031_v53  ;;  %v7111_v59 = vadd.f32 %v7095_v57, %v7063_v47  ;;  %v7191_v12 = vmul.f32 %v13333_v0, %v13313_v56 }
 0x5dc   : > { %v13317_v17 = vld [vmem:[#allocation2 + $0xf9] sm:$0xff]  ;;  %v6036_v29 = vpop.permute.xlu0 %6035  ;;  %v7096_v14 = vmul.f32 %v13244_v52, %v13315_v26  ;;  %v13327_v34 = vld [vmem:[#allocation2 + $0x108] sm:$0xff]  ;;  %v7049_v13 = vmul.f32 %v14832_v3, %v13313_v56  ;;  %v7192_v57 = vmul.f32 %v13333_v0, %v13325_v50  ;;  %v7017_v2 = vadd.f32 %v7001_v55, %v6969_v24 }
 0x5dd   : > { %6219 = vst.msk [vmem:[#allocation2 + $0x121] sm:$0xff] %vm250_vm0, %v6203_v43  ;;  %v7159_v4 = vadd.f32 %v7143_v19, %v7111_v59  ;;  %v7144_v33 = vmul.f32 %v13299_v18, %v13317_v17  ;;  %v6065_v46 = vmul.f32 %v13187_v39, %v6036_v29  ;;  %v7097_v58 = vmul.f32 %v13244_v52, %v13327_v34  ;;  %v13347_v63 = vld [vmem:[#allocation2 + $0x109] sm:$0xff] }
 0x5de   : > { %v7112_v21 = vadd.f32 %v7096_v14, %v7064_v10  ;;  %v6139_v7 = vpop.permute.xlu1 %6138  ;;  %v13350_v9 = vadd.f32 %v6064_v28, %v13263_v37  ;;  %v7065_v38 = vadd.f32 %v7049_v13, %v7017_v2  ;;  %v6922_v30 = vadd.f32 %v13288_v54, %v6874_v61 }
 0x5df   : > { %v6188_v19 = vmul.f32 %v13208_v25, %v6139_v7  ;;  %v7207_v60 = vadd.f32 %v7191_v12, %v7159_v4  ;;  %v6954_v31 = vmul.f32 %v14830_v27, %v13315_v26  ;;  %v7145_v37 = vmul.f32 %v13299_v18, %v13347_v63 }
 0x5e0   : > { %v6144_v20 = vpop.permute.xlu0 %6143  ;;  %v7160_v40 = vadd.f32 %v7144_v33, %v7112_v21  ;;  %v7113_v53 = vadd.f32 %v7097_v58, %v7065_v38  ;;  %v7002_v54 = vmul.f32 %v14831_v22, %v13317_v17  ;;  %v6875_v33 = vadd.f32 %v6859_v36, %v6827_v1 }
 0x5e1   : > { %v6189_v8 = vmul.f32 %v13208_v25, %v6144_v20  ;;  %v6204_v15 = vadd.f32 %v6188_v19, %v13274_v49  ;;  %v7223_v11 = vsel %vm250_vm0, %v7207_v60, 0.0  ;;  %v6970_v55 = vadd.f32 %v6954_v31, %v6922_v30 }
 0x5e2   : > { %v7208_v32 = vadd.f32 %v7192_v57, %v7160_v40  ;;  %v6041_v47 = vpop.permute.xlu1 %6040  ;;  %7224 = vadd.xlane.f32.xlu1 %v7223_v11  ;;  %v13362_v43 = vld [vmem:[#allocation2 + $0x10a] sm:$0xff]  ;;  %v6081_v49 = vadd.f32 %v6065_v46, %v13260_v41  ;;  %v7161_v24 = vadd.f32 %v7145_v37, %v7113_v53  ;;  %v13381_v4 = vld [vmem:[#allocation2 + $0x112] sm:$0xff]  ;;  %v6907_v13 = vmul.f32 %v14834_v51, %v13313_v56  ;;  %v6564_v37 = vld [vmem:[#allocation2 + $0xe1] sm:$0xff] }
 0x5e3   : > { %v6205_v42 = vadd.f32 %v6189_v8, %v13276_v62  ;;  %v13366_v28 = vld [vmem:[#allocation2 + $0x110] sm:$0xff]  ;;  %6220 = vst.msk [vmem:[#allocation2 + $0x129] sm:$0xff] %vm250_vm0, %v6204_v15  ;;  %v7193_v10 = vmul.f32 %v13333_v0, %v13362_v43  ;;  %v7050_v62 = vmul.f32 %v14832_v3, %v13325_v50  ;;  %v7018_v61 = vadd.f32 %v7002_v54, %v6970_v55 }
 0x5e4   : > { %v7226_v29 = vsel %vm250_vm0, %v7208_v32, 0.0  ;;  %v6154_v59 = vpop.permute.xlu0 %6153  ;;  %v13375_v14 = vld [vmem:[#allocation2 + $0x111] sm:$0xff]  ;;  %v7098_v41 = vmul.f32 %v13244_v52, %v13366_v28  ;;  %v6066_v21 = vmul.f32 %v13187_v39, %v6041_v47  ;;  %v6955_v7 = vmul.f32 %v14830_v27, %v13327_v34  ;;  %v13396_v40 = vld [vmem:[#allocation2 + $0x120] sm:$0xff] }
 0x5e5   : > { %6221 = vst.msk [vmem:[#allocation2 + $0x139] sm:$0xff] %vm250_vm0, %v6205_v42  ;;  %7227 = vadd.xlane.f32.xlu0 %v7226_v29  ;;  %v6191_v12 = vmul.f32 %v13208_v25, %v6154_v59  ;;  %v7209_v2 = vadd.f32 %v7193_v10, %v7161_v24  ;;  %v7066_v58 = vadd.f32 %v7050_v62, %v7018_v61  ;;  %v13410_v54 = vld [vmem:[#allocation2 + $0x121] sm:$0xff] }
 0x5e6   : > { %v6149_v46 = vpop.permute.xlu1 %6148  ;;  %v7146_v19 = vmul.f32 %v13299_v18, %v13375_v14  ;;  %v7194_v1 = vmul.f32 %v13333_v0, %v13381_v4  ;;  %v6923_v36 = vadd.f32 %v6907_v13, %v6875_v33  ;;  %v7003_v56 = vmul.f32 %v14831_v22, %v13347_v63 }
 0x5e7   : > { %v6207_v57 = vadd.f32 %v6191_v12, %v13311_v45  ;;  %v6190_v60 = vmul.f32 %v13208_v25, %v6149_v46  ;;  %v7229_v45 = vsel %vm250_vm0, %v7209_v2, 0.0  ;;  %v7114_v38 = vadd.f32 %v7098_v41, %v7066_v58  ;;  %v14838_v41 = vld [vmem:[#allocation108_spill] sm:$0xff] }
 0x5e8   : > { %v6164_v20 = vpop.permute.xlu0 %6163  ;;  %v7051_v30 = vmul.f32 %v14832_v3, %v13362_v43  ;;  %7230 = vadd.xlane.f32.xlu1 %v7229_v45  ;;  %v6971_v15 = vadd.f32 %v6955_v7, %v6923_v36  ;;  %v6828_v11 = vmul.f32 %v14836_v35, %v13315_v26  ;;  %v6860_v32 = vmul.f32 %v14833_v16, %v13317_v17  ;;  %v6515_v36 = vld [vmem:[#allocation2 + $0xd8] sm:$0xff] }
 0x5e9   : > { %6223 = vst.msk [vmem:[#allocation2 + $0x151] sm:$0xff] %vm250_vm0, %v6207_v57  ;;  %v6193_v8 = vmul.f32 %v13208_v25, %v6164_v20  ;;  %v6206_v31 = vadd.f32 %v6190_v60, %v13308_v6  ;;  %v7162_v53 = vadd.f32 %v7146_v19, %v7114_v38  ;;  %v7099_v55 = vmul.f32 %v13244_v52, %v13396_v40 }
 0x5ea   : > { %v6159_v47 = vpop.permute.xlu1 %6158  ;;  %v6908_v6 = vmul.f32 %v14834_v51, %v13325_v50  ;;  %v7019_v59 = vadd.f32 %v7003_v56, %v6971_v15  ;;  %v13416_v10 = vld [vmem:[#allocation2 + $0x122] sm:$0xff]  ;;  %v6876_v17 = vadd.f32 %v6860_v32, %v6828_v11  ;;  %v6082_v62 = vadd.f32 %v6066_v21, %v13269_v48 }
 0x5eb   : > { %v6209_v42 = vadd.f32 %v6193_v8, %v6081_v49  ;;  %6222 = vst.msk [vmem:[#allocation2 + $0x141] sm:$0xff] %vm250_vm0, %v6206_v31  ;;  %v6192_v29 = vmul.f32 %v13208_v25, %v6159_v47  ;;  %v6956_v49 = vmul.f32 %v14830_v27, %v13366_v28  ;;  %v7210_v12 = vadd.f32 %v7194_v1, %v7162_v53  ;;  %v13445_v8 = vld [vmem:[#allocation2 + $0x129] sm:$0xff] }
 0x5ec   : > { %v6046_v26 = vpop.permute.xlu0 %6045  ;;  %v13424_v50 = vmul.f32 %v13299_v18, %v6564_v37  ;;  %6658 = vadd.xlane.f32.xlu1 %v14838_v41  ;;  %v7067_v33 = vadd.f32 %v7051_v30, %v7019_v59  ;;  %v7147_v13 = vmul.f32 %v13299_v18, %v13410_v54  ;;  %v6924_v7 = vadd.f32 %v6908_v6, %v6876_v17  ;;  %v13468_v17 = vld [vmem:[#allocation2 + $0x138] sm:$0xff] }
 0x5ed   : > { %6225 = vst.msk [vmem:[#allocation2 + $0x169] sm:$0xff] %vm250_vm0, %v6209_v42  ;;  %v6067_v24 = vmul.f32 %v13187_v39, %v6046_v26  ;;  %v6208_v61 = vadd.f32 %v6192_v29, %v13350_v9  ;;  %v7232_v46 = vsel %vm250_vm0, %v7210_v12, 0.0  ;;  %v7195_v21 = vmul.f32 %v13333_v0, %v13416_v10  ;;  %v13437_v9 = vld [vmem:[#allocation2 + $0x128] sm:$0xff]  ;;  %v13479_v41 = vld [vmem:[#allocation2 + $0x139] sm:$0xff] }
 0x5ee   : > { %v6169_v48 = vpop.permute.xlu1 %6168  ;;  %v7004_v57 = vmul.f32 %v14831_v22, %v13375_v14  ;;  %v7052_v2 = vmul.f32 %v14832_v3, %v13381_v4  ;;  %7233 = vadd.xlane.f32.xlu0 %v7232_v46  ;;  %v7115_v19 = vadd.f32 %v7099_v55, %v7067_v33  ;;  %v6972_v20 = vadd.f32 %v6956_v49, %v6924_v7 }
 0x5ef   : > { %6224 = vst.msk [vmem:[#allocation2 + $0x159] sm:$0xff] %vm250_vm0, %v6208_v61  ;;  %v6194_v58 = vmul.f32 %v13208_v25, %v6169_v48  ;;  %v6829_v1 = vmul.f32 %v14836_v35, %v13327_v34  ;;  %v6083_v56 = vadd.f32 %v6067_v24, %v13265_v44  ;;  %v6861_v38 = vmul.f32 %v14833_v16, %v13347_v63  ;;  %v13453_v34 = vld [vmem:[#allocation2 + $0x12a] sm:$0xff] }
 0x5f0   : > { %v6174_v60 = vpop.permute.xlu0 %6173  ;;  %v6909_v30 = vmul.f32 %v14834_v51, %v13362_v43  ;;  %v7163_v15 = vadd.f32 %v7147_v13, %v7115_v19  ;;  %v7020_v11 = vadd.f32 %v7004_v57, %v6972_v20  ;;  %v7100_v32 = vmul.f32 %v13244_v52, %v13437_v9  ;;  %v14839_v63 = vld [vmem:[#allocation71_spill] sm:$0xff] }
 0x5f1   : > { %v6195_v45 = vmul.f32 %v13208_v25, %v6174_v60  ;;  %v6210_v31 = vadd.f32 %v6194_v58, %v6082_v62  ;;  %v6877_v47 = vadd.f32 %v6861_v38, %v6829_v1  ;;  %v6957_v42 = vmul.f32 %v14830_v27, %v13396_v40 }
 0x5f2   : > { %v6051_v37 = vpop.permute.xlu1 %6050  ;;  %v13458_v53 = vmul.f32 %v13244_v52, %v6515_v36  ;;  %6661 = vadd.xlane.f32.xlu0 %v14839_v63  ;;  %v7211_v43 = vadd.f32 %v7195_v21, %v7163_v15  ;;  %v7068_v6 = vadd.f32 %v7052_v2, %v7020_v11  ;;  %v7148_v29 = vmul.f32 %v13299_v18, %v13445_v8  ;;  %v13481_v33 = vld [vmem:[#allocation2 + $0x13a] sm:$0xff]  ;;  %v13506_v15 = vld [vmem:[#allocation2 + $0x142] sm:$0xff] }
 0x5f3   : > { %v6211_v44 = vadd.f32 %v6195_v45, %v6083_v56  ;;  %6226 = vst.msk [vmem:[#allocation2 + $0x171] sm:$0xff] %vm250_vm0, %v6210_v31  ;;  %v6068_v55 = vmul.f32 %v13187_v39, %v6051_v37  ;;  %v7196_v26 = vmul.f32 %v13333_v0, %v13453_v34  ;;  %v6925_v59 = vadd.f32 %v6909_v30, %v6877_v47  ;;  %v13495_v36 = vld [vmem:[#allocation2 + $0x140] sm:$0xff]  ;;  %v14840_v45 = vld [vmem:[#allocation83_spill] sm:$0xff] }
 0x5f4   : > { %v6830_v49 = vmul.f32 %v14836_v35, %v13366_v28  ;;  %v6862_v62 = vmul.f32 %v14833_v16, %v13375_v14  ;;  %v7235_v39 = vsel %vm250_vm0, %v7211_v43, 0.0  ;;  %v7116_v12 = vadd.f32 %v7100_v32, %v7068_v6  ;;  %v13497_v56 = vld [vmem:[#allocation2 + $0x141] sm:$0xff]  ;;  %v13522_v47 = vld [vmem:[#allocation2 + $0x150] sm:$0xff] }
 0x5f5   : > { %6227 = vst.msk [vmem:[#allocation2 + $0x181] sm:$0xff] %vm250_vm0, %v6211_v44  ;;  %v7005_v24 = vmul.f32 %v14831_v22, %v13410_v54  ;;  %v7053_v61 = vmul.f32 %v14832_v3, %v13416_v10  ;;  %7236 = vadd.xlane.f32.xlu1 %v7235_v39  ;;  %v6973_v7 = vadd.f32 %v6957_v42, %v6925_v59  ;;  %v13529_v42 = vld [vmem:[%s13889_s3] ss:$0 sm:$0xff]  ;;  %v13536_v43 = vld [vmem:[%s13889_s3 + $0x1] ss:$0 sm:$0xff] }
 0x5f6   : > { %v6179_v13 = vpop.permute.xlu1 %6178  ;;  %v6878_v28 = vadd.f32 %v6862_v62, %v6830_v49  ;;  %v6910_v14 = vmul.f32 %v14834_v51, %v13381_v4  ;;  %v6958_v46 = vmul.f32 %v14830_v27, %v13437_v9  ;;  %v6084_v48 = vadd.f32 %v6068_v55, %v13272_v5  ;;  %v13554_v62 = vld [vmem:[#allocation2 + $0x152] sm:$0xff] }
 0x5f7   : > { %v7164_v21 = vadd.f32 %v7148_v29, %v7116_v12  ;;  %v6196_v57 = vmul.f32 %v13208_v25, %v6179_v13  ;;  %v7101_v2 = vmul.f32 %v13244_v52, %v13468_v17  ;;  %v7021_v58 = vadd.f32 %v7005_v24, %v6973_v7  ;;  %v13559_v12 = vld [vmem:[%s13889_s3 + $0x2] ss:$0 sm:$0xff]  ;;  %v14841_v13 = vld [vmem:[#allocation15_spill] sm:$0xff] }
 0x5f8   : > { %v7149_v19 = vmul.f32 %v13299_v18, %v13479_v41  ;;  %v7197_v60 = vmul.f32 %v13333_v0, %v13481_v33  ;;  %v6926_v20 = vadd.f32 %v6910_v14, %v6878_v28  ;;  %v6831_v25 = vmul.f32 %v14836_v35, %v13396_v40 }
 0x5f9   : > { %v7212_v4 = vadd.f32 %v7196_v26, %v7164_v21  ;;  %v6212_v1 = vadd.f32 %v6196_v57, %v6084_v48  ;;  %v6863_v5 = vmul.f32 %v14833_v16, %v13410_v54  ;;  %6664 = vadd.xlane.f32.xlu1 %v14840_v45  ;;  %v7069_v38 = vadd.f32 %v7053_v61, %v7021_v58  ;;  %v13543_v26 = vld [vmem:[%s13889_s3 + $0x4] ss:$0 sm:$0xff] }
 0x5fa   : > { %v6974_v30 = vadd.f32 %v6958_v46, %v6926_v20  ;;  %v7006_v31 = vmul.f32 %v14831_v22, %v13445_v8  ;;  %v6911_v11 = vmul.f32 %v14834_v51, %v13416_v10  ;;  %v7054_v35 = vmul.f32 %v14832_v3, %v13453_v34  ;;  %v13524_v3 = vld [vmem:[#allocation2 + $0x151] sm:$0xff] }
 0x5fb   : > { %v7238_v32 = vsel %vm250_vm0, %v7212_v4, 0.0  ;;  %6228 = vst.msk [vmem:[#allocation2 + $0x189] sm:$0xff] %vm250_vm0, %v6212_v1  ;;  %v6879_v16 = vadd.f32 %v6863_v5, %v6831_v25  ;;  %v6959_v40 = vmul.f32 %v14830_v27, %v13468_v17  ;;  %v7117_v54 = vadd.f32 %v7101_v2, %v7069_v38  ;;  %v13572_v2 = vld [vmem:[#allocation2 + $0x158] sm:$0xff] }
 0x5fc   : > { %7239 = vadd.xlane.f32.xlu0 %v7238_v32  ;;  %v7022_v37 = vadd.f32 %v7006_v31, %v6974_v30  ;;  %v7102_v22 = vmul.f32 %v13244_v52, %v13495_v36  ;;  %v7150_v51 = vmul.f32 %v13299_v18, %v13497_v56  ;;  %v7198_v10 = vmul.f32 %v13333_v0, %v13506_v15  ;;  %v13598_v32 = vld [vmem:[%s13889_s3 + $0x3] ss:$0 sm:$0xff] }
 0x5fd   : > { %v6927_v44 = vadd.f32 %v6911_v11, %v6879_v16  ;;  %v6832_v63 = vmul.f32 %v13529_v42, %v13437_v9  ;;  %v6864_v55 = vmul.f32 %v13536_v43, %v13445_v8  ;;  %v7165_v6 = vadd.f32 %v7149_v19, %v7117_v54  ;;  %v13550_v9 = vld [vmem:[%s13889_s3 + $0x5] ss:$0 sm:$0xff]  ;;  %v13603_v54 = vld [vmem:[#allocation2 + $0x168] sm:$0xff] }
 0x5fe   : > { %v7070_v29 = vadd.f32 %v7054_v35, %v7022_v37  ;;  %v7007_v59 = vmul.f32 %v13543_v26, %v13479_v41  ;;  %v7055_v49 = vmul.f32 %v13550_v9, %v13481_v33  ;;  %v6912_v24 = vmul.f32 %v13559_v12, %v13453_v34  ;;  %v13574_v34 = vld [vmem:[#allocation2 + $0x159] sm:$0xff] }
 0x5ff   : > { %v6975_v8 = vadd.f32 %v6959_v40, %v6927_v44  ;;  %v6880_v39 = vadd.f32 %v6864_v55, %v6832_v63  ;;  %v6960_v61 = vmul.f32 %v14830_v27, %v13495_v36  ;;  %v7213_v7 = vadd.f32 %v7197_v60, %v7165_v6  ;;  %v13579_v60 = vld [vmem:[#allocation2 + $0x15a] sm:$0xff] }
 0x600   : > { %6667 = vadd.xlane.f32.xlu0 %v14841_v13  ;;  %v7118_v28 = vadd.f32 %v7102_v22, %v7070_v29  ;;  %v7103_v14 = vmul.f32 %v13244_v52, %v13522_v47  ;;  %v7151_v46 = vmul.f32 %v13299_v18, %v13524_v3  ;;  %v7199_v21 = vmul.f32 %v13333_v0, %v13554_v62  ;;  %v14843_v63 = vld [vmem:[#allocation104_spill] sm:$0xff]  ;;  %v13616_v29 = vld [vmem:[#allocation2 + $0x169] sm:$0xff] }
 0x601   : > { %v7023_v48 = vadd.f32 %v7007_v59, %v6975_v8  ;;  %v6928_v57 = vadd.f32 %v6912_v24, %v6880_v39  ;;  %v6833_v27 = vmul.f32 %v13529_v42, %v13468_v17  ;;  %v7241_v58 = vsel %vm250_vm0, %v7213_v7, 0.0  ;;  %v13618_v59 = vld [vmem:[#allocation2 + $0x16a] sm:$0xff] }
 0x602   : > { %v7166_v19 = vadd.f32 %v7150_v51, %v7118_v28  ;;  %v6865_v20 = vmul.f32 %v13536_v43, %v13479_v41  ;;  %v6913_v4 = vmul.f32 %v13559_v12, %v13481_v33  ;;  %7242 = vadd.xlane.f32.xlu1 %v7241_v58  ;;  %v7008_v5 = vmul.f32 %v13543_v26, %v13497_v56  ;;  %v14842_v51 = vld [vmem:[#allocation84_spill] sm:$0xff] }
 0x603   : > { %v7071_v1 = vadd.f32 %v7055_v49, %v7023_v48  ;;  %v6976_v25 = vadd.f32 %v6960_v61, %v6928_v57  ;;  %v7056_v17 = vmul.f32 %v13550_v9, %v13506_v15  ;;  %v7104_v38 = vmul.f32 %v13244_v52, %v13572_v2  ;;  %v14844_v48 = vld [vmem:[#allocation22_spill] sm:$0xff]  ;;  %v13638_v58 = vld [vmem:[#allocation2 + $0x172] sm:$0xff] }
 0x604   : > { %v7214_v45 = vadd.f32 %v7198_v10, %v7166_v19  ;;  %v7152_v30 = vmul.f32 %v13299_v18, %v13574_v34  ;;  %v6881_v41 = vadd.f32 %v6865_v20, %v6833_v27  ;;  %v7200_v33 = vmul.f32 %v13333_v0, %v13579_v60  ;;  %v13636_v27 = vld [vmem:[#allocation2 + $0x171] sm:$0xff] }
 0x605   : > { %v7119_v31 = vadd.f32 %v7103_v14, %v7071_v1  ;;  %v7024_v11 = vadd.f32 %v7008_v5, %v6976_v25  ;;  %v6961_v35 = vmul.f32 %v13598_v32, %v13522_v47  ;;  %v6834_v37 = vmul.f32 %v13529_v42, %v13495_v36 }
 0x606   : > { %v7244_v16 = vsel %vm250_vm0, %v7214_v45, 0.0  ;;  %v6929_v40 = vadd.f32 %v6913_v4, %v6881_v41  ;;  %v6866_v22 = vmul.f32 %v13536_v43, %v13497_v56  ;;  %6670 = vadd.xlane.f32.xlu1 %v14842_v51  ;;  %v13612_v55 = vsel %vm250_vm0, %v14843_v63, 0.0  ;;  %v7187_v63 = vld [vmem:[#allocation2 + $0x182] sm:$0xff] }
 0x607   : > { %7245 = vadd.xlane.f32.xlu0 %v7244_v16  ;;  %v7167_v10 = vadd.f32 %v7151_v46, %v7119_v31  ;;  %v7072_v44 = vadd.f32 %v7056_v17, %v7024_v11  ;;  %v7009_v6 = vmul.f32 %v13543_v26, %v13524_v3  ;;  %v6914_v56 = vmul.f32 %v13559_v12, %v13506_v15  ;;  %v13632_v15 = vld [vmem:[#allocation2 + $0x170] sm:$0xff]  ;;  %v14845_v16 = vld [vmem:[#allocation70_spill] sm:$0xff] }
 0x608   : > { %v6977_v36 = vadd.f32 %v6961_v35, %v6929_v40  ;;  %v6882_v49 = vadd.f32 %v6866_v22, %v6834_v37  ;;  %v6962_v8 = vmul.f32 %v13598_v32, %v13572_v2  ;;  %v7057_v61 = vmul.f32 %v13550_v9, %v13554_v62  ;;  %v14846_v22 = vld [vmem:[#allocation25_spill] sm:$0xff] }
 0x609   : > { %v7215_v39 = vadd.f32 %v7199_v21, %v7167_v10  ;;  %v7120_v24 = vadd.f32 %v7104_v38, %v7072_v44  ;;  %v7105_v13 = vmul.f32 %v13244_v52, %v13603_v54  ;;  %v7153_v28 = vmul.f32 %v13299_v18, %v13616_v29  ;;  %v7091_v10 = vld [vmem:[#allocation2 + $0x180] sm:$0xff] }
 0x60a   : > { %v7025_v7 = vadd.f32 %v7009_v6, %v6977_v36  ;;  %v7201_v14 = vmul.f32 %v13333_v0, %v13618_v59  ;;  %v6930_v46 = vadd.f32 %v6914_v56, %v6882_v49  ;;  %v6835_v19 = vmul.f32 %v13529_v42, %v13522_v47  ;;  %v7139_v44 = vld [vmem:[#allocation2 + $0x181] sm:$0xff] }
 0x60b   : > { %6673 = vadd.xlane.f32.xlu0 %v14844_v48  ;;  %v7247_v21 = vsel %vm250_vm0, %v7215_v39, 0.0  ;;  %v7168_v57 = vadd.f32 %v7152_v30, %v7120_v24  ;;  %v6867_v20 = vmul.f32 %v13536_v43, %v13524_v3  ;;  %v7010_v25 = vmul.f32 %v13543_v26, %v13574_v34 }
 0x60c   : > { %7248 = vadd.xlane.f32.xlu1 %v7247_v21  ;;  %v7073_v4 = vadd.f32 %v7057_v61, %v7025_v7  ;;  %v6978_v1 = vadd.f32 %v6962_v8, %v6930_v46  ;;  %v6915_v5 = vmul.f32 %v13559_v12, %v13554_v62  ;;  %v7058_v45 = vmul.f32 %v13550_v9, %v13579_v60 }
 0x60d   : > { %v7216_v17 = vadd.f32 %v7200_v33, %v7168_v57  ;;  %v7106_v38 = vmul.f32 %v13244_v52, %v13632_v15  ;;  %v6883_v47 = vadd.f32 %v6867_v20, %v6835_v19  ;;  %v7154_v3 = vmul.f32 %v13299_v18, %v13636_v27  ;;  %v7092_v57 = vld [vmem:[#allocation2 + $0x188] sm:$0xff]  ;;  %v6563_v19 = vld [vmem:[#allocation2 + $0xd9] sm:$0xff] }
 0x60e   : > { %v7121_v30 = vadd.f32 %v7105_v13, %v7073_v4  ;;  %v7026_v41 = vadd.f32 %v7010_v25, %v6978_v1  ;;  %v7202_v31 = vmul.f32 %v13333_v0, %v13638_v58  ;;  %v6963_v62 = vmul.f32 %v13598_v32, %v13603_v54  ;;  %v6516_v13 = vld [vmem:[#allocation2 + $0xe0] sm:$0xff]  ;;  %v14847_v1 = vld [vmem:[#allocation75_spill] sm:$0xff] }
 0x60f   : > { %v7250_v11 = vsel %vm250_vm0, %v7216_v17, 0.0  ;;  %v6931_v35 = vadd.f32 %v6915_v5, %v6883_v47  ;;  %v6836_v33 = vmul.f32 %v13529_v42, %v13572_v2  ;;  %v6681_v51 = vsel %vm250_vm0, %v14846_v22, 0.0  ;;  %v14849_v22 = vld [vmem:[#allocation26_spill] sm:$0xff] }
 0x610   : > { %7251 = vadd.xlane.f32.xlu0 %v7250_v11  ;;  %6676 = vadd.xlane.f32.xlu1 %v14845_v16  ;;  %v7169_v40 = vadd.f32 %v7153_v28, %v7121_v30  ;;  %v7074_v37 = vadd.f32 %v7058_v45, %v7026_v41  ;;  %v6868_v6 = vmul.f32 %v13536_v43, %v13574_v34  ;;  %v7140_v41 = vld [vmem:[#allocation2 + $0x189] sm:$0xff] }
 0x611   : > { %v6979_v36 = vadd.f32 %v6963_v62, %v6931_v35  ;;  %v7011_v49 = vmul.f32 %v13543_v26, %v13616_v29  ;;  %v7059_v2 = vmul.f32 %v13550_v9, %v13618_v59  ;;  %v6916_v56 = vmul.f32 %v13559_v12, %v13579_v60  ;;  %v6611_v62 = vld [vmem:[#allocation2 + $0xda] sm:$0xff] }
 0x612   : > { %v7217_v8 = vadd.f32 %v7201_v14, %v7169_v40  ;;  %v7122_v39 = vadd.f32 %v7106_v38, %v7074_v37  ;;  %v6884_v24 = vadd.f32 %v6868_v6, %v6836_v33  ;;  %v6964_v61 = vmul.f32 %v13598_v32, %v13632_v15 }
 0x613   : > { %v7027_v7 = vadd.f32 %v7011_v49, %v6979_v36  ;;  %v7107_v34 = vmul.f32 %v13244_v52, %v7091_v10  ;;  %v7155_v28 = vmul.f32 %v13299_v18, %v7139_v44  ;;  %v7203_v46 = vmul.f32 %v13333_v0, %v7187_v63 }
 0x614   : > { %6679 = vadd.xlane.f32.xlu0 %v13612_v55  ;;  %v7253_v48 = vsel %vm250_vm0, %v7217_v8, 0.0  ;;  %v7170_v21 = vadd.f32 %v7154_v3, %v7122_v39  ;;  %v6932_v60 = vadd.f32 %v6916_v56, %v6884_v24  ;;  %v7012_v14 = vmul.f32 %v13543_v26, %v13636_v27  ;;  %v7188_v3 = vld [vmem:[#allocation2 + $0x18a] sm:$0xff]  ;;  %v6612_v24 = vld [vmem:[#allocation2 + $0xe2] sm:$0xff] }
 0x615   : > { %7254 = vadd.xlane.f32.xlu1 %v7253_v48  ;;  %v7075_v20 = vadd.f32 %v7059_v2, %v7027_v7  ;;  %v7060_v4 = vmul.f32 %v13550_v9, %v13638_v58  ;;  %v6547_v25 = vadd.f32 %v13458_v53, %v14847_v1  ;;  %v6532_v5 = vmul.f32 %v13244_v52, %v6516_v13  ;;  %v7141_v48 = vld [vmem:[#allocation2 + $0x199] sm:$0xff] }
 0x616   : > { %v7218_v55 = vadd.f32 %v7202_v31, %v7170_v21  ;;  %v6980_v17 = vadd.f32 %v6964_v61, %v6932_v60  ;;  %v6837_v45 = vmul.f32 %v13529_v42, %v13603_v54  ;;  %v6869_v38 = vmul.f32 %v13536_v43, %v13616_v29  ;;  %v14848_v29 = vld [vmem:[#allocation74_spill] sm:$0xff]  ;;  %v7189_v21 = vld [vmem:[#allocation2 + $0x19a] sm:$0xff] }
 0x617   : > { %v7123_v47 = vadd.f32 %v7107_v34, %v7075_v20  ;;  %v7108_v30 = vmul.f32 %v13244_v52, %v7092_v57  ;;  %v6579_v11 = vmul.f32 %v13299_v18, %v6563_v19  ;;  %v6917_v53 = vmul.f32 %v13559_v12, %v13618_v59 }
 0x618   : > { %v7256_v35 = vsel %vm250_vm0, %v7218_v55, 0.0  ;;  %v7028_v31 = vadd.f32 %v7012_v14, %v6980_v17  ;;  %v6885_v33 = vadd.f32 %v6869_v38, %v6837_v45  ;;  %v6965_v54 = vmul.f32 %v13598_v32, %v7091_v10 }
 0x619   : > { %7257 = vadd.xlane.f32.xlu0 %v7256_v35  ;;  %6682 = vadd.xlane.f32.xlu1 %v6681_v51  ;;  %v6684_v16 = vsel %vm250_vm0, %v14848_v29, 0.0  ;;  %v7171_v40 = vadd.f32 %v7155_v28, %v7123_v47  ;;  %v6595_v37 = vadd.f32 %v6579_v11, %v6547_v25  ;;  %v6548_v6 = vadd.f32 %v6532_v5, %v14849_v22  ;;  %v7190_v47 = vld [vmem:[#allocation2 + $0x1a2] sm:$0xff] }
 0x61a   : > { %v7076_v36 = vadd.f32 %v7060_v4, %v7028_v31  ;;  %v7156_v49 = vmul.f32 %v13299_v18, %v7140_v41  ;;  %v7204_v59 = vmul.f32 %v13333_v0, %v7188_v3  ;;  %v6933_v2 = vadd.f32 %v6917_v53, %v6885_v33 }
 0x61b   : > { %v7219_v56 = vadd.f32 %v7203_v46, %v7171_v40  ;;  %v6627_v8 = vmul.f32 %v13333_v0, %v6611_v62  ;;  %v7013_v10 = vmul.f32 %v13543_v26, %v7139_v44  ;;  %v6838_v51 = vmul.f32 %v13529_v42, %v13632_v15 }
 0x61c   : > { %v7124_v39 = vadd.f32 %v7108_v30, %v7076_v36  ;;  %v6981_v61 = vadd.f32 %v6965_v54, %v6933_v2  ;;  %v7061_v13 = vmul.f32 %v13550_v9, %v7187_v63  ;;  %v6870_v7 = vmul.f32 %v13536_v43, %v13636_v27 }
 0x61d   : > { %6685 = vadd.xlane.f32.xlu0 %v6684_v16  ;;  %v7259_v34 = vsel %vm250_vm0, %v7219_v56, 0.0  ;;  %v6643_v28 = vadd.f32 %v6627_v8, %v6595_v37  ;;  %v6596_v46 = vadd.f32 %v13424_v50, %v6548_v6  ;;  %v6918_v44 = vmul.f32 %v13559_v12, %v13638_v58  ;;  %v7094_v12 = vld [vmem:[#allocation2 + $0x1a0] sm:$0xff] }
 0x61e   : > { %7260 = vadd.xlane.f32.xlu1 %v7259_v34  ;;  %v7172_v42 = vadd.f32 %v7156_v49, %v7124_v39  ;;  %v7029_v15 = vadd.f32 %v7013_v10, %v6981_v61  ;;  %v6886_v60 = vadd.f32 %v6870_v7, %v6838_v51  ;;  %v6966_v63 = vmul.f32 %v13598_v32, %v7092_v57  ;;  %v7142_v57 = vld [vmem:[#allocation2 + $0x1a1] sm:$0xff] }
 0x61f   : > { %v6628_v14 = vmul.f32 %v13333_v0, %v6612_v24  ;;  %v7157_v19 = vmul.f32 %v13299_v18, %v7141_v48  ;;  %v6687_v50 = vsel %vm250_vm0, %v6643_v28, 0.0  ;;  %v7205_v1 = vmul.f32 %v13333_v0, %v7189_v21  ;;  %v14850_v61 = vld [vmem:[#allocation105_spill] sm:$0xff] }
 0x620   : > { %v7220_v43 = vadd.f32 %v7204_v59, %v7172_v42  ;;  %v7077_v27 = vadd.f32 %v7061_v13, %v7029_v15  ;;  %v6934_v20 = vadd.f32 %v6918_v44, %v6886_v60  ;;  %v7014_v32 = vmul.f32 %v13543_v26, %v7140_v41  ;;  %v14851_v48 = vld [vmem:[#allocation17_spill] sm:$0xff]  ;;  %v14852_v60 = vld [vmem:[#allocation18_spill] sm:$0xff] }
 0x621   : > { %v6644_v4 = vadd.f32 %v6628_v14, %v6596_v46  ;;  %v7062_v45 = vmul.f32 %v13550_v9, %v7188_v3  ;;  %v7110_v38 = vmul.f32 %v13244_v52, %v7094_v12  ;;  %v7158_v35 = vmul.f32 %v13299_v18, %v7142_v57  ;;  %v6647_v52 = vpop.xlane.xlu0 %6646 }
 0x622   : > { %v7262_v58 = vsel %vm250_vm0, %v7220_v43, 0.0  ;;  %6688 = vadd.xlane.f32.xlu1 %v6687_v50  ;;  %v7125_v25 = vadd.f32 %v13247_v23, %v7077_v27  ;;  %v6982_v5 = vadd.f32 %v6966_v63, %v6934_v20  ;;  %v7206_v26 = vmul.f32 %v13333_v0, %v7190_v47 }
 0x623   : > { %7263 = vadd.xlane.f32.xlu0 %v7262_v58  ;;  %v6690_v30 = vsel %vm250_vm0, %v6644_v4, 0.0  ;;  %v6693_v28 = vadd.f32 %v6647_v52, %v14850_v61 }
 0x624   : > { %v7173_v55 = vadd.f32 %v7157_v19, %v7125_v25  ;;  %v7030_v17 = vadd.f32 %v7014_v32, %v6982_v5 }
 0x625   : > { %v6653_v3 = vpop.xlane.xlu0 %6652  ;;  %v6728_v63 = vrot.slane %v6693_v28, %v14852_v60 }
 0x626   : > { %v7221_v11 = vadd.f32 %v7205_v1, %v7173_v55  ;;  %v7078_v53 = vadd.f32 %v7062_v45, %v7030_v17  ;;  %v6695_v46 = vadd.f32 %v6653_v3, %v14850_v61 }
 0x627   : > { %6691 = vadd.xlane.f32.xlu0 %v6690_v30  ;;  %v6650_v33 = vpop.xlane.xlu1 %6649 }
 0x628   : > { %v7265_v23 = vsel %vm250_vm0, %v7221_v11, 0.0  ;;  %v7126_v31 = vadd.f32 %v7110_v38, %v7078_v53  ;;  %v6694_v13 = vadd.f32 %v6650_v33, %v14850_v61  ;;  %v6737_v14 = vrot.slane %v6695_v46, %v14852_v60 }
 0x629   : > { %7266 = vadd.xlane.f32.xlu1 %v7265_v23  ;;  %v6656_v29 = vpop.xlane.xlu0 %6655 }
 0x62a   : > { %v7174_v41 = vadd.f32 %v7158_v35, %v7126_v31  ;;  %v6696_v7 = vadd.f32 %v6656_v29, %v14850_v61  ;;  %v6732_v44 = vrot.slane %v6694_v13, %v14851_v48 }
 0x62c   : > { %v7222_v62 = vadd.f32 %v7206_v26, %v7174_v41  ;;  %v6741_v42 = vrot.slane %v6696_v7, %v14851_v48  ;;  %v6733_v19 = vsel %vm3226_vm3, %v6732_v44, %v6728_v63 }
 0x62e   : > { %v7268_v9 = vsel %vm250_vm0, %v7222_v62, 0.0  ;;  %v6742_v20 = vsel %vm3226_vm3, %v6741_v42, %v6737_v14 }
 0x62f   : > { %7269 = vadd.xlane.f32.xlu0 %v7268_v9  ;;  %v6797_v55 = vsel %vm3291_vm4, %v6742_v20, %v6733_v19 }
 0x66f   : > { %v7225_v54 = vpop.xlane.xlu1 %7224 }
 0x670   : > { %v13746_v12 = vadd.f32 %v7225_v54, %v14850_v61 }
 0x672   : > { %v7228_v40 = vpop.xlane.xlu0 %7227  ;;  %v7306_v35 = vrot.slane %v13746_v12, %v14852_v60 }
 0x673   : > { %v7272_v17 = vadd.f32 %v7228_v40, %v14850_v61 }
 0x675   : > { %v7231_v16 = vpop.xlane.xlu1 %7230  ;;  %v7310_v54 = vrot.slane %v7272_v17, %v14851_v48 }
 0x676   : > { %v7273_v58 = vadd.f32 %v7231_v16, %v14850_v61 }
 0x678   : > { %v7315_v23 = vrot.slane %v7273_v58, %v14852_v60 }
 0x679   : > { %v6659_v37 = vpop.xlane.xlu1 %6658 }
 0x67a   : > { %v6697_v50 = vadd.f32 %v6659_v37, %v14850_v61 }
 0x67b   : > { %v7234_v18 = vpop.xlane.xlu0 %7233 }
 0x67c   : > { %v7274_v27 = vadd.f32 %v7234_v18, %v14850_v61  ;;  %v6746_v47 = vrot.slane %v6697_v50, %v14852_v60 }
 0x67e   : > { %v7319_v45 = vrot.slane %v7274_v27, %v14851_v48 }
 0x67f   : > { %v6662_v22 = vpop.xlane.xlu0 %6661 }
 0x680   : > { %v6698_v43 = vadd.f32 %v6662_v22, %v14850_v61  ;;  %v7320_v29 = vsel %vm3226_vm3, %v7319_v45, %v7315_v23 }
 0x682   : > { %v7237_v6 = vpop.xlane.xlu1 %7236  ;;  %v6750_v5 = vrot.slane %v6698_v43, %v14851_v48 }
 0x683   : > { %v7275_v16 = vadd.f32 %v7237_v6, %v14850_v61 }
 0x684   : > { %v6751_v41 = vsel %vm3226_vm3, %v6750_v5, %v6746_v47 }
 0x685   : > { %v7324_v27 = vrot.slane %v7275_v16, %v14852_v60 }
 0x686   : > { %v6665_v49 = vpop.xlane.xlu1 %6664 }
 0x687   : > { %v6699_v32 = vadd.f32 %v6665_v49, %v14850_v61  ;;  %v6798_v49 = vsel %vm3293_vm5, %v6751_v41, %v6797_v55 }
 0x689   : > { %v7240_v36 = vpop.xlane.xlu0 %7239  ;;  %v6755_v62 = vrot.slane %v6699_v32, %v14852_v60 }
 0x68a   : > { %v7276_v31 = vadd.f32 %v7240_v36, %v14850_v61 }
 0x68d   : > { %v6668_v0 = vpop.xlane.xlu0 %6667 }
 0x68e   : > { %v6700_v4 = vadd.f32 %v6668_v0, %v14850_v61  ;;  %v7328_v0 = vrot.slane %v7276_v31, %v14851_v48 }
 0x68f   : > { %v7243_v59 = vpop.xlane.xlu1 %7242 }
 0x690   : > { %v6759_v30 = vrot.slane %v6700_v4, %v14851_v48  ;;  %v7277_v6 = vadd.f32 %v7243_v59, %v14850_v61  ;;  %v7329_v58 = vsel %vm3226_vm3, %v7328_v0, %v7324_v27 }
 0x692   : > { %v6760_v18 = vsel %vm3226_vm3, %v6759_v30, %v6755_v62  ;;  %v7333_v4 = vrot.slane %v7277_v6, %v14852_v60 }
 0x693   : > { %v6671_v2 = vpop.xlane.xlu1 %6670 }
 0x694   : > { %v7246_v56 = vpop.xlane.xlu0 %7245  ;;  %v6701_v11 = vadd.f32 %v6671_v2, %v14850_v61 }
 0x695   : > { %v7278_v22 = vadd.f32 %v7246_v56, %v14850_v61  ;;  %v6799_v56 = vsel %vm3295_vm6, %v6760_v18, %v6798_v49 }
 0x696   : > { %v6764_v37 = vrot.slane %v6701_v11, %v14852_v60 }
 0x697   : > { %v7337_v42 = vrot.slane %v7278_v22, %v14851_v48 }
 0x698   : > { %v6674_v8 = vpop.xlane.xlu0 %6673 }
 0x699   : > { %v13727_v10 = vpop.xlane.xlu1 %7248  ;;  %v6702_v57 = vadd.f32 %v6674_v8, %v14850_v61  ;;  %v7338_v55 = vsel %vm3226_vm3, %v7337_v42, %v7333_v4 }
 0x69a   : > { %v7279_v59 = vadd.f32 %v13727_v10, %v14850_v61 }
 0x69b   : > { %v6768_v9 = vrot.slane %v6702_v57, %v14851_v48 }
 0x69c   : > { %v7342_v5 = vrot.slane %v7279_v59, %v14852_v60 }
 0x69d   : > { %v6677_v51 = vpop.xlane.xlu1 %6676  ;;  %v7252_v39 = vpop.xlane.xlu0 %7251 }
 0x69e   : > { %v6703_v26 = vadd.f32 %v6677_v51, %v14850_v61  ;;  %v6769_v51 = vsel %vm3226_vm3, %v6768_v9, %v6764_v37 }
 0x69f   : > { %v6800_v63 = vsel %vm3297_vm7, %v6769_v51, %v6799_v56 }
 0x6a0   : > { %v6773_v2 = vrot.slane %v6703_v26, %v14852_v60 }
 0x6a1   : > { %v6680_v24 = vpop.xlane.xlu0 %6679 }
 0x6a2   : > { %v13731_v34 = vpop.xlane.xlu1 %7254  ;;  %v6704_v38 = vadd.f32 %v6680_v24, %v14850_v61  ;;  %v7280_v24 = vadd.f32 %v7252_v39, %v14850_v61 }
 0x6a3   : > { %v7281_v14 = vadd.f32 %v13731_v34, %v14850_v61 }
 0x6a4   : > { %v6777_v40 = vrot.slane %v6704_v38, %v14851_v48  ;;  %v7346_v19 = vrot.slane %v7280_v24, %v14851_v48 }
 0x6a5   : > { %v7351_v17 = vrot.slane %v7281_v14, %v14852_v60 }
 0x6a6   : > { %v6683_v15 = vpop.xlane.xlu1 %6682  ;;  %v7258_v21 = vpop.xlane.xlu0 %7257  ;;  %v6778_v28 = vsel %vm3226_vm3, %v6777_v40, %v6773_v2  ;;  %v7347_v47 = vsel %vm3226_vm3, %v7346_v19, %v7342_v5 }
 0x6a7   : > { %v6705_v52 = vadd.f32 %v6683_v15, %v14850_v61  ;;  %v7282_v46 = vadd.f32 %v7258_v21, %v14850_v61  ;;  %v6801_v10 = vsel %vm3299_vm8, %v6778_v28, %v6800_v63 }
 0x6a9   : > { %v6782_v13 = vrot.slane %v6705_v52, %v14852_v60 }
 0x6aa   : > { %v6686_v1 = vpop.xlane.xlu0 %6685 }
 0x6ab   : > { %v7261_v25 = vpop.xlane.xlu1 %7260  ;;  %v6706_v53 = vadd.f32 %v6686_v1, %v14850_v61  ;;  %v7355_v1 = vrot.slane %v7282_v46, %v14851_v48 }
 0x6ac   : > { %v7283_v20 = vadd.f32 %v7261_v25, %v14850_v61  ;;  %v7311_v25 = vsel %vm3226_vm3, %v7310_v54, %v7306_v35 }
 0x6ad   : > { %v6786_v36 = vrot.slane %v6706_v53, %v14851_v48  ;;  %v7375_v38 = vsel %vm3291_vm4, %v7320_v29, %v7311_v25  ;;  %v7356_v35 = vsel %vm3226_vm3, %v7355_v1, %v7351_v17 }
 0x6ae   : > { %v7360_v30 = vrot.slane %v7283_v20, %v14852_v60  ;;  %v7376_v53 = vsel %vm3293_vm5, %v7329_v58, %v7375_v38 }
 0x6af   : > { %v6689_v3 = vpop.xlane.xlu1 %6688  ;;  %v6787_v15 = vsel %vm3226_vm3, %v6786_v36, %v6782_v13  ;;  %v7377_v31 = vsel %vm3295_vm6, %v7338_v55, %v7376_v53 }
 0x6b0   : > { %v7264_v33 = vpop.xlane.xlu0 %7263  ;;  %v6707_v8 = vadd.f32 %v6689_v3, %v14850_v61  ;;  %v6802_v34 = vsel %vm3301_vm9, %v6787_v15, %v6801_v10  ;;  %v7378_v41 = vsel %vm3297_vm7, %v7347_v47, %v7377_v31 }
 0x6b1   : > { %v7284_v39 = vadd.f32 %v7264_v33, %v14850_v61  ;;  %v7379_v52 = vsel %vm3299_vm8, %v7356_v35, %v7378_v41 }
 0x6b2   : > { %v6791_v43 = vrot.slane %v6707_v8, %v14852_v60 }
 0x6b3   : > { %v7364_v32 = vrot.slane %v7284_v39, %v14851_v48 }
 0x6b4   : > { %v6692_v7 = vpop.xlane.xlu0 %6691 }
 0x6b5   : > { %v6708_v44 = vadd.f32 %v6692_v7, %v14850_v61  ;;  %v7365_v26 = vsel %vm3226_vm3, %v7364_v32, %v7360_v30 }
 0x6b6   : > { %v7267_v50 = vpop.xlane.xlu1 %7266 }
 0x6b7   : > { %v6795_v21 = vrot.slane %v6708_v44, %v14851_v48  ;;  %v7285_v45 = vadd.f32 %v7267_v50, %v14850_v61 }
 0x6b9   : > { %v6796_v12 = vsel %vm3226_vm3, %v6795_v21, %v6791_v43  ;;  %v7369_v62 = vrot.slane %v7285_v45, %v14852_v60 }
 0x6ba   : > { %v6803_v57 = vsel %vm3303_vm10, %v6796_v12, %v6802_v34 }
 0x6bb   : > { %8015 = vst.msk [vmem:[%s11091_s9 + $0x10] sm:$0xff] %vm3306_vm11, %v6803_v57 }
 0x6bc   : > { %v7270_v11 = vpop.xlane.xlu0 %7269 }
 0x6bd   : > { %v7286_v23 = vadd.f32 %v7270_v11, %v14850_v61  ;;  %v7380_v61 = vsel %vm3301_vm9, %v7365_v26, %v7379_v52 }
 0x6bf   : > { %v7373_v9 = vrot.slane %v7286_v23, %v14851_v48 }
 0x6c1   : > { %v7374_v3 = vsel %vm3226_vm3, %v7373_v9, %v7369_v62 }
 0x6c2   : > { %v7381_v60 = vsel %vm3303_vm10, %v7374_v3, %v7380_v61 }
 0x6c3   : > { %8016 = vst.msk [vmem:[%s11091_s9 + $0x18] sm:$0xff] %vm3306_vm11, %v7381_v60 }
 0x6c4   : > { %8198 = shalt.err (!%p8195_p3)
}
 0x6c5   : > { %s8199_s7 = scalar_lea.hbm %s13834_s15, 512  ;;  %s8203_s26 = scalar_lea.hbm %s13891_s5, 1024 }
 0x6c6   : > { %p8200_p4 = scmp.ne.s32.totalorder %s13834_s15, %s8199_s7  ;;  %p8204_p9 = scmp.lt.u32.totalorder %s13834_s15, %s13891_s5 }
 0x6c7   : > { %p8205_p10 = scmp.lt.u32.totalorder %s8203_s26, %s8199_s7  ;;  %p8207_p12 = scmp.lt.u32.totalorder %s8199_s7, %s13834_s15 }
 0x6c8   : > { %p8201_p7 = pnand %p8200_p4, %p8325_p5 }
 0x6c9   : > { %p8206_p11 = por %p8205_p10, %p8204_p9 }
 0x6ca   : > { %p8202_p8 = pneg %p8201_p7 }
 0x6cb   : > { %p8208_p13 = por %p8207_p12, %p8206_p11 }
 0x6cd   : > { %p8209_p0 = pnand %p8208_p13, %p8202_p8 }
 0x6cf   : > { %8212 = shalt.err (!%p8209_p0)
}
 0x6d0   : > { %s8252_s8 = smov 128   ;;  %s8253_s10 = smov 8  }
 0x6d1   : > { %8026 = dma.vmem_to_hbm [thread:$0]  (%p8325_p5), %s13836_s12, 512, %s13834_s15, %s13845_s4, %s8252_s8, %s8252_s8, %s8253_s10  }
 0x6d2 PF: > { %p8032_p1 = scmp.ge.s32.totalorder %s8247_s23, 2  ;;  %s7414_s11 = sand.u32 1, %s8235_s20  }
 0x6d3   : > { %s7415_s13 = scalar_lea.sflag [#allocation5], %s7414_s11 }
 0x6d4   : > { %p8029_p2 = pnand %p8032_p1, %p8329_p6 }
 0x6d6   : > { %8230 = dma.done.wait (!%p8029_p2), %s7415_s13, 512  }
 0x6d7   : > { %8232 = vsyncadd (!%p8029_p2), %s7415_s13, 4294966784  ;;  %p16_p3 = scmp.ge.s32.totalorder %s8312_s25, 4   ;;  %s14853_s20 = smov %s8239_s21 }
 0x6d8   : > { %s14854_s21 = smov %s8243_s22  ;;  %s14855_s22 = smov %s8323_s28 }
 0x6d9   : > { %s14856_s23 = smov %s8312_s25  ;;  %18 = sbr.rel (!%p16_p3) target bundleno = 5 (0x5), region = 93 }
 0x6e0   :  { %7420 = vsyncpa [#allocation5], 1 }
 0x6e1   :  { %7422 = vsyncpa [#allocation5 + $0x1], 1 }

</bundles_post_ra>
